<compile_context>
chip_gen: v7x
topology: tpu7x:2x2x1
jax: 0.10.0
libtpu: 0.0.40
codegen_flags: <defaults>
</compile_context>

<pallas_src>
import jax
import jax.numpy as jnp
import numpy as np
from jax import lax
from jax.experimental import pallas as pl
from jax.experimental.pallas import tpu as pltpu

C_IN, C1, C2, C3 = 512, 256, 128, 128
_SUBLANE = 16          # bf16 sublane tile
_PADL = 16             # sublane-aligned interior offset (zero halo col = _PADL-1)


def _round_up(x, m):
    return ((x + m - 1) // m) * m


# ----------------------------------------------------------------------------
# Kernel
# ----------------------------------------------------------------------------
def _make_kernel(bb, h, w, w16):
    """Build the fused conv1+conv2+conv3+GAP kernel for static (bb, h, w)."""
    wbufw = _PADL + w16 + 1          # aligned left halo + interior + right halo col

    def kernel(x_ref, w1_ref, w2_ref, w3_ref, o_ref, xslab, y1slab, y2slab, pbuf):
        f32 = jnp.float32

        # ---- halo-only zeroing (rows 0 / h+1, left halo col, right strip+col).
        # Re-zeroed every step: interior stores below never touch these regions,
        # and this keeps the kernel correct on either core of a megacore split.
        def zero_halo(slab, c):
            zrow = jnp.zeros((bb, 1, wbufw, c), slab.dtype)
            slab[:, 0:1, :, :] = zrow
            slab[:, h + 1:h + 2, :, :] = zrow
            slab[:, 1:h + 1, _PADL - 1:_PADL, :] = jnp.zeros((bb, h, 1, c), slab.dtype)
            slab[:, 1:h + 1, _PADL + w:_PADL + w16 + 1, :] = (
                jnp.zeros((bb, h, w16 - w + 1, c), slab.dtype))

        zero_halo(xslab, C_IN)
        zero_halo(y1slab, C1)
        zero_halo(y2slab, C2)

        # In-kernel zero padding: sublane-aligned interior store at W offset 16.
        xslab[:, 1:h + 1, _PADL:_PADL + w, :] = x_ref[...]

        if w16 != w:
            col = lax.broadcasted_iota(jnp.int32, (1, w16, 1), 1)

        rows = bb * (h + 2) * w16

        def conv3x3_relu(src, w_ref, cin, cout, sink):
            """3x3 'same' conv + ReLU.

            dx-only im2col patch (K = 3*cin, duplication x3 instead of x9) plus
            three accumulating MXU matmuls per image (one per dy), f32 accum.
            All patch stores and matmul-lhs slices are sublane/lane aligned.
            """
            k = 3 * cin
            # P[..., dx*cin:(dx+1)*cin] = src shifted by (dx-1) along W.
            for dx in range(3):
                sl = src[:, :, _PADL - 1 + dx:_PADL - 1 + dx + w16, :]
                pbuf[:, dx * cin:(dx + 1) * cin] = sl.reshape(rows, cin)
            for b in range(bb):
                base = b * (h + 2) * w16
                acc = jnp.dot(pbuf[base:base + h * w16, 0:k],
                              w_ref[0], preferred_element_type=f32)
                acc = acc + jnp.dot(pbuf[base + w16:base + w16 + h * w16, 0:k],
                                    w_ref[1], preferred_element_type=f32)
                acc = acc + jnp.dot(pbuf[base + 2 * w16:base + 2 * w16 + h * w16, 0:k],
                                    w_ref[2], preferred_element_type=f32)
                y = jnp.maximum(acc, 0.0).reshape(h, w16, cout)
                if w16 != w:
                    # Zero the alignment-padding columns so they neither leak
                    # into the next layer's taps nor into the average pool.
                    y = jnp.where(col < w, y, 0.0)
                sink(b, y)

        def sink_y1(b, y):
            y1slab[b, 1:h + 1, _PADL:_PADL + w16, :] = y.astype(y1slab.dtype)

        def sink_y2(b, y):
            y2slab[b, 1:h + 1, _PADL:_PADL + w16, :] = y.astype(y2slab.dtype)

        inv_hw = 1.0 / float(h * w)

        def sink_out(b, y):
            pooled = jnp.sum(y.reshape(h * w16, C3), axis=0, keepdims=True)
            o_ref[b, 0:1, :] = (pooled * inv_hw).astype(o_ref.dtype)

        conv3x3_relu(xslab, w1_ref, C_IN, C1, sink_y1)
        conv3x3_relu(y1slab, w2_ref, C1, C2, sink_y2)
        conv3x3_relu(y2slab, w3_ref, C2, C3, sink_out)

    return kernel


# ----------------------------------------------------------------------------
# Sizing helpers
# ----------------------------------------------------------------------------
def _vmem_budget_bytes():
    """Generation-aware scoped-VMEM budget (v7x: 64 MiB phys, v5e/v6e: 128 MiB)."""
    try:
        cap = int(pltpu.get_tpu_info().vmem_capacity_bytes)
    except Exception:
        cap = 64 << 20                      # conservative: safe on every generation
    return int(min(112 << 20, max(32 << 20, int(cap * 0.82))))


def _per_elem_vmem_bytes(h, w, w16):
    bf2 = 2
    wbufw = _PADL + w16 + 1
    slabs = (h + 2) * wbufw * (C_IN + C1 + C2) * bf2     # padded x / y1 / y2
    pbuf = (h + 2) * w16 * 3 * C_IN * bf2                # dx-im2col patch
    x_io = 2 * h * w * C_IN * bf2                        # double-buffered input block
    temps = 3 * h * w16 * C1 * 4                         # f32 acc / value headroom
    return slabs + pbuf + x_io + temps


def _weights_vmem_bytes():
    # bf16, counted double-buffered (constant index_map; see TODO on Buffered(1)).
    return 2 * 3 * (3 * C_IN * C1 + 3 * C1 * C2 + 3 * C2 * C3) * 2


def _pick_batch_block(n, h, w, w16, budget):
    per_elem = _per_elem_vmem_bytes(h, w, w16)
    avail = max(per_elem, int(budget * 0.6) - _weights_vmem_bytes())
    bb = max(1, min(n, int(avail // per_elem)))
    # Bound per-step matmul rows (~4096) and kernel unroll size.
    bb = min(bb, max(1, 4096 // (h * w16)), 16)
    # Guarantee >= 2 grid steps when N allows, so both v7x TensorCores are used.
    if n >= 2 and -(-n // bb) < 2:
        bb = -(-n // 2)
    return int(bb)


# ----------------------------------------------------------------------------
# Wrapper
# ----------------------------------------------------------------------------
def netd_forward3(x, w1_hwio, w2_hwio, w3_hwio, *, input_format="NCHW"):
    """Fused conv1+conv2+conv3+GAP.  Returns (N, 128, 1, 1) float32.

    x: (N, 512, H, W) if input_format == 'NCHW' (PyTorch layout), else (N, H, W, 512).
    w*_hwio: (3, 3, Cin, Cout) float32 weights.
    """
    if input_format == "NCHW":
        n, cin, h, w = x.shape
        # TODO(synk): accept NHWC end-to-end so this full HBM read+write transpose
        # pass disappears; kept only for PyTorch-layout parity.
        x = jnp.transpose(x, (0, 2, 3, 1))
    else:
        n, h, w, cin = x.shape
    assert cin == C_IN
    x = x.astype(jnp.bfloat16)

    w16 = _round_up(w, _SUBLANE)            # bf16 sublane-aligned interior width
    budget = _vmem_budget_bytes()
    bb = _pick_batch_block(n, h, w, w16, budget)
    n_pad = bb * (-(-n // bb))
    if n_pad != n:
        x = jnp.pad(x, ((0, n_pad - n), (0, 0), (0, 0), (0, 0)))

    # HWIO -> (3, 3*Cin, Cout): row order (dy)[dx*Cin + ci] matches the dx patch.
    w1 = w1_hwio.reshape(3, 3 * C_IN, C1).astype(jnp.bfloat16)
    w2 = w2_hwio.reshape(3, 3 * C1, C2).astype(jnp.bfloat16)
    w3 = w3_hwio.reshape(3, 3 * C2, C3).astype(jnp.bfloat16)

    wbufw = _PADL + w16 + 1
    kernel = _make_kernel(bb, h, w, w16)

    # TODO(synk): weights could use pipeline_mode=pl.Buffered(1) (constant index
    # map needs no double buffer) to shave ~3 MiB of VMEM on v7x.
    out = pl.pallas_call(
        kernel,
        out_shape=jax.ShapeDtypeStruct((n_pad, 1, C3), jnp.float32),
        grid=(n_pad // bb,),
        in_specs=[
            pl.BlockSpec((bb, h, w, C_IN), lambda i: (i, 0, 0, 0)),
            pl.BlockSpec((3, 3 * C_IN, C1), lambda i: (0, 0, 0)),   # resident weights
            pl.BlockSpec((3, 3 * C1, C2), lambda i: (0, 0, 0)),
            pl.BlockSpec((3, 3 * C2, C3), lambda i: (0, 0, 0)),
        ],
        out_specs=pl.BlockSpec((bb, 1, C3), lambda i: (i, 0, 0)),
        scratch_shapes=[
            pltpu.VMEM((bb, h + 2, wbufw, C_IN), jnp.bfloat16),         # padded x
            pltpu.VMEM((bb, h + 2, wbufw, C1), jnp.bfloat16),           # padded relu(conv1)
            pltpu.VMEM((bb, h + 2, wbufw, C2), jnp.bfloat16),           # padded relu(conv2)
            pltpu.VMEM((bb * (h + 2) * w16, 3 * C_IN), jnp.bfloat16),   # dx-im2col patch
        ],
        compiler_params=pltpu.CompilerParams(
            dimension_semantics=("parallel",),
            vmem_limit_bytes=int(budget),
        ),
    )(x, w1, w2, w3)

    out = out[:n]
    return out.reshape(n, C3, 1, 1)


# ----------------------------------------------------------------------------
# Deterministic parameter init (normal_(0, 0.01), like the PyTorch module)
# ----------------------------------------------------------------------------
def init_weights(key):
    k1, k2, k3 = jax.random.split(key, 3)
    # PyTorch conv weight layout is (Cout, Cin, kH, kW); convert to HWIO.
    w1 = jax.random.normal(k1, (256, 512, 3, 3), jnp.float32) * 0.01
    w2 = jax.random.normal(k2, (128, 256, 3, 3), jnp.float32) * 0.01
    w3 = jax.random.normal(k3, (128, 128, 3, 3), jnp.float32) * 0.01
    to_hwio = lambda t: jnp.transpose(t, (2, 3, 1, 0))
    return to_hwio(w1), to_hwio(w2), to_hwio(w3)


# Pure-JAX f32 reference for a correctness check.
def _ref_forward(x_nchw, w1, w2, w3):
    def conv(x, w):  # x NHWC, w HWIO
        return lax.conv_general_dilated(
            x, w, window_strides=(1, 1), padding="SAME",
            dimension_numbers=("NHWC", "HWIO", "NHWC"))
    x = jnp.transpose(x_nchw, (0, 2, 3, 1))
    x = jax.nn.relu(conv(x, w1))
    x = jax.nn.relu(conv(x, w2))
    x = jax.nn.relu(conv(x, w3))
    feat = jnp.mean(x, axis=(1, 2))                 # (N, 128)
    return feat[:, :, None, None]


if __name__ == "__main__":
    key = jax.random.PRNGKey(0)
    kx, kw = jax.random.split(key)

    # Small spatial / batch; channel sizes are fixed by the module (512 in).
    N, C, H, W = 2, 512, 8, 8
    x = jax.random.normal(kx, (N, C, H, W), jnp.float32)
    w1, w2, w3 = init_weights(kw)

    out = jax.jit(netd_forward3)(x, w1, w2, w3)
    out = jax.block_until_ready(out)

    ref = _ref_forward(x, w1, w2, w3)
    # bf16 activations on the MXU (f32 accumulation) -> loosened tolerance.
    np.testing.assert_allclose(np.asarray(out), np.asarray(ref),
                               rtol=3e-2, atol=2e-3)
    assert out.shape == (N, 128, 1, 1)
    print("KERNEL_OK")
</pallas_src>

<mosaic_0001>
module attributes {stable_mosaic.version = 11 : i64} {
  func.func @kernel(%arg0: i32, %arg1: memref<1x8x8x512xbf16, #tpu.memory_space<vmem>>, %arg2: memref<3x1536x256xbf16, #tpu.memory_space<vmem>>, %arg3: memref<3x768x128xbf16, #tpu.memory_space<vmem>>, %arg4: memref<3x384x128xbf16, #tpu.memory_space<vmem>>, %arg5: memref<1x1x128xf32, #tpu.memory_space<vmem>>, %arg6: memref<1x10x33x512xbf16, #tpu.memory_space<vmem>>, %arg7: memref<1x10x33x256xbf16, #tpu.memory_space<vmem>>, %arg8: memref<1x10x33x128xbf16, #tpu.memory_space<vmem>>, %arg9: memref<160x1536xbf16, #tpu.memory_space<vmem>>) attributes {dimension_semantics = [#tpu.dimension_semantics<parallel>], iteration_bounds = array<i64: 2>, scalar_prefetch = 0 : i64, scratch_operands = 4 : i64, tpu.core_type = #tpu.core_type<tc>, window_params = [{transform_indices = @transform_0, window_bounds = array<i64: 1, 8, 8, 512>}, {pipeline_mode = #tpu.pipeline_mode<synchronous>, transform_indices = @transform_1, window_bounds = array<i64: 3, 1536, 256>}, {pipeline_mode = #tpu.pipeline_mode<synchronous>, transform_indices = @transform_2, window_bounds = array<i64: 3, 768, 128>}, {pipeline_mode = #tpu.pipeline_mode<synchronous>, transform_indices = @transform_3, window_bounds = array<i64: 3, 384, 128>}, {transform_indices = @transform_4, window_bounds = array<i64: 1, 1, 128>}]} {
    %cst = arith.constant 0.000000e+00 : bf16
    %0 = vector.broadcast %cst : bf16 to vector<1x1x33x512xbf16>
    %c0 = arith.constant 0 : index
    %c0_0 = arith.constant 0 : index
    %c0_1 = arith.constant 0 : index
    %c0_2 = arith.constant 0 : index
    %1 = vector.load %arg6[%c0, %c0_0, %c0_1, %c0_2] : memref<1x10x33x512xbf16, #tpu.memory_space<vmem>>, vector<1x1x33x512xbf16>
    tpu.vector_store %arg6[%c0, %c0_0, %c0_1, %c0_2], %0 {strides = array<i32>} : memref<1x10x33x512xbf16, #tpu.memory_space<vmem>>, vector<1x1x33x512xbf16>,
    %c0_3 = arith.constant 0 : index
    %c9 = arith.constant 9 : index
    %c0_4 = arith.constant 0 : index
    %c0_5 = arith.constant 0 : index
    %2 = vector.load %arg6[%c0_3, %c9, %c0_4, %c0_5] : memref<1x10x33x512xbf16, #tpu.memory_space<vmem>>, vector<1x1x33x512xbf16>
    tpu.vector_store %arg6[%c0_3, %c9, %c0_4, %c0_5], %0 {strides = array<i32>} : memref<1x10x33x512xbf16, #tpu.memory_space<vmem>>, vector<1x1x33x512xbf16>,
    %cst_6 = arith.constant 0.000000e+00 : bf16
    %3 = vector.broadcast %cst_6 : bf16 to vector<1x8x1x512xbf16>
    %c0_7 = arith.constant 0 : index
    %c1 = arith.constant 1 : index
    %c15 = arith.constant 15 : index
    %c0_8 = arith.constant 0 : index
    %4 = vector.load %arg6[%c0_7, %c1, %c15, %c0_8] : memref<1x10x33x512xbf16, #tpu.memory_space<vmem>>, vector<1x8x1x512xbf16>
    tpu.vector_store %arg6[%c0_7, %c1, %c15, %c0_8], %3 {strides = array<i32>} : memref<1x10x33x512xbf16, #tpu.memory_space<vmem>>, vector<1x8x1x512xbf16>,
    %cst_9 = arith.constant 0.000000e+00 : bf16
    %5 = vector.broadcast %cst_9 : bf16 to vector<1x8x9x512xbf16>
    %c0_10 = arith.constant 0 : index
    %c1_11 = arith.constant 1 : index
    %c24 = arith.constant 24 : index
    %c0_12 = arith.constant 0 : index
    %6 = vector.load %arg6[%c0_10, %c1_11, %c24, %c0_12] : memref<1x10x33x512xbf16, #tpu.memory_space<vmem>>, vector<1x8x9x512xbf16>
    tpu.vector_store %arg6[%c0_10, %c1_11, %c24, %c0_12], %5 {strides = array<i32>} : memref<1x10x33x512xbf16, #tpu.memory_space<vmem>>, vector<1x8x9x512xbf16>,
    %cst_13 = arith.constant 0.000000e+00 : bf16
    %7 = vector.broadcast %cst_13 : bf16 to vector<1x1x33x256xbf16>
    %c0_14 = arith.constant 0 : index
    %c0_15 = arith.constant 0 : index
    %c0_16 = arith.constant 0 : index
    %c0_17 = arith.constant 0 : index
    %8 = vector.load %arg7[%c0_14, %c0_15, %c0_16, %c0_17] : memref<1x10x33x256xbf16, #tpu.memory_space<vmem>>, vector<1x1x33x256xbf16>
    tpu.vector_store %arg7[%c0_14, %c0_15, %c0_16, %c0_17], %7 {strides = array<i32>} : memref<1x10x33x256xbf16, #tpu.memory_space<vmem>>, vector<1x1x33x256xbf16>,
    %c0_18 = arith.constant 0 : index
    %c9_19 = arith.constant 9 : index
    %c0_20 = arith.constant 0 : index
    %c0_21 = arith.constant 0 : index
    %9 = vector.load %arg7[%c0_18, %c9_19, %c0_20, %c0_21] : memref<1x10x33x256xbf16, #tpu.memory_space<vmem>>, vector<1x1x33x256xbf16>
    tpu.vector_store %arg7[%c0_18, %c9_19, %c0_20, %c0_21], %7 {strides = array<i32>} : memref<1x10x33x256xbf16, #tpu.memory_space<vmem>>, vector<1x1x33x256xbf16>,
    %cst_22 = arith.constant 0.000000e+00 : bf16
    %10 = vector.broadcast %cst_22 : bf16 to vector<1x8x1x256xbf16>
    %c0_23 = arith.constant 0 : index
    %c1_24 = arith.constant 1 : index
    %c15_25 = arith.constant 15 : index
    %c0_26 = arith.constant 0 : index
    %11 = vector.load %arg7[%c0_23, %c1_24, %c15_25, %c0_26] : memref<1x10x33x256xbf16, #tpu.memory_space<vmem>>, vector<1x8x1x256xbf16>
    tpu.vector_store %arg7[%c0_23, %c1_24, %c15_25, %c0_26], %10 {strides = array<i32>} : memref<1x10x33x256xbf16, #tpu.memory_space<vmem>>, vector<1x8x1x256xbf16>,
    %cst_27 = arith.constant 0.000000e+00 : bf16
    %12 = vector.broadcast %cst_27 : bf16 to vector<1x8x9x256xbf16>
    %c0_28 = arith.constant 0 : index
    %c1_29 = arith.constant 1 : index
    %c24_30 = arith.constant 24 : index
    %c0_31 = arith.constant 0 : index
    %13 = vector.load %arg7[%c0_28, %c1_29, %c24_30, %c0_31] : memref<1x10x33x256xbf16, #tpu.memory_space<vmem>>, vector<1x8x9x256xbf16>
    tpu.vector_store %arg7[%c0_28, %c1_29, %c24_30, %c0_31], %12 {strides = array<i32>} : memref<1x10x33x256xbf16, #tpu.memory_space<vmem>>, vector<1x8x9x256xbf16>,
    %cst_32 = arith.constant 0.000000e+00 : bf16
    %14 = vector.broadcast %cst_32 : bf16 to vector<1x1x33x128xbf16>
    %c0_33 = arith.constant 0 : index
    %c0_34 = arith.constant 0 : index
    %c0_35 = arith.constant 0 : index
    %c0_36 = arith.constant 0 : index
    %15 = vector.load %arg8[%c0_33, %c0_34, %c0_35, %c0_36] : memref<1x10x33x128xbf16, #tpu.memory_space<vmem>>, vector<1x1x33x128xbf16>
    tpu.vector_store %arg8[%c0_33, %c0_34, %c0_35, %c0_36], %14 {strides = array<i32>} : memref<1x10x33x128xbf16, #tpu.memory_space<vmem>>, vector<1x1x33x128xbf16>,
    %c0_37 = arith.constant 0 : index
    %c9_38 = arith.constant 9 : index
    %c0_39 = arith.constant 0 : index
    %c0_40 = arith.constant 0 : index
    %16 = vector.load %arg8[%c0_37, %c9_38, %c0_39, %c0_40] : memref<1x10x33x128xbf16, #tpu.memory_space<vmem>>, vector<1x1x33x128xbf16>
    tpu.vector_store %arg8[%c0_37, %c9_38, %c0_39, %c0_40], %14 {strides = array<i32>} : memref<1x10x33x128xbf16, #tpu.memory_space<vmem>>, vector<1x1x33x128xbf16>,
    %cst_41 = arith.constant 0.000000e+00 : bf16
    %17 = vector.broadcast %cst_41 : bf16 to vector<1x8x1x128xbf16>
    %c0_42 = arith.constant 0 : index
    %c1_43 = arith.constant 1 : index
    %c15_44 = arith.constant 15 : index
    %c0_45 = arith.constant 0 : index
    %18 = vector.load %arg8[%c0_42, %c1_43, %c15_44, %c0_45] : memref<1x10x33x128xbf16, #tpu.memory_space<vmem>>, vector<1x8x1x128xbf16>
    tpu.vector_store %arg8[%c0_42, %c1_43, %c15_44, %c0_45], %17 {strides = array<i32>} : memref<1x10x33x128xbf16, #tpu.memory_space<vmem>>, vector<1x8x1x128xbf16>,
    %cst_46 = arith.constant 0.000000e+00 : bf16
    %19 = vector.broadcast %cst_46 : bf16 to vector<1x8x9x128xbf16>
    %c0_47 = arith.constant 0 : index
    %c1_48 = arith.constant 1 : index
    %c24_49 = arith.constant 24 : index
    %c0_50 = arith.constant 0 : index
    %20 = vector.load %arg8[%c0_47, %c1_48, %c24_49, %c0_50] : memref<1x10x33x128xbf16, #tpu.memory_space<vmem>>, vector<1x8x9x128xbf16>
    tpu.vector_store %arg8[%c0_47, %c1_48, %c24_49, %c0_50], %19 {strides = array<i32>} : memref<1x10x33x128xbf16, #tpu.memory_space<vmem>>, vector<1x8x9x128xbf16>,
    %c0_51 = arith.constant 0 : index
    %c0_52 = arith.constant 0 : index
    %c0_53 = arith.constant 0 : index
    %c0_54 = arith.constant 0 : index
    %21 = vector.load %arg1[%c0_51, %c0_52, %c0_53, %c0_54] : memref<1x8x8x512xbf16, #tpu.memory_space<vmem>>, vector<1x8x8x512xbf16>
    %c0_55 = arith.constant 0 : index
    %c1_56 = arith.constant 1 : index
    %c16 = arith.constant 16 : index
    %c0_57 = arith.constant 0 : index
    %22 = vector.load %arg6[%c0_55, %c1_56, %c16, %c0_57] : memref<1x10x33x512xbf16, #tpu.memory_space<vmem>>, vector<1x8x8x512xbf16>
    tpu.vector_store %arg6[%c0_55, %c1_56, %c16, %c0_57], %21 {strides = array<i32>} : memref<1x10x33x512xbf16, #tpu.memory_space<vmem>>, vector<1x8x8x512xbf16>,
    %23 = tpu.iota {dimensions = array<i32: 1>} : vector<1x16x1xi32>
    %c0_58 = arith.constant 0 : index
    %c0_59 = arith.constant 0 : index
    %c15_60 = arith.constant 15 : index
    %c0_61 = arith.constant 0 : index
    %24 = vector.load %arg6[%c0_58, %c0_59, %c15_60, %c0_61] : memref<1x10x33x512xbf16, #tpu.memory_space<vmem>>, vector<1x10x16x512xbf16>
    %25 = vector.shape_cast %24 : vector<1x10x16x512xbf16> to vector<160x512xbf16>
    %c0_62 = arith.constant 0 : index
    %c0_63 = arith.constant 0 : index
    %26 = vector.load %arg9[%c0_62, %c0_63] : memref<160x1536xbf16, #tpu.memory_space<vmem>>, vector<160x512xbf16>
    tpu.vector_store %arg9[%c0_62, %c0_63], %25 {strides = array<i32>} : memref<160x1536xbf16, #tpu.memory_space<vmem>>, vector<160x512xbf16>,
    %c0_64 = arith.constant 0 : index
    %c0_65 = arith.constant 0 : index
    %c16_66 = arith.constant 16 : index
    %c0_67 = arith.constant 0 : index
    %27 = vector.load %arg6[%c0_64, %c0_65, %c16_66, %c0_67] : memref<1x10x33x512xbf16, #tpu.memory_space<vmem>>, vector<1x10x16x512xbf16>
    %28 = vector.shape_cast %27 : vector<1x10x16x512xbf16> to vector<160x512xbf16>
    %c0_68 = arith.constant 0 : index
    %c512 = arith.constant 512 : index
    %29 = vector.load %arg9[%c0_68, %c512] : memref<160x1536xbf16, #tpu.memory_space<vmem>>, vector<160x512xbf16>
    tpu.vector_store %arg9[%c0_68, %c512], %28 {strides = array<i32>} : memref<160x1536xbf16, #tpu.memory_space<vmem>>, vector<160x512xbf16>,
    %c0_69 = arith.constant 0 : index
    %c0_70 = arith.constant 0 : index
    %c17 = arith.constant 17 : index
    %c0_71 = arith.constant 0 : index
    %30 = vector.load %arg6[%c0_69, %c0_70, %c17, %c0_71] : memref<1x10x33x512xbf16, #tpu.memory_space<vmem>>, vector<1x10x16x512xbf16>
    %31 = vector.shape_cast %30 : vector<1x10x16x512xbf16> to vector<160x512xbf16>
    %c0_72 = arith.constant 0 : index
    %c1024 = arith.constant 1024 : index
    %32 = vector.load %arg9[%c0_72, %c1024] : memref<160x1536xbf16, #tpu.memory_space<vmem>>, vector<160x512xbf16>
    tpu.vector_store %arg9[%c0_72, %c1024], %31 {strides = array<i32>} : memref<160x1536xbf16, #tpu.memory_space<vmem>>, vector<160x512xbf16>,
    %c0_73 = arith.constant 0 : index
    %c0_74 = arith.constant 0 : index
    %33 = vector.load %arg9[%c0_73, %c0_74] : memref<160x1536xbf16, #tpu.memory_space<vmem>>, vector<128x1536xbf16>
    %c0_75 = arith.constant 0 : index
    %c0_76 = arith.constant 0 : index
    %c0_77 = arith.constant 0 : index
    %34 = vector.load %arg2[%c0_75, %c0_76, %c0_77] : memref<3x1536x256xbf16, #tpu.memory_space<vmem>>, vector<1x1536x256xbf16>
    %35 = vector.shape_cast %34 : vector<1x1536x256xbf16> to vector<1536x256xbf16>
    %cst_78 = arith.constant dense<0.000000e+00> : vector<128x256xf32>
    %36 = tpu.matmul %33, %35, %cst_78 {dimension_numbers = #tpu.dot_dimension_numbers<[1], [0], [0], [1], [0, 0, 1, 1], [], []>} : vector<128x1536xbf16>, vector<1536x256xbf16>, vector<128x256xf32> -> vector<128x256xf32>
    %c16_79 = arith.constant 16 : index
    %c0_80 = arith.constant 0 : index
    %37 = vector.load %arg9[%c16_79, %c0_80] : memref<160x1536xbf16, #tpu.memory_space<vmem>>, vector<128x1536xbf16>
    %c1_81 = arith.constant 1 : index
    %c0_82 = arith.constant 0 : index
    %c0_83 = arith.constant 0 : index
    %38 = vector.load %arg2[%c1_81, %c0_82, %c0_83] : memref<3x1536x256xbf16, #tpu.memory_space<vmem>>, vector<1x1536x256xbf16>
    %39 = vector.shape_cast %38 : vector<1x1536x256xbf16> to vector<1536x256xbf16>
    %cst_84 = arith.constant dense<0.000000e+00> : vector<128x256xf32>
    %40 = tpu.matmul %37, %39, %cst_84 {dimension_numbers = #tpu.dot_dimension_numbers<[1], [0], [0], [1], [0, 0, 1, 1], [], []>} : vector<128x1536xbf16>, vector<1536x256xbf16>, vector<128x256xf32> -> vector<128x256xf32>
    %41 = arith.addf %36, %40 : vector<128x256xf32>
    %c32 = arith.constant 32 : index
    %c0_85 = arith.constant 0 : index
    %42 = vector.load %arg9[%c32, %c0_85] : memref<160x1536xbf16, #tpu.memory_space<vmem>>, vector<128x1536xbf16>
    %c2 = arith.constant 2 : index
    %c0_86 = arith.constant 0 : index
    %c0_87 = arith.constant 0 : index
    %43 = vector.load %arg2[%c2, %c0_86, %c0_87] : memref<3x1536x256xbf16, #tpu.memory_space<vmem>>, vector<1x1536x256xbf16>
    %44 = vector.shape_cast %43 : vector<1x1536x256xbf16> to vector<1536x256xbf16>
    %cst_88 = arith.constant dense<0.000000e+00> : vector<128x256xf32>
    %45 = tpu.matmul %42, %44, %cst_88 {dimension_numbers = #tpu.dot_dimension_numbers<[1], [0], [0], [1], [0, 0, 1, 1], [], []>} : vector<128x1536xbf16>, vector<1536x256xbf16>, vector<128x256xf32> -> vector<128x256xf32>
    %46 = arith.addf %41, %45 : vector<128x256xf32>
    %cst_89 = arith.constant 0.000000e+00 : f32
    %47 = vector.broadcast %cst_89 : f32 to vector<128x256xf32>
    %48 = arith.maximumf %46, %47 : vector<128x256xf32>
    %49 = vector.shape_cast %48 : vector<128x256xf32> to vector<8x16x256xf32>
    %c8_i32 = arith.constant 8 : i32
    %50 = vector.broadcast %c8_i32 : i32 to vector<1x16x1xi32>
    %51 = arith.cmpi slt, %23, %50 : vector<1x16x1xi32>
    %cst_90 = arith.constant 0.000000e+00 : f32
    %52 = vector.shape_cast %51 : vector<1x16x1xi1> to vector<1x16x1xi1>
    %53 = vector.broadcast %52 : vector<1x16x1xi1> to vector<8x16x256xi1>
    %54 = vector.broadcast %cst_90 : f32 to vector<8x16x256xf32>
    %55 = arith.select %53, %49, %54 : vector<8x16x256xi1>, vector<8x16x256xf32>
    %56 = arith.truncf %55 : vector<8x16x256xf32> to vector<8x16x256xbf16>
    %c0_91 = arith.constant 0 : index
    %c1_92 = arith.constant 1 : index
    %c16_93 = arith.constant 16 : index
    %c0_94 = arith.constant 0 : index
    %57 = vector.load %arg7[%c0_91, %c1_92, %c16_93, %c0_94] : memref<1x10x33x256xbf16, #tpu.memory_space<vmem>>, vector<1x8x16x256xbf16>
    %58 = vector.shape_cast %57 : vector<1x8x16x256xbf16> to vector<8x16x256xbf16>
    %59 = vector.shape_cast %56 : vector<8x16x256xbf16> to vector<1x8x16x256xbf16>
    tpu.vector_store %arg7[%c0_91, %c1_92, %c16_93, %c0_94], %59 {strides = array<i32>} : memref<1x10x33x256xbf16, #tpu.memory_space<vmem>>, vector<1x8x16x256xbf16>,
    %c0_95 = arith.constant 0 : index
    %c0_96 = arith.constant 0 : index
    %c15_97 = arith.constant 15 : index
    %c0_98 = arith.constant 0 : index
    %60 = vector.load %arg7[%c0_95, %c0_96, %c15_97, %c0_98] : memref<1x10x33x256xbf16, #tpu.memory_space<vmem>>, vector<1x10x16x256xbf16>
    %61 = vector.shape_cast %60 : vector<1x10x16x256xbf16> to vector<160x256xbf16>
    %c0_99 = arith.constant 0 : index
    %c0_100 = arith.constant 0 : index
    %62 = vector.load %arg9[%c0_99, %c0_100] : memref<160x1536xbf16, #tpu.memory_space<vmem>>, vector<160x256xbf16>
    tpu.vector_store %arg9[%c0_99, %c0_100], %61 {strides = array<i32>} : memref<160x1536xbf16, #tpu.memory_space<vmem>>, vector<160x256xbf16>,
    %c0_101 = arith.constant 0 : index
    %c0_102 = arith.constant 0 : index
    %c16_103 = arith.constant 16 : index
    %c0_104 = arith.constant 0 : index
    %63 = vector.load %arg7[%c0_101, %c0_102, %c16_103, %c0_104] : memref<1x10x33x256xbf16, #tpu.memory_space<vmem>>, vector<1x10x16x256xbf16>
    %64 = vector.shape_cast %63 : vector<1x10x16x256xbf16> to vector<160x256xbf16>
    %c0_105 = arith.constant 0 : index
    %c256 = arith.constant 256 : index
    %65 = vector.load %arg9[%c0_105, %c256] : memref<160x1536xbf16, #tpu.memory_space<vmem>>, vector<160x256xbf16>
    tpu.vector_store %arg9[%c0_105, %c256], %64 {strides = array<i32>} : memref<160x1536xbf16, #tpu.memory_space<vmem>>, vector<160x256xbf16>,
    %c0_106 = arith.constant 0 : index
    %c0_107 = arith.constant 0 : index
    %c17_108 = arith.constant 17 : index
    %c0_109 = arith.constant 0 : index
    %66 = vector.load %arg7[%c0_106, %c0_107, %c17_108, %c0_109] : memref<1x10x33x256xbf16, #tpu.memory_space<vmem>>, vector<1x10x16x256xbf16>
    %67 = vector.shape_cast %66 : vector<1x10x16x256xbf16> to vector<160x256xbf16>
    %c0_110 = arith.constant 0 : index
    %c512_111 = arith.constant 512 : index
    %68 = vector.load %arg9[%c0_110, %c512_111] : memref<160x1536xbf16, #tpu.memory_space<vmem>>, vector<160x256xbf16>
    tpu.vector_store %arg9[%c0_110, %c512_111], %67 {strides = array<i32>} : memref<160x1536xbf16, #tpu.memory_space<vmem>>, vector<160x256xbf16>,
    %c0_112 = arith.constant 0 : index
    %c0_113 = arith.constant 0 : index
    %69 = vector.load %arg9[%c0_112, %c0_113] : memref<160x1536xbf16, #tpu.memory_space<vmem>>, vector<128x768xbf16>
    %c0_114 = arith.constant 0 : index
    %c0_115 = arith.constant 0 : index
    %c0_116 = arith.constant 0 : index
    %70 = vector.load %arg3[%c0_114, %c0_115, %c0_116] : memref<3x768x128xbf16, #tpu.memory_space<vmem>>, vector<1x768x128xbf16>
    %71 = vector.shape_cast %70 : vector<1x768x128xbf16> to vector<768x128xbf16>
    %cst_117 = arith.constant dense<0.000000e+00> : vector<128x128xf32>
    %72 = tpu.matmul %69, %71, %cst_117 {dimension_numbers = #tpu.dot_dimension_numbers<[1], [0], [0], [1], [0, 0, 1, 1], [], []>} : vector<128x768xbf16>, vector<768x128xbf16>, vector<128x128xf32> -> vector<128x128xf32>
    %c16_118 = arith.constant 16 : index
    %c0_119 = arith.constant 0 : index
    %73 = vector.load %arg9[%c16_118, %c0_119] : memref<160x1536xbf16, #tpu.memory_space<vmem>>, vector<128x768xbf16>
    %c1_120 = arith.constant 1 : index
    %c0_121 = arith.constant 0 : index
    %c0_122 = arith.constant 0 : index
    %74 = vector.load %arg3[%c1_120, %c0_121, %c0_122] : memref<3x768x128xbf16, #tpu.memory_space<vmem>>, vector<1x768x128xbf16>
    %75 = vector.shape_cast %74 : vector<1x768x128xbf16> to vector<768x128xbf16>
    %cst_123 = arith.constant dense<0.000000e+00> : vector<128x128xf32>
    %76 = tpu.matmul %73, %75, %cst_123 {dimension_numbers = #tpu.dot_dimension_numbers<[1], [0], [0], [1], [0, 0, 1, 1], [], []>} : vector<128x768xbf16>, vector<768x128xbf16>, vector<128x128xf32> -> vector<128x128xf32>
    %77 = arith.addf %72, %76 : vector<128x128xf32>
    %c32_124 = arith.constant 32 : index
    %c0_125 = arith.constant 0 : index
    %78 = vector.load %arg9[%c32_124, %c0_125] : memref<160x1536xbf16, #tpu.memory_space<vmem>>, vector<128x768xbf16>
    %c2_126 = arith.constant 2 : index
    %c0_127 = arith.constant 0 : index
    %c0_128 = arith.constant 0 : index
    %79 = vector.load %arg3[%c2_126, %c0_127, %c0_128] : memref<3x768x128xbf16, #tpu.memory_space<vmem>>, vector<1x768x128xbf16>
    %80 = vector.shape_cast %79 : vector<1x768x128xbf16> to vector<768x128xbf16>
    %cst_129 = arith.constant dense<0.000000e+00> : vector<128x128xf32>
    %81 = tpu.matmul %78, %80, %cst_129 {dimension_numbers = #tpu.dot_dimension_numbers<[1], [0], [0], [1], [0, 0, 1, 1], [], []>} : vector<128x768xbf16>, vector<768x128xbf16>, vector<128x128xf32> -> vector<128x128xf32>
    %82 = arith.addf %77, %81 : vector<128x128xf32>
    %cst_130 = arith.constant 0.000000e+00 : f32
    %83 = vector.broadcast %cst_130 : f32 to vector<128x128xf32>
    %84 = arith.maximumf %82, %83 : vector<128x128xf32>
    %85 = vector.shape_cast %84 : vector<128x128xf32> to vector<8x16x128xf32>
    %c8_i32_131 = arith.constant 8 : i32
    %86 = vector.broadcast %c8_i32_131 : i32 to vector<1x16x1xi32>
    %87 = arith.cmpi slt, %23, %86 : vector<1x16x1xi32>
    %cst_132 = arith.constant 0.000000e+00 : f32
    %88 = vector.shape_cast %87 : vector<1x16x1xi1> to vector<1x16x1xi1>
    %89 = vector.broadcast %88 : vector<1x16x1xi1> to vector<8x16x128xi1>
    %90 = vector.broadcast %cst_132 : f32 to vector<8x16x128xf32>
    %91 = arith.select %89, %85, %90 : vector<8x16x128xi1>, vector<8x16x128xf32>
    %92 = arith.truncf %91 : vector<8x16x128xf32> to vector<8x16x128xbf16>
    %c0_133 = arith.constant 0 : index
    %c1_134 = arith.constant 1 : index
    %c16_135 = arith.constant 16 : index
    %c0_136 = arith.constant 0 : index
    %93 = vector.load %arg8[%c0_133, %c1_134, %c16_135, %c0_136] : memref<1x10x33x128xbf16, #tpu.memory_space<vmem>>, vector<1x8x16x128xbf16>
    %94 = vector.shape_cast %93 : vector<1x8x16x128xbf16> to vector<8x16x128xbf16>
    %95 = vector.shape_cast %92 : vector<8x16x128xbf16> to vector<1x8x16x128xbf16>
    tpu.vector_store %arg8[%c0_133, %c1_134, %c16_135, %c0_136], %95 {strides = array<i32>} : memref<1x10x33x128xbf16, #tpu.memory_space<vmem>>, vector<1x8x16x128xbf16>,
    %c0_137 = arith.constant 0 : index
    %c0_138 = arith.constant 0 : index
    %c15_139 = arith.constant 15 : index
    %c0_140 = arith.constant 0 : index
    %96 = vector.load %arg8[%c0_137, %c0_138, %c15_139, %c0_140] : memref<1x10x33x128xbf16, #tpu.memory_space<vmem>>, vector<1x10x16x128xbf16>
    %97 = vector.shape_cast %96 : vector<1x10x16x128xbf16> to vector<160x128xbf16>
    %c0_141 = arith.constant 0 : index
    %c0_142 = arith.constant 0 : index
    %98 = vector.load %arg9[%c0_141, %c0_142] : memref<160x1536xbf16, #tpu.memory_space<vmem>>, vector<160x128xbf16>
    tpu.vector_store %arg9[%c0_141, %c0_142], %97 {strides = array<i32>} : memref<160x1536xbf16, #tpu.memory_space<vmem>>, vector<160x128xbf16>,
    %c0_143 = arith.constant 0 : index
    %c0_144 = arith.constant 0 : index
    %c16_145 = arith.constant 16 : index
    %c0_146 = arith.constant 0 : index
    %99 = vector.load %arg8[%c0_143, %c0_144, %c16_145, %c0_146] : memref<1x10x33x128xbf16, #tpu.memory_space<vmem>>, vector<1x10x16x128xbf16>
    %100 = vector.shape_cast %99 : vector<1x10x16x128xbf16> to vector<160x128xbf16>
    %c0_147 = arith.constant 0 : index
    %c128 = arith.constant 128 : index
    %101 = vector.load %arg9[%c0_147, %c128] : memref<160x1536xbf16, #tpu.memory_space<vmem>>, vector<160x128xbf16>
    tpu.vector_store %arg9[%c0_147, %c128], %100 {strides = array<i32>} : memref<160x1536xbf16, #tpu.memory_space<vmem>>, vector<160x128xbf16>,
    %c0_148 = arith.constant 0 : index
    %c0_149 = arith.constant 0 : index
    %c17_150 = arith.constant 17 : index
    %c0_151 = arith.constant 0 : index
    %102 = vector.load %arg8[%c0_148, %c0_149, %c17_150, %c0_151] : memref<1x10x33x128xbf16, #tpu.memory_space<vmem>>, vector<1x10x16x128xbf16>
    %103 = vector.shape_cast %102 : vector<1x10x16x128xbf16> to vector<160x128xbf16>
    %c0_152 = arith.constant 0 : index
    %c256_153 = arith.constant 256 : index
    %104 = vector.load %arg9[%c0_152, %c256_153] : memref<160x1536xbf16, #tpu.memory_space<vmem>>, vector<160x128xbf16>
    tpu.vector_store %arg9[%c0_152, %c256_153], %103 {strides = array<i32>} : memref<160x1536xbf16, #tpu.memory_space<vmem>>, vector<160x128xbf16>,
    %c0_154 = arith.constant 0 : index
    %c0_155 = arith.constant 0 : index
    %105 = vector.load %arg9[%c0_154, %c0_155] : memref<160x1536xbf16, #tpu.memory_space<vmem>>, vector<128x384xbf16>
    %c0_156 = arith.constant 0 : index
    %c0_157 = arith.constant 0 : index
    %c0_158 = arith.constant 0 : index
    %106 = vector.load %arg4[%c0_156, %c0_157, %c0_158] : memref<3x384x128xbf16, #tpu.memory_space<vmem>>, vector<1x384x128xbf16>
    %107 = vector.shape_cast %106 : vector<1x384x128xbf16> to vector<384x128xbf16>
    %cst_159 = arith.constant dense<0.000000e+00> : vector<128x128xf32>
    %108 = tpu.matmul %105, %107, %cst_159 {dimension_numbers = #tpu.dot_dimension_numbers<[1], [0], [0], [1], [0, 0, 1, 1], [], []>} : vector<128x384xbf16>, vector<384x128xbf16>, vector<128x128xf32> -> vector<128x128xf32>
    %c16_160 = arith.constant 16 : index
    %c0_161 = arith.constant 0 : index
    %109 = vector.load %arg9[%c16_160, %c0_161] : memref<160x1536xbf16, #tpu.memory_space<vmem>>, vector<128x384xbf16>
    %c1_162 = arith.constant 1 : index
    %c0_163 = arith.constant 0 : index
    %c0_164 = arith.constant 0 : index
    %110 = vector.load %arg4[%c1_162, %c0_163, %c0_164] : memref<3x384x128xbf16, #tpu.memory_space<vmem>>, vector<1x384x128xbf16>
    %111 = vector.shape_cast %110 : vector<1x384x128xbf16> to vector<384x128xbf16>
    %cst_165 = arith.constant dense<0.000000e+00> : vector<128x128xf32>
    %112 = tpu.matmul %109, %111, %cst_165 {dimension_numbers = #tpu.dot_dimension_numbers<[1], [0], [0], [1], [0, 0, 1, 1], [], []>} : vector<128x384xbf16>, vector<384x128xbf16>, vector<128x128xf32> -> vector<128x128xf32>
    %113 = arith.addf %108, %112 : vector<128x128xf32>
    %c32_166 = arith.constant 32 : index
    %c0_167 = arith.constant 0 : index
    %114 = vector.load %arg9[%c32_166, %c0_167] : memref<160x1536xbf16, #tpu.memory_space<vmem>>, vector<128x384xbf16>
    %c2_168 = arith.constant 2 : index
    %c0_169 = arith.constant 0 : index
    %c0_170 = arith.constant 0 : index
    %115 = vector.load %arg4[%c2_168, %c0_169, %c0_170] : memref<3x384x128xbf16, #tpu.memory_space<vmem>>, vector<1x384x128xbf16>
    %116 = vector.shape_cast %115 : vector<1x384x128xbf16> to vector<384x128xbf16>
    %cst_171 = arith.constant dense<0.000000e+00> : vector<128x128xf32>
    %117 = tpu.matmul %114, %116, %cst_171 {dimension_numbers = #tpu.dot_dimension_numbers<[1], [0], [0], [1], [0, 0, 1, 1], [], []>} : vector<128x384xbf16>, vector<384x128xbf16>, vector<128x128xf32> -> vector<128x128xf32>
    %118 = arith.addf %113, %117 : vector<128x128xf32>
    %cst_172 = arith.constant 0.000000e+00 : f32
    %119 = vector.broadcast %cst_172 : f32 to vector<128x128xf32>
    %120 = arith.maximumf %118, %119 : vector<128x128xf32>
    %121 = vector.shape_cast %120 : vector<128x128xf32> to vector<8x16x128xf32>
    %c8_i32_173 = arith.constant 8 : i32
    %122 = vector.broadcast %c8_i32_173 : i32 to vector<1x16x1xi32>
    %123 = arith.cmpi slt, %23, %122 : vector<1x16x1xi32>
    %cst_174 = arith.constant 0.000000e+00 : f32
    %124 = vector.shape_cast %123 : vector<1x16x1xi1> to vector<1x16x1xi1>
    %125 = vector.broadcast %124 : vector<1x16x1xi1> to vector<8x16x128xi1>
    %126 = vector.broadcast %cst_174 : f32 to vector<8x16x128xf32>
    %127 = arith.select %125, %121, %126 : vector<8x16x128xi1>, vector<8x16x128xf32>
    %128 = vector.shape_cast %127 : vector<8x16x128xf32> to vector<128x128xf32>
    %cst_175 = arith.constant dense<0.000000e+00> : vector<128xf32>
    %129 = vector.multi_reduction <add>, %128, %cst_175 [0] : vector<128x128xf32> to vector<128xf32>
    %130 = vector.shape_cast %129 : vector<128xf32> to vector<1x128xf32>
    %cst_176 = arith.constant 1.562500e-02 : f32
    %131 = vector.broadcast %cst_176 : f32 to vector<1x128xf32>
    %132 = arith.mulf %130, %131 : vector<1x128xf32>
    %c0_177 = arith.constant 0 : index
    %c0_178 = arith.constant 0 : index
    %c0_179 = arith.constant 0 : index
    %133 = vector.load %arg5[%c0_177, %c0_178, %c0_179] : memref<1x1x128xf32, #tpu.memory_space<vmem>>, vector<1x1x128xf32>
    %134 = vector.shape_cast %133 : vector<1x1x128xf32> to vector<1x128xf32>
    %135 = vector.shape_cast %132 : vector<1x128xf32> to vector<1x1x128xf32>
    tpu.vector_store %arg5[%c0_177, %c0_178, %c0_179], %135 {strides = array<i32>} : memref<1x1x128xf32, #tpu.memory_space<vmem>>, vector<1x1x128xf32>,
    return
  }
  func.func @transform_0(%arg0: i32) -> (i32, i32, i32, i32) {
    %c0_i32 = arith.constant 0 : i32
    %c0_i32_0 = arith.constant 0 : i32
    %c0_i32_1 = arith.constant 0 : i32
    %c0_i32_2 = arith.constant 0 : i32
    return %arg0, %c0_i32, %c0_i32_0, %c0_i32_1 : i32, i32, i32, i32
  }
  func.func @transform_1(%arg0: i32) -> (i32, i32, i32) {
    %c0_i32 = arith.constant 0 : i32
    %c0_i32_0 = arith.constant 0 : i32
    %c0_i32_1 = arith.constant 0 : i32
    %c0_i32_2 = arith.constant 0 : i32
    return %c0_i32, %c0_i32_0, %c0_i32_1 : i32, i32, i32
  }
  func.func @transform_2(%arg0: i32) -> (i32, i32, i32) {
    %c0_i32 = arith.constant 0 : i32
    %c0_i32_0 = arith.constant 0 : i32
    %c0_i32_1 = arith.constant 0 : i32
    %c0_i32_2 = arith.constant 0 : i32
    return %c0_i32, %c0_i32_0, %c0_i32_1 : i32, i32, i32
  }
  func.func @transform_3(%arg0: i32) -> (i32, i32, i32) {
    %c0_i32 = arith.constant 0 : i32
    %c0_i32_0 = arith.constant 0 : i32
    %c0_i32_1 = arith.constant 0 : i32
    %c0_i32_2 = arith.constant 0 : i32
    return %c0_i32, %c0_i32_0, %c0_i32_1 : i32, i32, i32
  }
  func.func @transform_4(%arg0: i32) -> (i32, i32, i32) {
    %c0_i32 = arith.constant 0 : i32
    %c0_i32_0 = arith.constant 0 : i32
    %c0_i32_1 = arith.constant 0 : i32
    return %arg0, %c0_i32, %c0_i32_0 : i32, i32, i32
  }
}

</mosaic_0001>

<bundles_post_ra>
// kernel: netd_forward3.1
= control target key start
LH: loop header
LB: loop body
LE: loop exit
PB: predicated region body
PF: predicated region fallthrough
CT: control target
= control target key end

     0   :  { %9 = vsyncpa [#allocation7], 0  ;;  %s22504_s0 = inlined_call_operand.vmem [shape: bf16[2,8,8,512], index: 0, kind: input, shape index: {}]   ;;  %s22505_s1 = inlined_call_operand.vmem [shape: bf16[3,1536,256], index: 1, kind: input, shape index: {}]   ;;  %s22506_s2 = inlined_call_operand.vmem [shape: bf16[3,768,128], index: 2, kind: input, shape index: {}]   ;;  %s22507_s3 = inlined_call_operand.vmem [shape: bf16[3,384,128], index: 3, kind: input, shape index: {}]   ;;  %s22508_s4 = inlined_call_operand.hbm [shape: f32[2,1,128], index: 4, kind: output, shape index: {}]  }
   0x1   :  { %11 = vsyncpa [#allocation7 + $0x1], 0  ;;  %s17887_s15 = smov 0   ;;  %s17889_s16 = smov 0  }
   0x2   :  { %s17891_s17 = smov 0   ;;  %s17893_s18 = smov 0  }
   0x3 LB: > { %s17908_s19 = sadd.s32 4294967295, %s17856_s18   ;;  %s13343_s20 = sadd.s32 4294967294, %s17856_s18   ;;  %s17856_s18 = sphi %s17893_s18, %s22801_s18   ;;  %s17852_s17 = sphi %s17891_s17, %s22800_s17   ;;  %s17848_s16 = sphi %s17889_s16, %s22799_s16   ;;  %s17844_s15 = sphi %s17887_s15, %s22798_s15  }
   0x4   : > { %s17912_s21 = sadd.s32 1, %s17856_s18   ;;  %s113_s22 = sadd.s32 1, %s17852_s17 }
   0x5   : > { %s110_s23 = ssub.s32 %s17856_s18, %s17912_s21  ;;  %p123_p0 = scmp.ne.s32.totalorder %s17852_s17, %s17848_s16 }
   0x6   : > { %p111_p1 = scmp.eq.s32.totalorder %s110_s23, 0  ;;  %p124_p2 = scmp.eq.s32.totalorder %s17908_s19, 1 }
   0x7   : > { %p129_p3 = scmp.ne.s32.totalorder %s17848_s16, %s17844_s15  ;;  %p130_p4 = scmp.eq.s32.totalorder %s13343_s20, 1 }
   0x8   : > { %s17923_s24 = scalar_select %p111_p1, %s17852_s17, %s113_s22  }
   0x9   : > { %p17925_p5 = por %p124_p2, %p123_p0  ;;  %p17929_p6 = por %p130_p4, %p129_p3 }
   0xa   : > { %p13346_p7 = scmp.ge.s32.totalorder %s17856_s18, 1  ;;  %p165_p8 = scmp.lt.s32.totalorder %s17856_s18, 3 }
   0xc   : > { %p166_p9 = pnand %p13346_p7, %p165_p8 }
   0xe   : > { %169 = sbr.rel (%p166_p9) target bundleno = 2558 (0x9fe), region = 36 }
  0x15   : > { %v16689_v0 = vld [vmem:[%s22505_s1 + $0x804] ss:$8 sps:$4 sm:$0xff]   ;;  %v16691_v1 = vld [vmem:[%s22505_s1 + $0x800] ss:$8 sps:$4 sm:$0xff]   ;;  %v22509_v2 = vmov 0   ;;  %p190_p10 = scmp.lt.s32.totalorder %s17908_s19, 1 }
  0x16   : > { %288 = vst [vmem:[#allocation2 + $0x80] sm:$0xff] %v22509_v2  ;;  %198 = vst [vmem:[#allocation2 + $0x10] sm:$0xff] %v22509_v2  ;;  %3935 = vmatprep.subr.bf16.mxu0 %v16689_v0  ;;  %v16692_v3 = vld [vmem:[%s22505_s1 + $0x814] ss:$8 sps:$4 sm:$0xff]   ;;  %v16694_v4 = vld [vmem:[%s22505_s1 + $0x810] ss:$8 sps:$4 sm:$0xff]  }
  0x17   : > { %199 = vst [vmem:[#allocation2 + $0x18] sm:$0xff] %v22509_v2  ;;  %220 = vst [vmem:[#allocation2 + $0x2e0] sm:$0xff] %v22509_v2  ;;  %3936 = vmatpush1.bf16.msra.mxu0 %v16691_v1  ;;  %v16695_v5 = vld [vmem:[%s22505_s1 + $0x824] ss:$8 sps:$4 sm:$0xff]   ;;  %v16697_v6 = vld [vmem:[%s22505_s1 + $0x820] ss:$8 sps:$4 sm:$0xff]  }
  0x18   : > { %221 = vst [vmem:[#allocation2 + $0x2e8] sm:$0xff] %v22509_v2  ;;  %353 = vst [vmem:[#allocation3 + $0x8] sm:$0xff] %v22509_v2  ;;  %3937 = vmatprep.subr.bf16.mxu0 %v16692_v3  ;;  %v16698_v7 = vld [vmem:[%s22505_s1 + $0x834] ss:$8 sps:$4 sm:$0xff]   ;;  %v16700_v8 = vld [vmem:[%s22505_s1 + $0x830] ss:$8 sps:$4 sm:$0xff]  }
  0x19   : > { %361 = vst [vmem:[#allocation3 + $0x170] sm:$0xff] %v22509_v2  ;;  %425 = vst [vmem:[#allocation4 + $0x4] sm:$0xf] %v22509_v2  ;;  %s191_s23 = scalar_select %p190_p10, %s17908_s19, 1  ;;  %v16701_v9 = vld [vmem:[%s22505_s1 + $0x844] ss:$8 sps:$4 sm:$0xff]  }
  0x1a   : > { %426 = vst [vmem:[#allocation4 + $0x8] sm:$0xf] %v22509_v2  ;;  %427 = vst [vmem:[#allocation4 + $0xc] sm:$0xf] %v22509_v2  ;;  %v16703_v10 = vld [vmem:[%s22505_s1 + $0x840] ss:$8 sps:$4 sm:$0xff]  }
  0x1b   : > { %433 = vst [vmem:[#allocation4 + $0xb8] sm:$0xf] %v22509_v2  ;;  %434 = vst [vmem:[#allocation4 + $0xbc] sm:$0xf] %v22509_v2  ;;  %3938 = vmatpush1.bf16.msra.mxu0 %v16694_v4  ;;  %s15098_s5 = sshll.u32 %s191_s23, 7  ;;  %vm204_vm0 = vcmask 1040384  }
  0x1c   : > { %435 = vst [vmem:[#allocation4 + $0xc0] sm:$0xf] %v22509_v2  ;;  %464 = vst [vmem:[#allocation4 + $0x20] sm:$0xf] %v22509_v2  ;;  %3939 = vmatprep.subr.bf16.mxu0 %v16695_v5  ;;  %v16704_v11 = vld [vmem:[%s22505_s1 + $0x854] ss:$8 sps:$4 sm:$0xff]   ;;  %s17994_s10 = scalar_lea.vmem %s22504_s0, %s15098_s5 }
  0x1d   : > { %468 = vst [vmem:[#allocation4 + $0x34] sm:$0xf] %v22509_v2  ;;  %472 = vst [vmem:[#allocation4 + $0x48] sm:$0xf] %v22509_v2  ;;  %v16706_v12 = vld [vmem:[%s22505_s1 + $0x850] ss:$8 sps:$4 sm:$0xff]  }
  0x1e   : > { %476 = vst [vmem:[#allocation4 + $0x5c] sm:$0xf] %v22509_v2  ;;  %480 = vst [vmem:[#allocation4 + $0x70] sm:$0xf] %v22509_v2  ;;  %v16707_v13 = vld [vmem:[%s22505_s1 + $0x864] ss:$8 sps:$4 sm:$0xff]  }
  0x1f   : > { %484 = vst [vmem:[#allocation4 + $0x84] sm:$0xf] %v22509_v2  ;;  %488 = vst [vmem:[#allocation4 + $0x98] sm:$0xf] %v22509_v2  ;;  %3940 = vmatpush1.bf16.msra.mxu0 %v16697_v6  ;;  %v18003_v14 = vld [vmem:[%s17994_s10] sm:$0xff]  ;;  %v18018_v18 = vld [vmem:[%s17994_s10 + $0x10] sm:$0xff] }
  0x20   : > { %492 = vst [vmem:[#allocation4 + $0xac] sm:$0xf] %v22509_v2  ;;  %3941 = vmatprep.subr.bf16.mxu0 %v16698_v7  ;;  %512 = vst [vmem:[#allocation2 + $0x70] sm:$0xff] %v18003_v14  ;;  %v18008_v15 = vcombine.high %v18003_v14, %v22509_v2  ;;  %v16709_v16 = vld [vmem:[%s22505_s1 + $0x860] ss:$8 sps:$4 sm:$0xff]   ;;  %v18032_v22 = vld [vmem:[%s17994_s10 + $0x30] sm:$0xff]  ;;  %v18125_v49 = vcombine.low %v18003_v14, %v22509_v2  ;;  %v18132_v51 = vcombine.high %v18018_v18, %v22509_v2 }
  0x21   : > { %v16710_v17 = vld [vmem:[%s22505_s1 + $0x874] ss:$8 sps:$4 sm:$0xff]   ;;  %514 = vst [vmem:[#allocation2 + $0xc0] sm:$0xff] %v18018_v18  ;;  %v16712_v19 = vld [vmem:[%s22505_s1 + $0x870] ss:$8 sps:$4 sm:$0xff]   ;;  %v18025_v20 = vld [vmem:[%s17994_s10 + $0x20] sm:$0xff]  ;;  %v18160_v59 = vcombine.low %v18018_v18, %v22509_v2 }
  0x22   : > { %3967 = vmatprep.mubr.bf16.mxu0 %v18008_v15  ;;  %v16713_v21 = vld [vmem:[%s22505_s1 + $0x884] ss:$8 sps:$4 sm:$0xff]   ;;  %516 = vst [vmem:[#allocation2 + $0x110] sm:$0xff] %v18025_v20  ;;  %v16715_v23 = vld [vmem:[%s22505_s1 + $0x880] ss:$8 sps:$4 sm:$0xff]   ;;  %518 = vst [vmem:[#allocation2 + $0x160] sm:$0xff] %v18032_v22  ;;  %v18167_v61 = vcombine.high %v18025_v20, %v22509_v2 }
  0x23   : > { %3942 = vmatpush1.bf16.msra.mxu0 %v16700_v8  ;;  %v16716_v24 = vld [vmem:[%s22505_s1 + $0x894] ss:$8 sps:$4 sm:$0xff]   ;;  %v18042_v25 = vld [vmem:[%s17994_s10 + $0x40] sm:$0xff]  ;;  %v16718_v26 = vld [vmem:[%s22505_s1 + $0x890] ss:$8 sps:$4 sm:$0xff]   ;;  %vm207_vm2 = vcmask 1044484   ;;  %v18195_v8 = vcombine.low %v18025_v20, %v22509_v2 }
  0x24   : > { %3943 = vmatprep.subr.bf16.mxu0 %v16701_v9  ;;  %520 = vst [vmem:[#allocation2 + $0x1b0] sm:$0xff] %v18042_v25  ;;  %v16719_v27 = vld [vmem:[%s22505_s1 + $0x8a4] ss:$8 sps:$4 sm:$0xff]   ;;  %v18052_v28 = vld [vmem:[%s17994_s10 + $0x50] sm:$0xff]  ;;  %v16721_v29 = vld [vmem:[%s22505_s1 + $0x8a0] ss:$8 sps:$4 sm:$0xff]  }
  0x25   : > { %522 = vst [vmem:[#allocation2 + $0x200] sm:$0xff] %v18052_v28  ;;  %v18059_v30 = vld [vmem:[%s17994_s10 + $0x60] sm:$0xff]  ;;  %v16722_v31 = vld [vmem:[%s22505_s1 + $0x8b4] ss:$8 sps:$4 sm:$0xff]   ;;  %v16724_v33 = vld [vmem:[%s22505_s1 + $0x8b0] ss:$8 sps:$4 sm:$0xff]  }
  0x26   : > { %524 = vst [vmem:[#allocation2 + $0x250] sm:$0xff] %v18059_v30  ;;  %v18066_v32 = vld [vmem:[%s17994_s10 + $0x70] sm:$0xff]  ;;  %v16725_v34 = vld [vmem:[%s22505_s1 + $0x8c4] ss:$8 sps:$4 sm:$0xff]   ;;  %v16727_v36 = vld [vmem:[%s22505_s1 + $0x8c0] ss:$8 sps:$4 sm:$0xff]  }
  0x27   : > { %3944 = vmatpush1.bf16.msra.mxu0 %v16703_v10  ;;  %526 = vst [vmem:[#allocation2 + $0x2a0] sm:$0xff] %v18066_v32  ;;  %v18076_v35 = vld [vmem:[%s17994_s10 + $0x8] sm:$0xff]  ;;  %v16728_v37 = vld [vmem:[%s22505_s1 + $0x8d4] ss:$8 sps:$4 sm:$0xff]   ;;  %v16730_v39 = vld [vmem:[%s22505_s1 + $0x8d0] ss:$8 sps:$4 sm:$0xff]  }
  0x28   : > { %3945 = vmatprep.subr.bf16.mxu0 %v16704_v11  ;;  %513 = vst [vmem:[#allocation2 + $0x78] sm:$0xff] %v18076_v35  ;;  %v18086_v38 = vld [vmem:[%s17994_s10 + $0x18] sm:$0xff]  ;;  %v18093_v40 = vld [vmem:[%s17994_s10 + $0x28] sm:$0xff]  ;;  %vm205_vm1 = vsmask.f32 256  ;;  %v22622_v57 = vmov 0  ;;  %v18201_v11 = vcombine.high %v18032_v22, %v22509_v2 }
  0x29   : > { %515 = vst [vmem:[#allocation2 + $0xc8] sm:$0xff] %v18086_v38  ;;  %v16731_v41 = vld [vmem:[%s22505_s1 + $0x8e4] ss:$8 sps:$4 sm:$0xff]   ;;  %517 = vst [vmem:[#allocation2 + $0x118] sm:$0xff] %v18093_v40  ;;  %v18100_v42 = vld [vmem:[%s17994_s10 + $0x38] sm:$0xff]  ;;  %vm233_vm10 = vcmask 1043459  }
  0x2a   : > { %v16733_v43 = vld [vmem:[%s22505_s1 + $0x8e0] ss:$8 sps:$4 sm:$0xff]   ;;  %519 = vst [vmem:[#allocation2 + $0x168] sm:$0xff] %v18100_v42  ;;  %v16734_v44 = vld [vmem:[%s22505_s1 + $0x8f4] ss:$8 sps:$4 sm:$0xff]   ;;  %vm18154_vm4 = vmand %vm204_vm0, %vm205_vm1  ;;  %vm236_vm12 = vcmask 1047559  }
  0x2b   : > { %3946 = vmatpush1.bf16.msra.mxu0 %v16706_v12  ;;  %v18110_v45 = vld [vmem:[%s17994_s10 + $0x48] sm:$0xff]  ;;  %v16736_v46 = vld [vmem:[%s22505_s1 + $0x8f0] ss:$8 sps:$4 sm:$0xff]   ;;  %v16742_v53 = vld [vmem:[%s22505_s1 + $0x914] ss:$8 sps:$4 sm:$0xff]   ;;  %v22623_v57 = vsel %vm18154_vm4, 4294967295, %v22622_v57 }
  0x2c   : > { %3947 = vmatprep.subr.bf16.mxu0 %v16707_v13  ;;  %521 = vst [vmem:[#allocation2 + $0x1b8] sm:$0xff] %v18110_v45  ;;  %v16739_v47 = vld [vmem:[%s22505_s1 + $0x904] ss:$8 sps:$4 sm:$0xff]   ;;  %v18120_v48 = vld [vmem:[%s17994_s10 + $0x58] sm:$0xff]  ;;  %v16737_v50 = vld [vmem:[%s22505_s1 + $0x900] ss:$8 sps:$4 sm:$0xff]  }
  0x2d   : > { %523 = vst [vmem:[#allocation2 + $0x208] sm:$0xff] %v18120_v48  ;;  %v18135_v52 = vld [vmem:[%s17994_s10 + $0x68] sm:$0xff]  ;;  %v18143_v54 = vld [vmem:[%s17994_s10 + $0x78] sm:$0xff]  ;;  %vm208_vm3 = vsmask.f32 4352  ;;  %22624 = vst [vmem:[#allocation9_spill] sm:$0xff] %v22623_v57 }
  0x2e   : > { %525 = vst [vmem:[#allocation2 + $0x258] sm:$0xff] %v18135_v52  ;;  %v16740_v55 = vld [vmem:[%s22505_s1 + $0x910] ss:$8 sps:$4 sm:$0xff]   ;;  %527 = vst [vmem:[#allocation2 + $0x2a8] sm:$0xff] %v18143_v54  ;;  %v16745_v56 = vld [vmem:[%s22505_s1 + $0x924] ss:$8 sps:$4 sm:$0xff]  }
  0x2f   : > { %3948 = vmatpush1.bf16.msra.mxu0 %v16709_v16  ;;  %v290_v58 = vld [vmem:[#allocation2 + $0x90] sm:$0x11]  ;;  %vm209_vm5 = vmand %vm207_vm2, %vm208_vm3  ;;  %v16743_v60 = vld [vmem:[%s22505_s1 + $0x920] ss:$8 sps:$4 sm:$0xff]   ;;  %vm1573_vm7 = vsmask.f32 3328 }
  0x30   : > { %3949 = vmatprep.subr.bf16.mxu0 %v16710_v17  ;;  %vm18171_vm6 = vmor %vm209_vm5, %vm18154_vm4  ;;  %v16748_v63 = vld [vmem:[%s22505_s1 + $0x934] ss:$8 sps:$4 sm:$0xff]   ;;  %v298_v1 = vld [vmem:[#allocation2 + $0xe0] sm:$0x11]  ;;  %vm1574_vm8 = vsmask.f32 7440 }
  0x31   : > { %v291_v0 = vsel %vm18171_vm6, 0, %v290_v58  ;;  %v16746_v3 = vld [vmem:[%s22505_s1 + $0x930] ss:$8 sps:$4 sm:$0xff]   ;;  %v299_v4 = vsel %vm18171_vm6, 0, %v298_v1  ;;  %v16751_v5 = vld [vmem:[%s22505_s1 + $0x944] ss:$8 sps:$4 sm:$0xff]   ;;  %v18299_v58 = vcombine.high %v18066_v32, %v22509_v2  ;;  %vm18508_vm9 = vmor %vm1573_vm7, %vm1574_vm8 }
  0x32   : > { %292 = vst [vmem:[#allocation2 + $0x90] sm:$0x11] %v291_v0  ;;  %300 = vst [vmem:[#allocation2 + $0xe0] sm:$0x11] %v299_v4  ;;  %v16749_v6 = vld [vmem:[%s22505_s1 + $0x940] ss:$8 sps:$4 sm:$0xff]   ;;  %v18319_v4 = vcombine.low %v18066_v32, %v22509_v2 }
  0x33   : > { %3950 = vmatpush1.bf16.msra.mxu0 %v16712_v19  ;;  %v306_v7 = vld [vmem:[#allocation2 + $0x130] sm:$0x11]  ;;  %v314_v10 = vld [vmem:[#allocation2 + $0x180] sm:$0x11]  ;;  %v18220_v19 = vcombine.low %v18032_v22, %v22509_v2  ;;  %22627 = vst [vmem:[#allocation10_spill] sm:$0xff] %v18299_v58  ;;  %s188_s12 = sand.u32 1, %s17848_s16  }
  0x34   : > { %3951 = vmatprep.subr.bf16.mxu0 %v16713_v21  ;;  %v307_v9 = vsel %vm18171_vm6, 0, %v306_v7  ;;  %v315_v12 = vsel %vm18171_vm6, 0, %v314_v10  ;;  %v16754_v13 = vld [vmem:[%s22505_s1 + $0x954] ss:$8 sps:$4 sm:$0xff]   ;;  %v16752_v17 = vld [vmem:[%s22505_s1 + $0x950] ss:$8 sps:$4 sm:$0xff]   ;;  %v18227_v21 = vcombine.high %v18042_v25, %v22509_v2 }
  0x35   : > { %308 = vst [vmem:[#allocation2 + $0x130] sm:$0x11] %v307_v9  ;;  %316 = vst [vmem:[#allocation2 + $0x180] sm:$0x11] %v315_v12  ;;  %v322_v14 = vld [vmem:[#allocation2 + $0x1d0] sm:$0x11] }
  0x36   : > { %v323_v16 = vsel %vm18171_vm6, 0, %v322_v14  ;;  %v16757_v18 = vld [vmem:[%s22505_s1 + $0x964] ss:$8 sps:$4 sm:$0xff]   ;;  %v16755_v20 = vld [vmem:[%s22505_s1 + $0x960] ss:$8 sps:$4 sm:$0xff]   ;;  %22628 = vst [vmem:[#allocation11_spill] sm:$0xff] %v18319_v4  ;;  %v18347_v14 = vcombine.high %v18086_v38, %v22509_v2 }
  0x37   : > { %3952 = vmatpush1.bf16.msra.mxu0 %v16715_v23  ;;  %324 = vst [vmem:[#allocation2 + $0x1d0] sm:$0x11] %v323_v16  ;;  %v16760_v23 = vld [vmem:[%s22505_s1 + $0x974] ss:$8 sps:$4 sm:$0xff]   ;;  %v16781_v1 = vld [vmem:[%s22505_s1 + $0x9e4] ss:$8 sps:$4 sm:$0xff]  }
  0x38   : > { %3953 = vmatprep.subr.bf16.mxu0 %v16716_v24  ;;  %v330_v24 = vld [vmem:[#allocation2 + $0x220] sm:$0x11]  ;;  %v301_v7 = vld [vmem:[#allocation2 + $0xe8] sm:$0x11]  ;;  %v16782_v32 = vld [vmem:[%s22505_s1 + $0x9f0] ss:$8 sps:$4 sm:$0xff]  }
  0x39   : > { %v331_v22 = vsel %vm18171_vm6, 0, %v330_v24  ;;  %v302_v9 = vsel %vm18171_vm6, 0, %v301_v7  ;;  %v16787_v10 = vld [vmem:[%s22505_s1 + $0xa04] ss:$8 sps:$4 sm:$0xff]   ;;  %v16785_v12 = vld [vmem:[%s22505_s1 + $0xa00] ss:$8 sps:$4 sm:$0xff]  }
  0x3a   : > { %332 = vst [vmem:[#allocation2 + $0x220] sm:$0x11] %v331_v22  ;;  %303 = vst [vmem:[#allocation2 + $0xe8] sm:$0x11] %v302_v9  ;;  %v16790_v16 = vld [vmem:[%s22505_s1 + $0xa14] ss:$8 sps:$4 sm:$0xff]  }
  0x3b   : > { %3954 = vmatpush1.bf16.msra.mxu0 %v16718_v26  ;;  %v16758_v26 = vld [vmem:[%s22505_s1 + $0x970] ss:$8 sps:$4 sm:$0xff]   ;;  %v18365_v24 = vld [vmem:[#allocation2 + $0x80] sm:$0xff]  ;;  %v16814_v7 = vld [vmem:[%s22505_s1 + $0xa94] ss:$8 sps:$4 sm:$0xff]   ;;  %s15095_s13 = sshll.u32 %s17908_s19, 4 }
  0x3c   : > { %3955 = vmatprep.subr.bf16.mxu0 %v16719_v27  ;;  %v16763_v27 = vld [vmem:[%s22505_s1 + $0x984] ss:$8 sps:$4 sm:$0xff]   ;;  %v18369_v22 = vcombine.low %v18086_v38, %v18365_v24  ;;  %v16794_v38 = vld [vmem:[%s22505_s1 + $0xa30] ss:$8 sps:$4 sm:$0xff]   ;;  %vm234_vm11 = vsmask.f32 7950  ;;  %s22462_s23 = scalar_lea.hbm %s22508_s4, %s15095_s13 }
  0x3d   : > { %v341_v9 = vld [vmem:[#allocation2 + $0x278] sm:$0x11]  ;;  %vm18537_vm13 = vmand %vm233_vm10, %vm234_vm11  ;;  %vm237_vm14 = vsmask.f32 7966  ;;  %vm591_vm2 = vsmask.f32 4368 }
  0x3e   : > { %vm238_vm15 = vmand %vm236_vm12, %vm237_vm14  ;;  %s189_s14 = scalar_lea.vmem [#allocation6], %s188_s12  ;;  %s13276_s27 = scalar_lea.sflag [#allocation7], %s188_s12 }
  0x3f   : > { %3956 = vmatpush1.bf16.msra.mxu0 %v16721_v29  ;;  %v16761_v29 = vld [vmem:[%s22505_s1 + $0x980] ss:$8 sps:$4 sm:$0xff]   ;;  %vm18546_vm0 = vmor %vm238_vm15, %vm18537_vm13  ;;  %s13288_s10 = sshll.u32 %s189_s14, 4  ;;  %s17861_s19 = smov [#allocation6]   ;;  %s22464_s10 = int_to_ptr.vmem [resolvable:$true] %s13288_s10 }
  0x40   : > { %3957 = vmatprep.subr.bf16.mxu0 %v16722_v31  ;;  %v18247_v31 = vcombine.low %v18042_v25, %v22509_v2  ;;  %v16764_v25 = vld [vmem:[%s22505_s1 + $0x990] ss:$8 sps:$4 sm:$0xff]   ;;  %vm18594_vm3 = vmor %vm205_vm1, %vm591_vm2  ;;  %s17794_s28 = scalar_lea.vmem %s22464_s10, 16  ;;  %s17798_s29 = sshll.u32 %s17861_s19, 4  ;;  %s17799_s29 = int_to_ptr.vmem [resolvable:$false] %s17798_s29 }
  0x41   : > { %p17795_p11 = scmp.ne.s32.totalorder %s22464_s10, %s17794_s28  ;;  %s17800_s30 = scalar_lea.vmem %s17799_s29, 32 }
  0x42   : > { %p17801_p0 = scmp.lt.s32.totalorder %s22464_s10, %s17799_s29  ;;  %p17802_p1 = scmp.lt.s32.totalorder %s17800_s30, %s17794_s28 }
  0x43   : > { %3958 = vmatpush1.bf16.msra.mxu0 %v16724_v33  ;;  %v18251_v33 = vcombine.high %v18052_v28, %v22509_v2  ;;  %p17796_p12 = pnand %p17795_p11, %p17925_p5 }
  0x44   : > { %3959 = vmatprep.subr.bf16.mxu0 %v16725_v34  ;;  %v16766_v34 = vld [vmem:[%s22505_s1 + $0x994] ss:$8 sps:$4 sm:$0xff]   ;;  %p17803_p2 = por %p17802_p1, %p17801_p0 }
  0x45   : > { %p17797_p13 = pneg %p17796_p12 }
  0x47   : > { %3960 = vmatpush1.bf16.msra.mxu0 %v16727_v36  ;;  %v338_v36 = vld [vmem:[#allocation2 + $0x270] sm:$0x11]  ;;  %p17804_p3 = pnand %p17803_p2, %p17797_p13 }
  0x48   : > { %3961 = vmatprep.subr.bf16.mxu0 %v16728_v37  ;;  %v339_v37 = vsel %vm18171_vm6, 0, %v338_v36  ;;  %v16799_v36 = vld [vmem:[%s22505_s1 + $0xa44] ss:$8 sps:$4 sm:$0xff]  }
  0x49   : > { %340 = vst [vmem:[#allocation2 + $0x270] sm:$0x11] %v339_v37  ;;  %v16797_v37 = vld [vmem:[%s22505_s1 + $0xa40] ss:$8 sps:$4 sm:$0xff]  }
  0x4b   : > { %3962 = vmatpush1.bf16.msra.mxu0 %v16730_v39  ;;  %v16769_v39 = vld [vmem:[%s22505_s1 + $0x9a4] ss:$8 sps:$4 sm:$0xff]  }
  0x4c   : > { %3963 = vmatprep.subr.bf16.mxu0 %v16731_v41  ;;  %v16767_v41 = vld [vmem:[%s22505_s1 + $0x9a0] ss:$8 sps:$4 sm:$0xff]  }
  0x4f   : > { %3964 = vmatpush1.bf16.msra.mxu0 %v16733_v43  ;;  %v18271_v43 = vcombine.low %v18052_v28, %v22509_v2  ;;  %v16770_v28 = vld [vmem:[%s22505_s1 + $0x9b0] ss:$8 sps:$4 sm:$0xff]  }
  0x50   : > { %3965 = vmatprep.subr.bf16.mxu0 %v16734_v44  ;;  %v18275_v44 = vcombine.high %v18059_v30, %v22509_v2 }
  0x53   : > { %3966 = vmatpush1.bf16.msra.mxu0 %v16736_v46  ;;  %v16772_v46 = vld [vmem:[%s22505_s1 + $0x9b4] ss:$8 sps:$4 sm:$0xff]  }
  0x54   : > { %4048 = vmatprep.subr.bf16.mxu0 %v16739_v47  ;;  %v346_v47 = vld [vmem:[#allocation2 + $0x2c0] sm:$0x11] }
  0x56   : > { %3968 = vmatmul.mubr.bf16.vlgmr.msra.gmra.mrb[0].mxu0 %v18125_v49 }
  0x57   : > { %4049 = vmatpush1.bf16.msra.mxu0 %v16737_v50  ;;  %3977 = vmatprep.mubr.bf16.mxu0 %v18132_v51  ;;  %v347_v50 = vsel %vm18171_vm6, 0, %v346_v47 }
  0x58   : > { %4050 = vmatprep.subr.bf16.mxu0 %v16742_v53  ;;  %348 = vst [vmem:[#allocation2 + $0x2c0] sm:$0x11] %v347_v50  ;;  %v16775_v53 = vld [vmem:[%s22505_s1 + $0x9c4] ss:$8 sps:$4 sm:$0xff]  }
  0x59   : > { %v16805_v50 = vld [vmem:[%s22505_s1 + $0xa64] ss:$8 sps:$4 sm:$0xff]  }
  0x5b   : > { %4051 = vmatpush1.bf16.msra.mxu0 %v16740_v55  ;;  %v16773_v55 = vld [vmem:[%s22505_s1 + $0x9c0] ss:$8 sps:$4 sm:$0xff]  }
  0x5c   : > { %4052 = vmatprep.subr.bf16.mxu0 %v16745_v56  ;;  %v18295_v56 = vcombine.low %v18059_v30, %v22509_v2  ;;  %v16776_v30 = vld [vmem:[%s22505_s1 + $0x9d0] ss:$8 sps:$4 sm:$0xff]  }
  0x5e   : > { %3978 = vmatmul.mubr.bf16.gmra.mrb[4].mxu0 %v18160_v59 }
  0x5f   : > { %4053 = vmatpush1.bf16.msra.mxu0 %v16743_v60  ;;  %3987 = vmatprep.mubr.bf16.mxu0 %v18167_v61  ;;  %v16778_v60 = vld [vmem:[%s22505_s1 + $0x9d4] ss:$8 sps:$4 sm:$0xff]  }
  0x60   : > { %4054 = vmatprep.subr.bf16.mxu0 %v16748_v63  ;;  %v293_v63 = vld [vmem:[#allocation2 + $0x98] sm:$0x11] }
  0x61   : > { %v294_v0 = vsel %vm18171_vm6, 0, %v293_v63  ;;  %v333_v63 = vld [vmem:[#allocation2 + $0x228] sm:$0x11] }
  0x62   : > { %295 = vst [vmem:[#allocation2 + $0x98] sm:$0x11] %v294_v0  ;;  %v334_v0 = vsel %vm18171_vm6, 0, %v333_v63  ;;  %v17781_v63 = vld [vmem:[#allocation2 + $0xc0] sm:$0xff] }
  0x63   : > { %4055 = vmatpush1.bf16.msra.mxu0 %v16746_v3  ;;  %v16779_v3 = vld [vmem:[%s22505_s1 + $0x9e0] ss:$8 sps:$4 sm:$0xff]   ;;  %335 = vst [vmem:[#allocation2 + $0x228] sm:$0x11] %v334_v0  ;;  %v1673_v0 = vshrl.u32 %v17781_v63, 16 }
  0x64   : > { %4056 = vmatprep.subr.bf16.mxu0 %v16751_v5  ;;  %v18323_v5 = vcombine.high %v18076_v35, %v22509_v2 }
  0x66   : > { %3988 = vmatmul.mubr.bf16.gmra.mrb[8].mxu0 %v18195_v8 }
  0x67   : > { %4057 = vmatpush1.bf16.msra.mxu0 %v16749_v6  ;;  %3997 = vmatprep.mubr.bf16.mxu0 %v18201_v11  ;;  %v16784_v6 = vld [vmem:[%s22505_s1 + $0x9f4] ss:$8 sps:$4 sm:$0xff]  }
  0x68   : > { %4058 = vmatprep.subr.bf16.mxu0 %v16754_v13  ;;  %v18343_v13 = vcombine.low %v18076_v35, %v22509_v2  ;;  %v16788_v35 = vld [vmem:[%s22505_s1 + $0xa10] ss:$8 sps:$4 sm:$0xff]  }
  0x6b   : > { %4059 = vmatpush1.bf16.msra.mxu0 %v16752_v17  ;;  %v309_v17 = vld [vmem:[#allocation2 + $0x138] sm:$0x11] }
  0x6c   : > { %4060 = vmatprep.subr.bf16.mxu0 %v16757_v18  ;;  %v310_v18 = vsel %vm18171_vm6, 0, %v309_v17 }
  0x6d   : > { %311 = vst [vmem:[#allocation2 + $0x138] sm:$0x11] %v310_v18  ;;  %v22511_v18 = vshll.u32 %v18365_v24, 16 }
  0x6e   : > { %3998 = vmatmul.mubr.bf16.gmra.mrb[12].mxu0 %v18220_v19 }
  0x6f   : > { %4061 = vmatpush1.bf16.msra.mxu0 %v16755_v20  ;;  %4007 = vmatprep.mubr.bf16.mxu0 %v18227_v21  ;;  %v16793_v20 = vld [vmem:[%s22505_s1 + $0xa24] ss:$8 sps:$4 sm:$0xff]  }
  0x70   : > { %4062 = vmatprep.subr.bf16.mxu0 %v16760_v23  ;;  %v16791_v23 = vld [vmem:[%s22505_s1 + $0xa20] ss:$8 sps:$4 sm:$0xff]  }
  0x73   : > { %4063 = vmatpush1.bf16.msra.mxu0 %v16758_v26  ;;  %v18373_v26 = vcombine.high %v18093_v40, %v18365_v24 }
  0x74   : > { %4064 = vmatprep.subr.bf16.mxu0 %v16763_v27  ;;  %v16796_v27 = vld [vmem:[%s22505_s1 + $0xa34] ss:$8 sps:$4 sm:$0xff]  }
  0x76   : > { %4008 = vmatmul.mubr.bf16.gmra.mrb[16].mxu0 %v18247_v31 }
  0x77   : > { %4065 = vmatpush1.bf16.msra.mxu0 %v16761_v29  ;;  %4017 = vmatprep.mubr.bf16.mxu0 %v18251_v33  ;;  %v317_v29 = vld [vmem:[#allocation2 + $0x188] sm:$0x11] }
  0x78   : > { %4066 = vmatprep.subr.bf16.mxu0 %v16766_v34  ;;  %v318_v34 = vsel %vm18171_vm6, 0, %v317_v29 }
  0x79   : > { %319 = vst [vmem:[#allocation2 + $0x188] sm:$0x11] %v318_v34 }
  0x7b   : > { %4067 = vmatpush1.bf16.msra.mxu0 %v16764_v25  ;;  %v18393_v25 = vcombine.low %v18093_v40, %v18365_v24  ;;  %v16800_v40 = vld [vmem:[%s22505_s1 + $0xa50] ss:$8 sps:$4 sm:$0xff]  }
  0x7c   : > { %4068 = vmatprep.subr.bf16.mxu0 %v16769_v39  ;;  %v18397_v39 = vcombine.high %v18100_v42, %v18365_v24 }
  0x7e   : > { %4018 = vmatmul.mubr.bf16.gmra.mrb[20].mxu0 %v18271_v43 }
  0x7f   : > { %4069 = vmatpush1.bf16.msra.mxu0 %v16767_v41  ;;  %4027 = vmatprep.mubr.bf16.mxu0 %v18275_v44  ;;  %v16802_v41 = vld [vmem:[%s22505_s1 + $0xa54] ss:$8 sps:$4 sm:$0xff]  }
  0x80   : > { %4070 = vmatprep.subr.bf16.mxu0 %v16772_v46  ;;  %v325_v46 = vld [vmem:[#allocation2 + $0x1d8] sm:$0x11] }
  0x81   : > { %v326_v47 = vsel %vm18171_vm6, 0, %v325_v46 }
  0x82   : > { %327 = vst [vmem:[#allocation2 + $0x1d8] sm:$0x11] %v326_v47  ;;  %v16818_v47 = vld [vmem:[%s22505_s1 + $0xab0] ss:$8 sps:$4 sm:$0xff]  }
  0x83   : > { %4071 = vmatpush1.bf16.msra.mxu0 %v16770_v28  ;;  %v16803_v28 = vld [vmem:[%s22505_s1 + $0xa60] ss:$8 sps:$4 sm:$0xff]  }
  0x84   : > { %4072 = vmatprep.subr.bf16.mxu0 %v16775_v53  ;;  %v18417_v53 = vcombine.low %v18100_v42, %v18365_v24  ;;  %v16806_v42 = vld [vmem:[%s22505_s1 + $0xa70] ss:$8 sps:$4 sm:$0xff]  }
  0x86   : > { %4028 = vmatmul.mubr.bf16.gmra.mrb[24].mxu0 %v18295_v56 }
  0x87   : > { %4073 = vmatpush1.bf16.msra.mxu0 %v16773_v55  ;;  %4037 = vmatprep.mubr.bf16.mxu0 %v18299_v58  ;;  %v18421_v55 = vcombine.high %v18110_v45, %v18365_v24 }
  0x88   : > { %4074 = vmatprep.subr.bf16.mxu0 %v16778_v60  ;;  %v16808_v60 = vld [vmem:[%s22505_s1 + $0xa74] ss:$8 sps:$4 sm:$0xff]  }
  0x8b   : > { %4075 = vmatpush1.bf16.msra.mxu0 %v16776_v30  ;;  %v16811_v30 = vld [vmem:[%s22505_s1 + $0xa84] ss:$8 sps:$4 sm:$0xff]  }
  0x8c   : > { %4076 = vmatprep.subr.bf16.mxu0 %v16781_v1  ;;  %v16809_v1 = vld [vmem:[%s22505_s1 + $0xa80] ss:$8 sps:$4 sm:$0xff]  }
  0x8e   : > { %4038 = vmatmul.mubr.bf16.gmra.mrb[28].mxu0 %v18319_v4 }
  0x8f   : > { %4077 = vmatpush1.bf16.msra.mxu0 %v16779_v3  ;;  %4080 = vmatprep.mubr.bf16.mxu0 %v18323_v5  ;;  %v18441_v3 = vcombine.low %v18110_v45, %v18365_v24  ;;  %v16812_v45 = vld [vmem:[%s22505_s1 + $0xa90] ss:$8 sps:$4 sm:$0xff]  }
  0x90   : > { %4078 = vmatprep.subr.bf16.mxu0 %v16784_v6  ;;  %v18445_v6 = vcombine.high %v18120_v48, %v18365_v24 }
  0x93   : > { %4079 = vmatpush1.bf16.msra.mxu0 %v16782_v32  ;;  %v342_v32 = vsel %vm18171_vm6, 0, %v341_v9  ;;  %v18505_v9 = vcombine.high %v18143_v54, %v18365_v24 }
  0x94   : > { %4161 = vmatprep.subr.bf16.mxu0 %v16787_v10  ;;  %v17780_v10 = vld [vmem:[#allocation2 + $0x70] sm:$0xff]  ;;  %343 = vst [vmem:[#allocation2 + $0x278] sm:$0x11] %v342_v32 }
  0x95   : > { %v1628_v17 = vshll.u32 %v17780_v10, 16  ;;  %22629 = vst [vmem:[#allocation12_spill] sm:$0xff] %v18505_v9 }
  0x96   : > { %4081 = vmatmul.mubr.bf16.vlgmr.msra.gmra.mrb[0].mxu0 %v18343_v13 }
  0x97   : > { %4162 = vmatpush1.bf16.msra.mxu0 %v16785_v12  ;;  %4090 = vmatprep.mubr.bf16.mxu0 %v18347_v14  ;;  %v1625_v12 = vshrl.u32 %v17780_v10, 16  ;;  %v1630_v34 = vrot.slane %v1628_v17, 5  ;;  %v22630_v10 = vmov 0  ;;  %v1529_v17 = vld [vmem:[#allocation2 + $0xe0] sm:$0x11] }
  0x98   : > { %4163 = vmatprep.subr.bf16.mxu0 %v16790_v16  ;;  %v16817_v16 = vld [vmem:[%s22505_s1 + $0xaa4] ss:$8 sps:$4 sm:$0xff]   ;;  %v22631_v10 = vsel %vm18508_vm9, 4294967295, %v22630_v10 }
  0x99   : > { %v1627_v29 = vrot.slane %v1625_v12, 4  ;;  %22632 = vst [vmem:[#allocation13_spill] sm:$0xff] %v22631_v10  ;;  %v17381_v10 = vld [vmem:[%s22505_s1 + $0x6b0] ss:$8 sps:$4 sm:$0xff]  }
  0x9b   : > { %4164 = vmatpush1.bf16.msra.mxu0 %v16788_v35  ;;  %v1652_v35 = vshrl.u32 %v18365_v24, 16 }
  0x9c   : > { %4165 = vmatprep.subr.bf16.mxu0 %v16793_v20  ;;  %v16815_v20 = vld [vmem:[%s22505_s1 + $0xaa0] ss:$8 sps:$4 sm:$0xff]  }
  0x9d   : > { %v18590_v57 = vrot.slane %v1652_v35, 7 }
  0x9e   : > { %4091 = vmatmul.mubr.bf16.gmra.mrb[4].mxu0 %v18369_v22 }
  0x9f   : > { %4166 = vmatpush1.bf16.msra.mxu0 %v16791_v23  ;;  %4100 = vmatprep.mubr.bf16.mxu0 %v18373_v26  ;;  %v18467_v23 = vcombine.low %v18120_v48, %v18365_v24  ;;  %v1654_v48 = vrot.slane %v1652_v35, 4 }
  0xa0   : > { %4167 = vmatprep.subr.bf16.mxu0 %v16796_v27  ;;  %v18471_v27 = vcombine.high %v18135_v52, %v18365_v24 }
  0xa3   : > { %4168 = vmatpush1.bf16.msra.mxu0 %v16794_v38  ;;  %v16820_v38 = vld [vmem:[%s22505_s1 + $0xab4] ss:$8 sps:$4 sm:$0xff]  }
  0xa4   : > { %4169 = vmatprep.subr.bf16.mxu0 %v16799_v36  ;;  %v18478_v36 = vrot.slane %v22511_v18, 5  ;;  %v246_v18 = vld [vmem:[#allocation2 + $0xb0] sm:$0x88] }
  0xa6   : > { %4101 = vmatmul.mubr.bf16.gmra.mrb[8].mxu0 %v18393_v25 }
  0xa7   : > { %4170 = vmatpush1.bf16.msra.mxu0 %v16797_v37  ;;  %4110 = vmatprep.mubr.bf16.mxu0 %v18397_v39  ;;  %v349_v37 = vld [vmem:[#allocation2 + $0x2c8] sm:$0x11] }
  0xa8   : > { %4171 = vmatprep.subr.bf16.mxu0 %v16802_v41  ;;  %v1523_v41 = vld [vmem:[#allocation2 + $0x90] sm:$0x11]  ;;  %v350_v46 = vsel %vm18171_vm6, 0, %v349_v37 }
  0xa9   : > { %351 = vst [vmem:[#allocation2 + $0x2c8] sm:$0x11] %v350_v46 }
  0xab   : > { %4172 = vmatpush1.bf16.msra.mxu0 %v16800_v40  ;;  %v16823_v40 = vld [vmem:[%s22505_s1 + $0xac4] ss:$8 sps:$4 sm:$0xff]  }
  0xac   : > { %4173 = vmatprep.subr.bf16.mxu0 %v16805_v50  ;;  %v1631_v50 = vor.u32 %v1630_v34, %v1627_v29 }
  0xae   : > { %4111 = vmatmul.mubr.bf16.gmra.mrb[12].mxu0 %v18417_v53  ;;  %v1632_v32 = vrot.slane %v1631_v50, 4 }
  0xaf   : > { %4174 = vmatpush1.bf16.msra.mxu0 %v16803_v28  ;;  %4120 = vmatprep.mubr.bf16.mxu0 %v18421_v55  ;;  %v1655_v28 = vor.u32 %v1654_v48, %v18478_v36  ;;  %v16829_v48 = vld [vmem:[%s22505_s1 + $0xae4] ss:$8 sps:$4 sm:$0xff]  }
  0xb0   : > { %4175 = vmatprep.subr.bf16.mxu0 %v16808_v60  ;;  %v1658_v60 = vshll.u32 %v1523_v41, 16  ;;  %v1637_v37 = vsel %vm18508_vm9, %v1632_v32, %v18478_v36  ;;  %v1535_v32 = vld [vmem:[#allocation2 + $0x130] sm:$0x11] }
  0xb1   : > { %v18512_v12 = vrot.slane %v1655_v28, 4 }
  0xb3   : > { %4176 = vmatpush1.bf16.msra.mxu0 %v16806_v42  ;;  %v1676_v42 = vshll.u32 %v17781_v63, 16 }
  0xb4   : > { %4177 = vmatprep.subr.bf16.mxu0 %v16811_v30  ;;  %v16821_v30 = vld [vmem:[%s22505_s1 + $0xac0] ss:$8 sps:$4 sm:$0xff]  }
  0xb6   : > { %4121 = vmatmul.mubr.bf16.gmra.mrb[16].mxu0 %v18441_v3 }
  0xb7   : > { %4178 = vmatpush1.bf16.msra.mxu0 %v16809_v1  ;;  %4130 = vmatprep.mubr.bf16.mxu0 %v18445_v6  ;;  %v18498_v1 = vcombine.low %v18135_v52, %v18365_v24  ;;  %v1660_v52 = vrot.slane %v1658_v60, 5  ;;  %v18533_v60 = vcombine.low %v18143_v54, %v18365_v24  ;;  %v240_v54 = vld [vmem:[#allocation2 + $0x60] sm:$0x88] }
  0xb8   : > { %4179 = vmatprep.subr.bf16.mxu0 %v16814_v7  ;;  %v16826_v7 = vld [vmem:[%s22505_s1 + $0xad4] ss:$8 sps:$4 sm:$0xff]  }
  0xb9   : > { %v1661_v41 = vsel %vm18508_vm9, %v18512_v12, %v1660_v52  ;;  %22633 = vst [vmem:[#allocation14_spill] sm:$0xff] %v18533_v60 }
  0xba   : > { %v18535_v63 = vcombine.high %v1637_v37, %v1661_v41 }
  0xbb   : > { %4180 = vmatpush1.bf16.msra.mxu0 %v16812_v45  ;;  %v1675_v45 = vrot.slane %v1673_v0, 4  ;;  %v22634_v0 = vmov 0 }
  0xbc   : > { %4181 = vmatprep.subr.bf16.mxu0 %v16817_v16  ;;  %v1678_v16 = vrot.slane %v1676_v42, 5  ;;  %v22635_v0 = vsel %vm18537_vm13, 4294967295, %v22634_v0  ;;  %v16832_v42 = vld [vmem:[%s22505_s1 + $0xaf4] ss:$8 sps:$4 sm:$0xff]  }
  0xbd   : > { %22636 = vst [vmem:[#allocation15_spill] sm:$0xff] %v22635_v0  ;;  %v17784_v0 = vld [vmem:[#allocation2 + $0x1b0] sm:$0xff] }
  0xbe   : > { %4131 = vmatmul.mubr.bf16.gmra.mrb[20].mxu0 %v18467_v23  ;;  %v1679_v46 = vor.u32 %v1678_v16, %v1675_v45  ;;  %v22637_v45 = vmov 0  ;;  %v17783_v16 = vld [vmem:[#allocation2 + $0x160] sm:$0xff] }
  0xbf   : > { %4182 = vmatpush1.bf16.msra.mxu0 %v16815_v20  ;;  %4140 = vmatprep.mubr.bf16.mxu0 %v18471_v27  ;;  %v17782_v20 = vld [vmem:[#allocation2 + $0x110] sm:$0xff]  ;;  %v22638_v45 = vsel %vm18546_vm0, 4294967295, %v22637_v45 }
  0xc0   : > { %4183 = vmatprep.subr.bf16.mxu0 %v16820_v38  ;;  %v1721_v29 = vshrl.u32 %v17782_v20, 16  ;;  %v1724_v34 = vshll.u32 %v17782_v20, 16  ;;  %v16824_v38 = vld [vmem:[%s22505_s1 + $0xad0] ss:$8 sps:$4 sm:$0xff]   ;;  %22639 = vst [vmem:[#allocation16_spill] sm:$0xff] %v22638_v45  ;;  %v1772_v20 = vshll.u32 %v17783_v16, 16 }
  0xc2   : > { %v1723_v50 = vrot.slane %v1721_v29, 4  ;;  %v1726_v28 = vrot.slane %v1724_v34, 5  ;;  %v241_v29 = vsel %vm18546_vm0, 0, %v240_v54  ;;  %v16830_v34 = vld [vmem:[%s22505_s1 + $0xaf0] ss:$8 sps:$4 sm:$0xff]  }
  0xc3   : > { %4184 = vmatpush1.bf16.msra.mxu0 %v16818_v47  ;;  %v1706_v47 = vshll.u32 %v1529_v17, 16  ;;  %v1769_v17 = vshrl.u32 %v17783_v16, 16  ;;  %242 = vst [vmem:[#allocation2 + $0x60] sm:$0x88] %v241_v29  ;;  %v1541_v54 = vld [vmem:[#allocation2 + $0x180] sm:$0x11] }
  0xc4   : > { %4185 = vmatprep.subr.bf16.mxu0 %v16823_v40  ;;  %v16827_v40 = vld [vmem:[%s22505_s1 + $0xae0] ss:$8 sps:$4 sm:$0xff]   ;;  %v1727_v52 = vor.u32 %v1726_v28, %v1723_v50  ;;  %v18569_v28 = vcombine.low %v1637_v37, %v1661_v41  ;;  %v1774_v29 = vrot.slane %v1772_v20, 5  ;;  %v16836_v37 = vld [vmem:[%s22505_s1 + $0xb10] ss:$8 sps:$4 sm:$0xff]  }
  0xc5   : > { %v1771_v16 = vrot.slane %v1769_v17, 4  ;;  %v16841_v17 = vld [vmem:[%s22505_s1 + $0xb24] ss:$8 sps:$4 sm:$0xff]  }
  0xc6   : > { %4141 = vmatmul.mubr.bf16.gmra.mrb[24].mxu0 %v18498_v1  ;;  %v1728_v50 = vrot.slane %v1727_v52, 4  ;;  %v247_v52 = vsel %vm18546_vm0, 0, %v246_v18  ;;  %v1802_v18 = vshll.u32 %v1541_v54, 16 }
  0xc7   : > { %4186 = vmatpush1.bf16.msra.mxu0 %v16821_v30  ;;  %4150 = vmatprep.mubr.bf16.mxu0 %v18505_v9  ;;  %v1680_v30 = vrot.slane %v1679_v46, 4  ;;  %v1775_v20 = vor.u32 %v1774_v29, %v1771_v16  ;;  %248 = vst [vmem:[#allocation2 + $0xb0] sm:$0x88] %v247_v52  ;;  %v1817_v16 = vshrl.u32 %v17784_v0, 16  ;;  %v1820_v29 = vshll.u32 %v17784_v0, 16 }
  0xc8   : > { %4187 = vmatprep.subr.bf16.mxu0 %v16826_v7  ;;  %v1708_v7 = vrot.slane %v1706_v47, 5  ;;  %v1754_v47 = vshll.u32 %v1535_v32, 16  ;;  %v1733_v41 = vsel %vm18508_vm9, %v1728_v50, %v18478_v36 }
  0xc9   : > { %v1776_v54 = vrot.slane %v1775_v20, 4  ;;  %v252_v20 = vld [vmem:[#allocation2 + $0x100] sm:$0x88] }
  0xca   : > { %v1709_v46 = vsel %vm18508_vm9, %v18512_v12, %v1708_v7  ;;  %v539_v7 = vld [vmem:[#allocation2 + $0x70] sm:$0xff]  ;;  %v1756_v32 = vrot.slane %v1754_v47, 5 }
  0xcb   : > { %4188 = vmatpush1.bf16.msra.mxu0 %v16824_v38  ;;  %v16835_v38 = vld [vmem:[%s22505_s1 + $0xb04] ss:$8 sps:$4 sm:$0xff]   ;;  %v643_v2 = vshrl.u32 %v539_v7, 16  ;;  %v646_v47 = vshll.u32 %v539_v7, 16 }
  0xcc   : > { %4189 = vmatprep.subr.bf16.mxu0 %v16829_v48  ;;  %v1685_v48 = vsel %vm18508_vm9, %v1680_v30, %v18478_v36  ;;  %v1757_v35 = vsel %vm18508_vm9, %v18512_v12, %v1756_v32 }
  0xcd   : > { %v18574_v30 = vcombine.high %v1685_v48, %v1709_v46  ;;  %v18607_v4 = vcombine.low %v1685_v48, %v1709_v46  ;;  %v18615_v32 = vcombine.high %v1733_v41, %v1757_v35  ;;  %v1804_v48 = vrot.slane %v1802_v18, 5  ;;  %v16847_v18 = vld [vmem:[%s22505_s1 + $0xb44] ss:$8 sps:$4 sm:$0xff]  }
  0xce   : > { %4151 = vmatmul.mubr.bf16.gmra.mrb[28].mxu0 %v18533_v60  ;;  %v22643_v60 = vshll.u32 %v18365_v24, 16 }
  0xcf   : > { %4190 = vmatpush1.bf16.msra.mxu0 %v16827_v40  ;;  %4193 = vmatprep.mubr.bf16.mxu0 %v18535_v63  ;;  %v16833_v40 = vld [vmem:[%s22505_s1 + $0xb00] ss:$8 sps:$4 sm:$0xff]   ;;  %22640 = vst [vmem:[#allocation17_spill] sm:$0xff] %v18574_v30  ;;  %22644 = vst [vmem:[#allocation18_spill] sm:$0xff] %v18607_v4 }
  0xd0   : > { %4191 = vmatprep.subr.bf16.mxu0 %v16832_v42  ;;  %v16838_v42 = vld [vmem:[%s22505_s1 + $0xb14] ss:$8 sps:$4 sm:$0xff]   ;;  %v18605_v9 = vor.u32 %v22643_v60, %v18590_v57  ;;  %22645 = vst [vmem:[#allocation19_spill] sm:$0xff] %v18615_v32 }
  0xd1   : > { %v16844_v60 = vld [vmem:[%s22505_s1 + $0xb34] ss:$8 sps:$4 sm:$0xff]  }
  0xd3   : > { %4192 = vmatpush1.bf16.msra.mxu0 %v16830_v34  ;;  %v537_v34 = vld [vmem:[#allocation2 + $0x60] sm:$0x88] }
  0xd4   : > { %4274 = vmatprep.subr.bf16.mxu0 %v16835_v38  ;;  %v645_v38 = vrot.slane %v643_v2, 7  ;;  %v638_v2 = vshrl.u32 %v537_v34, 16  ;;  %v1819_v34 = vrot.slane %v1817_v16, 4  ;;  %v1781_v16 = vsel %vm18508_vm9, %v1776_v54, %v18478_v36  ;;  %v16850_v54 = vld [vmem:[%s22505_s1 + $0xb54] ss:$8 sps:$4 sm:$0xff]  }
  0xd6   : > { %4194 = vmatmul.mubr.bf16.vlgmr.msra.gmra.mrb[0].mxu0 %v18569_v28  ;;  %v648_v7 = vor.u32 %v646_v47, %v645_v38  ;;  %v663_v52 = vrot.slane %v645_v38, 4  ;;  %v1822_v38 = vrot.slane %v1820_v29, 5  ;;  %v1547_v47 = vld [vmem:[#allocation2 + $0x1d0] sm:$0x11] }
  0xd7   : > { %4275 = vmatpush1.bf16.msra.mxu0 %v16833_v40  ;;  %4203 = vmatprep.mubr.bf16.mxu0 %v18574_v30  ;;  %v13351_v40 = vrot.slane %v638_v2, 11  ;;  %v253_v2 = vsel %vm18546_vm0, 0, %v252_v20  ;;  %v18646_v20 = vcombine.low %v1733_v41, %v1757_v35  ;;  %v16848_v41 = vld [vmem:[%s22505_s1 + $0xb50] ss:$8 sps:$4 sm:$0xff]   ;;  %v16853_v35 = vld [vmem:[%s22505_s1 + $0xb64] ss:$8 sps:$4 sm:$0xff]  }
  0xd8   : > { %4276 = vmatprep.subr.bf16.mxu0 %v16838_v42  ;;  %v671_v0 = vsel %vm18594_vm3, %v663_v52, %v18605_v9  ;;  %v16839_v42 = vld [vmem:[%s22505_s1 + $0xb20] ss:$8 sps:$4 sm:$0xff]   ;;  %254 = vst [vmem:[#allocation2 + $0x100] sm:$0x88] %v253_v2  ;;  %v1823_v29 = vor.u32 %v1822_v38, %v1819_v34  ;;  %v1850_v52 = vshll.u32 %v1547_v47, 16 }
  0xd9   : > { %v649_v24 = vsel %vm18594_vm3, %v13351_v40, %v648_v7  ;;  %v1805_v7 = vsel %vm18508_vm9, %v18512_v12, %v1804_v48  ;;  %v17785_v40 = vld [vmem:[#allocation2 + $0x200] sm:$0xff]  ;;  %22647 = vst [vmem:[#allocation21_spill] sm:$0xff] %v18646_v20  ;;  %v258_v2 = vld [vmem:[#allocation2 + $0x150] sm:$0x88] }
  0xda   : > { %v18622_v46 = vcombine.high %v649_v24, %v671_v0  ;;  %v18651_v34 = vcombine.high %v1781_v16, %v1805_v7  ;;  %v1824_v38 = vrot.slane %v1823_v29, 4  ;;  %v259_v58 = vsel %vm18546_vm0, 0, %v258_v2 }
  0xdb   : > { %4277 = vmatpush1.bf16.msra.mxu0 %v16836_v37  ;;  %v18624_v37 = vcombine.low %v649_v24, %v671_v0  ;;  %v1865_v0 = vshrl.u32 %v17785_v40, 16  ;;  %v16845_v24 = vld [vmem:[%s22505_s1 + $0xb40] ss:$8 sps:$4 sm:$0xff]   ;;  %260 = vst [vmem:[#allocation2 + $0x150] sm:$0x88] %v259_v58  ;;  %v18672_v2 = vcombine.low %v1781_v16, %v1805_v7 }
  0xdc   : > { %4278 = vmatprep.subr.bf16.mxu0 %v16841_v17  ;;  %3741 = vmatprep.mubr.bf16.mxu1 %v18622_v46  ;;  %v16842_v17 = vld [vmem:[%s22505_s1 + $0xb30] ss:$8 sps:$4 sm:$0xff]   ;;  %22648 = vst [vmem:[#allocation22_spill] sm:$0xff] %v18651_v34  ;;  %v16859_v7 = vld [vmem:[%s22505_s1 + $0xb84] ss:$8 sps:$4 sm:$0xff]  }
  0xdd   : > { %22646 = vst [vmem:[#allocation20_spill] sm:$0xff] %v18624_v37  ;;  %v1867_v48 = vrot.slane %v1865_v0, 4  ;;  %22649 = vst [vmem:[#allocation23_spill] sm:$0xff] %v18672_v2  ;;  %v16854_v16 = vld [vmem:[%s22505_s1 + $0xb70] ss:$8 sps:$4 sm:$0xff]  }
  0xde   : > { %4204 = vmatmul.mubr.bf16.gmra.mrb[4].mxu0 %v18607_v4 }
  0xdf   : > { %4279 = vmatpush1.bf16.msra.mxu0 %v16839_v42  ;;  %4213 = vmatprep.mubr.bf16.mxu0 %v18615_v32  ;;  %v1868_v42 = vshll.u32 %v17785_v40, 16  ;;  %v1553_v40 = vld [vmem:[#allocation2 + $0x220] sm:$0x11] }
  0xe0   : > { %4280 = vmatprep.subr.bf16.mxu0 %v16844_v60  ;;  %v1852_v60 = vrot.slane %v1850_v52, 5  ;;  %v1829_v52 = vsel %vm18508_vm9, %v1824_v38, %v18478_v36 }
  0xe1   : > { %v1870_v47 = vrot.slane %v1868_v42, 5  ;;  %v1898_v42 = vshll.u32 %v1553_v40, 16 }
  0xe2   : > { %v1853_v0 = vsel %vm18508_vm9, %v18512_v12, %v1852_v60 }
  0xe3   : > { %4281 = vmatpush1.bf16.msra.mxu0 %v16842_v17  ;;  %v17786_v17 = vld [vmem:[#allocation2 + $0x250] sm:$0xff]  ;;  %v1871_v58 = vor.u32 %v1870_v47, %v1867_v48  ;;  %v1900_v60 = vrot.slane %v1898_v42, 5  ;;  %v264_v48 = vld [vmem:[#allocation2 + $0x1a0] sm:$0x88] }
  0xe4   : > { %4282 = vmatprep.subr.bf16.mxu0 %v16847_v18  ;;  %v1913_v18 = vshrl.u32 %v17786_v17, 16  ;;  %v1916_v29 = vshll.u32 %v17786_v17, 16  ;;  %v18677_v17 = vcombine.high %v1829_v52, %v1853_v0  ;;  %v1559_v47 = vld [vmem:[#allocation2 + $0x270] sm:$0x11]  ;;  %v265_v40 = vsel %vm18546_vm0, 0, %v264_v48 }
  0xe5   : > { %266 = vst [vmem:[#allocation2 + $0x1a0] sm:$0x88] %v265_v40  ;;  %v1901_v42 = vsel %vm18508_vm9, %v18512_v12, %v1900_v60  ;;  %v16857_v48 = vld [vmem:[%s22505_s1 + $0xb80] ss:$8 sps:$4 sm:$0xff]   ;;  %v18698_v40 = vcombine.low %v1829_v52, %v1853_v0  ;;  %v270_v60 = vld [vmem:[#allocation2 + $0x1f0] sm:$0x88] }
  0xe6   : > { %4214 = vmatmul.mubr.bf16.gmra.mrb[8].mxu0 %v18646_v20  ;;  %22650 = vst [vmem:[#allocation24_spill] sm:$0xff] %v18677_v17  ;;  %v1915_v38 = vrot.slane %v1913_v18, 4  ;;  %v1872_v20 = vrot.slane %v1871_v58, 4  ;;  %v16860_v52 = vld [vmem:[%s22505_s1 + $0xb90] ss:$8 sps:$4 sm:$0xff]  }
  0xe7   : > { %4283 = vmatpush1.bf16.msra.mxu0 %v16845_v24  ;;  %4223 = vmatprep.mubr.bf16.mxu0 %v18651_v34  ;;  %v16851_v24 = vld [vmem:[%s22505_s1 + $0xb60] ss:$8 sps:$4 sm:$0xff]   ;;  %v1918_v34 = vrot.slane %v1916_v29, 5  ;;  %22651 = vst [vmem:[#allocation25_spill] sm:$0xff] %v18698_v40  ;;  %v16865_v0 = vld [vmem:[%s22505_s1 + $0xba4] ss:$8 sps:$4 sm:$0xff]  }
  0xe8   : > { %4284 = vmatprep.subr.bf16.mxu0 %v16850_v54  ;;  %v16856_v54 = vld [vmem:[%s22505_s1 + $0xb74] ss:$8 sps:$4 sm:$0xff]   ;;  %v1877_v58 = vsel %vm18508_vm9, %v1872_v20, %v18478_v36 }
  0xe9   : > { %v16862_v20 = vld [vmem:[%s22505_s1 + $0xb94] ss:$8 sps:$4 sm:$0xff]  }
  0xeb   : > { %4285 = vmatpush1.bf16.msra.mxu0 %v16848_v41  ;;  %v1919_v41 = vor.u32 %v1918_v34, %v1915_v38  ;;  %v18700_v34 = vcombine.high %v1877_v58, %v1901_v42 }
  0xec   : > { %4286 = vmatprep.subr.bf16.mxu0 %v16853_v35  ;;  %v17787_v35 = vld [vmem:[#allocation2 + $0x2a0] sm:$0xff] }
  0xed   : > { %v1961_v18 = vshrl.u32 %v17787_v35, 16  ;;  %v1964_v29 = vshll.u32 %v17787_v35, 16  ;;  %22652 = vst [vmem:[#allocation26_spill] sm:$0xff] %v18700_v34  ;;  %v1920_v38 = vrot.slane %v1919_v41, 4 }
  0xee   : > { %4224 = vmatmul.mubr.bf16.gmra.mrb[12].mxu0 %v18672_v2  ;;  %v271_v2 = vsel %vm18546_vm0, 0, %v270_v60  ;;  %v18724_v60 = vcombine.low %v1877_v58, %v1901_v42  ;;  %v16866_v58 = vld [vmem:[%s22505_s1 + $0xbb0] ss:$8 sps:$4 sm:$0xff]   ;;  %v16871_v42 = vld [vmem:[%s22505_s1 + $0xbc4] ss:$8 sps:$4 sm:$0xff]  }
  0xef   : > { %4287 = vmatpush1.bf16.msra.mxu0 %v16851_v24  ;;  %4233 = vmatprep.mubr.bf16.mxu0 %v18677_v17  ;;  %v1946_v24 = vshll.u32 %v1559_v47, 16  ;;  %v1966_v35 = vrot.slane %v1964_v29, 5  ;;  %v1565_v47 = vld [vmem:[#allocation2 + $0x2c0] sm:$0x11]  ;;  %272 = vst [vmem:[#allocation2 + $0x1f0] sm:$0x88] %v271_v2 }
  0xf0   : > { %4288 = vmatprep.subr.bf16.mxu0 %v16856_v54  ;;  %v1963_v54 = vrot.slane %v1961_v18, 4  ;;  %v1994_v41 = vshll.u32 %v1565_v47, 16  ;;  %v17788_v18 = vld [vmem:[#allocation2 + $0x78] sm:$0xff]  ;;  %22653 = vst [vmem:[#allocation27_spill] sm:$0xff] %v18724_v60 }
  0xf1   : > { %v1948_v17 = vrot.slane %v1946_v24, 5  ;;  %v1639_v29 = vshrl.u32 %v17788_v18, 16  ;;  %v1642_v24 = vshll.u32 %v17788_v18, 16  ;;  %v1524_v18 = vld [vmem:[#allocation2 + $0x98] sm:$0x11] }
  0xf3   : > { %4289 = vmatpush1.bf16.msra.mxu0 %v16854_v16  ;;  %v1925_v16 = vsel %vm18508_vm9, %v1920_v38, %v18478_v36  ;;  %v1949_v2 = vsel %vm18508_vm9, %v18512_v12, %v1948_v17  ;;  %v16868_v38 = vld [vmem:[%s22505_s1 + $0xbb4] ss:$8 sps:$4 sm:$0xff]   ;;  %v1996_v17 = vrot.slane %v1994_v41, 5  ;;  %v1644_v47 = vrot.slane %v1642_v24, 5  ;;  %v16869_v24 = vld [vmem:[%s22505_s1 + $0xbc0] ss:$8 sps:$4 sm:$0xff]  }
  0xf4   : > { %4290 = vmatprep.subr.bf16.mxu0 %v16859_v7  ;;  %v1967_v7 = vor.u32 %v1966_v35, %v1963_v54  ;;  %v18729_v54 = vcombine.high %v1925_v16, %v1949_v2 }
  0xf5   : > { %v1997_v41 = vsel %vm18508_vm9, %v18512_v12, %v1996_v17 }
  0xf6   : > { %4234 = vmatmul.mubr.bf16.gmra.mrb[16].mxu0 %v18698_v40  ;;  %22654 = vst [vmem:[#allocation28_spill] sm:$0xff] %v18729_v54  ;;  %v1968_v35 = vrot.slane %v1967_v7, 4 }
  0xf7   : > { %4291 = vmatpush1.bf16.msra.mxu0 %v16857_v48  ;;  %4243 = vmatprep.mubr.bf16.mxu0 %v18700_v34  ;;  %v16863_v48 = vld [vmem:[%s22505_s1 + $0xba0] ss:$8 sps:$4 sm:$0xff]  }
  0xf8   : > { %4292 = vmatprep.subr.bf16.mxu0 %v16862_v20  ;;  %v1641_v20 = vrot.slane %v1639_v29, 4  ;;  %v276_v34 = vld [vmem:[#allocation2 + $0x240] sm:$0x88]  ;;  %v1668_v29 = vshll.u32 %v1524_v18, 16 }
  0xf9   : > { %v277_v40 = vsel %vm18546_vm0, 0, %v276_v34  ;;  %v1973_v34 = vsel %vm18508_vm9, %v1968_v35, %v18478_v36 }
  0xfa   : > { %278 = vst [vmem:[#allocation2 + $0x240] sm:$0x88] %v277_v40  ;;  %v1645_v40 = vor.u32 %v1644_v47, %v1641_v20  ;;  %v1670_v17 = vrot.slane %v1668_v29, 5  ;;  %v1532_v20 = vld [vmem:[#allocation2 + $0x118] sm:$0xff]  ;;  %v1530_v47 = vld [vmem:[#allocation2 + $0xe8] sm:$0x11] }
  0xfb   : > { %4293 = vmatpush1.bf16.msra.mxu0 %v16860_v52  ;;  %v17789_v52 = vld [vmem:[#allocation2 + $0xc8] sm:$0xff] }
  0xfc   : > { %4294 = vmatprep.subr.bf16.mxu0 %v16865_v0  ;;  %v1687_v0 = vshrl.u32 %v17789_v52, 16  ;;  %v1690_v7 = vshll.u32 %v17789_v52, 16  ;;  %v18755_v52 = vcombine.high %v1973_v34, %v1997_v41  ;;  %v16875_v29 = vld [vmem:[%s22505_s1 + $0xbe0] ss:$8 sps:$4 sm:$0xff]  }
  0xfe   : > { %4244 = vmatmul.mubr.bf16.gmra.mrb[20].mxu0 %v18724_v60  ;;  %22656 = vst [vmem:[#allocation30_spill] sm:$0xff] %v18755_v52  ;;  %v1689_v35 = vrot.slane %v1687_v0, 4  ;;  %v1646_v60 = vrot.slane %v1645_v40, 4  ;;  %v1716_v40 = vshll.u32 %v1530_v47, 16  ;;  %v1536_v47 = vld [vmem:[#allocation2 + $0x138] sm:$0x11] }
  0xff   : > { %4295 = vmatpush1.bf16.msra.mxu0 %v16863_v48  ;;  %4253 = vmatprep.mubr.bf16.mxu0 %v18729_v54  ;;  %v18750_v48 = vcombine.low %v1925_v16, %v1949_v2  ;;  %v1692_v54 = vrot.slane %v1690_v7, 5  ;;  %v16872_v16 = vld [vmem:[%s22505_s1 + $0xbd0] ss:$8 sps:$4 sm:$0xff]   ;;  %v16877_v2 = vld [vmem:[%s22505_s1 + $0xbe4] ss:$8 sps:$4 sm:$0xff]   ;;  %v1671_v7 = vsel %vm18508_vm9, %v18512_v12, %v1670_v17 }
 0x100   : > { %4296 = vmatprep.subr.bf16.mxu0 %v16868_v38  ;;  %v16874_v38 = vld [vmem:[%s22505_s1 + $0xbd4] ss:$8 sps:$4 sm:$0xff]   ;;  %v1651_v0 = vsel %vm18508_vm9, %v1646_v60, %v18478_v36  ;;  %v243_v17 = vld [vmem:[#allocation2 + $0x68] sm:$0x88] }
 0x101   : > { %22655 = vst [vmem:[#allocation29_spill] sm:$0xff] %v18750_v48  ;;  %v1693_v18 = vor.u32 %v1692_v54, %v1689_v35  ;;  %v18776_v54 = vcombine.high %v1651_v0, %v1671_v7  ;;  %v16880_v60 = vld [vmem:[%s22505_s1 + $0xbf4] ss:$8 sps:$4 sm:$0xff]   ;;  %v244_v32 = vsel %vm18546_vm0, 0, %v243_v17 }
 0x102   : > { %245 = vst [vmem:[#allocation2 + $0x68] sm:$0x88] %v244_v32  ;;  %v16886_v17 = vld [vmem:[%s22505_s1 + $0x14] ss:$8 sps:$4 sm:$0xff]  }
 0x103   : > { %4297 = vmatpush1.bf16.msra.mxu0 %v16866_v58  ;;  %v1735_v58 = vshrl.u32 %v1532_v20, 16  ;;  %22658 = vst [vmem:[#allocation32_spill] sm:$0xff] %v18776_v54  ;;  %v1694_v35 = vrot.slane %v1693_v18, 4  ;;  %v1764_v18 = vshll.u32 %v1536_v47, 16 }
 0x104   : > { %4298 = vmatprep.subr.bf16.mxu0 %v16871_v42  ;;  %v1738_v42 = vshll.u32 %v1532_v20, 16 }
 0x106   : > { %4254 = vmatmul.mubr.bf16.gmra.mrb[24].mxu0 %v18750_v48  ;;  %v1740_v20 = vrot.slane %v1738_v42, 5  ;;  %v1538_v48 = vld [vmem:[#allocation2 + $0x168] sm:$0xff] }
 0x107   : > { %4299 = vmatpush1.bf16.msra.mxu0 %v16869_v24  ;;  %4263 = vmatprep.mubr.bf16.mxu0 %v18755_v52  ;;  %v18774_v24 = vcombine.low %v1973_v34, %v1997_v41  ;;  %v1718_v52 = vrot.slane %v1716_v40, 5  ;;  %v16878_v34 = vld [vmem:[%s22505_s1 + $0xbf0] ss:$8 sps:$4 sm:$0xff]   ;;  %v16883_v41 = vld [vmem:[%s22505_s1 + $0x4] ss:$8 sps:$4 sm:$0xff]   ;;  %v1786_v42 = vshll.u32 %v1538_v48, 16 }
 0x108   : > { %4300 = vmatprep.subr.bf16.mxu0 %v16874_v38  ;;  %v1737_v38 = vrot.slane %v1735_v58, 4  ;;  %v1783_v58 = vshrl.u32 %v1538_v48, 16  ;;  %v16881_v40 = vld [vmem:[%s22505_s1] ss:$8 sps:$4 sm:$0xff]   ;;  %v249_v48 = vld [vmem:[#allocation2 + $0xb8] sm:$0x88] }
 0x109   : > { %22657 = vst [vmem:[#allocation31_spill] sm:$0xff] %v18774_v24  ;;  %v1719_v32 = vsel %vm18508_vm9, %v18512_v12, %v1718_v52  ;;  %v1766_v52 = vrot.slane %v1764_v18, 5  ;;  %v1788_v47 = vrot.slane %v1786_v42, 5  ;;  %v16887_v42 = vld [vmem:[%s22505_s1 + $0x20] ss:$8 sps:$4 sm:$0xff]  }
 0x10b   : > { %4301 = vmatpush1.bf16.msra.mxu0 %v16872_v16  ;;  %v1699_v16 = vsel %vm18508_vm9, %v1694_v35, %v18478_v36 }
 0x10c   : > { %4302 = vmatprep.subr.bf16.mxu0 %v16877_v2  ;;  %v1741_v2 = vor.u32 %v1740_v20, %v1737_v38  ;;  %v18805_v35 = vcombine.high %v1699_v16, %v1719_v32  ;;  %v1544_v20 = vld [vmem:[#allocation2 + $0x1b8] sm:$0xff] }
 0x10e   : > { %4264 = vmatmul.mubr.bf16.gmra.mrb[28].mxu0 %v18774_v24  ;;  %22660 = vst [vmem:[#allocation34_spill] sm:$0xff] %v18805_v35  ;;  %v1742_v38 = vrot.slane %v1741_v2, 4  ;;  %v1542_v24 = vld [vmem:[#allocation2 + $0x188] sm:$0x11] }
 0x10f   : > { %4303 = vmatpush1.bf16.msra.mxu0 %v16875_v29  ;;  %4306 = vmatprep.mubr.bf16.mxu0 %v18776_v54  ;;  %v18800_v29 = vcombine.low %v1651_v0, %v1671_v7  ;;  %v250_v54 = vsel %vm18546_vm0, 0, %v249_v48  ;;  %v1831_v0 = vshrl.u32 %v1544_v20, 16  ;;  %v1834_v7 = vshll.u32 %v1544_v20, 16 }
 0x110   : > { %4304 = vmatprep.subr.bf16.mxu0 %v16880_v60  ;;  %v1785_v60 = vrot.slane %v1783_v58, 4  ;;  %251 = vst [vmem:[#allocation2 + $0xb8] sm:$0x88] %v250_v54  ;;  %v1747_v2 = vsel %vm18508_vm9, %v1742_v38, %v18478_v36  ;;  %v1767_v54 = vsel %vm18508_vm9, %v18512_v12, %v1766_v52  ;;  %v1812_v58 = vshll.u32 %v1542_v24, 16  ;;  %v1550_v24 = vld [vmem:[#allocation2 + $0x208] sm:$0xff] }
 0x111   : > { %22659 = vst [vmem:[#allocation33_spill] sm:$0xff] %v18800_v29  ;;  %v1833_v20 = vrot.slane %v1831_v0, 4  ;;  %v1836_v48 = vrot.slane %v1834_v7, 5  ;;  %v18831_v38 = vcombine.high %v1747_v2, %v1767_v54  ;;  %v16895_v7 = vld [vmem:[%s22505_s1 + $0x44] ss:$8 sps:$4 sm:$0xff]  }
 0x112   : > { %v1789_v18 = vor.u32 %v1788_v47, %v1785_v60  ;;  %v1814_v60 = vrot.slane %v1812_v58, 5  ;;  %v255_v47 = vld [vmem:[#allocation2 + $0x108] sm:$0x88] }
 0x113   : > { %4305 = vmatpush1.bf16.msra.mxu0 %v16878_v34  ;;  %v16884_v34 = vld [vmem:[%s22505_s1 + $0x10] ss:$8 sps:$4 sm:$0xff]   ;;  %22662 = vst [vmem:[#allocation36_spill] sm:$0xff] %v18831_v38 }
 0x114   : > { %5347 = vmatprep.subr.bf16.mxu0 %v16883_v41  ;;  %v16889_v41 = vld [vmem:[%s22505_s1 + $0x24] ss:$8 sps:$4 sm:$0xff]   ;;  %v1790_v52 = vrot.slane %v1789_v18, 4  ;;  %v1815_v58 = vsel %vm18508_vm9, %v18512_v12, %v1814_v60  ;;  %v1556_v60 = vld [vmem:[#allocation2 + $0x258] sm:$0xff] }
 0x116   : > { %4307 = vmatmul.mubr.bf16.vlgmr.msra.gmra.mrb[0].mxu0 %v18800_v29  ;;  %v256_v29 = vsel %vm18546_vm0, 0, %v255_v47  ;;  %v1795_v18 = vsel %vm18508_vm9, %v1790_v52, %v18478_v36  ;;  %v1554_v52 = vld [vmem:[#allocation2 + $0x228] sm:$0x11] }
 0x117   : > { %5348 = vmatpush1.bf16.msra.mxu0 %v16881_v40  ;;  %4316 = vmatprep.mubr.bf16.mxu0 %v18805_v35  ;;  %v18826_v40 = vcombine.low %v1699_v16, %v1719_v32  ;;  %v1548_v35 = vld [vmem:[#allocation2 + $0x1d8] sm:$0x11]  ;;  %v1837_v32 = vor.u32 %v1836_v48, %v1833_v20  ;;  %257 = vst [vmem:[#allocation2 + $0x108] sm:$0x88] %v256_v29  ;;  %v16893_v29 = vld [vmem:[%s22505_s1 + $0x40] ss:$8 sps:$4 sm:$0xff]  }
 0x118   : > { %5349 = vmatprep.subr.bf16.mxu0 %v16886_v17  ;;  %v16892_v17 = vld [vmem:[%s22505_s1 + $0x34] ss:$8 sps:$4 sm:$0xff]   ;;  %v16890_v16 = vld [vmem:[%s22505_s1 + $0x30] ss:$8 sps:$4 sm:$0xff]   ;;  %v1860_v0 = vshll.u32 %v1548_v35, 16  ;;  %v18852_v35 = vcombine.low %v1747_v2, %v1767_v54  ;;  %v18857_v48 = vcombine.high %v1795_v18, %v1815_v58 }
 0x119   : > { %22661 = vst [vmem:[#allocation35_spill] sm:$0xff] %v18826_v40  ;;  %v1838_v20 = vrot.slane %v1837_v32, 4  ;;  %v16896_v2 = vld [vmem:[%s22505_s1 + $0x50] ss:$8 sps:$4 sm:$0xff]  }
 0x11a   : > { %22663 = vst [vmem:[#allocation37_spill] sm:$0xff] %v18852_v35  ;;  %22664 = vst [vmem:[#allocation38_spill] sm:$0xff] %v18857_v48 }
 0x11b   : > { %5350 = vmatpush1.bf16.msra.mxu0 %v16884_v34  ;;  %v1879_v34 = vshrl.u32 %v1550_v24, 16  ;;  %v1843_v54 = vsel %vm18508_vm9, %v1838_v20, %v18478_v36  ;;  %v18878_v20 = vcombine.low %v1795_v18, %v1815_v58  ;;  %v16902_v18 = vld [vmem:[%s22505_s1 + $0x70] ss:$8 sps:$4 sm:$0xff]   ;;  %v16907_v58 = vld [vmem:[%s22505_s1 + $0x84] ss:$8 sps:$4 sm:$0xff]  }
 0x11c   : > { %5351 = vmatprep.subr.bf16.mxu0 %v16889_v41  ;;  %v1882_v41 = vshll.u32 %v1550_v24, 16 }
 0x11d   : > { %v1881_v24 = vrot.slane %v1879_v34, 4  ;;  %v1930_v34 = vshll.u32 %v1556_v60, 16  ;;  %22665 = vst [vmem:[#allocation39_spill] sm:$0xff] %v18878_v20 }
 0x11e   : > { %4317 = vmatmul.mubr.bf16.gmra.mrb[4].mxu0 %v18826_v40  ;;  %v1884_v47 = vrot.slane %v1882_v41, 5  ;;  %v16899_v41 = vld [vmem:[%s22505_s1 + $0x60] ss:$8 sps:$4 sm:$0xff]  }
 0x11f   : > { %5352 = vmatpush1.bf16.msra.mxu0 %v16887_v42  ;;  %4326 = vmatprep.mubr.bf16.mxu0 %v18831_v38  ;;  %v16898_v42 = vld [vmem:[%s22505_s1 + $0x54] ss:$8 sps:$4 sm:$0xff]  }
 0x120   : > { %5353 = vmatprep.subr.bf16.mxu0 %v16892_v17  ;;  %v1862_v17 = vrot.slane %v1860_v0, 5  ;;  %v261_v38 = vld [vmem:[#allocation2 + $0x158] sm:$0x88]  ;;  %v1885_v32 = vor.u32 %v1884_v47, %v1881_v24  ;;  %v1908_v0 = vshll.u32 %v1554_v52, 16  ;;  %v1932_v52 = vrot.slane %v1930_v34, 5  ;;  %v1562_v47 = vld [vmem:[#allocation2 + $0x2a8] sm:$0xff] }
 0x121   : > { %v262_v40 = vsel %vm18546_vm0, 0, %v261_v38  ;;  %v16901_v38 = vld [vmem:[%s22505_s1 + $0x64] ss:$8 sps:$4 sm:$0xff]   ;;  %v16905_v34 = vld [vmem:[%s22505_s1 + $0x80] ss:$8 sps:$4 sm:$0xff]  }
 0x122   : > { %263 = vst [vmem:[#allocation2 + $0x158] sm:$0x88] %v262_v40  ;;  %v16904_v40 = vld [vmem:[%s22505_s1 + $0x74] ss:$8 sps:$4 sm:$0xff]  }
 0x123   : > { %5354 = vmatpush1.bf16.msra.mxu0 %v16890_v16  ;;  %v1863_v16 = vsel %vm18508_vm9, %v18512_v12, %v1862_v17  ;;  %v1886_v17 = vrot.slane %v1885_v32, 4  ;;  %v1978_v32 = vshll.u32 %v1562_v47, 16 }
 0x124   : > { %5355 = vmatprep.subr.bf16.mxu0 %v16895_v7  ;;  %v1927_v7 = vshrl.u32 %v1556_v60, 16  ;;  %v1560_v60 = vld [vmem:[#allocation2 + $0x278] sm:$0x11] }
 0x126   : > { %4327 = vmatmul.mubr.bf16.gmra.mrb[8].mxu0 %v18852_v35  ;;  %v1929_v24 = vrot.slane %v1927_v7, 4 }
 0x127   : > { %5356 = vmatpush1.bf16.msra.mxu0 %v16893_v29  ;;  %4336 = vmatprep.mubr.bf16.mxu0 %v18857_v48  ;;  %v18883_v29 = vcombine.high %v1843_v54, %v1863_v16  ;;  %v1910_v48 = vrot.slane %v1908_v0, 5 }
 0x128   : > { %5357 = vmatprep.subr.bf16.mxu0 %v16898_v42  ;;  %v267_v42 = vld [vmem:[#allocation2 + $0x1a8] sm:$0x88]  ;;  %v1933_v7 = vor.u32 %v1932_v52, %v1929_v24  ;;  %v273_v24 = vld [vmem:[#allocation2 + $0x1f8] sm:$0x88]  ;;  %v1566_v52 = vld [vmem:[#allocation2 + $0x2c8] sm:$0x11] }
 0x129   : > { %22666 = vst [vmem:[#allocation40_spill] sm:$0xff] %v18883_v29  ;;  %v268_v35 = vsel %vm18546_vm0, 0, %v267_v42  ;;  %v1911_v0 = vsel %vm18508_vm9, %v18512_v12, %v1910_v48 }
 0x12a   : > { %269 = vst [vmem:[#allocation2 + $0x1a8] sm:$0x88] %v268_v35  ;;  %v1956_v35 = vshll.u32 %v1560_v60, 16  ;;  %v274_v60 = vsel %vm18546_vm0, 0, %v273_v24  ;;  %v531_v24 = vld [vmem:[#allocation2 + $0x10] sm:$0x88] }
 0x12b   : > { %5358 = vmatpush1.bf16.msra.mxu0 %v16896_v2  ;;  %v1891_v2 = vsel %vm18508_vm9, %v1886_v17, %v18478_v36  ;;  %v16910_v17 = vld [vmem:[%s22505_s1 + $0x94] ss:$8 sps:$4 sm:$0xff]   ;;  %275 = vst [vmem:[#allocation2 + $0x1f8] sm:$0x88] %v274_v60 }
 0x12c   : > { %5359 = vmatprep.subr.bf16.mxu0 %v16901_v38  ;;  %v1975_v38 = vshrl.u32 %v1562_v47, 16  ;;  %v18909_v42 = vcombine.high %v1891_v2, %v1911_v0  ;;  %v1980_v47 = vrot.slane %v1978_v32, 5  ;;  %v1958_v48 = vrot.slane %v1956_v35, 5  ;;  %v16911_v35 = vld [vmem:[%s22505_s1 + $0xa0] ss:$8 sps:$4 sm:$0xff]  }
 0x12d   : > { %v2004_v32 = vshll.u32 %v1566_v52, 16 }
 0x12e   : > { %4337 = vmatmul.mubr.bf16.gmra.mrb[12].mxu0 %v18878_v20  ;;  %22668 = vst [vmem:[#allocation42_spill] sm:$0xff] %v18909_v42 }
 0x12f   : > { %5360 = vmatpush1.bf16.msra.mxu0 %v16899_v41  ;;  %4346 = vmatprep.mubr.bf16.mxu0 %v18883_v29  ;;  %v18904_v41 = vcombine.low %v1843_v54, %v1863_v16  ;;  %v1934_v29 = vrot.slane %v1933_v7, 4  ;;  %v16908_v54 = vld [vmem:[%s22505_s1 + $0x90] ss:$8 sps:$4 sm:$0xff]   ;;  %v16913_v16 = vld [vmem:[%s22505_s1 + $0xa4] ss:$8 sps:$4 sm:$0xff]   ;;  %v18927_v7 = vcombine.low %v1891_v2, %v1911_v0 }
 0x130   : > { %5361 = vmatprep.subr.bf16.mxu0 %v16904_v40  ;;  %v1977_v40 = vrot.slane %v1975_v38, 4  ;;  %v1959_v38 = vsel %vm18508_vm9, %v18512_v12, %v1958_v48  ;;  %v16914_v0 = vld [vmem:[%s22505_s1 + $0xb0] ss:$8 sps:$4 sm:$0xff]   ;;  %v16919_v48 = vld [vmem:[%s22505_s1 + $0xc4] ss:$8 sps:$4 sm:$0xff]  }
 0x131   : > { %22667 = vst [vmem:[#allocation41_spill] sm:$0xff] %v18904_v41  ;;  %22669 = vst [vmem:[#allocation43_spill] sm:$0xff] %v18927_v7 }
 0x133   : > { %5362 = vmatpush1.bf16.msra.mxu0 %v16902_v18  ;;  %v1981_v18 = vor.u32 %v1980_v47, %v1977_v40  ;;  %v279_v47 = vld [vmem:[#allocation2 + $0x248] sm:$0x88] }
 0x134   : > { %5363 = vmatprep.subr.bf16.mxu0 %v16907_v58  ;;  %v1939_v58 = vsel %vm18508_vm9, %v1934_v29, %v18478_v36  ;;  %v16916_v29 = vld [vmem:[%s22505_s1 + $0xb4] ss:$8 sps:$4 sm:$0xff]   ;;  %v280_v2 = vsel %vm18546_vm0, 0, %v279_v47 }
 0x135   : > { %v1982_v40 = vrot.slane %v1981_v18, 4  ;;  %281 = vst [vmem:[#allocation2 + $0x248] sm:$0x88] %v280_v2  ;;  %v18953_v18 = vcombine.low %v1939_v58, %v1959_v38  ;;  %v551_v47 = vld [vmem:[#allocation2 + $0x110] sm:$0xff]  ;;  %v16923_v2 = vld [vmem:[%s22505_s1 + $0xe0] ss:$8 sps:$4 sm:$0xff]  }
 0x136   : > { %4347 = vmatmul.mubr.bf16.gmra.mrb[16].mxu0 %v18904_v41 }
 0x137   : > { %5364 = vmatpush1.bf16.msra.mxu0 %v16905_v34  ;;  %4356 = vmatprep.mubr.bf16.mxu0 %v18909_v42  ;;  %v18932_v34 = vcombine.high %v1939_v58, %v1959_v38  ;;  %v1987_v52 = vsel %vm18508_vm9, %v1982_v40, %v18478_v36  ;;  %22671 = vst [vmem:[#allocation45_spill] sm:$0xff] %v18953_v18  ;;  %v16922_v36 = vld [vmem:[%s22505_s1 + $0xd4] ss:$8 sps:$4 sm:$0xff]   ;;  %v16920_v58 = vld [vmem:[%s22505_s1 + $0xd0] ss:$8 sps:$4 sm:$0xff]  }
 0x138   : > { %5365 = vmatprep.subr.bf16.mxu0 %v16910_v17  ;;  %v2006_v17 = vrot.slane %v2004_v32, 5  ;;  %v16917_v32 = vld [vmem:[%s22505_s1 + $0xc0] ss:$8 sps:$4 sm:$0xff]   ;;  %v16925_v38 = vld [vmem:[%s22505_s1 + $0xe4] ss:$8 sps:$4 sm:$0xff]  }
 0x139   : > { %22670 = vst [vmem:[#allocation44_spill] sm:$0xff] %v18932_v34  ;;  %v22712_v45 = vld [vmem:[#allocation43_spill] sm:$0xff] }
 0x13a   : > { %v2007_v60 = vsel %vm18508_vm9, %v18512_v12, %v2006_v17  ;;  %v543_v12 = vld [vmem:[#allocation2 + $0xb0] sm:$0x88] }
 0x13b   : > { %5366 = vmatpush1.bf16.msra.mxu0 %v16908_v54  ;;  %v594_v54 = vshrl.u32 %v531_v24, 16 }
 0x13c   : > { %5367 = vmatprep.subr.bf16.mxu0 %v16913_v16  ;;  %v545_v16 = vld [vmem:[#allocation2 + $0xc0] sm:$0xff] }
 0x13d   : > { %v13349_v40 = vrot.slane %v594_v54, 11  ;;  %v687_v17 = vshrl.u32 %v545_v16, 16  ;;  %v731_v54 = vshrl.u32 %v551_v47, 16 }
 0x13e   : > { %4357 = vmatmul.mubr.bf16.gmra.mrb[20].mxu0 %v18927_v7  ;;  %v555_v7 = vld [vmem:[#allocation2 + $0x150] sm:$0x88] }
 0x13f   : > { %5368 = vmatpush1.bf16.msra.mxu0 %v16911_v35  ;;  %4366 = vmatprep.mubr.bf16.mxu0 %v18932_v34  ;;  %v18958_v35 = vcombine.high %v1987_v52, %v2007_v60  ;;  %v733_v34 = vrot.slane %v731_v54, 7  ;;  %v16932_v54 = vld [vmem:[%s22505_s1 + $0x110] ss:$8 sps:$4 sm:$0xff]  }
 0x140   : > { %5369 = vmatprep.subr.bf16.mxu0 %v16916_v29  ;;  %v619_v29 = vrot.slane %v18590_v57, 4  ;;  %v605_v57 = vsel %vm18594_vm3, %v13349_v40, %v18605_v9 }
 0x141   : > { %22672 = vst [vmem:[#allocation46_spill] sm:$0xff] %v18958_v35  ;;  %v751_v42 = vrot.slane %v733_v34, 4 }
 0x142   : > { %v18978_v24 = vsel %vm18594_vm3, %v619_v29, %v18605_v9  ;;  %v690_v29 = vshll.u32 %v545_v16, 16 }
 0x143   : > { %5370 = vmatpush1.bf16.msra.mxu0 %v16914_v0  ;;  %v682_v0 = vshrl.u32 %v543_v12, 16  ;;  %v13370_v40 = vcombine.high %v605_v57, %v18978_v24  ;;  %v16926_v12 = vld [vmem:[%s22505_s1 + $0xf0] ss:$8 sps:$4 sm:$0xff]  }
 0x144   : > { %5371 = vmatprep.subr.bf16.mxu0 %v16919_v48  ;;  %v689_v48 = vrot.slane %v687_v17, 7 }
 0x145   : > { %v13353_v17 = vrot.slane %v682_v0, 11  ;;  %v13369_v0 = vcombine.low %v605_v57, %v18978_v24  ;;  %v16937_v57 = vld [vmem:[%s22505_s1 + $0x124] ss:$8 sps:$4 sm:$0xff]  }
 0x146   : > { %4367 = vmatmul.mubr.bf16.gmra.mrb[24].mxu0 %v18953_v18  ;;  %v18989_v18 = vld [vmem:[#allocation2 + $0x160] sm:$0xff] }
 0x147   : > { %5372 = vmatpush1.bf16.msra.mxu0 %v16917_v32  ;;  %4376 = vmatprep.mubr.bf16.mxu0 %v18958_v35  ;;  %v18983_v32 = vcombine.low %v1987_v52, %v2007_v60  ;;  %v549_v35 = vld [vmem:[#allocation2 + $0x100] sm:$0x88]  ;;  %v707_v60 = vrot.slane %v689_v48, 4  ;;  %v775_v16 = vshrl.u32 %v18989_v18, 16 }
 0x148   : > { %5373 = vmatprep.subr.bf16.mxu0 %v16922_v36  ;;  %v16928_v36 = vld [vmem:[%s22505_s1 + $0xf4] ss:$8 sps:$4 sm:$0xff]   ;;  %v16931_v52 = vld [vmem:[%s22505_s1 + $0x104] ss:$8 sps:$4 sm:$0xff]  }
 0x149   : > { %22673 = vst [vmem:[#allocation47_spill] sm:$0xff] %v18983_v32 }
 0x14b   : > { %5374 = vmatpush1.bf16.msra.mxu0 %v16920_v58  ;;  %v726_v58 = vshrl.u32 %v549_v35, 16  ;;  %v19006_v35 = vld [vmem:[#allocation2 + $0x1b0] sm:$0xff] }
 0x14c   : > { %5375 = vmatprep.subr.bf16.mxu0 %v16925_v38  ;;  %v16929_v38 = vld [vmem:[%s22505_s1 + $0x100] ss:$8 sps:$4 sm:$0xff]  }
 0x14e   : > { %4377 = vmatmul.mubr.bf16.gmra.mrb[28].mxu0 %v18983_v32  ;;  %v16934_v32 = vld [vmem:[%s22505_s1 + $0x114] ss:$8 sps:$4 sm:$0xff]  }
 0x14f   : > { %5376 = vmatpush1.bf16.msra.mxu0 %v16923_v2  ;;  %5379 = vmatprep.mubr.bf16.mxu0 %v13370_v40  ;;  %v692_v2 = vor.u32 %v690_v29, %v689_v48  ;;  %v734_v40 = vshll.u32 %v551_v47, 16  ;;  %v819_v47 = vshrl.u32 %v19006_v35, 16  ;;  %v715_v29 = vsel %vm18594_vm3, %v707_v60, %v18605_v9  ;;  %v16938_v60 = vld [vmem:[%s22505_s1 + $0x130] ss:$8 sps:$4 sm:$0xff]  }
 0x150   : > { %5377 = vmatprep.subr.bf16.mxu0 %v16928_v36  ;;  %v13355_v36 = vrot.slane %v726_v58, 11  ;;  %v16935_v58 = vld [vmem:[%s22505_s1 + $0x120] ss:$8 sps:$4 sm:$0xff]  }
 0x151   : > { %v693_v48 = vsel %vm18594_vm3, %v13353_v17, %v692_v2  ;;  %v778_v17 = vshll.u32 %v18989_v18, 16  ;;  %v16943_v2 = vld [vmem:[%s22505_s1 + $0x144] ss:$8 sps:$4 sm:$0xff]  }
 0x153   : > { %5378 = vmatpush1.bf16.msra.mxu0 %v16926_v12  ;;  %v770_v12 = vshrl.u32 %v555_v7, 16  ;;  %v561_v7 = vld [vmem:[#allocation2 + $0x1a0] sm:$0x88] }
 0x154   : > { %5460 = vmatprep.subr.bf16.mxu0 %v16931_v52  ;;  %v777_v52 = vrot.slane %v775_v16, 7  ;;  %v19027_v16 = vcombine.high %v693_v48, %v715_v29 }
 0x156   : > { %5380 = vmatmul.mubr.bf16.vlgmr.msra.gmra.mrb[0].mxu0 %v13369_v0  ;;  %22674 = vst [vmem:[#allocation48_spill] sm:$0xff] %v19027_v16  ;;  %v13357_v0 = vrot.slane %v770_v12, 11  ;;  %v759_v12 = vsel %vm18594_vm3, %v751_v42, %v18605_v9  ;;  %v16944_v42 = vld [vmem:[%s22505_s1 + $0x150] ss:$8 sps:$4 sm:$0xff]  }
 0x157   : > { %5461 = vmatpush1.bf16.msra.mxu0 %v16929_v38  ;;  %5389 = vmatprep.mubr.bf16.mxu0 %v18622_v46  ;;  %v16940_v46 = vld [vmem:[%s22505_s1 + $0x134] ss:$8 sps:$4 sm:$0xff]   ;;  %v19030_v38 = vld [vmem:[#allocation2 + $0x200] sm:$0xff] }
 0x158   : > { %5462 = vmatprep.subr.bf16.mxu0 %v16934_v32  ;;  %v736_v32 = vor.u32 %v734_v40, %v733_v34  ;;  %v814_v34 = vshrl.u32 %v561_v7, 16  ;;  %v821_v40 = vrot.slane %v819_v47, 7  ;;  %v863_v18 = vshrl.u32 %v19030_v38, 16  ;;  %v16946_v47 = vld [vmem:[%s22505_s1 + $0x154] ss:$8 sps:$4 sm:$0xff]  }
 0x159   : > { %v567_v7 = vld [vmem:[#allocation2 + $0x1f0] sm:$0x88] }
 0x15b   : > { %5463 = vmatpush1.bf16.msra.mxu0 %v16932_v54  ;;  %v795_v54 = vrot.slane %v777_v52, 4 }
 0x15c   : > { %5464 = vmatprep.subr.bf16.mxu0 %v16937_v57  ;;  %v737_v57 = vsel %vm18594_vm3, %v13355_v36, %v736_v32  ;;  %v780_v36 = vor.u32 %v778_v17, %v777_v52  ;;  %v822_v32 = vshll.u32 %v19006_v35, 16  ;;  %v858_v52 = vshrl.u32 %v567_v7, 16 }
 0x15d   : > { %v865_v17 = vrot.slane %v863_v18, 7  ;;  %v16952_v18 = vld [vmem:[%s22505_s1 + $0x174] ss:$8 sps:$4 sm:$0xff]  }
 0x15e   : > { %5390 = vmatmul.mubr.bf16.gmra.mrb[4].mxu0 %v18624_v37  ;;  %v16941_v37 = vld [vmem:[%s22505_s1 + $0x140] ss:$8 sps:$4 sm:$0xff]  }
 0x15f   : > { %5465 = vmatpush1.bf16.msra.mxu0 %v16935_v58  ;;  %5399 = vmatprep.mubr.bf16.mxu0 %v19027_v16  ;;  %v19049_v58 = vcombine.low %v693_v48, %v715_v29  ;;  %v19057_v16 = vld [vmem:[#allocation2 + $0x250] sm:$0xff]  ;;  %v13359_v48 = vrot.slane %v814_v34, 11  ;;  %v16949_v29 = vld [vmem:[%s22505_s1 + $0x164] ss:$8 sps:$4 sm:$0xff]   ;;  %v803_v34 = vsel %vm18594_vm3, %v795_v54, %v18605_v9 }
 0x160   : > { %5466 = vmatprep.subr.bf16.mxu0 %v16940_v46  ;;  %v19054_v46 = vcombine.high %v737_v57, %v759_v12  ;;  %v907_v35 = vshrl.u32 %v19057_v16, 16  ;;  %v16950_v54 = vld [vmem:[%s22505_s1 + $0x170] ss:$8 sps:$4 sm:$0xff]  }
 0x161   : > { %22675 = vst [vmem:[#allocation49_spill] sm:$0xff] %v19049_v58 }
 0x162   : > { %22676 = vst [vmem:[#allocation50_spill] sm:$0xff] %v19054_v46 }
 0x163   : > { %5467 = vmatpush1.bf16.msra.mxu0 %v16938_v60  ;;  %v839_v60 = vrot.slane %v821_v40, 4 }
 0x164   : > { %5468 = vmatprep.subr.bf16.mxu0 %v16943_v2  ;;  %v781_v2 = vsel %vm18594_vm3, %v13357_v0, %v780_v36  ;;  %v573_v0 = vld [vmem:[#allocation2 + $0x240] sm:$0x88]  ;;  %v866_v36 = vshll.u32 %v19030_v38, 16 }
 0x165   : > { %v19081_v7 = vcombine.high %v781_v2, %v803_v34  ;;  %v847_v38 = vsel %vm18594_vm3, %v839_v60, %v18605_v9  ;;  %v16956_v60 = vld [vmem:[%s22505_s1 + $0x190] ss:$8 sps:$4 sm:$0xff]  }
 0x166   : > { %5400 = vmatmul.mubr.bf16.gmra.mrb[8].mxu0 %v19049_v58  ;;  %v16947_v58 = vld [vmem:[%s22505_s1 + $0x160] ss:$8 sps:$4 sm:$0xff]  }
 0x167   : > { %5469 = vmatpush1.bf16.msra.mxu0 %v16941_v37  ;;  %5409 = vmatprep.mubr.bf16.mxu0 %v19054_v46  ;;  %v19076_v37 = vcombine.low %v737_v57, %v759_v12  ;;  %22678 = vst [vmem:[#allocation52_spill] sm:$0xff] %v19081_v7  ;;  %v16955_v57 = vld [vmem:[%s22505_s1 + $0x184] ss:$8 sps:$4 sm:$0xff]   ;;  %v13361_v12 = vrot.slane %v858_v52, 11  ;;  %v19100_v46 = vcombine.low %v781_v2, %v803_v34  ;;  %v532_v52 = vld [vmem:[#allocation2 + $0x18] sm:$0x88] }
 0x168   : > { %5470 = vmatprep.subr.bf16.mxu0 %v16946_v47  ;;  %v824_v47 = vor.u32 %v822_v32, %v821_v40  ;;  %v909_v40 = vrot.slane %v907_v35, 7  ;;  %v16961_v34 = vld [vmem:[%s22505_s1 + $0x1a4] ss:$8 sps:$4 sm:$0xff]  }
 0x169   : > { %22677 = vst [vmem:[#allocation51_spill] sm:$0xff] %v19076_v37  ;;  %22679 = vst [vmem:[#allocation53_spill] sm:$0xff] %v19100_v46 }
 0x16a   : > { %v825_v32 = vsel %vm18594_vm3, %v13359_v48, %v824_v47  ;;  %v868_v48 = vor.u32 %v866_v36, %v865_v17  ;;  %v19108_v47 = vld [vmem:[#allocation2 + $0x78] sm:$0xff] }
 0x16b   : > { %5471 = vmatpush1.bf16.msra.mxu0 %v16944_v42  ;;  %v883_v42 = vrot.slane %v865_v17, 4  ;;  %v19105_v35 = vcombine.high %v825_v32, %v847_v38  ;;  %v607_v17 = vshrl.u32 %v532_v52, 16  ;;  %v538_v52 = vld [vmem:[#allocation2 + $0x68] sm:$0x88] }
 0x16c   : > { %5472 = vmatprep.subr.bf16.mxu0 %v16949_v29  ;;  %v902_v29 = vshrl.u32 %v573_v0, 16  ;;  %v927_v0 = vrot.slane %v909_v40, 4 }
 0x16d   : > { %22680 = vst [vmem:[#allocation54_spill] sm:$0xff] %v19105_v35  ;;  %v891_v36 = vsel %vm18594_vm3, %v883_v42, %v18605_v9  ;;  %v16962_v42 = vld [vmem:[%s22505_s1 + $0x1b0] ss:$8 sps:$4 sm:$0xff]  }
 0x16e   : > { %5410 = vmatmul.mubr.bf16.gmra.mrb[12].mxu0 %v19076_v37  ;;  %v16953_v37 = vld [vmem:[%s22505_s1 + $0x180] ss:$8 sps:$4 sm:$0xff]   ;;  %v13363_v2 = vrot.slane %v902_v29, 11  ;;  %v19127_v29 = vcombine.low %v825_v32, %v847_v38  ;;  %v16967_v32 = vld [vmem:[%s22505_s1 + $0x1c4] ss:$8 sps:$4 sm:$0xff]   ;;  %v651_v38 = vshrl.u32 %v538_v52, 16 }
 0x16f   : > { %5473 = vmatpush1.bf16.msra.mxu0 %v16947_v58  ;;  %5419 = vmatprep.mubr.bf16.mxu0 %v19081_v7  ;;  %v16958_v58 = vld [vmem:[%s22505_s1 + $0x194] ss:$8 sps:$4 sm:$0xff]  }
 0x170   : > { %5474 = vmatprep.subr.bf16.mxu0 %v16952_v18  ;;  %v910_v18 = vshll.u32 %v19057_v16, 16  ;;  %v656_v16 = vshrl.u32 %v19108_v47, 16  ;;  %22681 = vst [vmem:[#allocation55_spill] sm:$0xff] %v19127_v29  ;;  %v13352_v52 = vrot.slane %v651_v38, 11 }
 0x173   : > { %5475 = vmatpush1.bf16.msra.mxu0 %v16950_v54  ;;  %v869_v54 = vsel %vm18594_vm3, %v13361_v12, %v868_v48  ;;  %v912_v12 = vor.u32 %v910_v18, %v909_v40  ;;  %v19134_v48 = vld [vmem:[#allocation2 + $0xc8] sm:$0xff]  ;;  %v659_v40 = vshll.u32 %v19108_v47, 16  ;;  %v16970_v47 = vld [vmem:[%s22505_s1 + $0x1d4] ss:$8 sps:$4 sm:$0xff]  }
 0x174   : > { %5476 = vmatprep.subr.bf16.mxu0 %v16955_v57  ;;  %v16959_v57 = vld [vmem:[%s22505_s1 + $0x1a0] ss:$8 sps:$4 sm:$0xff]   ;;  %v700_v18 = vshrl.u32 %v19134_v48, 16 }
 0x176   : > { %5420 = vmatmul.mubr.bf16.gmra.mrb[16].mxu0 %v19100_v46 }
 0x177   : > { %5477 = vmatpush1.bf16.msra.mxu0 %v16953_v37  ;;  %5429 = vmatprep.mubr.bf16.mxu0 %v19105_v35  ;;  %v16964_v37 = vld [vmem:[%s22505_s1 + $0x1b4] ss:$8 sps:$4 sm:$0xff]   ;;  %v13350_v35 = vrot.slane %v607_v17, 11  ;;  %v935_v17 = vsel %vm18594_vm3, %v927_v0, %v18605_v9  ;;  %v16968_v0 = vld [vmem:[%s22505_s1 + $0x1d0] ss:$8 sps:$4 sm:$0xff]  }
 0x178   : > { %5478 = vmatprep.subr.bf16.mxu0 %v16958_v58  ;;  %v19132_v58 = vcombine.high %v869_v54, %v891_v36 }
 0x179   : > { %v618_v38 = vsel %vm18594_vm3, %v13350_v35, %v18605_v9  ;;  %v16974_v35 = vld [vmem:[%s22505_s1 + $0x1f0] ss:$8 sps:$4 sm:$0xff]  }
 0x17a   : > { %22682 = vst [vmem:[#allocation56_spill] sm:$0xff] %v19132_v58 }
 0x17b   : > { %5479 = vmatpush1.bf16.msra.mxu0 %v16956_v60  ;;  %v658_v60 = vrot.slane %v656_v16, 7  ;;  %v544_v16 = vld [vmem:[#allocation2 + $0xb8] sm:$0x88] }
 0x17c   : > { %5480 = vmatprep.subr.bf16.mxu0 %v16961_v34  ;;  %v913_v34 = vsel %vm18594_vm3, %v13363_v2, %v912_v12  ;;  %v19161_v2 = vld [vmem:[#allocation2 + $0x118] sm:$0xff] }
 0x17d   : > { %v672_v12 = vrot.slane %v658_v60, 4  ;;  %v19179_v46 = vcombine.low %v913_v34, %v935_v17 }
 0x17e   : > { %5430 = vmatmul.mubr.bf16.gmra.mrb[20].mxu0 %v19127_v29  ;;  %v19154_v29 = vcombine.low %v869_v54, %v891_v36  ;;  %v16973_v54 = vld [vmem:[%s22505_s1 + $0x1e4] ss:$8 sps:$4 sm:$0xff]   ;;  %v695_v36 = vshrl.u32 %v544_v16, 16 }
 0x17f   : > { %5481 = vmatpush1.bf16.msra.mxu0 %v16959_v57  ;;  %5439 = vmatprep.mubr.bf16.mxu0 %v19132_v58  ;;  %v16965_v57 = vld [vmem:[%s22505_s1 + $0x1c0] ss:$8 sps:$4 sm:$0xff]   ;;  %v744_v58 = vshrl.u32 %v19161_v2, 16  ;;  %22685 = vst [vmem:[#allocation59_spill] sm:$0xff] %v19179_v46 }
 0x180   : > { %5482 = vmatprep.subr.bf16.mxu0 %v16964_v37  ;;  %22683 = vst [vmem:[#allocation57_spill] sm:$0xff] %v19154_v29  ;;  %v19159_v37 = vcombine.high %v913_v34, %v935_v17  ;;  %v19185_v16 = vld [vmem:[#allocation2 + $0x168] sm:$0xff] }
 0x181   : > { %v16979_v34 = vld [vmem:[%s22505_s1 + $0x204] ss:$8 sps:$4 sm:$0xff]  }
 0x182   : > { %22684 = vst [vmem:[#allocation58_spill] sm:$0xff] %v19159_v37 }
 0x183   : > { %5483 = vmatpush1.bf16.msra.mxu0 %v16962_v42  ;;  %v702_v42 = vrot.slane %v700_v18, 7  ;;  %v550_v18 = vld [vmem:[#allocation2 + $0x108] sm:$0x88] }
 0x184   : > { %5484 = vmatprep.subr.bf16.mxu0 %v16967_v32  ;;  %v703_v32 = vshll.u32 %v19134_v48, 16  ;;  %v13372_v48 = vcombine.high %v618_v38, %v18978_v24  ;;  %v739_v17 = vshrl.u32 %v550_v18, 16  ;;  %v19210_v18 = vld [vmem:[#allocation2 + $0x1b8] sm:$0xff] }
 0x185   : > { %v716_v7 = vrot.slane %v702_v42, 4 }
 0x186   : > { %5440 = vmatmul.mubr.bf16.gmra.mrb[24].mxu0 %v19154_v29  ;;  %v16971_v29 = vld [vmem:[%s22505_s1 + $0x1e0] ss:$8 sps:$4 sm:$0xff]  }
 0x187   : > { %5485 = vmatpush1.bf16.msra.mxu0 %v16965_v57  ;;  %5449 = vmatprep.mubr.bf16.mxu0 %v19159_v37  ;;  %v16976_v57 = vld [vmem:[%s22505_s1 + $0x1f4] ss:$8 sps:$4 sm:$0xff]   ;;  %v13354_v37 = vrot.slane %v695_v36, 11  ;;  %v680_v36 = vsel %vm18594_vm3, %v672_v12, %v18605_v9  ;;  %v16980_v12 = vld [vmem:[%s22505_s1 + $0x210] ss:$8 sps:$4 sm:$0xff]  }
 0x188   : > { %5486 = vmatprep.subr.bf16.mxu0 %v16970_v47  ;;  %v661_v47 = vor.u32 %v659_v40, %v658_v60  ;;  %v747_v60 = vshll.u32 %v19161_v2, 16  ;;  %v788_v40 = vshrl.u32 %v19185_v16, 16  ;;  %v556_v2 = vld [vmem:[#allocation2 + $0x158] sm:$0x88] }
 0x18b   : > { %5487 = vmatpush1.bf16.msra.mxu0 %v16968_v0  ;;  %v746_v0 = vrot.slane %v744_v58, 7  ;;  %v16982_v58 = vld [vmem:[%s22505_s1 + $0x214] ss:$8 sps:$4 sm:$0xff]  }
 0x18c   : > { %5488 = vmatprep.subr.bf16.mxu0 %v16973_v54  ;;  %v662_v54 = vsel %vm18594_vm3, %v13352_v52, %v661_v47  ;;  %v705_v52 = vor.u32 %v703_v32, %v702_v42  ;;  %v791_v42 = vshll.u32 %v19185_v16, 16  ;;  %v832_v32 = vshrl.u32 %v19210_v18, 16  ;;  %v16988_v16 = vld [vmem:[%s22505_s1 + $0x234] ss:$8 sps:$4 sm:$0xff]  }
 0x18d   : > { %v760_v47 = vrot.slane %v746_v0, 4 }
 0x18e   : > { %5450 = vmatmul.mubr.bf16.gmra.mrb[28].mxu0 %v19179_v46  ;;  %v16977_v46 = vld [vmem:[%s22505_s1 + $0x200] ss:$8 sps:$4 sm:$0xff]  }
 0x18f   : > { %5489 = vmatpush1.bf16.msra.mxu0 %v16971_v29  ;;  %5492 = vmatprep.mubr.bf16.mxu0 %v13372_v48  ;;  %v13371_v29 = vcombine.low %v618_v38, %v18978_v24  ;;  %v13356_v48 = vrot.slane %v739_v17, 11  ;;  %v16985_v24 = vld [vmem:[%s22505_s1 + $0x224] ss:$8 sps:$4 sm:$0xff]   ;;  %v783_v38 = vshrl.u32 %v556_v2, 16  ;;  %v724_v17 = vsel %vm18594_vm3, %v716_v7, %v18605_v9  ;;  %v16986_v7 = vld [vmem:[%s22505_s1 + $0x230] ss:$8 sps:$4 sm:$0xff]  }
 0x190   : > { %5490 = vmatprep.subr.bf16.mxu0 %v16976_v57  ;;  %v19208_v57 = vcombine.high %v662_v54, %v680_v36  ;;  %v19236_v2 = vld [vmem:[#allocation2 + $0x208] sm:$0xff] }
 0x192   : > { %22686 = vst [vmem:[#allocation60_spill] sm:$0xff] %v19208_v57 }
 0x193   : > { %5491 = vmatpush1.bf16.msra.mxu0 %v16974_v35  ;;  %v790_v35 = vrot.slane %v788_v40, 7  ;;  %v562_v40 = vld [vmem:[#allocation2 + $0x1a8] sm:$0x88] }
 0x194   : > { %5573 = vmatprep.subr.bf16.mxu0 %v16979_v34  ;;  %v706_v34 = vsel %vm18594_vm3, %v13354_v37, %v705_v52  ;;  %v749_v37 = vor.u32 %v747_v60, %v746_v0  ;;  %v13358_v52 = vrot.slane %v783_v38, 11  ;;  %v19246_v0 = vld [vmem:[#allocation2 + $0x80] sm:$0xff] }
 0x196   : > { %5493 = vmatmul.mubr.bf16.vlgmr.msra.gmra.mrb[0].mxu0 %v13371_v29  ;;  %v19229_v29 = vcombine.low %v662_v54, %v680_v36  ;;  %v16991_v54 = vld [vmem:[%s22505_s1 + $0x244] ss:$8 sps:$4 sm:$0xff]   ;;  %v827_v36 = vshrl.u32 %v562_v40, 16  ;;  %v750_v38 = vsel %vm18594_vm3, %v13356_v48, %v749_v37  ;;  %v19258_v40 = vcombine.low %v706_v34, %v724_v17  ;;  %v568_v48 = vld [vmem:[#allocation2 + $0x1f8] sm:$0x88] }
 0x197   : > { %5574 = vmatpush1.bf16.msra.mxu0 %v16977_v46  ;;  %5502 = vmatprep.mubr.bf16.mxu0 %v19208_v57  ;;  %v16983_v46 = vld [vmem:[%s22505_s1 + $0x220] ss:$8 sps:$4 sm:$0xff]   ;;  %v804_v57 = vrot.slane %v790_v35, 4  ;;  %v835_v37 = vshll.u32 %v19210_v18, 16 }
 0x198   : > { %5575 = vmatprep.subr.bf16.mxu0 %v16982_v58  ;;  %22687 = vst [vmem:[#allocation61_spill] sm:$0xff] %v19229_v29  ;;  %v19234_v58 = vcombine.high %v706_v34, %v724_v17  ;;  %22689 = vst [vmem:[#allocation63_spill] sm:$0xff] %v19258_v40  ;;  %v16997_v17 = vld [vmem:[%s22505_s1 + $0x264] ss:$8 sps:$4 sm:$0xff]  }
 0x19a   : > { %22688 = vst [vmem:[#allocation62_spill] sm:$0xff] %v19234_v58 }
 0x19b   : > { %5576 = vmatpush1.bf16.msra.mxu0 %v16980_v12  ;;  %v834_v12 = vrot.slane %v832_v32, 7  ;;  %v16994_v32 = vld [vmem:[%s22505_s1 + $0x254] ss:$8 sps:$4 sm:$0xff]  }
 0x19c   : > { %5577 = vmatprep.subr.bf16.mxu0 %v16985_v24  ;;  %v876_v24 = vshrl.u32 %v19236_v2, 16 }
 0x19e   : > { %5503 = vmatmul.mubr.bf16.gmra.mrb[4].mxu0 %v19229_v29  ;;  %v768_v29 = vsel %vm18594_vm3, %v760_v47, %v18605_v9  ;;  %v16992_v47 = vld [vmem:[%s22505_s1 + $0x250] ss:$8 sps:$4 sm:$0xff]  }
 0x19f   : > { %5578 = vmatpush1.bf16.msra.mxu0 %v16983_v46  ;;  %5512 = vmatprep.mubr.bf16.mxu0 %v19234_v58  ;;  %v16989_v46 = vld [vmem:[%s22505_s1 + $0x240] ss:$8 sps:$4 sm:$0xff]   ;;  %v19263_v60 = vcombine.high %v750_v38, %v768_v29  ;;  %v22690_v58 = vshrl.u32 %v19246_v0, 16 }
 0x1a0   : > { %5579 = vmatprep.subr.bf16.mxu0 %v16988_v16  ;;  %v793_v16 = vor.u32 %v791_v42, %v790_v35  ;;  %v13360_v35 = vrot.slane %v827_v36, 11  ;;  %v22597_v42 = vshll.u32 %v19246_v0, 16  ;;  %v17000_v36 = vld [vmem:[%s22505_s1 + $0x274] ss:$8 sps:$4 sm:$0xff]  }
 0x1a1   : > { %v852_v34 = vrot.slane %v22690_v58, 7  ;;  %v812_v58 = vsel %vm18594_vm3, %v804_v57, %v18605_v9  ;;  %v576_v9 = vld [vmem:[#allocation2 + $0x258] sm:$0xff] }
 0x1a2   : > { %v794_v18 = vsel %vm18594_vm3, %v13358_v52, %v793_v16  ;;  %v848_v52 = vrot.slane %v834_v12, 4  ;;  %v16998_v57 = vld [vmem:[%s22505_s1 + $0x270] ss:$8 sps:$4 sm:$0xff]  }
 0x1a3   : > { %5580 = vmatpush1.bf16.msra.mxu0 %v16986_v7  ;;  %v871_v7 = vshrl.u32 %v568_v48, 16  ;;  %v855_v16 = vor.u32 %v22597_v42, %v852_v34  ;;  %v19310_v42 = vcombine.low %v794_v18, %v812_v58 }
 0x1a4   : > { %5581 = vmatprep.subr.bf16.mxu0 %v16991_v54  ;;  %v878_v54 = vrot.slane %v876_v24, 7  ;;  %v19290_v24 = vcombine.high %v794_v18, %v812_v58  ;;  %v17009_v18 = vld [vmem:[%s22505_s1 + $0x2a4] ss:$8 sps:$4 sm:$0xff]  }
 0x1a5   : > { %v856_v34 = vsel %vm18594_vm3, %v848_v52, %v855_v16  ;;  %v923_v52 = vshll.u32 %v576_v9, 16 }
 0x1a6   : > { %5513 = vmatmul.mubr.bf16.gmra.mrb[8].mxu0 %v19258_v40  ;;  %v16995_v40 = vld [vmem:[%s22505_s1 + $0x260] ss:$8 sps:$4 sm:$0xff]   ;;  %v892_v48 = vrot.slane %v878_v54, 4 }
 0x1a7   : > { %5582 = vmatpush1.bf16.msra.mxu0 %v16989_v46  ;;  %5522 = vmatprep.mubr.bf16.mxu0 %v19263_v60  ;;  %v19285_v46 = vcombine.low %v750_v38, %v768_v29  ;;  %v17003_v29 = vld [vmem:[%s22505_s1 + $0x284] ss:$8 sps:$4 sm:$0xff]   ;;  %v13362_v38 = vrot.slane %v871_v7, 11 }
 0x1a8   : > { %5583 = vmatprep.subr.bf16.mxu0 %v16994_v32  ;;  %v837_v32 = vor.u32 %v835_v37, %v834_v12  ;;  %v879_v12 = vshll.u32 %v19236_v2, 16 }
 0x1aa   : > { %v838_v37 = vsel %vm18594_vm3, %v13360_v35, %v837_v32  ;;  %v881_v7 = vor.u32 %v879_v12, %v878_v54  ;;  %v17004_v35 = vld [vmem:[%s22505_s1 + $0x290] ss:$8 sps:$4 sm:$0xff]  }
 0x1ab   : > { %5584 = vmatpush1.bf16.msra.mxu0 %v16992_v47  ;;  %v920_v47 = vshrl.u32 %v576_v9, 16  ;;  %v19315_v2 = vcombine.high %v838_v37, %v856_v34  ;;  %v19332_v12 = vcombine.low %v838_v37, %v856_v34  ;;  %v17015_v37 = vld [vmem:[%s22505_s1 + $0x2c4] ss:$8 sps:$4 sm:$0xff]  }
 0x1ac   : > { %5585 = vmatprep.subr.bf16.mxu0 %v16997_v17  ;;  %v17001_v17 = vld [vmem:[%s22505_s1 + $0x280] ss:$8 sps:$4 sm:$0xff]   ;;  %v882_v54 = vsel %vm18594_vm3, %v13362_v38, %v881_v7 }
 0x1ad   : > { %v922_v32 = vrot.slane %v920_v47, 7 }
 0x1ae   : > { %5523 = vmatmul.mubr.bf16.gmra.mrb[12].mxu0 %v19285_v46 }
 0x1af   : > { %5586 = vmatpush1.bf16.msra.mxu0 %v16995_v40  ;;  %5532 = vmatprep.mubr.bf16.mxu0 %v19290_v24  ;;  %v17006_v40 = vld [vmem:[%s22505_s1 + $0x294] ss:$8 sps:$4 sm:$0xff]   ;;  %v936_v38 = vrot.slane %v922_v32, 4 }
 0x1b0   : > { %5587 = vmatprep.subr.bf16.mxu0 %v17000_v36  ;;  %v574_v36 = vld [vmem:[#allocation2 + $0x248] sm:$0x88] }
 0x1b1   : > { %v915_v58 = vshrl.u32 %v574_v36, 16  ;;  %v944_v7 = vsel %vm18594_vm3, %v936_v38, %v855_v16  ;;  %v17013_v36 = vld [vmem:[%s22505_s1 + $0x2c0] ss:$8 sps:$4 sm:$0xff]   ;;  %v17027_v38 = vld [vmem:[%s22505_s1 + $0x304] ss:$8 sps:$4 sm:$0xff]  }
 0x1b3   : > { %5588 = vmatpush1.bf16.msra.mxu0 %v16998_v57  ;;  %v900_v57 = vsel %vm18594_vm3, %v892_v48, %v855_v16  ;;  %v13364_v9 = vrot.slane %v915_v58, 11  ;;  %v17010_v48 = vld [vmem:[%s22505_s1 + $0x2b0] ss:$8 sps:$4 sm:$0xff]   ;;  %v17018_v58 = vld [vmem:[%s22505_s1 + $0x2d4] ss:$8 sps:$4 sm:$0xff]  }
 0x1b4   : > { %5589 = vmatprep.subr.bf16.mxu0 %v17003_v29  ;;  %v17007_v29 = vld [vmem:[%s22505_s1 + $0x2a0] ss:$8 sps:$4 sm:$0xff]   ;;  %v19337_v47 = vcombine.high %v882_v54, %v900_v57  ;;  %v17016_v16 = vld [vmem:[%s22505_s1 + $0x2d0] ss:$8 sps:$4 sm:$0xff]  }
 0x1b6   : > { %5533 = vmatmul.mubr.bf16.gmra.mrb[16].mxu0 %v19310_v42 }
 0x1b7   : > { %5590 = vmatpush1.bf16.msra.mxu0 %v17001_v17  ;;  %5542 = vmatprep.mubr.bf16.mxu0 %v19315_v2  ;;  %v17012_v17 = vld [vmem:[%s22505_s1 + $0x2b4] ss:$8 sps:$4 sm:$0xff]  }
 0x1b8   : > { %5591 = vmatprep.subr.bf16.mxu0 %v17006_v40  ;;  %v925_v40 = vor.u32 %v923_v52, %v922_v32  ;;  %v211_v32 = vld [vmem:[#allocation2 + $0x40] sm:$0x11] }
 0x1b9   : > { %v212_v52 = vsel %vm18171_vm6, 0, %v211_v32  ;;  %v17036_v32 = vld [vmem:[%s22505_s1 + $0x334] ss:$8 sps:$4 sm:$0xff]  }
 0x1ba   : > { %v926_v34 = vsel %vm18594_vm3, %v13364_v9, %v925_v40  ;;  %213 = vst [vmem:[#allocation2 + $0x40] sm:$0x11] %v212_v52  ;;  %v17024_v9 = vld [vmem:[%s22505_s1 + $0x2f4] ss:$8 sps:$4 sm:$0xff]   ;;  %v17022_v40 = vld [vmem:[%s22505_s1 + $0x2f0] ss:$8 sps:$4 sm:$0xff]  }
 0x1bb   : > { %5592 = vmatpush1.bf16.msra.mxu0 %v17004_v35  ;;  %v19354_v35 = vcombine.low %v882_v54, %v900_v57  ;;  %v17021_v54 = vld [vmem:[%s22505_s1 + $0x2e4] ss:$8 sps:$4 sm:$0xff]   ;;  %v17019_v57 = vld [vmem:[%s22505_s1 + $0x2e0] ss:$8 sps:$4 sm:$0xff]  }
 0x1bc   : > { %5593 = vmatprep.subr.bf16.mxu0 %v17009_v18  ;;  %v19356_v18 = vcombine.high %v926_v34, %v944_v7  ;;  %v17039_v52 = vld [vmem:[%s22505_s1 + $0x344] ss:$8 sps:$4 sm:$0xff]  }
 0x1be   : > { %5543 = vmatmul.mubr.bf16.gmra.mrb[20].mxu0 %v19332_v12 }
 0x1bf   : > { %5594 = vmatpush1.bf16.msra.mxu0 %v17007_v29  ;;  %5552 = vmatprep.mubr.bf16.mxu0 %v19337_v47  ;;  %v19374_v29 = vcombine.low %v926_v34, %v944_v7  ;;  %v17030_v34 = vld [vmem:[%s22505_s1 + $0x314] ss:$8 sps:$4 sm:$0xff]   ;;  %v17028_v7 = vld [vmem:[%s22505_s1 + $0x310] ss:$8 sps:$4 sm:$0xff]  }
 0x1c0   : > { %5595 = vmatprep.subr.bf16.mxu0 %v17012_v17  ;;  %v19378_v17 = vcombine.high %v19246_v0, %v19246_v0 }
 0x1c3   : > { %5596 = vmatpush1.bf16.msra.mxu0 %v17010_v48  ;;  %v17025_v48 = vld [vmem:[%s22505_s1 + $0x300] ss:$8 sps:$4 sm:$0xff]  }
 0x1c4   : > { %5597 = vmatprep.subr.bf16.mxu0 %v17015_v37  ;;  %v19396_v37 = vcombine.low %v19246_v0, %v19246_v0 }
 0x1c6   : > { %5553 = vmatmul.mubr.bf16.gmra.mrb[24].mxu0 %v19354_v35 }
 0x1c7   : > { %5598 = vmatpush1.bf16.msra.mxu0 %v17013_v36  ;;  %5562 = vmatprep.mubr.bf16.mxu0 %v19356_v18  ;;  %v17033_v36 = vld [vmem:[%s22505_s1 + $0x324] ss:$8 sps:$4 sm:$0xff]  }
 0x1c8   : > { %5599 = vmatprep.subr.bf16.mxu0 %v17018_v58  ;;  %v17031_v58 = vld [vmem:[%s22505_s1 + $0x320] ss:$8 sps:$4 sm:$0xff]  }
 0x1cb   : > { %5600 = vmatpush1.bf16.msra.mxu0 %v17016_v16  ;;  %v17037_v16 = vld [vmem:[%s22505_s1 + $0x340] ss:$8 sps:$4 sm:$0xff]  }
 0x1cc   : > { %5601 = vmatprep.subr.bf16.mxu0 %v17021_v54  ;;  %v17040_v54 = vld [vmem:[%s22505_s1 + $0x350] ss:$8 sps:$4 sm:$0xff]  }
 0x1ce   : > { %5563 = vmatmul.mubr.bf16.gmra.mrb[28].mxu0 %v19374_v29 }
 0x1cf   : > { %5602 = vmatpush1.bf16.msra.mxu0 %v17019_v57  ;;  %5605 = vmatprep.mubr.bf16.mxu0 %v19378_v17  ;;  %v17045_v57 = vld [vmem:[%s22505_s1 + $0x364] ss:$8 sps:$4 sm:$0xff]  }
 0x1d0   : > { %5603 = vmatprep.subr.bf16.mxu0 %v17024_v9  ;;  %v17043_v9 = vld [vmem:[%s22505_s1 + $0x360] ss:$8 sps:$4 sm:$0xff]  }
 0x1d3   : > { %5604 = vmatpush1.bf16.msra.mxu0 %v17022_v40  ;;  %v17048_v40 = vld [vmem:[%s22505_s1 + $0x374] ss:$8 sps:$4 sm:$0xff]  }
 0x1d4   : > { %5686 = vmatprep.subr.bf16.mxu0 %v17027_v38  ;;  %v17046_v38 = vld [vmem:[%s22505_s1 + $0x370] ss:$8 sps:$4 sm:$0xff]  }
 0x1d6   : > { %5606 = vmatmul.mubr.bf16.vlgmr.msra.gmra.mrb[0].mxu0 %v19396_v37 }
 0x1d7   : > { %5687 = vmatpush1.bf16.msra.mxu0 %v17025_v48  ;;  %5615 = vmatprep.mubr.bf16.mxu0 %v18008_v15  ;;  %v17034_v15 = vld [vmem:[%s22505_s1 + $0x330] ss:$8 sps:$4 sm:$0xff]   ;;  %v17051_v48 = vld [vmem:[%s22505_s1 + $0x384] ss:$8 sps:$4 sm:$0xff]  }
 0x1d8   : > { %5688 = vmatprep.subr.bf16.mxu0 %v17030_v34  ;;  %v17049_v34 = vld [vmem:[%s22505_s1 + $0x380] ss:$8 sps:$4 sm:$0xff]  }
 0x1db   : > { %5689 = vmatpush1.bf16.msra.mxu0 %v17028_v7  ;;  %v17054_v7 = vld [vmem:[%s22505_s1 + $0x394] ss:$8 sps:$4 sm:$0xff]  }
 0x1dc   : > { %5690 = vmatprep.subr.bf16.mxu0 %v17033_v36  ;;  %v17052_v36 = vld [vmem:[%s22505_s1 + $0x390] ss:$8 sps:$4 sm:$0xff]  }
 0x1de   : > { %5616 = vmatmul.mubr.bf16.gmra.mrb[4].mxu0 %v18125_v49  ;;  %v17042_v49 = vld [vmem:[%s22505_s1 + $0x354] ss:$8 sps:$4 sm:$0xff]  }
 0x1df   : > { %5691 = vmatpush1.bf16.msra.mxu0 %v17031_v58  ;;  %5625 = vmatprep.mubr.bf16.mxu0 %v18132_v51  ;;  %v17057_v58 = vld [vmem:[%s22505_s1 + $0x3a4] ss:$8 sps:$4 sm:$0xff]  }
 0x1e0   : > { %5692 = vmatprep.subr.bf16.mxu0 %v17036_v32  ;;  %v17055_v32 = vld [vmem:[%s22505_s1 + $0x3a0] ss:$8 sps:$4 sm:$0xff]  }
 0x1e3   : > { %5693 = vmatpush1.bf16.msra.mxu0 %v17034_v15  ;;  %v17060_v15 = vld [vmem:[%s22505_s1 + $0x3b4] ss:$8 sps:$4 sm:$0xff]  }
 0x1e4   : > { %5694 = vmatprep.subr.bf16.mxu0 %v17039_v52  ;;  %v17058_v52 = vld [vmem:[%s22505_s1 + $0x3b0] ss:$8 sps:$4 sm:$0xff]  }
 0x1e6   : > { %5626 = vmatmul.mubr.bf16.gmra.mrb[8].mxu0 %v18160_v59 }
 0x1e7   : > { %5695 = vmatpush1.bf16.msra.mxu0 %v17037_v16  ;;  %5635 = vmatprep.mubr.bf16.mxu0 %v18167_v61  ;;  %v17063_v16 = vld [vmem:[%s22505_s1 + $0x3c4] ss:$8 sps:$4 sm:$0xff]  }
 0x1e8   : > { %5696 = vmatprep.subr.bf16.mxu0 %v17042_v49  ;;  %v17061_v49 = vld [vmem:[%s22505_s1 + $0x3c0] ss:$8 sps:$4 sm:$0xff]  }
 0x1eb   : > { %5697 = vmatpush1.bf16.msra.mxu0 %v17040_v54  ;;  %v17066_v54 = vld [vmem:[%s22505_s1 + $0x3d4] ss:$8 sps:$4 sm:$0xff]  }
 0x1ec   : > { %5698 = vmatprep.subr.bf16.mxu0 %v17045_v57  ;;  %v214_v57 = vld [vmem:[#allocation2 + $0x48] sm:$0x11] }
 0x1ee   : > { %5636 = vmatmul.mubr.bf16.gmra.mrb[12].mxu0 %v18195_v8 }
 0x1ef   : > { %5699 = vmatpush1.bf16.msra.mxu0 %v17043_v9  ;;  %5645 = vmatprep.mubr.bf16.mxu0 %v18201_v11  ;;  %v215_v9 = vsel %vm18171_vm6, 0, %v214_v57  ;;  %v17093_v57 = vld [vmem:[%s22505_s1 + $0x464] ss:$8 sps:$4 sm:$0xff]  }
 0x1f0   : > { %5700 = vmatprep.subr.bf16.mxu0 %v17048_v40  ;;  %216 = vst [vmem:[#allocation2 + $0x48] sm:$0x11] %v215_v9  ;;  %v17064_v40 = vld [vmem:[%s22505_s1 + $0x3d0] ss:$8 sps:$4 sm:$0xff]   ;;  %v17091_v9 = vld [vmem:[%s22505_s1 + $0x460] ss:$8 sps:$4 sm:$0xff]  }
 0x1f3   : > { %5701 = vmatpush1.bf16.msra.mxu0 %v17046_v38  ;;  %v17069_v38 = vld [vmem:[%s22505_s1 + $0x3e4] ss:$8 sps:$4 sm:$0xff]  }
 0x1f4   : > { %5702 = vmatprep.subr.bf16.mxu0 %v17051_v48  ;;  %v17067_v48 = vld [vmem:[%s22505_s1 + $0x3e0] ss:$8 sps:$4 sm:$0xff]  }
 0x1f6   : > { %5646 = vmatmul.mubr.bf16.gmra.mrb[16].mxu0 %v18220_v19 }
 0x1f7   : > { %5703 = vmatpush1.bf16.msra.mxu0 %v17049_v34  ;;  %5655 = vmatprep.mubr.bf16.mxu0 %v18227_v21  ;;  %v17072_v34 = vld [vmem:[%s22505_s1 + $0x3f4] ss:$8 sps:$4 sm:$0xff]  }
 0x1f8   : > { %5704 = vmatprep.subr.bf16.mxu0 %v17054_v7  ;;  %v17070_v7 = vld [vmem:[%s22505_s1 + $0x3f0] ss:$8 sps:$4 sm:$0xff]  }
 0x1fb   : > { %5705 = vmatpush1.bf16.msra.mxu0 %v17052_v36  ;;  %v17075_v36 = vld [vmem:[%s22505_s1 + $0x404] ss:$8 sps:$4 sm:$0xff]  }
 0x1fc   : > { %5706 = vmatprep.subr.bf16.mxu0 %v17057_v58  ;;  %v17073_v58 = vld [vmem:[%s22505_s1 + $0x400] ss:$8 sps:$4 sm:$0xff]  }
 0x1fe   : > { %5656 = vmatmul.mubr.bf16.gmra.mrb[20].mxu0 %v18247_v31 }
 0x1ff   : > { %5707 = vmatpush1.bf16.msra.mxu0 %v17055_v32  ;;  %5665 = vmatprep.mubr.bf16.mxu0 %v18251_v33  ;;  %v17078_v32 = vld [vmem:[%s22505_s1 + $0x414] ss:$8 sps:$4 sm:$0xff]  }
 0x200   : > { %5708 = vmatprep.subr.bf16.mxu0 %v17060_v15  ;;  %v17081_v15 = vld [vmem:[%s22505_s1 + $0x424] ss:$8 sps:$4 sm:$0xff]  }
 0x203   : > { %5709 = vmatpush1.bf16.msra.mxu0 %v17058_v52  ;;  %v17079_v52 = vld [vmem:[%s22505_s1 + $0x420] ss:$8 sps:$4 sm:$0xff]  }
 0x204   : > { %5710 = vmatprep.subr.bf16.mxu0 %v17063_v16  ;;  %v17087_v16 = vld [vmem:[%s22505_s1 + $0x444] ss:$8 sps:$4 sm:$0xff]  }
 0x206   : > { %5666 = vmatmul.mubr.bf16.gmra.mrb[24].mxu0 %v18271_v43 }
 0x207   : > { %5711 = vmatpush1.bf16.msra.mxu0 %v17061_v49  ;;  %5675 = vmatprep.mubr.bf16.mxu0 %v18275_v44  ;;  %v17085_v49 = vld [vmem:[%s22505_s1 + $0x440] ss:$8 sps:$4 sm:$0xff]  }
 0x208   : > { %5712 = vmatprep.subr.bf16.mxu0 %v17066_v54  ;;  %v17088_v54 = vld [vmem:[%s22505_s1 + $0x450] ss:$8 sps:$4 sm:$0xff]  }
 0x20b   : > { %5713 = vmatpush1.bf16.msra.mxu0 %v17064_v40  ;;  %v17096_v40 = vld [vmem:[%s22505_s1 + $0x474] ss:$8 sps:$4 sm:$0xff]  }
 0x20c   : > { %5714 = vmatprep.subr.bf16.mxu0 %v17069_v38  ;;  %v17094_v38 = vld [vmem:[%s22505_s1 + $0x470] ss:$8 sps:$4 sm:$0xff]  }
 0x20e   : > { %5676 = vmatmul.mubr.bf16.gmra.mrb[28].mxu0 %v18295_v56 }
 0x20f   : > { %5715 = vmatpush1.bf16.msra.mxu0 %v17067_v48  ;;  %5718 = vmatprep.mubr.bf16.mxu0 %v19378_v17  ;;  %v17076_v17 = vld [vmem:[%s22505_s1 + $0x410] ss:$8 sps:$4 sm:$0xff]   ;;  %v17099_v48 = vld [vmem:[%s22505_s1 + $0x484] ss:$8 sps:$4 sm:$0xff]  }
 0x210   : > { %5716 = vmatprep.subr.bf16.mxu0 %v17072_v34  ;;  %v17097_v34 = vld [vmem:[%s22505_s1 + $0x480] ss:$8 sps:$4 sm:$0xff]  }
 0x213   : > { %5717 = vmatpush1.bf16.msra.mxu0 %v17070_v7  ;;  %v17102_v7 = vld [vmem:[%s22505_s1 + $0x494] ss:$8 sps:$4 sm:$0xff]  }
 0x214   : > { %5799 = vmatprep.subr.bf16.mxu0 %v17075_v36  ;;  %v17100_v36 = vld [vmem:[%s22505_s1 + $0x490] ss:$8 sps:$4 sm:$0xff]  }
 0x216   : > { %5719 = vmatmul.mubr.bf16.vlgmr.msra.gmra.mrb[0].mxu0 %v19396_v37  ;;  %v17084_v37 = vld [vmem:[%s22505_s1 + $0x434] ss:$8 sps:$4 sm:$0xff]  }
 0x217   : > { %5800 = vmatpush1.bf16.msra.mxu0 %v17073_v58  ;;  %5728 = vmatprep.mubr.bf16.mxu0 %v18323_v5  ;;  %v17082_v5 = vld [vmem:[%s22505_s1 + $0x430] ss:$8 sps:$4 sm:$0xff]   ;;  %v17105_v58 = vld [vmem:[%s22505_s1 + $0x4a4] ss:$8 sps:$4 sm:$0xff]  }
 0x218   : > { %5801 = vmatprep.subr.bf16.mxu0 %v17078_v32  ;;  %v17103_v32 = vld [vmem:[%s22505_s1 + $0x4a0] ss:$8 sps:$4 sm:$0xff]  }
 0x21b   : > { %5802 = vmatpush1.bf16.msra.mxu0 %v17076_v17  ;;  %v17108_v17 = vld [vmem:[%s22505_s1 + $0x4b4] ss:$8 sps:$4 sm:$0xff]  }
 0x21c   : > { %5803 = vmatprep.subr.bf16.mxu0 %v17081_v15  ;;  %v22691_v15 = vshrl.u32 %v19246_v0, 16 }
 0x21e   : > { %5729 = vmatmul.mubr.bf16.gmra.mrb[4].mxu0 %v18343_v13  ;;  %v17090_v13 = vld [vmem:[%s22505_s1 + $0x454] ss:$8 sps:$4 sm:$0xff]  }
 0x21f   : > { %5804 = vmatpush1.bf16.msra.mxu0 %v17079_v52  ;;  %5738 = vmatprep.mubr.bf16.mxu0 %v18347_v14  ;;  %v1579_v52 = vrot.slane %v22691_v15, 4  ;;  %v17118_v15 = vld [vmem:[%s22505_s1 + $0x4f0] ss:$8 sps:$4 sm:$0xff]  }
 0x220   : > { %5805 = vmatprep.subr.bf16.mxu0 %v17084_v37  ;;  %v22692_v37 = vshll.u32 %v19246_v0, 16  ;;  %v17109_v0 = vld [vmem:[%s22505_s1 + $0x4c0] ss:$8 sps:$4 sm:$0xff]  }
 0x223   : > { %5806 = vmatpush1.bf16.msra.mxu0 %v17082_v5  ;;  %v1582_v5 = vrot.slane %v22692_v37, 5 }
 0x224   : > { %5807 = vmatprep.subr.bf16.mxu0 %v17087_v16  ;;  %v1517_v16 = vld [vmem:[#allocation2 + $0x40] sm:$0x11] }
 0x226   : > { %5739 = vmatmul.mubr.bf16.gmra.mrb[8].mxu0 %v18369_v22 }
 0x227   : > { %5808 = vmatpush1.bf16.msra.mxu0 %v17085_v49  ;;  %5748 = vmatprep.mubr.bf16.mxu0 %v18373_v26  ;;  %v17106_v49 = vld [vmem:[%s22505_s1 + $0x4b0] ss:$8 sps:$4 sm:$0xff]  }
 0x228   : > { %5809 = vmatprep.subr.bf16.mxu0 %v17090_v13  ;;  %v17111_v13 = vld [vmem:[%s22505_s1 + $0x4c4] ss:$8 sps:$4 sm:$0xff]  }
 0x22b   : > { %5810 = vmatpush1.bf16.msra.mxu0 %v17088_v54  ;;  %v1583_v54 = vor.u32 %v1582_v5, %v1579_v52  ;;  %v17123_v52 = vld [vmem:[%s22505_s1 + $0x504] ss:$8 sps:$4 sm:$0xff]  }
 0x22c   : > { %5811 = vmatprep.subr.bf16.mxu0 %v17093_v57  ;;  %v1610_v57 = vshll.u32 %v1517_v16, 16  ;;  %v17126_v16 = vld [vmem:[%s22505_s1 + $0x514] ss:$8 sps:$4 sm:$0xff]  }
 0x22e   : > { %5749 = vmatmul.mubr.bf16.gmra.mrb[12].mxu0 %v18393_v25 }
 0x22f   : > { %5812 = vmatpush1.bf16.msra.mxu0 %v17091_v9  ;;  %5758 = vmatprep.mubr.bf16.mxu0 %v18397_v39  ;;  %v17114_v9 = vld [vmem:[%s22505_s1 + $0x4d4] ss:$8 sps:$4 sm:$0xff]  }
 0x230   : > { %5813 = vmatprep.subr.bf16.mxu0 %v17096_v40  ;;  %v19603_v40 = vrot.slane %v1583_v54, 4  ;;  %v17127_v54 = vld [vmem:[%s22505_s1 + $0x520] ss:$8 sps:$4 sm:$0xff]  }
 0x233   : > { %5814 = vmatpush1.bf16.msra.mxu0 %v17094_v38  ;;  %v1612_v38 = vrot.slane %v1610_v57, 5  ;;  %v17132_v57 = vld [vmem:[%s22505_s1 + $0x534] ss:$8 sps:$4 sm:$0xff]  }
 0x234   : > { %5815 = vmatprep.subr.bf16.mxu0 %v17099_v48  ;;  %v17112_v48 = vld [vmem:[%s22505_s1 + $0x4d0] ss:$8 sps:$4 sm:$0xff]  }
 0x236   : > { %5759 = vmatmul.mubr.bf16.gmra.mrb[16].mxu0 %v18417_v53 }
 0x237   : > { %5816 = vmatpush1.bf16.msra.mxu0 %v17097_v34  ;;  %5768 = vmatprep.mubr.bf16.mxu0 %v18421_v55  ;;  %v17117_v34 = vld [vmem:[%s22505_s1 + $0x4e4] ss:$8 sps:$4 sm:$0xff]  }
 0x238   : > { %5817 = vmatprep.subr.bf16.mxu0 %v17102_v7  ;;  %v19616_v7 = vsel %vm18508_vm9, %v19603_v40, %v1582_v5  ;;  %v17121_v5 = vld [vmem:[%s22505_s1 + $0x500] ss:$8 sps:$4 sm:$0xff]  }
 0x23b   : > { %5818 = vmatpush1.bf16.msra.mxu0 %v17100_v36  ;;  %v1613_v36 = vsel %vm18508_vm9, %v19603_v40, %v1612_v38  ;;  %v17136_v38 = vld [vmem:[%s22505_s1 + $0x550] ss:$8 sps:$4 sm:$0xff]  }
 0x23c   : > { %5819 = vmatprep.subr.bf16.mxu0 %v17105_v58  ;;  %v17115_v58 = vld [vmem:[%s22505_s1 + $0x4e0] ss:$8 sps:$4 sm:$0xff]   ;;  %v13449_v37 = vcombine.low %v19616_v7, %v1613_v36 }
 0x23e   : > { %5769 = vmatmul.mubr.bf16.gmra.mrb[20].mxu0 %v18441_v3 }
 0x23f   : > { %5820 = vmatpush1.bf16.msra.mxu0 %v17103_v32  ;;  %5778 = vmatprep.mubr.bf16.mxu0 %v18445_v6  ;;  %v13450_v32 = vcombine.high %v19616_v7, %v1613_v36  ;;  %v17139_v36 = vld [vmem:[%s22505_s1 + $0x560] ss:$8 sps:$4 sm:$0xff]  }
 0x240   : > { %5821 = vmatprep.subr.bf16.mxu0 %v17108_v17  ;;  %v17120_v17 = vld [vmem:[%s22505_s1 + $0x4f4] ss:$8 sps:$4 sm:$0xff]  }
 0x243   : > { %5822 = vmatpush1.bf16.msra.mxu0 %v17106_v49  ;;  %v17124_v49 = vld [vmem:[%s22505_s1 + $0x510] ss:$8 sps:$4 sm:$0xff]  }
 0x244   : > { %5823 = vmatprep.subr.bf16.mxu0 %v17111_v13  ;;  %v17129_v13 = vld [vmem:[%s22505_s1 + $0x524] ss:$8 sps:$4 sm:$0xff]  }
 0x246   : > { %5779 = vmatmul.mubr.bf16.gmra.mrb[24].mxu0 %v18467_v23 }
 0x247   : > { %5824 = vmatpush1.bf16.msra.mxu0 %v17109_v0  ;;  %5788 = vmatprep.mubr.bf16.mxu0 %v18471_v27  ;;  %v17135_v0 = vld [vmem:[%s22505_s1 + $0x544] ss:$8 sps:$4 sm:$0xff]  }
 0x248   : > { %5825 = vmatprep.subr.bf16.mxu0 %v17114_v9  ;;  %v17133_v9 = vld [vmem:[%s22505_s1 + $0x540] ss:$8 sps:$4 sm:$0xff]  }
 0x24b   : > { %5826 = vmatpush1.bf16.msra.mxu0 %v17112_v48  ;;  %v22693_v48 = vld [vmem:[#allocation19_spill] sm:$0xff] }
 0x24c   : > { %5827 = vmatprep.subr.bf16.mxu0 %v17117_v34  ;;  %v17141_v34 = vld [vmem:[%s22505_s1 + $0x564] ss:$8 sps:$4 sm:$0xff]  }
 0x24e   : > { %5789 = vmatmul.mubr.bf16.gmra.mrb[28].mxu0 %v18498_v1 }
 0x24f   : > { %5828 = vmatpush1.bf16.msra.mxu0 %v17115_v58  ;;  %5831 = vmatprep.mubr.bf16.mxu0 %v13450_v32  ;;  %v17144_v58 = vld [vmem:[%s22505_s1 + $0x574] ss:$8 sps:$4 sm:$0xff]  }
 0x250   : > { %5829 = vmatprep.subr.bf16.mxu0 %v17120_v17  ;;  %v22694_v32 = vld [vmem:[#allocation21_spill] sm:$0xff] }
 0x251   : > { %v17142_v17 = vld [vmem:[%s22505_s1 + $0x570] ss:$8 sps:$4 sm:$0xff]  }
 0x253   : > { %5830 = vmatpush1.bf16.msra.mxu0 %v17118_v15  ;;  %v22695_v15 = vld [vmem:[#allocation22_spill] sm:$0xff] }
 0x254   : > { %5912 = vmatprep.subr.bf16.mxu0 %v17123_v52  ;;  %v17147_v52 = vld [vmem:[%s22505_s1 + $0x584] ss:$8 sps:$4 sm:$0xff]  }
 0x256   : > { %5832 = vmatmul.mubr.bf16.vlgmr.msra.gmra.mrb[0].mxu0 %v13449_v37  ;;  %v17145_v37 = vld [vmem:[%s22505_s1 + $0x580] ss:$8 sps:$4 sm:$0xff]  }
 0x257   : > { %5913 = vmatpush1.bf16.msra.mxu0 %v17121_v5  ;;  %5841 = vmatprep.mubr.bf16.mxu0 %v18535_v63  ;;  %v17130_v63 = vld [vmem:[%s22505_s1 + $0x530] ss:$8 sps:$4 sm:$0xff]   ;;  %v17150_v5 = vld [vmem:[%s22505_s1 + $0x594] ss:$8 sps:$4 sm:$0xff]  }
 0x258   : > { %5914 = vmatprep.subr.bf16.mxu0 %v17126_v16  ;;  %v282_v16 = vld [vmem:[#allocation2 + $0x290] sm:$0x88] }
 0x25b   : > { %5915 = vmatpush1.bf16.msra.mxu0 %v17124_v49  ;;  %v283_v49 = vsel %vm18546_vm0, 0, %v282_v16  ;;  %v22700_v16 = vld [vmem:[#allocation27_spill] sm:$0xff] }
 0x25c   : > { %5916 = vmatprep.subr.bf16.mxu0 %v17129_v13  ;;  %v22696_v13 = vld [vmem:[#allocation23_spill] sm:$0xff]  ;;  %284 = vst [vmem:[#allocation2 + $0x290] sm:$0x88] %v283_v49 }
 0x25d   : > { %v17160_v49 = vld [vmem:[%s22505_s1 + $0x5d0] ss:$8 sps:$4 sm:$0xff]  }
 0x25e   : > { %5842 = vmatmul.mubr.bf16.gmra.mrb[4].mxu0 %v18569_v28  ;;  %v17138_v28 = vld [vmem:[%s22505_s1 + $0x554] ss:$8 sps:$4 sm:$0xff]  }
 0x25f   : > { %5917 = vmatpush1.bf16.msra.mxu0 %v17127_v54  ;;  %5851 = vmatprep.mubr.bf16.mxu0 %v18574_v30  ;;  %v17148_v54 = vld [vmem:[%s22505_s1 + $0x590] ss:$8 sps:$4 sm:$0xff]  }
 0x260   : > { %5918 = vmatprep.subr.bf16.mxu0 %v17132_v57  ;;  %v22697_v57 = vld [vmem:[#allocation24_spill] sm:$0xff]  ;;  %v22725_v30 = vld [vmem:[#allocation57_spill] sm:$0xff] }
 0x263   : > { %5919 = vmatpush1.bf16.msra.mxu0 %v17130_v63  ;;  %v17153_v63 = vld [vmem:[%s22505_s1 + $0x5a4] ss:$8 sps:$4 sm:$0xff]  }
 0x264   : > { %5920 = vmatprep.subr.bf16.mxu0 %v17135_v0  ;;  %v17151_v0 = vld [vmem:[%s22505_s1 + $0x5a0] ss:$8 sps:$4 sm:$0xff]  }
 0x266   : > { %5852 = vmatmul.mubr.bf16.gmra.mrb[8].mxu0 %v18607_v4  ;;  %v585_v4 = vld [vmem:[#allocation2 + $0x2e0] sm:$0x88] }
 0x267   : > { %5921 = vmatpush1.bf16.msra.mxu0 %v17133_v9  ;;  %5861 = vmatprep.mubr.bf16.mxu0 %v22693_v48  ;;  %v17156_v9 = vld [vmem:[%s22505_s1 + $0x5b4] ss:$8 sps:$4 sm:$0xff]  }
 0x268   : > { %5922 = vmatprep.subr.bf16.mxu0 %v17138_v28  ;;  %v1518_v28 = vld [vmem:[#allocation2 + $0x48] sm:$0x11] }
 0x26b   : > { %5923 = vmatpush1.bf16.msra.mxu0 %v17136_v38  ;;  %v22698_v38 = vld [vmem:[#allocation25_spill] sm:$0xff] }
 0x26c   : > { %5924 = vmatprep.subr.bf16.mxu0 %v17141_v34  ;;  %v17154_v34 = vld [vmem:[%s22505_s1 + $0x5b0] ss:$8 sps:$4 sm:$0xff]  }
 0x26e   : > { %5862 = vmatmul.mubr.bf16.gmra.mrb[12].mxu0 %v22694_v32 }
 0x26f   : > { %5925 = vmatpush1.bf16.msra.mxu0 %v17139_v36  ;;  %5871 = vmatprep.mubr.bf16.mxu0 %v22695_v15  ;;  %v22699_v36 = vld [vmem:[#allocation26_spill] sm:$0xff] }
 0x270   : > { %5926 = vmatprep.subr.bf16.mxu0 %v17144_v58  ;;  %v17159_v58 = vld [vmem:[%s22505_s1 + $0x5c4] ss:$8 sps:$4 sm:$0xff]  }
 0x273   : > { %5927 = vmatpush1.bf16.msra.mxu0 %v17142_v17  ;;  %v1620_v17 = vshll.u32 %v1518_v28, 16 }
 0x274   : > { %5928 = vmatprep.subr.bf16.mxu0 %v17147_v52  ;;  %v17157_v52 = vld [vmem:[%s22505_s1 + $0x5c0] ss:$8 sps:$4 sm:$0xff]  }
 0x276   : > { %5872 = vmatmul.mubr.bf16.gmra.mrb[16].mxu0 %v22696_v13 }
 0x277   : > { %5929 = vmatpush1.bf16.msra.mxu0 %v17145_v37  ;;  %5881 = vmatprep.mubr.bf16.mxu0 %v22697_v57  ;;  %v17162_v37 = vld [vmem:[%s22505_s1 + $0x5d4] ss:$8 sps:$4 sm:$0xff]  }
 0x278   : > { %5930 = vmatprep.subr.bf16.mxu0 %v17150_v5  ;;  %v1622_v5 = vrot.slane %v1620_v17, 5  ;;  %v17166_v17 = vld [vmem:[%s22505_s1 + $0x5f0] ss:$8 sps:$4 sm:$0xff]  }
 0x27b   : > { %5931 = vmatpush1.bf16.msra.mxu0 %v17148_v54  ;;  %v22701_v54 = vld [vmem:[#allocation28_spill] sm:$0xff] }
 0x27c   : > { %5932 = vmatprep.subr.bf16.mxu0 %v17153_v63  ;;  %v17165_v63 = vld [vmem:[%s22505_s1 + $0x5e4] ss:$8 sps:$4 sm:$0xff]  }
 0x27e   : > { %5882 = vmatmul.mubr.bf16.gmra.mrb[20].mxu0 %v22698_v38  ;;  %v22723_v38 = vld [vmem:[#allocation56_spill] sm:$0xff] }
 0x27f   : > { %5933 = vmatpush1.bf16.msra.mxu0 %v17151_v0  ;;  %5891 = vmatprep.mubr.bf16.mxu0 %v22699_v36  ;;  %v1623_v0 = vsel %vm18508_vm9, %v19603_v40, %v1622_v5  ;;  %v17171_v40 = vld [vmem:[%s22505_s1 + $0xc04] ss:$8 sps:$4 sm:$0xff]   ;;  %v17174_v5 = vld [vmem:[%s22505_s1 + $0xc14] ss:$8 sps:$4 sm:$0xff]  }
 0x280   : > { %5934 = vmatprep.subr.bf16.mxu0 %v17156_v9  ;;  %v17163_v9 = vld [vmem:[%s22505_s1 + $0x5e0] ss:$8 sps:$4 sm:$0xff]   ;;  %v13452_v28 = vcombine.high %v19616_v7, %v1623_v0 }
 0x281   : > { %v22722_v36 = vld [vmem:[#allocation55_spill] sm:$0xff] }
 0x283   : > { %5935 = vmatpush1.bf16.msra.mxu0 %v17154_v34  ;;  %v17168_v34 = vld [vmem:[%s22505_s1 + $0x5f4] ss:$8 sps:$4 sm:$0xff]  }
 0x284   : > { %5936 = vmatprep.subr.bf16.mxu0 %v17159_v58  ;;  %v22702_v58 = vld [vmem:[#allocation29_spill] sm:$0xff] }
 0x286   : > { %5892 = vmatmul.mubr.bf16.gmra.mrb[24].mxu0 %v22700_v16 }
 0x287   : > { %5937 = vmatpush1.bf16.msra.mxu0 %v17157_v52  ;;  %5901 = vmatprep.mubr.bf16.mxu0 %v22701_v54  ;;  %v13451_v52 = vcombine.low %v19616_v7, %v1623_v0  ;;  %v17177_v7 = vld [vmem:[%s22505_s1 + $0xc24] ss:$8 sps:$4 sm:$0xff]   ;;  %v17175_v0 = vld [vmem:[%s22505_s1 + $0xc20] ss:$8 sps:$4 sm:$0xff]  }
 0x288   : > { %5938 = vmatprep.subr.bf16.mxu0 %v17162_v37  ;;  %v17169_v37 = vld [vmem:[%s22505_s1 + $0xc00] ss:$8 sps:$4 sm:$0xff]  }
 0x289   : > { %v19956_v54 = vld [vmem:[#allocation2 + $0x80] sm:$0xff] }
 0x28a   : > { %v22724_v15 = vshrl.u32 %v19956_v54, 16  ;;  %v22604_v48 = vshll.u32 %v19956_v54, 16 }
 0x28b   : > { %5939 = vmatpush1.bf16.msra.mxu0 %v17160_v49  ;;  %v17172_v49 = vld [vmem:[%s22505_s1 + $0xc10] ss:$8 sps:$4 sm:$0xff]  }
 0x28c   : > { %5940 = vmatprep.subr.bf16.mxu0 %v17165_v63  ;;  %v22703_v63 = vld [vmem:[#allocation32_spill] sm:$0xff]  ;;  %v975_v32 = vrot.slane %v22724_v15, 7 }
 0x28d   : > { %v17246_v15 = vld [vmem:[%s22505_s1 + $0xd94] ss:$8 sps:$4 sm:$0xff]  }
 0x28e   : > { %5902 = vmatmul.mubr.bf16.gmra.mrb[28].mxu0 %v22702_v58 }
 0x28f   : > { %5941 = vmatpush1.bf16.msra.mxu0 %v17163_v9  ;;  %5944 = vmatprep.mubr.bf16.mxu0 %v13452_v28  ;;  %v17180_v9 = vld [vmem:[%s22505_s1 + $0xc34] ss:$8 sps:$4 sm:$0xff]  }
 0x290   : > { %5942 = vmatprep.subr.bf16.mxu0 %v17168_v34  ;;  %v22704_v28 = vld [vmem:[#allocation33_spill] sm:$0xff] }
 0x291   : > { %v17178_v34 = vld [vmem:[%s22505_s1 + $0xc30] ss:$8 sps:$4 sm:$0xff]  }
 0x293   : > { %5943 = vmatpush1.bf16.msra.mxu0 %v17166_v17  ;;  %v22705_v17 = vld [vmem:[#allocation34_spill] sm:$0xff] }
 0x294   : > { %7274 = vmatprep.subr.bf16.mxu0 %v17171_v40  ;;  %v17183_v40 = vld [vmem:[%s22505_s1 + $0xc44] ss:$8 sps:$4 sm:$0xff]  }
 0x296   : > { %5945 = vmatmul.mubr.bf16.vlgmr.msra.gmra.mrb[0].mxu0 %v13451_v52  ;;  %v17181_v52 = vld [vmem:[%s22505_s1 + $0xc40] ss:$8 sps:$4 sm:$0xff]  }
 0x297   : > { %7275 = vmatpush1.bf16.msra.mxu0 %v17169_v37  ;;  %5954 = vmatprep.mubr.bf16.mxu0 %v22703_v63  ;;  %v17186_v37 = vld [vmem:[%s22505_s1 + $0xc54] ss:$8 sps:$4 sm:$0xff]  }
 0x298   : > { %7276 = vmatprep.subr.bf16.mxu0 %v17174_v5  ;;  %v22706_v5 = vld [vmem:[#allocation35_spill] sm:$0xff]  ;;  %v22707_v63 = vld [vmem:[#allocation36_spill] sm:$0xff] }
 0x29b   : > { %7277 = vmatpush1.bf16.msra.mxu0 %v17172_v49  ;;  %v17184_v49 = vld [vmem:[%s22505_s1 + $0xc50] ss:$8 sps:$4 sm:$0xff]  }
 0x29c   : > { %7278 = vmatprep.subr.bf16.mxu0 %v17177_v7  ;;  %v17189_v7 = vld [vmem:[%s22505_s1 + $0xc64] ss:$8 sps:$4 sm:$0xff]  }
 0x29e   : > { %5955 = vmatmul.mubr.bf16.gmra.mrb[4].mxu0 %v22704_v28  ;;  %v22708_v28 = vld [vmem:[#allocation37_spill] sm:$0xff] }
 0x29f   : > { %7279 = vmatpush1.bf16.msra.mxu0 %v17175_v0  ;;  %5964 = vmatprep.mubr.bf16.mxu0 %v22705_v17  ;;  %v17187_v0 = vld [vmem:[%s22505_s1 + $0xc60] ss:$8 sps:$4 sm:$0xff]   ;;  %v17349_v17 = vld [vmem:[%s22505_s1 + $0x664] ss:$8 sps:$4 sm:$0xff]  }
 0x2a0   : > { %7280 = vmatprep.subr.bf16.mxu0 %v17180_v9  ;;  %v17192_v9 = vld [vmem:[%s22505_s1 + $0xc74] ss:$8 sps:$4 sm:$0xff]  }
 0x2a3   : > { %7281 = vmatpush1.bf16.msra.mxu0 %v17178_v34  ;;  %v17190_v34 = vld [vmem:[%s22505_s1 + $0xc70] ss:$8 sps:$4 sm:$0xff]  }
 0x2a4   : > { %7282 = vmatprep.subr.bf16.mxu0 %v17183_v40  ;;  %v22709_v40 = vld [vmem:[#allocation38_spill] sm:$0xff] }
 0x2a6   : > { %5965 = vmatmul.mubr.bf16.gmra.mrb[8].mxu0 %v22706_v5  ;;  %v581_v5 = vld [vmem:[#allocation2 + $0x2a0] sm:$0xff] }
 0x2a7   : > { %7283 = vmatpush1.bf16.msra.mxu0 %v17181_v52  ;;  %5974 = vmatprep.mubr.bf16.mxu0 %v22707_v63  ;;  %v17195_v52 = vld [vmem:[%s22505_s1 + $0xc84] ss:$8 sps:$4 sm:$0xff]   ;;  %v17229_v63 = vld [vmem:[%s22505_s1 + $0xd40] ss:$8 sps:$4 sm:$0xff]   ;;  %v951_v58 = vshrl.u32 %v581_v5, 16  ;;  %v954_v13 = vshll.u32 %v581_v5, 16 }
 0x2a8   : > { %7284 = vmatprep.subr.bf16.mxu0 %v17186_v37  ;;  %v17193_v37 = vld [vmem:[%s22505_s1 + $0xc80] ss:$8 sps:$4 sm:$0xff]  }
 0x2a9   : > { %v953_v16 = vrot.slane %v951_v58, 7  ;;  %v17241_v58 = vld [vmem:[%s22505_s1 + $0xd80] ss:$8 sps:$4 sm:$0xff]  }
 0x2ab   : > { %7285 = vmatpush1.bf16.msra.mxu0 %v17184_v49  ;;  %v17198_v49 = vld [vmem:[%s22505_s1 + $0xc94] ss:$8 sps:$4 sm:$0xff]  }
 0x2ac   : > { %7286 = vmatprep.subr.bf16.mxu0 %v17189_v7  ;;  %v285_v7 = vld [vmem:[#allocation2 + $0x298] sm:$0x88] }
 0x2ae   : > { %5975 = vmatmul.mubr.bf16.gmra.mrb[12].mxu0 %v22708_v28  ;;  %v17337_v28 = vld [vmem:[%s22505_s1 + $0x644] ss:$8 sps:$4 sm:$0xff]  }
 0x2af   : > { %7287 = vmatpush1.bf16.msra.mxu0 %v17187_v0  ;;  %5984 = vmatprep.mubr.bf16.mxu0 %v22709_v40  ;;  %v286_v0 = vsel %vm18546_vm0, 0, %v285_v7  ;;  %v17199_v7 = vld [vmem:[%s22505_s1 + $0xca0] ss:$8 sps:$4 sm:$0xff]  }
 0x2b0   : > { %7288 = vmatprep.subr.bf16.mxu0 %v17192_v9  ;;  %287 = vst [vmem:[#allocation2 + $0x298] sm:$0x88] %v286_v0  ;;  %v17196_v9 = vld [vmem:[%s22505_s1 + $0xc90] ss:$8 sps:$4 sm:$0xff]   ;;  %v22711_v0 = vld [vmem:[#allocation42_spill] sm:$0xff] }
 0x2b1   : > { %v17223_v40 = vld [vmem:[%s22505_s1 + $0xd20] ss:$8 sps:$4 sm:$0xff]  }
 0x2b3   : > { %7289 = vmatpush1.bf16.msra.mxu0 %v17190_v34  ;;  %v22710_v34 = vld [vmem:[#allocation40_spill] sm:$0xff] }
 0x2b4   : > { %7290 = vmatprep.subr.bf16.mxu0 %v17195_v52  ;;  %v17201_v52 = vld [vmem:[%s22505_s1 + $0xca4] ss:$8 sps:$4 sm:$0xff]  }
 0x2b6   : > { %5985 = vmatmul.mubr.bf16.gmra.mrb[16].mxu0 %v18878_v20  ;;  %v17325_v20 = vld [vmem:[%s22505_s1 + $0x624] ss:$8 sps:$4 sm:$0xff]  }
 0x2b7   : > { %7291 = vmatpush1.bf16.msra.mxu0 %v17193_v37  ;;  %5994 = vmatprep.mubr.bf16.mxu0 %v22710_v34  ;;  %v17204_v37 = vld [vmem:[%s22505_s1 + $0xcb4] ss:$8 sps:$4 sm:$0xff]  }
 0x2b8   : > { %7292 = vmatprep.subr.bf16.mxu0 %v17198_v49  ;;  %v17202_v49 = vld [vmem:[%s22505_s1 + $0xcb0] ss:$8 sps:$4 sm:$0xff]  }
 0x2b9   : > { %v22716_v34 = vld [vmem:[#allocation49_spill] sm:$0xff] }
 0x2bb   : > { %7293 = vmatpush1.bf16.msra.mxu0 %v17196_v9  ;;  %v17207_v9 = vld [vmem:[%s22505_s1 + $0xcc4] ss:$8 sps:$4 sm:$0xff]  }
 0x2bc   : > { %7294 = vmatprep.subr.bf16.mxu0 %v17201_v52  ;;  %v17205_v52 = vld [vmem:[%s22505_s1 + $0xcc0] ss:$8 sps:$4 sm:$0xff]  }
 0x2be   : > { %5995 = vmatmul.mubr.bf16.gmra.mrb[20].mxu0 %v18904_v41  ;;  %v17319_v41 = vld [vmem:[%s22505_s1 + $0x614] ss:$8 sps:$4 sm:$0xff]  }
 0x2bf   : > { %7295 = vmatpush1.bf16.msra.mxu0 %v17199_v7  ;;  %6004 = vmatprep.mubr.bf16.mxu0 %v22711_v0  ;;  %v17210_v7 = vld [vmem:[%s22505_s1 + $0xcd4] ss:$8 sps:$4 sm:$0xff]  }
 0x2c0   : > { %7296 = vmatprep.subr.bf16.mxu0 %v17204_v37  ;;  %v17208_v37 = vld [vmem:[%s22505_s1 + $0xcd0] ss:$8 sps:$4 sm:$0xff]  }
 0x2c1   : > { %v22713_v0 = vld [vmem:[#allocation44_spill] sm:$0xff] }
 0x2c3   : > { %7297 = vmatpush1.bf16.msra.mxu0 %v17202_v49  ;;  %v17213_v49 = vld [vmem:[%s22505_s1 + $0xce4] ss:$8 sps:$4 sm:$0xff]  }
 0x2c4   : > { %7298 = vmatprep.subr.bf16.mxu0 %v17207_v9  ;;  %v17211_v9 = vld [vmem:[%s22505_s1 + $0xce0] ss:$8 sps:$4 sm:$0xff]  }
 0x2c6   : > { %6005 = vmatmul.mubr.bf16.gmra.mrb[24].mxu0 %v22712_v45  ;;  %v22714_v45 = vld [vmem:[#allocation45_spill] sm:$0xff] }
 0x2c7   : > { %7299 = vmatpush1.bf16.msra.mxu0 %v17205_v52  ;;  %6014 = vmatprep.mubr.bf16.mxu0 %v22713_v0  ;;  %v17216_v52 = vld [vmem:[%s22505_s1 + $0xcf4] ss:$8 sps:$4 sm:$0xff]  }
 0x2c8   : > { %7300 = vmatprep.subr.bf16.mxu0 %v17210_v7  ;;  %v17214_v7 = vld [vmem:[%s22505_s1 + $0xcf0] ss:$8 sps:$4 sm:$0xff]  }
 0x2c9   : > { %v22715_v0 = vld [vmem:[#allocation48_spill] sm:$0xff] }
 0x2cb   : > { %7301 = vmatpush1.bf16.msra.mxu0 %v17208_v37  ;;  %v17219_v37 = vld [vmem:[%s22505_s1 + $0xd04] ss:$8 sps:$4 sm:$0xff]  }
 0x2cc   : > { %7302 = vmatprep.subr.bf16.mxu0 %v17213_v49  ;;  %v17313_v49 = vld [vmem:[%s22505_s1 + $0x604] ss:$8 sps:$4 sm:$0xff]  }
 0x2cd   : > { %3709 = vmatprep.subr.bf16.mxu1 %v17313_v49  ;;  %v22717_v49 = vld [vmem:[#allocation50_spill] sm:$0xff] }
 0x2ce   : > { %6015 = vmatmul.mubr.bf16.gmra.mrb[28].mxu0 %v22714_v45  ;;  %v17315_v45 = vld [vmem:[%s22505_s1 + $0x600] ss:$8 sps:$4 sm:$0xff]  }
 0x2cf   : > { %7303 = vmatpush1.bf16.msra.mxu0 %v17211_v9  ;;  %7306 = vmatprep.mubr.bf16.mxu0 %v22715_v0  ;;  %v17217_v9 = vld [vmem:[%s22505_s1 + $0xd00] ss:$8 sps:$4 sm:$0xff]  }
 0x2d0   : > { %7304 = vmatprep.subr.bf16.mxu0 %v17216_v52  ;;  %v17222_v52 = vld [vmem:[%s22505_s1 + $0xd14] ss:$8 sps:$4 sm:$0xff]   ;;  %3710 = vmatpush1.bf16.msra.mxu1 %v17315_v45  ;;  %v17225_v45 = vld [vmem:[%s22505_s1 + $0xd24] ss:$8 sps:$4 sm:$0xff]  }
 0x2d1   : > { %3711 = vmatprep.subr.bf16.mxu1 %v17319_v41  ;;  %v17228_v41 = vld [vmem:[%s22505_s1 + $0xd34] ss:$8 sps:$4 sm:$0xff]  }
 0x2d3   : > { %7305 = vmatpush1.bf16.msra.mxu0 %v17214_v7  ;;  %v17321_v7 = vld [vmem:[%s22505_s1 + $0x610] ss:$8 sps:$4 sm:$0xff]  }
 0x2d4   : > { %7387 = vmatprep.subr.bf16.mxu0 %v17219_v37  ;;  %v17220_v37 = vld [vmem:[%s22505_s1 + $0xd10] ss:$8 sps:$4 sm:$0xff]   ;;  %3712 = vmatpush1.bf16.msra.mxu1 %v17321_v7 }
 0x2d5   : > { %3713 = vmatprep.subr.bf16.mxu1 %v17325_v20  ;;  %v22718_v7 = vld [vmem:[#allocation51_spill] sm:$0xff] }
 0x2d6   : > { %7307 = vmatmul.mubr.bf16.vlgmr.msra.gmra.mrb[0].mxu0 %v22716_v34  ;;  %v17226_v20 = vld [vmem:[%s22505_s1 + $0xd30] ss:$8 sps:$4 sm:$0xff]  }
 0x2d7   : > { %7388 = vmatpush1.bf16.msra.mxu0 %v17217_v9  ;;  %7316 = vmatprep.mubr.bf16.mxu0 %v22717_v49  ;;  %v17327_v9 = vld [vmem:[%s22505_s1 + $0x620] ss:$8 sps:$4 sm:$0xff]  }
 0x2d8   : > { %7389 = vmatprep.subr.bf16.mxu0 %v17222_v52  ;;  %3714 = vmatpush1.bf16.msra.mxu1 %v17327_v9  ;;  %v17331_v52 = vld [vmem:[%s22505_s1 + $0x634] ss:$8 sps:$4 sm:$0xff]   ;;  %v17231_v9 = vld [vmem:[%s22505_s1 + $0xd44] ss:$8 sps:$4 sm:$0xff]  }
 0x2d9   : > { %3715 = vmatprep.subr.bf16.mxu1 %v17331_v52  ;;  %v17343_v52 = vld [vmem:[%s22505_s1 + $0x654] ss:$8 sps:$4 sm:$0xff]  }
 0x2db   : > { %7390 = vmatpush1.bf16.msra.mxu0 %v17220_v37  ;;  %v17333_v37 = vld [vmem:[%s22505_s1 + $0x630] ss:$8 sps:$4 sm:$0xff]  }
 0x2dc   : > { %7391 = vmatprep.subr.bf16.mxu0 %v17225_v45  ;;  %v22719_v45 = vld [vmem:[#allocation52_spill] sm:$0xff]  ;;  %3716 = vmatpush1.bf16.msra.mxu1 %v17333_v37  ;;  %v22720_v37 = vld [vmem:[#allocation53_spill] sm:$0xff] }
 0x2dd   : > { %3717 = vmatprep.subr.bf16.mxu1 %v17337_v28  ;;  %v17232_v28 = vld [vmem:[%s22505_s1 + $0xd50] ss:$8 sps:$4 sm:$0xff]  }
 0x2de   : > { %7317 = vmatmul.mubr.bf16.gmra.mrb[4].mxu0 %v22718_v7 }
 0x2df   : > { %7392 = vmatpush1.bf16.msra.mxu0 %v17223_v40  ;;  %7326 = vmatprep.mubr.bf16.mxu0 %v22719_v45  ;;  %v17339_v40 = vld [vmem:[%s22505_s1 + $0x640] ss:$8 sps:$4 sm:$0xff]  }
 0x2e0   : > { %7393 = vmatprep.subr.bf16.mxu0 %v17228_v41  ;;  %v17234_v41 = vld [vmem:[%s22505_s1 + $0xd54] ss:$8 sps:$4 sm:$0xff]   ;;  %3718 = vmatpush1.bf16.msra.mxu1 %v17339_v40  ;;  %v17237_v40 = vld [vmem:[%s22505_s1 + $0xd64] ss:$8 sps:$4 sm:$0xff]  }
 0x2e1   : > { %3719 = vmatprep.subr.bf16.mxu1 %v17343_v52  ;;  %v17240_v52 = vld [vmem:[%s22505_s1 + $0xd74] ss:$8 sps:$4 sm:$0xff]  }
 0x2e3   : > { %7394 = vmatpush1.bf16.msra.mxu0 %v17226_v20  ;;  %v17345_v20 = vld [vmem:[%s22505_s1 + $0x650] ss:$8 sps:$4 sm:$0xff]  }
 0x2e4   : > { %7395 = vmatprep.subr.bf16.mxu0 %v17231_v9  ;;  %v22721_v9 = vld [vmem:[#allocation54_spill] sm:$0xff]  ;;  %3720 = vmatpush1.bf16.msra.mxu1 %v17345_v20  ;;  %v579_v20 = vld [vmem:[#allocation2 + $0x290] sm:$0x88] }
 0x2e5   : > { %3721 = vmatprep.subr.bf16.mxu1 %v17349_v17  ;;  %v17357_v17 = vld [vmem:[%s22505_s1 + $0x670] ss:$8 sps:$4 sm:$0xff]   ;;  %v946_v57 = vshrl.u32 %v579_v20, 16  ;;  %v956_v20 = vor.u32 %v954_v13, %v953_v16 }
 0x2e6   : > { %7327 = vmatmul.mubr.bf16.gmra.mrb[8].mxu0 %v22720_v37  ;;  %v17244_v13 = vld [vmem:[%s22505_s1 + $0xd90] ss:$8 sps:$4 sm:$0xff]  }
 0x2e7   : > { %7396 = vmatpush1.bf16.msra.mxu0 %v17229_v63  ;;  %7336 = vmatprep.mubr.bf16.mxu0 %v22721_v9  ;;  %v17351_v63 = vld [vmem:[%s22505_s1 + $0x660] ss:$8 sps:$4 sm:$0xff]   ;;  %v13365_v5 = vrot.slane %v946_v57, 11 }
 0x2e8   : > { %7397 = vmatprep.subr.bf16.mxu0 %v17234_v41  ;;  %v17235_v41 = vld [vmem:[%s22505_s1 + $0xd60] ss:$8 sps:$4 sm:$0xff]   ;;  %3722 = vmatpush1.bf16.msra.mxu1 %v17351_v63  ;;  %v17243_v63 = vld [vmem:[%s22505_s1 + $0xd84] ss:$8 sps:$4 sm:$0xff]  }
 0x2e9   : > { %v22726_v57 = vld [vmem:[#allocation58_spill] sm:$0xff] }
 0x2eb   : > { %7398 = vmatpush1.bf16.msra.mxu0 %v17232_v28  ;;  %v17355_v28 = vld [vmem:[%s22505_s1 + $0x674] ss:$8 sps:$4 sm:$0xff]  }
 0x2ec   : > { %7399 = vmatprep.subr.bf16.mxu0 %v17237_v40  ;;  %v17238_v40 = vld [vmem:[%s22505_s1 + $0xd70] ss:$8 sps:$4 sm:$0xff]   ;;  %3723 = vmatprep.subr.bf16.mxu1 %v17355_v28  ;;  %v971_v28 = vrot.slane %v953_v16, 4  ;;  %v17249_v16 = vld [vmem:[%s22505_s1 + $0xda4] ss:$8 sps:$4 sm:$0xff]  }
 0x2ed   : > { %3724 = vmatpush1.bf16.msra.mxu1 %v17357_v17  ;;  %v19990_v17 = vor.u32 %v22604_v48, %v975_v32  ;;  %v990_v48 = vshrl.u32 %v585_v4, 16  ;;  %v17252_v4 = vld [vmem:[%s22505_s1 + $0xdb4] ss:$8 sps:$4 sm:$0xff]  }
 0x2ee   : > { %7337 = vmatmul.mubr.bf16.gmra.mrb[12].mxu0 %v22722_v36 }
 0x2ef   : > { %7400 = vmatpush1.bf16.msra.mxu0 %v17235_v41  ;;  %7346 = vmatprep.mubr.bf16.mxu0 %v22723_v38  ;;  %v17361_v41 = vld [vmem:[%s22505_s1 + $0x684] ss:$8 sps:$4 sm:$0xff]  }
 0x2f0   : > { %7401 = vmatprep.subr.bf16.mxu0 %v17240_v52  ;;  %v17363_v52 = vld [vmem:[%s22505_s1 + $0x680] ss:$8 sps:$4 sm:$0xff]   ;;  %3725 = vmatprep.subr.bf16.mxu1 %v17361_v41  ;;  %v957_v41 = vsel %vm18594_vm3, %v13365_v5, %v956_v20 }
 0x2f1   : > { %3726 = vmatpush1.bf16.msra.mxu1 %v17363_v52  ;;  %v979_v52 = vsel %vm18594_vm3, %v971_v28, %v19990_v17  ;;  %v17247_v5 = vld [vmem:[%s22505_s1 + $0xda0] ss:$8 sps:$4 sm:$0xff]   ;;  %v13367_v28 = vrot.slane %v990_v48, 11  ;;  %v17255_v48 = vld [vmem:[%s22505_s1 + $0xdc4] ss:$8 sps:$4 sm:$0xff]  }
 0x2f2   : > { %v20020_v20 = vcombine.high %v957_v41, %v979_v52 }
 0x2f3   : > { %7402 = vmatpush1.bf16.msra.mxu0 %v17238_v40  ;;  %v17367_v40 = vld [vmem:[%s22505_s1 + $0x694] ss:$8 sps:$4 sm:$0xff]  }
 0x2f4   : > { %7403 = vmatprep.subr.bf16.mxu0 %v17243_v63  ;;  %v17369_v63 = vld [vmem:[%s22505_s1 + $0x690] ss:$8 sps:$4 sm:$0xff]   ;;  %3727 = vmatprep.subr.bf16.mxu1 %v17367_v40  ;;  %v1015_v40 = vrot.slane %v975_v32, 4  ;;  %v1001_v32 = vsel %vm18594_vm3, %v13367_v28, %v19990_v17  ;;  %v17253_v28 = vld [vmem:[%s22505_s1 + $0xdc0] ss:$8 sps:$4 sm:$0xff]  }
 0x2f5   : > { %3728 = vmatpush1.bf16.msra.mxu1 %v17369_v63  ;;  %v17379_v63 = vld [vmem:[%s22505_s1 + $0x6b4] ss:$8 sps:$4 sm:$0xff]  }
 0x2f6   : > { %7347 = vmatmul.mubr.bf16.gmra.mrb[16].mxu0 %v22725_v30 }
 0x2f7   : > { %7404 = vmatpush1.bf16.msra.mxu0 %v17241_v58  ;;  %7356 = vmatprep.mubr.bf16.mxu0 %v22726_v57  ;;  %v17373_v58 = vld [vmem:[%s22505_s1 + $0x6a4] ss:$8 sps:$4 sm:$0xff]  }
 0x2f8   : > { %7405 = vmatprep.subr.bf16.mxu0 %v17246_v15  ;;  %v17375_v15 = vld [vmem:[%s22505_s1 + $0x6a0] ss:$8 sps:$4 sm:$0xff]   ;;  %3729 = vmatprep.subr.bf16.mxu1 %v17373_v58  ;;  %v20045_v58 = vsel %vm18594_vm3, %v1015_v40, %v19990_v17 }
 0x2f9   : > { %3730 = vmatpush1.bf16.msra.mxu1 %v17375_v15  ;;  %v17385_v15 = vld [vmem:[%s22505_s1 + $0x6c4] ss:$8 sps:$4 sm:$0xff]   ;;  %v13406_v40 = vcombine.high %v1001_v32, %v20045_v58 }
 0x2fa   : > { %3731 = vmatprep.subr.bf16.mxu1 %v17379_v63  ;;  %v17256_v63 = vld [vmem:[%s22505_s1 + $0xdd0] ss:$8 sps:$4 sm:$0xff]  }
 0x2fb   : > { %7406 = vmatpush1.bf16.msra.mxu0 %v17244_v13  ;;  %v22727_v13 = vld [vmem:[#allocation59_spill] sm:$0xff] }
 0x2fc   : > { %7407 = vmatprep.subr.bf16.mxu0 %v17249_v16  ;;  %v17250_v16 = vld [vmem:[%s22505_s1 + $0xdb0] ss:$8 sps:$4 sm:$0xff]  }
 0x2fd   : > { %3732 = vmatpush1.bf16.msra.mxu1 %v17381_v10  ;;  %v17258_v10 = vld [vmem:[%s22505_s1 + $0xdd4] ss:$8 sps:$4 sm:$0xff]  }
 0x2fe   : > { %7357 = vmatmul.mubr.bf16.gmra.mrb[20].mxu0 %v22727_v13  ;;  %3733 = vmatprep.subr.bf16.mxu1 %v17385_v15  ;;  %v13405_v15 = vcombine.low %v1001_v32, %v20045_v58  ;;  %v17403_v32 = vld [vmem:[%s22505_s1 + $0x6f4] ss:$8 sps:$4 sm:$0xff]  }
 0x2ff   : > { %7408 = vmatpush1.bf16.msra.mxu0 %v17247_v5  ;;  %7366 = vmatprep.mubr.bf16.mxu0 %v20020_v20  ;;  %v20050_v5 = vcombine.low %v957_v41, %v979_v52  ;;  %v17391_v41 = vld [vmem:[%s22505_s1 + $0x6d4] ss:$8 sps:$4 sm:$0xff]   ;;  %v17393_v52 = vld [vmem:[%s22505_s1 + $0x6d0] ss:$8 sps:$4 sm:$0xff]  }
 0x300   : > { %7409 = vmatprep.subr.bf16.mxu0 %v17252_v4  ;;  %v17387_v4 = vld [vmem:[%s22505_s1 + $0x6c0] ss:$8 sps:$4 sm:$0xff]  }
 0x301   : > { %3734 = vmatpush1.bf16.msra.mxu1 %v17387_v4  ;;  %v17399_v4 = vld [vmem:[%s22505_s1 + $0x6e0] ss:$8 sps:$4 sm:$0xff]  }
 0x302   : > { %3735 = vmatprep.subr.bf16.mxu1 %v17391_v41  ;;  %v17262_v41 = vld [vmem:[%s22505_s1 + $0xdf0] ss:$8 sps:$4 sm:$0xff]  }
 0x303   : > { %7410 = vmatpush1.bf16.msra.mxu0 %v17250_v16  ;;  %v17261_v16 = vld [vmem:[%s22505_s1 + $0xde4] ss:$8 sps:$4 sm:$0xff]  }
 0x304   : > { %7411 = vmatprep.subr.bf16.mxu0 %v17255_v48  ;;  %v17397_v48 = vld [vmem:[%s22505_s1 + $0x6e4] ss:$8 sps:$4 sm:$0xff]  }
 0x305   : > { %3736 = vmatpush1.bf16.msra.mxu1 %v17393_v52  ;;  %v22728_v52 = vld [vmem:[#allocation62_spill] sm:$0xff] }
 0x306   : > { %7367 = vmatmul.mubr.bf16.gmra.mrb[24].mxu0 %v20050_v5  ;;  %3737 = vmatprep.subr.bf16.mxu1 %v17397_v48  ;;  %v17409_v48 = vld [vmem:[%s22505_s1 + $0x700] ss:$8 sps:$4 sm:$0xff]  }
 0x307   : > { %7412 = vmatpush1.bf16.msra.mxu0 %v17253_v28  ;;  %7376 = vmatprep.mubr.bf16.mxu0 %v13406_v40  ;;  %v17259_v28 = vld [vmem:[%s22505_s1 + $0xde0] ss:$8 sps:$4 sm:$0xff]   ;;  %v17264_v40 = vld [vmem:[%s22505_s1 + $0xdf4] ss:$8 sps:$4 sm:$0xff]  }
 0x308   : > { %7413 = vmatprep.subr.bf16.mxu0 %v17258_v10  ;;  %v17405_v10 = vld [vmem:[%s22505_s1 + $0x6f0] ss:$8 sps:$4 sm:$0xff]  }
 0x309   : > { %3738 = vmatpush1.bf16.msra.mxu1 %v17399_v4  ;;  %v17270_v4 = vld [vmem:[%s22505_s1 + $0xe14] ss:$8 sps:$4 sm:$0xff]  }
 0x30a   : > { %3739 = vmatprep.subr.bf16.mxu1 %v17403_v32  ;;  %v22730_v32 = vld [vmem:[#allocation63_spill] sm:$0xff] }
 0x30b   : > { %7414 = vmatpush1.bf16.msra.mxu0 %v17256_v63  ;;  %v17267_v63 = vld [vmem:[%s22505_s1 + $0xe04] ss:$8 sps:$4 sm:$0xff]  }
 0x30c   : > { %7415 = vmatprep.subr.bf16.mxu0 %v17261_v16  ;;  %v17411_v16 = vld [vmem:[%s22505_s1 + $0x704] ss:$8 sps:$4 sm:$0xff]  }
 0x30d   : > { %3740 = vmatpush1.bf16.msra.mxu1 %v17405_v10  ;;  %v17415_v10 = vld [vmem:[%s22505_s1 + $0x710] ss:$8 sps:$4 sm:$0xff]  }
 0x30e   : > { %7377 = vmatmul.mubr.bf16.gmra.mrb[28].mxu0 %v13405_v15  ;;  %v17265_v15 = vld [vmem:[%s22505_s1 + $0xe00] ss:$8 sps:$4 sm:$0xff]   ;;  %3822 = vmatprep.subr.bf16.mxu1 %v17411_v16 }
 0x30f   : > { %7416 = vmatpush1.bf16.msra.mxu0 %v17259_v28  ;;  %7419 = vmatprep.mubr.bf16.mxu0 %v22728_v52  ;;  %v22729_v28 = vld [vmem:[#allocation20_spill] sm:$0xff]  ;;  %v17421_v16 = vld [vmem:[%s22505_s1 + $0x720] ss:$8 sps:$4 sm:$0xff]  }
 0x310   : > { %7417 = vmatprep.subr.bf16.mxu0 %v17264_v40  ;;  %3742 = vmatmul.mubr.bf16.vlgmr.msra.gmra.mrb[0].mxu1 %v22729_v28  ;;  %v17417_v40 = vld [vmem:[%s22505_s1 + $0x714] ss:$8 sps:$4 sm:$0xff]   ;;  %v17427_v28 = vld [vmem:[%s22505_s1 + $0x730] ss:$8 sps:$4 sm:$0xff]  }
 0x311   : > { %3823 = vmatpush1.bf16.msra.mxu1 %v17409_v48  ;;  %3751 = vmatprep.mubr.bf16.mxu1 %v22715_v0  ;;  %v17423_v0 = vld [vmem:[%s22505_s1 + $0x724] ss:$8 sps:$4 sm:$0xff]   ;;  %v17271_v48 = vld [vmem:[%s22505_s1 + $0xe20] ss:$8 sps:$4 sm:$0xff]  }
 0x312   : > { %3824 = vmatprep.subr.bf16.mxu1 %v17417_v40  ;;  %v17274_v40 = vld [vmem:[%s22505_s1 + $0xe30] ss:$8 sps:$4 sm:$0xff]  }
 0x313   : > { %7418 = vmatpush1.bf16.msra.mxu0 %v17262_v41  ;;  %v17268_v41 = vld [vmem:[%s22505_s1 + $0xe10] ss:$8 sps:$4 sm:$0xff]  }
 0x314   : > { %7500 = vmatprep.subr.bf16.mxu0 %v17267_v63  ;;  %v17273_v63 = vld [vmem:[%s22505_s1 + $0xe24] ss:$8 sps:$4 sm:$0xff]  }
 0x315   : > { %3825 = vmatpush1.bf16.msra.mxu1 %v17415_v10  ;;  %v17433_v10 = vld [vmem:[%s22505_s1 + $0x740] ss:$8 sps:$4 sm:$0xff]  }
 0x316   : > { %7420 = vmatmul.mubr.bf16.vlgmr.msra.gmra.mrb[0].mxu0 %v22730_v32  ;;  %3826 = vmatprep.subr.bf16.mxu1 %v17423_v0  ;;  %v17441_v0 = vld [vmem:[%s22505_s1 + $0x754] ss:$8 sps:$4 sm:$0xff]  }
 0x317   : > { %7501 = vmatpush1.bf16.msra.mxu0 %v17265_v15  ;;  %7429 = vmatprep.mubr.bf16.mxu0 %v19263_v60  ;;  %v17276_v15 = vld [vmem:[%s22505_s1 + $0xe34] ss:$8 sps:$4 sm:$0xff]  }
 0x318   : > { %7502 = vmatprep.subr.bf16.mxu0 %v17270_v4  ;;  %3752 = vmatmul.mubr.bf16.gmra.mrb[4].mxu1 %v22716_v34  ;;  %v17429_v4 = vld [vmem:[%s22505_s1 + $0x734] ss:$8 sps:$4 sm:$0xff]   ;;  %v17279_v34 = vld [vmem:[%s22505_s1 + $0xe44] ss:$8 sps:$4 sm:$0xff]  }
 0x319   : > { %3827 = vmatpush1.bf16.msra.mxu1 %v17421_v16  ;;  %3761 = vmatprep.mubr.bf16.mxu1 %v22717_v49  ;;  %v17435_v49 = vld [vmem:[%s22505_s1 + $0x744] ss:$8 sps:$4 sm:$0xff]   ;;  %v17439_v16 = vld [vmem:[%s22505_s1 + $0x750] ss:$8 sps:$4 sm:$0xff]  }
 0x31a   : > { %3828 = vmatprep.subr.bf16.mxu1 %v17429_v4  ;;  %v17445_v4 = vld [vmem:[%s22505_s1 + $0x760] ss:$8 sps:$4 sm:$0xff]  }
 0x31b   : > { %7503 = vmatpush1.bf16.msra.mxu0 %v17268_v41  ;;  %v17277_v41 = vld [vmem:[%s22505_s1 + $0xe40] ss:$8 sps:$4 sm:$0xff]  }
 0x31c   : > { %7504 = vmatprep.subr.bf16.mxu0 %v17273_v63  ;;  %v17282_v63 = vld [vmem:[%s22505_s1 + $0xe54] ss:$8 sps:$4 sm:$0xff]  }
 0x31d   : > { %3829 = vmatpush1.bf16.msra.mxu1 %v17427_v28  ;;  %v17283_v28 = vld [vmem:[%s22505_s1 + $0xe60] ss:$8 sps:$4 sm:$0xff]  }
 0x31e   : > { %7430 = vmatmul.mubr.bf16.gmra.mrb[4].mxu0 %v19285_v46  ;;  %3830 = vmatprep.subr.bf16.mxu1 %v17435_v49  ;;  %v580_v49 = vld [vmem:[#allocation2 + $0x298] sm:$0x88] }
 0x31f   : > { %7505 = vmatpush1.bf16.msra.mxu0 %v17271_v48  ;;  %7439 = vmatprep.mubr.bf16.mxu0 %v19290_v24  ;;  %v17280_v48 = vld [vmem:[%s22505_s1 + $0xe50] ss:$8 sps:$4 sm:$0xff]  }
 0x320   : > { %7506 = vmatprep.subr.bf16.mxu0 %v17276_v15  ;;  %3762 = vmatmul.mubr.bf16.gmra.mrb[8].mxu1 %v22718_v7  ;;  %v17285_v7 = vld [vmem:[%s22505_s1 + $0xe64] ss:$8 sps:$4 sm:$0xff]  }
 0x321   : > { %3831 = vmatpush1.bf16.msra.mxu1 %v17433_v10  ;;  %3771 = vmatprep.mubr.bf16.mxu1 %v22719_v45  ;;  %v582_v45 = vld [vmem:[#allocation2 + $0x2a8] sm:$0xff]  ;;  %v17453_v10 = vld [vmem:[%s22505_s1 + $0x774] ss:$8 sps:$4 sm:$0xff]  }
 0x322   : > { %3832 = vmatprep.subr.bf16.mxu1 %v17441_v0  ;;  %v17447_v15 = vld [vmem:[%s22505_s1 + $0x764] ss:$8 sps:$4 sm:$0xff]   ;;  %v959_v0 = vshrl.u32 %v580_v49, 16  ;;  %v17465_v49 = vld [vmem:[%s22505_s1 + $0x794] ss:$8 sps:$4 sm:$0xff]  }
 0x323   : > { %7507 = vmatpush1.bf16.msra.mxu0 %v17274_v40  ;;  %v17288_v40 = vld [vmem:[%s22505_s1 + $0xe74] ss:$8 sps:$4 sm:$0xff]  }
 0x324   : > { %7508 = vmatprep.subr.bf16.mxu0 %v17279_v34  ;;  %v964_v34 = vshrl.u32 %v582_v45, 16 }
 0x325   : > { %3833 = vmatpush1.bf16.msra.mxu1 %v17439_v16  ;;  %v967_v16 = vshll.u32 %v582_v45, 16  ;;  %v17294_v45 = vld [vmem:[%s22505_s1 + $0xe94] ss:$8 sps:$4 sm:$0xff]  }
 0x326   : > { %7440 = vmatmul.mubr.bf16.gmra.mrb[8].mxu0 %v19310_v42  ;;  %3834 = vmatprep.subr.bf16.mxu1 %v17447_v15  ;;  %v17289_v15 = vld [vmem:[%s22505_s1 + $0xe80] ss:$8 sps:$4 sm:$0xff]  }
 0x327   : > { %7509 = vmatpush1.bf16.msra.mxu0 %v17277_v41  ;;  %7449 = vmatprep.mubr.bf16.mxu0 %v19315_v2  ;;  %v17451_v41 = vld [vmem:[%s22505_s1 + $0x770] ss:$8 sps:$4 sm:$0xff]  }
 0x328   : > { %7510 = vmatprep.subr.bf16.mxu0 %v17282_v63  ;;  %3772 = vmatmul.mubr.bf16.gmra.mrb[12].mxu1 %v22720_v37  ;;  %v17286_v63 = vld [vmem:[%s22505_s1 + $0xe70] ss:$8 sps:$4 sm:$0xff]   ;;  %v17291_v37 = vld [vmem:[%s22505_s1 + $0xe84] ss:$8 sps:$4 sm:$0xff]  }
 0x329   : > { %3835 = vmatpush1.bf16.msra.mxu1 %v17445_v4  ;;  %3781 = vmatprep.mubr.bf16.mxu1 %v22721_v9  ;;  %v966_v9 = vrot.slane %v964_v34, 7  ;;  %v13366_v4 = vrot.slane %v959_v0, 11  ;;  %v586_v34 = vld [vmem:[#allocation2 + $0x2e8] sm:$0x88] }
 0x32a   : > { %3836 = vmatprep.subr.bf16.mxu1 %v17453_v10  ;;  %v17463_v10 = vld [vmem:[%s22505_s1 + $0x790] ss:$8 sps:$4 sm:$0xff]   ;;  %v17471_v0 = vld [vmem:[%s22505_s1 + $0x7a4] ss:$8 sps:$4 sm:$0xff]  }
 0x32b   : > { %7511 = vmatpush1.bf16.msra.mxu0 %v17280_v48  ;;  %v17459_v48 = vld [vmem:[%s22505_s1 + $0x784] ss:$8 sps:$4 sm:$0xff]  }
 0x32c   : > { %7512 = vmatprep.subr.bf16.mxu0 %v17285_v7  ;;  %v17457_v7 = vld [vmem:[%s22505_s1 + $0x780] ss:$8 sps:$4 sm:$0xff]  }
 0x32d   : > { %3837 = vmatpush1.bf16.msra.mxu1 %v17451_v41  ;;  %v17292_v41 = vld [vmem:[%s22505_s1 + $0xe90] ss:$8 sps:$4 sm:$0xff]  }
 0x32e   : > { %7450 = vmatmul.mubr.bf16.gmra.mrb[12].mxu0 %v19332_v12  ;;  %3838 = vmatprep.subr.bf16.mxu1 %v17459_v48 }
 0x32f   : > { %7513 = vmatpush1.bf16.msra.mxu0 %v17283_v28  ;;  %7459 = vmatprep.mubr.bf16.mxu0 %v19337_v47  ;;  %v969_v28 = vor.u32 %v967_v16, %v966_v9  ;;  %v17295_v16 = vld [vmem:[%s22505_s1 + $0xea0] ss:$8 sps:$4 sm:$0xff]  }
 0x330   : > { %7514 = vmatprep.subr.bf16.mxu0 %v17288_v40  ;;  %v980_v40 = vrot.slane %v966_v9, 4  ;;  %3782 = vmatmul.mubr.bf16.gmra.mrb[16].mxu1 %v22722_v36  ;;  %v17297_v36 = vld [vmem:[%s22505_s1 + $0xea4] ss:$8 sps:$4 sm:$0xff]   ;;  %v17469_v9 = vld [vmem:[%s22505_s1 + $0x7a0] ss:$8 sps:$4 sm:$0xff]  }
 0x331   : > { %3839 = vmatpush1.bf16.msra.mxu1 %v17457_v7  ;;  %3791 = vmatprep.mubr.bf16.mxu1 %v22723_v38  ;;  %v970_v38 = vsel %vm18594_vm3, %v13366_v4, %v969_v28  ;;  %v17300_v7 = vld [vmem:[%s22505_s1 + $0xeb4] ss:$8 sps:$4 sm:$0xff]   ;;  %v17475_v4 = vld [vmem:[%s22505_s1 + $0x7b0] ss:$8 sps:$4 sm:$0xff]  }
 0x332   : > { %3840 = vmatprep.subr.bf16.mxu1 %v17465_v49  ;;  %v17298_v28 = vld [vmem:[%s22505_s1 + $0xeb0] ss:$8 sps:$4 sm:$0xff]   ;;  %v17481_v49 = vld [vmem:[%s22505_s1 + $0x7c0] ss:$8 sps:$4 sm:$0xff]  }
 0x333   : > { %7515 = vmatpush1.bf16.msra.mxu0 %v17286_v63  ;;  %v988_v63 = vsel %vm18594_vm3, %v980_v40, %v19990_v17  ;;  %v17483_v40 = vld [vmem:[%s22505_s1 + $0x7c4] ss:$8 sps:$4 sm:$0xff]  }
 0x334   : > { %7516 = vmatprep.subr.bf16.mxu0 %v17291_v37  ;;  %v1003_v37 = vshrl.u32 %v586_v34, 16  ;;  %v20255_v48 = vcombine.high %v970_v38, %v988_v63  ;;  %v20282_v34 = vcombine.low %v970_v38, %v988_v63  ;;  %v17487_v38 = vld [vmem:[%s22505_s1 + $0x7d0] ss:$8 sps:$4 sm:$0xff]  }
 0x335   : > { %3841 = vmatpush1.bf16.msra.mxu1 %v17463_v10  ;;  %v17301_v10 = vld [vmem:[%s22505_s1 + $0xec0] ss:$8 sps:$4 sm:$0xff]   ;;  %v17304_v63 = vld [vmem:[%s22505_s1 + $0xed0] ss:$8 sps:$4 sm:$0xff]  }
 0x336   : > { %7460 = vmatmul.mubr.bf16.gmra.mrb[16].mxu0 %v19354_v35  ;;  %3842 = vmatprep.subr.bf16.mxu1 %v17471_v0  ;;  %v17493_v0 = vld [vmem:[%s22505_s1 + $0x7e0] ss:$8 sps:$4 sm:$0xff]  }
 0x337   : > { %7517 = vmatpush1.bf16.msra.mxu0 %v17289_v15  ;;  %7469 = vmatprep.mubr.bf16.mxu0 %v19356_v18  ;;  %v13368_v15 = vrot.slane %v1003_v37, 11 }
 0x338   : > { %7518 = vmatprep.subr.bf16.mxu0 %v17294_v45  ;;  %3792 = vmatmul.mubr.bf16.gmra.mrb[20].mxu1 %v22725_v30  ;;  %v17477_v45 = vld [vmem:[%s22505_s1 + $0x7b4] ss:$8 sps:$4 sm:$0xff]   ;;  %v17303_v30 = vld [vmem:[%s22505_s1 + $0xec4] ss:$8 sps:$4 sm:$0xff]  }
 0x339   : > { %3843 = vmatpush1.bf16.msra.mxu1 %v17469_v9  ;;  %3801 = vmatprep.mubr.bf16.mxu1 %v22726_v57  ;;  %v1014_v57 = vsel %vm18594_vm3, %v13368_v15, %v19990_v17  ;;  %v17306_v17 = vld [vmem:[%s22505_s1 + $0xed4] ss:$8 sps:$4 sm:$0xff]   ;;  %v17307_v9 = vld [vmem:[%s22505_s1 + $0xee0] ss:$8 sps:$4 sm:$0xff]   ;;  %v17499_v15 = vld [vmem:[%s22505_s1 + $0x7f0] ss:$8 sps:$4 sm:$0xff]  }
 0x33a   : > { %3844 = vmatprep.subr.bf16.mxu1 %v17477_v45  ;;  %v13407_v37 = vcombine.low %v1014_v57, %v20045_v58  ;;  %v17310_v45 = vld [vmem:[%s22505_s1 + $0xef0] ss:$8 sps:$4 sm:$0xff]  }
 0x33b   : > { %7519 = vmatpush1.bf16.msra.mxu0 %v17292_v41  ;;  %v13408_v41 = vcombine.high %v1014_v57, %v20045_v58  ;;  %v17501_v58 = vld [vmem:[%s22505_s1 + $0x7f4] ss:$8 sps:$4 sm:$0xff]   ;;  %v17330_v57 = vld [vmem:[%s22505_s1 + $0xf24] ss:$8 sps:$4 sm:$0xff]  }
 0x33c   : > { %7520 = vmatprep.subr.bf16.mxu0 %v17297_v36  ;;  %v17489_v36 = vld [vmem:[%s22505_s1 + $0x7d4] ss:$8 sps:$4 sm:$0xff]  }
 0x33d   : > { %3845 = vmatpush1.bf16.msra.mxu1 %v17475_v4  ;;  %v17316_v4 = vld [vmem:[%s22505_s1 + $0xf00] ss:$8 sps:$4 sm:$0xff]  }
 0x33e   : > { %7470 = vmatmul.mubr.bf16.gmra.mrb[20].mxu0 %v19374_v29  ;;  %3846 = vmatprep.subr.bf16.mxu1 %v17483_v40  ;;  %v17328_v40 = vld [vmem:[%s22505_s1 + $0xf20] ss:$8 sps:$4 sm:$0xff]  }
 0x33f   : > { %7521 = vmatpush1.bf16.msra.mxu0 %v17295_v16  ;;  %7479 = vmatprep.mubr.bf16.mxu0 %v20255_v48  ;;  %v17312_v16 = vld [vmem:[%s22505_s1 + $0xef4] ss:$8 sps:$4 sm:$0xff]  }
 0x340   : > { %7522 = vmatprep.subr.bf16.mxu0 %v17300_v7  ;;  %3802 = vmatmul.mubr.bf16.gmra.mrb[24].mxu1 %v22727_v13  ;;  %v17309_v13 = vld [vmem:[%s22505_s1 + $0xee4] ss:$8 sps:$4 sm:$0xff]   ;;  %v22731_v7 = vld [vmem:[#allocation60_spill] sm:$0xff] }
 0x341   : > { %3847 = vmatpush1.bf16.msra.mxu1 %v17481_v49  ;;  %3811 = vmatprep.mubr.bf16.mxu1 %v20020_v20  ;;  %v17495_v20 = vld [vmem:[%s22505_s1 + $0x7e4] ss:$8 sps:$4 sm:$0xff]   ;;  %v17382_v49 = vld [vmem:[%s22505_s1 + $0xfb0] ss:$8 sps:$4 sm:$0xff]  }
 0x342   : > { %3848 = vmatprep.subr.bf16.mxu1 %v17489_v36  ;;  %v17394_v36 = vld [vmem:[%s22505_s1 + $0xfd0] ss:$8 sps:$4 sm:$0xff]  }
 0x343   : > { %7523 = vmatpush1.bf16.msra.mxu0 %v17298_v28  ;;  %v17324_v28 = vld [vmem:[%s22505_s1 + $0xf14] ss:$8 sps:$4 sm:$0xff]  }
 0x344   : > { %7524 = vmatprep.subr.bf16.mxu0 %v17303_v30  ;;  %v22732_v30 = vld [vmem:[#allocation61_spill] sm:$0xff] }
 0x345   : > { %3849 = vmatpush1.bf16.msra.mxu1 %v17487_v38  ;;  %v17402_v38 = vld [vmem:[%s22505_s1 + $0xfe4] ss:$8 sps:$4 sm:$0xff]  }
 0x346   : > { %7480 = vmatmul.mubr.bf16.gmra.mrb[24].mxu0 %v20282_v34  ;;  %3850 = vmatprep.subr.bf16.mxu1 %v17495_v20  ;;  %v17414_v20 = vld [vmem:[%s22505_s1 + $0x1004] ss:$8 sps:$4 sm:$0xff]  }
 0x347   : > { %7525 = vmatpush1.bf16.msra.mxu0 %v17301_v10  ;;  %7489 = vmatprep.mubr.bf16.mxu0 %v13408_v41  ;;  %v22733_v10 = vld [vmem:[#allocation10_spill] sm:$0xff]  ;;  %v17396_v41 = vld [vmem:[%s22505_s1 + $0xfd4] ss:$8 sps:$4 sm:$0xff]  }
 0x348   : > { %7526 = vmatprep.subr.bf16.mxu0 %v17306_v17  ;;  %3812 = vmatmul.mubr.bf16.gmra.mrb[28].mxu1 %v20050_v5  ;;  %v17318_v5 = vld [vmem:[%s22505_s1 + $0xf04] ss:$8 sps:$4 sm:$0xff]  }
 0x349   : > { %3851 = vmatpush1.bf16.msra.mxu1 %v17493_v0  ;;  %3854 = vmatprep.mubr.bf16.mxu1 %v22731_v7  ;;  %v22734_v17 = vld [vmem:[#allocation11_spill] sm:$0xff] }
 0x34a   : > { %3852 = vmatprep.subr.bf16.mxu1 %v17501_v58  ;;  %v17426_v0 = vld [vmem:[%s22505_s1 + $0x1024] ss:$8 sps:$4 sm:$0xff]   ;;  %v17436_v58 = vld [vmem:[%s22505_s1 + $0x1040] ss:$8 sps:$4 sm:$0xff]  }
 0x34b   : > { %7527 = vmatpush1.bf16.msra.mxu0 %v17304_v63  ;;  %v20457_v63 = vcombine.low %v19956_v54, %v19956_v54  ;;  %v17450_v7 = vld [vmem:[%s22505_s1 + $0x1064] ss:$8 sps:$4 sm:$0xff]  }
 0x34c   : > { %7528 = vmatprep.subr.bf16.mxu0 %v17309_v13  ;;  %v17406_v13 = vld [vmem:[%s22505_s1 + $0xff0] ss:$8 sps:$4 sm:$0xff]  }
 0x34d   : > { %3853 = vmatpush1.bf16.msra.mxu1 %v17499_v15  ;;  %v17448_v15 = vld [vmem:[%s22505_s1 + $0x1060] ss:$8 sps:$4 sm:$0xff]  }
 0x34e   : > { %7490 = vmatmul.mubr.bf16.gmra.mrb[28].mxu0 %v13407_v37  ;;  %v17412_v37 = vld [vmem:[%s22505_s1 + $0x1000] ss:$8 sps:$4 sm:$0xff]  }
 0x34f   : > { %7529 = vmatpush1.bf16.msra.mxu0 %v17307_v9  ;;  %7532 = vmatprep.mubr.bf16.mxu0 %v18132_v51  ;;  %v17322_v51 = vld [vmem:[%s22505_s1 + $0xf10] ss:$8 sps:$4 sm:$0xff]   ;;  %v17424_v9 = vld [vmem:[%s22505_s1 + $0x1020] ss:$8 sps:$4 sm:$0xff]  }
 0x350   : > { %7530 = vmatprep.subr.bf16.mxu0 %v17312_v16  ;;  %3855 = vmatmul.mubr.bf16.vlgmr.msra.gmra.mrb[0].mxu1 %v22732_v30  ;;  %v17438_v16 = vld [vmem:[%s22505_s1 + $0x1044] ss:$8 sps:$4 sm:$0xff]   ;;  %v229_v30 = vld [vmem:[#allocation2 + $0x318] sm:$0x11] }
 0x351   : > { %3864 = vmatprep.mubr.bf16.mxu1 %v22728_v52  ;;  %v17342_v52 = vld [vmem:[%s22505_s1 + $0xf44] ss:$8 sps:$4 sm:$0xff]  }
 0x353   : > { %7531 = vmatpush1.bf16.msra.mxu0 %v17310_v45  ;;  %v17462_v45 = vld [vmem:[%s22505_s1 + $0x1084] ss:$8 sps:$4 sm:$0xff]  }
 0x354   : > { %7613 = vmatprep.subr.bf16.mxu0 %v17318_v5  ;;  %v17460_v5 = vld [vmem:[%s22505_s1 + $0x1080] ss:$8 sps:$4 sm:$0xff]  }
 0x356   : > { %7533 = vmatmul.mubr.bf16.vlgmr.msra.gmra.mrb[0].mxu0 %v18160_v59  ;;  %v17336_v59 = vld [vmem:[%s22505_s1 + $0xf34] ss:$8 sps:$4 sm:$0xff]  }
 0x357   : > { %7614 = vmatpush1.bf16.msra.mxu0 %v17316_v4  ;;  %7542 = vmatprep.mubr.bf16.mxu0 %v18167_v61  ;;  %v17334_v61 = vld [vmem:[%s22505_s1 + $0xf30] ss:$8 sps:$4 sm:$0xff]   ;;  %v17474_v4 = vld [vmem:[%s22505_s1 + $0x10a4] ss:$8 sps:$4 sm:$0xff]  }
 0x358   : > { %7615 = vmatprep.subr.bf16.mxu0 %v17324_v28  ;;  %3865 = vmatmul.mubr.bf16.gmra.mrb[4].mxu1 %v22730_v32  ;;  %v17340_v32 = vld [vmem:[%s22505_s1 + $0xf40] ss:$8 sps:$4 sm:$0xff]  }
 0x359   : > { %3874 = vmatprep.mubr.bf16.mxu1 %v19263_v60  ;;  %v17354_v60 = vld [vmem:[%s22505_s1 + $0xf64] ss:$8 sps:$4 sm:$0xff]   ;;  %v17472_v28 = vld [vmem:[%s22505_s1 + $0x10a0] ss:$8 sps:$4 sm:$0xff]  }
 0x35b   : > { %7616 = vmatpush1.bf16.msra.mxu0 %v17322_v51  ;;  %v230_v51 = vsel %vm18171_vm6, 0, %v229_v30  ;;  %v17531_v30 = vld [vmem:[%s22505_s1 + $0x1184] ss:$8 sps:$4 sm:$0xff]  }
 0x35c   : > { %7617 = vmatprep.subr.bf16.mxu0 %v17330_v57  ;;  %231 = vst [vmem:[#allocation2 + $0x318] sm:$0x11] %v230_v51  ;;  %v17529_v51 = vld [vmem:[%s22505_s1 + $0x1180] ss:$8 sps:$4 sm:$0xff]  }
 0x35e   : > { %7543 = vmatmul.mubr.bf16.gmra.mrb[4].mxu0 %v18195_v8  ;;  %v17348_v8 = vld [vmem:[%s22505_s1 + $0xf54] ss:$8 sps:$4 sm:$0xff]  }
 0x35f   : > { %7618 = vmatpush1.bf16.msra.mxu0 %v17328_v40  ;;  %7552 = vmatprep.mubr.bf16.mxu0 %v18201_v11  ;;  %v17346_v11 = vld [vmem:[%s22505_s1 + $0xf50] ss:$8 sps:$4 sm:$0xff]   ;;  %v22736_v40 = vshll.u32 %v19956_v54, 16 }
 0x360   : > { %7619 = vmatprep.subr.bf16.mxu0 %v17336_v59  ;;  %3875 = vmatmul.mubr.bf16.gmra.mrb[8].mxu1 %v19285_v46  ;;  %v17352_v46 = vld [vmem:[%s22505_s1 + $0xf60] ss:$8 sps:$4 sm:$0xff]  }
 0x361   : > { %3884 = vmatprep.mubr.bf16.mxu1 %v19290_v24  ;;  %v17366_v24 = vld [vmem:[%s22505_s1 + $0xf84] ss:$8 sps:$4 sm:$0xff]   ;;  %v2014_v59 = vrot.slane %v22736_v40, 5 }
 0x362   : > { %v22749_v40 = vld [vmem:[#allocation27_spill] sm:$0xff] }
 0x363   : > { %7620 = vmatpush1.bf16.msra.mxu0 %v17334_v61  ;;  %v17478_v61 = vld [vmem:[%s22505_s1 + $0x10b0] ss:$8 sps:$4 sm:$0xff]  }
 0x364   : > { %7621 = vmatprep.subr.bf16.mxu0 %v17342_v52  ;;  %v22737_v52 = vld [vmem:[#allocation12_spill] sm:$0xff] }
 0x366   : > { %7553 = vmatmul.mubr.bf16.gmra.mrb[8].mxu0 %v18220_v19  ;;  %v17360_v19 = vld [vmem:[%s22505_s1 + $0xf74] ss:$8 sps:$4 sm:$0xff]  }
 0x367   : > { %7622 = vmatpush1.bf16.msra.mxu0 %v17340_v32  ;;  %7562 = vmatprep.mubr.bf16.mxu0 %v18227_v21  ;;  %v17358_v21 = vld [vmem:[%s22505_s1 + $0xf70] ss:$8 sps:$4 sm:$0xff]   ;;  %v17486_v32 = vld [vmem:[%s22505_s1 + $0x10c4] ss:$8 sps:$4 sm:$0xff]  }
 0x368   : > { %7623 = vmatprep.subr.bf16.mxu0 %v17348_v8  ;;  %3885 = vmatmul.mubr.bf16.gmra.mrb[12].mxu1 %v19310_v42  ;;  %v17364_v42 = vld [vmem:[%s22505_s1 + $0xf80] ss:$8 sps:$4 sm:$0xff]   ;;  %v17492_v8 = vld [vmem:[%s22505_s1 + $0x10d4] ss:$8 sps:$4 sm:$0xff]  }
 0x369   : > { %3894 = vmatprep.mubr.bf16.mxu1 %v19315_v2  ;;  %v17378_v2 = vld [vmem:[%s22505_s1 + $0xfa4] ss:$8 sps:$4 sm:$0xff]  }
 0x36b   : > { %7624 = vmatpush1.bf16.msra.mxu0 %v17346_v11  ;;  %v1572_v11 = vld [vmem:[#allocation2 + $0x318] sm:$0x11] }
 0x36c   : > { %7625 = vmatprep.subr.bf16.mxu0 %v17354_v60  ;;  %v22738_v60 = vld [vmem:[#allocation14_spill] sm:$0xff] }
 0x36e   : > { %7563 = vmatmul.mubr.bf16.gmra.mrb[12].mxu0 %v18247_v31  ;;  %v17372_v31 = vld [vmem:[%s22505_s1 + $0xf94] ss:$8 sps:$4 sm:$0xff]  }
 0x36f   : > { %7626 = vmatpush1.bf16.msra.mxu0 %v17352_v46  ;;  %7572 = vmatprep.mubr.bf16.mxu0 %v18251_v33  ;;  %v17370_v33 = vld [vmem:[%s22505_s1 + $0xf90] ss:$8 sps:$4 sm:$0xff]  }
 0x370   : > { %7627 = vmatprep.subr.bf16.mxu0 %v17360_v19  ;;  %3895 = vmatmul.mubr.bf16.gmra.mrb[16].mxu1 %v19332_v12  ;;  %v17376_v12 = vld [vmem:[%s22505_s1 + $0xfa0] ss:$8 sps:$4 sm:$0xff]   ;;  %v2052_v19 = vshll.u32 %v1572_v11, 16 }
 0x371   : > { %3904 = vmatprep.mubr.bf16.mxu1 %v19337_v47  ;;  %v226_v47 = vld [vmem:[#allocation2 + $0x310] sm:$0x11]  ;;  %v22751_v11 = vld [vmem:[#allocation29_spill] sm:$0xff] }
 0x373   : > { %7628 = vmatpush1.bf16.msra.mxu0 %v17358_v21  ;;  %v17490_v21 = vld [vmem:[%s22505_s1 + $0x10d0] ss:$8 sps:$4 sm:$0xff]  }
 0x374   : > { %7629 = vmatprep.subr.bf16.mxu0 %v17366_v24  ;;  %v17498_v24 = vld [vmem:[%s22505_s1 + $0x10e4] ss:$8 sps:$4 sm:$0xff]  }
 0x376   : > { %7573 = vmatmul.mubr.bf16.gmra.mrb[16].mxu0 %v18271_v43  ;;  %v17384_v43 = vld [vmem:[%s22505_s1 + $0xfb4] ss:$8 sps:$4 sm:$0xff]  }
 0x377   : > { %7630 = vmatpush1.bf16.msra.mxu0 %v17364_v42  ;;  %7582 = vmatprep.mubr.bf16.mxu0 %v18275_v44  ;;  %v227_v44 = vsel %vm18171_vm6, 0, %v226_v47  ;;  %v2054_v42 = vrot.slane %v2052_v19, 5  ;;  %v22752_v19 = vld [vmem:[#allocation30_spill] sm:$0xff] }
 0x378   : > { %7631 = vmatprep.subr.bf16.mxu0 %v17372_v31  ;;  %3905 = vmatmul.mubr.bf16.gmra.mrb[20].mxu1 %v19354_v35  ;;  %228 = vst [vmem:[#allocation2 + $0x310] sm:$0x11] %v227_v44  ;;  %v17390_v35 = vld [vmem:[%s22505_s1 + $0xfc4] ss:$8 sps:$4 sm:$0xff]   ;;  %v17504_v44 = vld [vmem:[%s22505_s1 + $0x10f4] ss:$8 sps:$4 sm:$0xff]  }
 0x379   : > { %3914 = vmatprep.mubr.bf16.mxu1 %v19356_v18  ;;  %v17388_v18 = vld [vmem:[%s22505_s1 + $0xfc0] ss:$8 sps:$4 sm:$0xff]  }
 0x37b   : > { %7632 = vmatpush1.bf16.msra.mxu0 %v17370_v33 }
 0x37c   : > { %7633 = vmatprep.subr.bf16.mxu0 %v17378_v2 }
 0x37e   : > { %7583 = vmatmul.mubr.bf16.gmra.mrb[20].mxu0 %v18295_v56  ;;  %v20440_v56 = vcombine.high %v19956_v54, %v19956_v54 }
 0x37f   : > { %7634 = vmatpush1.bf16.msra.mxu0 %v17376_v12  ;;  %7592 = vmatprep.mubr.bf16.mxu0 %v22733_v10  ;;  %v17496_v12 = vld [vmem:[%s22505_s1 + $0x10e0] ss:$8 sps:$4 sm:$0xff]  }
 0x380   : > { %7635 = vmatprep.subr.bf16.mxu0 %v17384_v43  ;;  %3915 = vmatmul.mubr.bf16.gmra.mrb[24].mxu1 %v19374_v29  ;;  %v17400_v29 = vld [vmem:[%s22505_s1 + $0xfe0] ss:$8 sps:$4 sm:$0xff]  }
 0x381   : > { %3924 = vmatprep.mubr.bf16.mxu1 %v20255_v48  ;;  %v17408_v48 = vld [vmem:[%s22505_s1 + $0xff4] ss:$8 sps:$4 sm:$0xff]   ;;  %v17554_v10 = vld [vmem:[%s22506_s2 + $0x180] sm:$0xff]  }
 0x383   : > { %7636 = vmatpush1.bf16.msra.mxu0 %v17382_v49  ;;  %v17553_v49 = vld [vmem:[%s22506_s2 + $0x1c0] sm:$0xff]  }
 0x384   : > { %7637 = vmatprep.subr.bf16.mxu0 %v17390_v35  ;;  %v17555_v35 = vld [vmem:[%s22506_s2 + $0x1c8] sm:$0xff]   ;;  %15151 = vmatprep.subr.bf16.mxu1 %v17553_v49 }
 0x385   : > { %15152 = vmatpush3.bf16.msra.mxu1 %v17554_v10  ;;  %v22753_v49 = vld [vmem:[#allocation31_spill] sm:$0xff] }
 0x386   : > { %7593 = vmatmul.mubr.bf16.gmra.mrb[24].mxu0 %v22734_v17  ;;  %v17556_v17 = vld [vmem:[%s22506_s2 + $0x188] sm:$0xff]   ;;  %15153 = vmatprep.subr.bf16.mxu1 %v17555_v35  ;;  %v17544_v10 = vld [vmem:[%s22505_s1 + $0x11d0] ss:$8 sps:$4 sm:$0xff]  }
 0x387   : > { %7638 = vmatpush1.bf16.msra.mxu0 %v17388_v18  ;;  %7602 = vmatprep.mubr.bf16.mxu0 %v20440_v56  ;;  %v17502_v18 = vld [vmem:[%s22505_s1 + $0x10f0] ss:$8 sps:$4 sm:$0xff]  }
 0x388   : > { %7639 = vmatprep.subr.bf16.mxu0 %v17396_v41  ;;  %3925 = vmatmul.mubr.bf16.gmra.mrb[28].mxu1 %v20282_v34  ;;  %v17420_v34 = vld [vmem:[%s22505_s1 + $0x1014] ss:$8 sps:$4 sm:$0xff]   ;;  %v17507_v41 = vld [vmem:[%s22505_s1 + $0x1104] ss:$8 sps:$4 sm:$0xff]  }
 0x389   : > { %15154 = vmatpush3.bf16.msra.mxu1 %v17556_v17  ;;  %v22754_v17 = vld [vmem:[#allocation34_spill] sm:$0xff] }
 0x38b   : > { %7640 = vmatpush1.bf16.msra.mxu0 %v17394_v36  ;;  %v17557_v36 = vld [vmem:[%s22506_s2 + $0x1d0] sm:$0xff]  }
 0x38c   : > { %7641 = vmatprep.subr.bf16.mxu0 %v17402_v38  ;;  %v17505_v38 = vld [vmem:[%s22505_s1 + $0x1100] ss:$8 sps:$4 sm:$0xff]   ;;  %15155 = vmatprep.subr.bf16.mxu1 %v17557_v36 }
 0x38d   : > { %v22755_v36 = vld [vmem:[#allocation35_spill] sm:$0xff] }
 0x38e   : > { %7603 = vmatmul.mubr.bf16.gmra.mrb[28].mxu0 %v20457_v63 }
 0x38f   : > { %7642 = vmatpush1.bf16.msra.mxu0 %v17400_v29  ;;  %7645 = vmatprep.mubr.bf16.mxu0 %v18347_v14  ;;  %v17418_v14 = vld [vmem:[%s22505_s1 + $0x1010] ss:$8 sps:$4 sm:$0xff]  }
 0x390   : > { %7643 = vmatprep.subr.bf16.mxu0 %v17408_v48  ;;  %v17558_v29 = vld [vmem:[%s22506_s2 + $0x190] sm:$0xff]   ;;  %v22741_v48 = vld [vmem:[#allocation18_spill] sm:$0xff] }
 0x391   : > { %15156 = vmatpush3.bf16.msra.mxu1 %v17558_v29  ;;  %v22758_v29 = vld [vmem:[#allocation38_spill] sm:$0xff] }
 0x393   : > { %7644 = vmatpush1.bf16.msra.mxu0 %v17406_v13  ;;  %v17508_v13 = vld [vmem:[%s22505_s1 + $0x1110] ss:$8 sps:$4 sm:$0xff]  }
 0x394   : > { %7726 = vmatprep.subr.bf16.mxu0 %v17414_v20  ;;  %v22742_v20 = vld [vmem:[#allocation19_spill] sm:$0xff] }
 0x396   : > { %7646 = vmatmul.mubr.bf16.vlgmr.msra.gmra.mrb[0].mxu0 %v18369_v22  ;;  %v17432_v22 = vld [vmem:[%s22505_s1 + $0x1034] ss:$8 sps:$4 sm:$0xff]  }
 0x397   : > { %7727 = vmatpush1.bf16.msra.mxu0 %v17412_v37  ;;  %7655 = vmatprep.mubr.bf16.mxu0 %v18373_v26  ;;  %v17430_v26 = vld [vmem:[%s22505_s1 + $0x1030] ss:$8 sps:$4 sm:$0xff]   ;;  %v17513_v37 = vld [vmem:[%s22505_s1 + $0x1124] ss:$8 sps:$4 sm:$0xff]  }
 0x398   : > { %7728 = vmatprep.subr.bf16.mxu0 %v17420_v34  ;;  %v17559_v34 = vld [vmem:[%s22506_s2 + $0x1d8] sm:$0xff]  }
 0x399   : > { %15157 = vmatprep.subr.bf16.mxu1 %v17559_v34 }
 0x39b   : > { %7729 = vmatpush1.bf16.msra.mxu0 %v17418_v14  ;;  %v17560_v14 = vld [vmem:[%s22506_s2 + $0x198] sm:$0xff]  }
 0x39c   : > { %7730 = vmatprep.subr.bf16.mxu0 %v17426_v0  ;;  %v17511_v0 = vld [vmem:[%s22505_s1 + $0x1120] ss:$8 sps:$4 sm:$0xff]   ;;  %15158 = vmatpush3.bf16.msra.mxu1 %v17560_v14 }
 0x39e   : > { %7656 = vmatmul.mubr.bf16.gmra.mrb[4].mxu0 %v18393_v25  ;;  %v17444_v25 = vld [vmem:[%s22505_s1 + $0x1054] ss:$8 sps:$4 sm:$0xff]  }
 0x39f   : > { %7731 = vmatpush1.bf16.msra.mxu0 %v17424_v9  ;;  %7665 = vmatprep.mubr.bf16.mxu0 %v18397_v39  ;;  %v17442_v39 = vld [vmem:[%s22505_s1 + $0x1050] ss:$8 sps:$4 sm:$0xff]   ;;  %v17516_v9 = vld [vmem:[%s22505_s1 + $0x1134] ss:$8 sps:$4 sm:$0xff]  }
 0x3a0   : > { %7732 = vmatprep.subr.bf16.mxu0 %v17432_v22  ;;  %v22743_v22 = vld [vmem:[#allocation21_spill] sm:$0xff] }
 0x3a3   : > { %7733 = vmatpush1.bf16.msra.mxu0 %v17430_v26  ;;  %v17514_v26 = vld [vmem:[%s22505_s1 + $0x1130] ss:$8 sps:$4 sm:$0xff]  }
 0x3a4   : > { %7734 = vmatprep.subr.bf16.mxu0 %v17438_v16  ;;  %v22744_v16 = vld [vmem:[#allocation22_spill] sm:$0xff] }
 0x3a6   : > { %7666 = vmatmul.mubr.bf16.gmra.mrb[8].mxu0 %v18417_v53  ;;  %v17456_v53 = vld [vmem:[%s22505_s1 + $0x1074] ss:$8 sps:$4 sm:$0xff]  }
 0x3a7   : > { %7735 = vmatpush1.bf16.msra.mxu0 %v17436_v58  ;;  %7675 = vmatprep.mubr.bf16.mxu0 %v18421_v55  ;;  %v17454_v55 = vld [vmem:[%s22505_s1 + $0x1070] ss:$8 sps:$4 sm:$0xff]   ;;  %v17519_v58 = vld [vmem:[%s22505_s1 + $0x1144] ss:$8 sps:$4 sm:$0xff]  }
 0x3a8   : > { %7736 = vmatprep.subr.bf16.mxu0 %v17444_v25  ;;  %v17561_v25 = vld [vmem:[%s22506_s2 + $0x1e0] sm:$0xff]  }
 0x3a9   : > { %15159 = vmatprep.subr.bf16.mxu1 %v17561_v25  ;;  %v22763_v25 = vld [vmem:[#allocation43_spill] sm:$0xff] }
 0x3ab   : > { %7737 = vmatpush1.bf16.msra.mxu0 %v17442_v39  ;;  %v17562_v39 = vld [vmem:[%s22506_s2 + $0x1a0] sm:$0xff]  }
 0x3ac   : > { %7738 = vmatprep.subr.bf16.mxu0 %v17450_v7  ;;  %v17517_v7 = vld [vmem:[%s22505_s1 + $0x1140] ss:$8 sps:$4 sm:$0xff]   ;;  %15160 = vmatpush3.bf16.msra.mxu1 %v17562_v39  ;;  %v22764_v39 = vld [vmem:[#allocation44_spill] sm:$0xff] }
 0x3ae   : > { %7676 = vmatmul.mubr.bf16.gmra.mrb[12].mxu0 %v18441_v3  ;;  %v17468_v3 = vld [vmem:[%s22505_s1 + $0x1094] ss:$8 sps:$4 sm:$0xff]  }
 0x3af   : > { %7739 = vmatpush1.bf16.msra.mxu0 %v17448_v15  ;;  %7685 = vmatprep.mubr.bf16.mxu0 %v18445_v6  ;;  %v17466_v6 = vld [vmem:[%s22505_s1 + $0x1090] ss:$8 sps:$4 sm:$0xff]   ;;  %v17522_v15 = vld [vmem:[%s22505_s1 + $0x1154] ss:$8 sps:$4 sm:$0xff]  }
 0x3b0   : > { %7740 = vmatprep.subr.bf16.mxu0 %v17456_v53  ;;  %v22745_v53 = vld [vmem:[#allocation23_spill] sm:$0xff] }
 0x3b3   : > { %7741 = vmatpush1.bf16.msra.mxu0 %v17454_v55  ;;  %v17520_v55 = vld [vmem:[%s22505_s1 + $0x1150] ss:$8 sps:$4 sm:$0xff]  }
 0x3b4   : > { %7742 = vmatprep.subr.bf16.mxu0 %v17462_v45  ;;  %v22746_v45 = vld [vmem:[#allocation24_spill] sm:$0xff] }
 0x3b6   : > { %7686 = vmatmul.mubr.bf16.gmra.mrb[16].mxu0 %v18467_v23  ;;  %v17480_v23 = vld [vmem:[%s22505_s1 + $0x10b4] ss:$8 sps:$4 sm:$0xff]  }
 0x3b7   : > { %7743 = vmatpush1.bf16.msra.mxu0 %v17460_v5  ;;  %7695 = vmatprep.mubr.bf16.mxu0 %v18471_v27  ;;  %v22735_v27 = vshrl.u32 %v19956_v54, 16  ;;  %v17484_v54 = vld [vmem:[%s22505_s1 + $0x10c0] ss:$8 sps:$4 sm:$0xff]   ;;  %v17525_v5 = vld [vmem:[%s22505_s1 + $0x1164] ss:$8 sps:$4 sm:$0xff]  }
 0x3b8   : > { %7744 = vmatprep.subr.bf16.mxu0 %v17468_v3  ;;  %v17523_v3 = vld [vmem:[%s22505_s1 + $0x1160] ss:$8 sps:$4 sm:$0xff]  }
 0x3b9   : > { %v2011_v57 = vrot.slane %v22735_v27, 4  ;;  %v17534_v27 = vld [vmem:[%s22505_s1 + $0x1194] ss:$8 sps:$4 sm:$0xff]  }
 0x3bb   : > { %7745 = vmatpush1.bf16.msra.mxu0 %v17466_v6  ;;  %v17528_v6 = vld [vmem:[%s22505_s1 + $0x1174] ss:$8 sps:$4 sm:$0xff]  }
 0x3bc   : > { %7746 = vmatprep.subr.bf16.mxu0 %v17474_v4  ;;  %v22747_v4 = vld [vmem:[#allocation25_spill] sm:$0xff] }
 0x3be   : > { %7696 = vmatmul.mubr.bf16.gmra.mrb[20].mxu0 %v18498_v1  ;;  %v2015_v1 = vor.u32 %v2014_v59, %v2011_v57  ;;  %v1571_v57 = vld [vmem:[#allocation2 + $0x310] sm:$0x11] }
 0x3bf   : > { %7747 = vmatpush1.bf16.msra.mxu0 %v17472_v28  ;;  %7705 = vmatprep.mubr.bf16.mxu0 %v22737_v52  ;;  %v17526_v28 = vld [vmem:[%s22505_s1 + $0x1170] ss:$8 sps:$4 sm:$0xff]   ;;  %v17537_v52 = vld [vmem:[%s22505_s1 + $0x11a4] ss:$8 sps:$4 sm:$0xff]  }
 0x3c0   : > { %7748 = vmatprep.subr.bf16.mxu0 %v17480_v23  ;;  %v20571_v46 = vrot.slane %v2015_v1, 4  ;;  %v22748_v23 = vld [vmem:[#allocation26_spill] sm:$0xff] }
 0x3c1   : > { %v17535_v1 = vld [vmem:[%s22505_s1 + $0x11a0] ss:$8 sps:$4 sm:$0xff]  }
 0x3c2   : > { %v20583_v33 = vsel %vm18508_vm9, %v20571_v46, %v2014_v59  ;;  %v20588_v2 = vsel %vm18508_vm9, %v20571_v46, %v2054_v42  ;;  %v17532_v59 = vld [vmem:[%s22505_s1 + $0x1190] ss:$8 sps:$4 sm:$0xff]   ;;  %v17541_v42 = vld [vmem:[%s22505_s1 + $0x11c0] ss:$8 sps:$4 sm:$0xff]  }
 0x3c3   : > { %7749 = vmatpush1.bf16.msra.mxu0 %v17478_v61  ;;  %v13488_v43 = vcombine.high %v20583_v33, %v20588_v2  ;;  %v13487_v47 = vcombine.low %v20583_v33, %v20588_v2  ;;  %v22750_v61 = vld [vmem:[#allocation28_spill] sm:$0xff] }
 0x3c4   : > { %7750 = vmatprep.subr.bf16.mxu0 %v17486_v32  ;;  %v2042_v32 = vshll.u32 %v1571_v57, 16 }
 0x3c6   : > { %7706 = vmatmul.mubr.bf16.gmra.mrb[24].mxu0 %v22738_v60  ;;  %v17538_v60 = vld [vmem:[%s22505_s1 + $0x11b0] ss:$8 sps:$4 sm:$0xff]  }
 0x3c7   : > { %7751 = vmatpush1.bf16.msra.mxu0 %v17484_v54  ;;  %7715 = vmatprep.mubr.bf16.mxu0 %v20440_v56  ;;  %v22740_v56 = vld [vmem:[#allocation17_spill] sm:$0xff] }
 0x3c8   : > { %7752 = vmatprep.subr.bf16.mxu0 %v17492_v8  ;;  %v17540_v54 = vld [vmem:[%s22505_s1 + $0x11b4] ss:$8 sps:$4 sm:$0xff]   ;;  %v2044_v8 = vrot.slane %v2042_v32, 5 }
 0x3cb   : > { %7753 = vmatpush1.bf16.msra.mxu0 %v17490_v21  ;;  %v17543_v21 = vld [vmem:[%s22505_s1 + $0x11c4] ss:$8 sps:$4 sm:$0xff]  }
 0x3cc   : > { %7754 = vmatprep.subr.bf16.mxu0 %v17498_v24  ;;  %v2045_v24 = vsel %vm18508_vm9, %v20571_v46, %v2044_v8  ;;  %v17549_v46 = vld [vmem:[%s22505_s1 + $0x11e4] ss:$8 sps:$4 sm:$0xff]  }
 0x3cd   : > { %v13485_v35 = vcombine.low %v20583_v33, %v2045_v24 }
 0x3ce   : > { %7716 = vmatmul.mubr.bf16.gmra.mrb[28].mxu0 %v20457_v63  ;;  %v17510_v63 = vld [vmem:[%s22505_s1 + $0x1114] ss:$8 sps:$4 sm:$0xff]  }
 0x3cf   : > { %7755 = vmatpush1.bf16.msra.mxu0 %v17496_v12  ;;  %7758 = vmatprep.mubr.bf16.mxu0 %v22740_v56  ;;  %v13486_v12 = vcombine.high %v20583_v33, %v2045_v24  ;;  %v17552_v56 = vld [vmem:[%s22505_s1 + $0x11f4] ss:$8 sps:$4 sm:$0xff]  }
 0x3d0   : > { %7756 = vmatprep.subr.bf16.mxu0 %v17504_v44  ;;  %v17546_v44 = vld [vmem:[%s22505_s1 + $0x11d4] ss:$8 sps:$4 sm:$0xff]  }
 0x3d1   : > { %v368_v33 = vld [vmem:[#allocation3 + $0x30] sm:$0x88] }
 0x3d3   : > { %7757 = vmatpush1.bf16.msra.mxu0 %v17502_v18  ;;  %v17547_v18 = vld [vmem:[%s22505_s1 + $0x11e0] ss:$8 sps:$4 sm:$0xff]  }
 0x3d4   : > { %7839 = vmatprep.subr.bf16.mxu0 %v17507_v41  ;;  %v17550_v41 = vld [vmem:[%s22505_s1 + $0x11f0] ss:$8 sps:$4 sm:$0xff]  }
 0x3d6   : > { %7759 = vmatmul.mubr.bf16.vlgmr.msra.gmra.mrb[0].mxu0 %v22741_v48  ;;  %v22759_v48 = vld [vmem:[#allocation39_spill] sm:$0xff] }
 0x3d7   : > { %7840 = vmatpush1.bf16.msra.mxu0 %v17505_v38  ;;  %7768 = vmatprep.mubr.bf16.mxu0 %v22742_v20  ;;  %v22756_v38 = vld [vmem:[#allocation36_spill] sm:$0xff] }
 0x3d8   : > { %7841 = vmatprep.subr.bf16.mxu0 %v17510_v63  ;;  %v22757_v63 = vld [vmem:[#allocation37_spill] sm:$0xff] }
 0x3db   : > { %7842 = vmatpush1.bf16.msra.mxu0 %v17508_v13  ;;  %v22760_v13 = vld [vmem:[#allocation40_spill] sm:$0xff] }
 0x3dc   : > { %7843 = vmatprep.subr.bf16.mxu0 %v17513_v37 }
 0x3de   : > { %7769 = vmatmul.mubr.bf16.gmra.mrb[4].mxu0 %v22743_v22 }
 0x3df   : > { %7844 = vmatpush1.bf16.msra.mxu0 %v17511_v0  ;;  %7778 = vmatprep.mubr.bf16.mxu0 %v22744_v16  ;;  %v22761_v0 = vld [vmem:[#allocation41_spill] sm:$0xff] }
 0x3e0   : > { %7845 = vmatprep.subr.bf16.mxu0 %v17516_v9  ;;  %v22762_v9 = vld [vmem:[#allocation42_spill] sm:$0xff] }
 0x3e3   : > { %7846 = vmatpush1.bf16.msra.mxu0 %v17514_v26 }
 0x3e4   : > { %7847 = vmatprep.subr.bf16.mxu0 %v17519_v58 }
 0x3e6   : > { %7779 = vmatmul.mubr.bf16.gmra.mrb[8].mxu0 %v22745_v53 }
 0x3e7   : > { %7848 = vmatpush1.bf16.msra.mxu0 %v17517_v7  ;;  %7788 = vmatprep.mubr.bf16.mxu0 %v22746_v45  ;;  %v22765_v45 = vld [vmem:[#allocation45_spill] sm:$0xff] }
 0x3e8   : > { %7849 = vmatprep.subr.bf16.mxu0 %v17522_v15 }
 0x3eb   : > { %7850 = vmatpush1.bf16.msra.mxu0 %v17520_v55 }
 0x3ec   : > { %7851 = vmatprep.subr.bf16.mxu0 %v17525_v5  ;;  %v22766_v5 = vld [vmem:[#allocation46_spill] sm:$0xff] }
 0x3ee   : > { %7789 = vmatmul.mubr.bf16.gmra.mrb[12].mxu0 %v22747_v4 }
 0x3ef   : > { %7852 = vmatpush1.bf16.msra.mxu0 %v17523_v3  ;;  %7798 = vmatprep.mubr.bf16.mxu0 %v22748_v23  ;;  %v22767_v23 = vld [vmem:[#allocation47_spill] sm:$0xff] }
 0x3f0   : > { %7853 = vmatprep.subr.bf16.mxu0 %v17528_v6 }
 0x3f3   : > { %7854 = vmatpush1.bf16.msra.mxu0 %v17526_v28 }
 0x3f4   : > { %7855 = vmatprep.subr.bf16.mxu0 %v17531_v30 }
 0x3f6   : > { %7799 = vmatmul.mubr.bf16.gmra.mrb[16].mxu0 %v22749_v40 }
 0x3f7   : > { %7856 = vmatpush1.bf16.msra.mxu0 %v17529_v51  ;;  %7808 = vmatprep.mubr.bf16.mxu0 %v22750_v61 }
 0x3f8   : > { %7857 = vmatprep.subr.bf16.mxu0 %v17534_v27 }
 0x3fb   : > { %7858 = vmatpush1.bf16.msra.mxu0 %v17532_v59 }
 0x3fc   : > { %7859 = vmatprep.subr.bf16.mxu0 %v17537_v52 }
 0x3fe   : > { %7809 = vmatmul.mubr.bf16.gmra.mrb[20].mxu0 %v22751_v11 }
 0x3ff   : > { %7860 = vmatpush1.bf16.msra.mxu0 %v17535_v1  ;;  %7818 = vmatprep.mubr.bf16.mxu0 %v22752_v19 }
 0x400   : > { %7861 = vmatprep.subr.bf16.mxu0 %v17540_v54 }
 0x403   : > { %7862 = vmatpush1.bf16.msra.mxu0 %v17538_v60 }
 0x404   : > { %7863 = vmatprep.subr.bf16.mxu0 %v17543_v21  ;;  %v393_v21 = vld [vmem:[#allocation3 + $0x48] sm:$0x11] }
 0x405   : > { %v394_v24 = vsel %vm18171_vm6, 0, %v393_v21 }
 0x406   : > { %7819 = vmatmul.mubr.bf16.gmra.mrb[24].mxu0 %v22753_v49  ;;  %395 = vst [vmem:[#allocation3 + $0x48] sm:$0x11] %v394_v24  ;;  %v17859_v49 = vmov 0.0|0.0  }
 0x407   : > { %7864 = vmatpush1.bf16.msra.mxu0 %v17541_v42  ;;  %7828 = vmatprep.mubr.bf16.mxu0 %v13486_v12  ;;  %v17563_v42 = vld [vmem:[%s22506_s2 + $0x1e8] sm:$0xff]   ;;  %11268 = vst [vmem:[#allocation4 + $0x20] sm:$0xf] %v17859_v49  ;;  %11272 = vst [vmem:[#allocation4 + $0x48] sm:$0xf] %v17859_v49 }
 0x408   : > { %7865 = vmatprep.subr.bf16.mxu0 %v17546_v44  ;;  %v17564_v12 = vld [vmem:[%s22506_s2 + $0x1a8] sm:$0xff]   ;;  %15161 = vmatprep.subr.bf16.mxu1 %v17563_v42  ;;  %v17565_v44 = vld [vmem:[%s22506_s2 + $0x1f0] sm:$0xff]   ;;  %11276 = vst [vmem:[#allocation4 + $0x70] sm:$0xf] %v17859_v49  ;;  %11280 = vst [vmem:[#allocation4 + $0x98] sm:$0xf] %v17859_v49 }
 0x409   : > { %15162 = vmatpush3.bf16.msra.mxu1 %v17564_v12 }
 0x40a   : > { %15163 = vmatprep.subr.bf16.mxu1 %v17565_v44 }
 0x40b   : > { %7866 = vmatpush1.bf16.msra.mxu0 %v17544_v10  ;;  %v371_v10 = vld [vmem:[#allocation3 + $0x58] sm:$0x88] }
 0x40c   : > { %7867 = vmatprep.subr.bf16.mxu0 %v17549_v46  ;;  %v17566_v46 = vld [vmem:[%s22506_s2 + $0x1b0] sm:$0xff]  }
 0x40d   : > { %15164 = vmatpush3.bf16.msra.mxu1 %v17566_v46 }
 0x40e   : > { %7829 = vmatmul.mubr.bf16.gmra.mrb[28].mxu0 %v13485_v35  ;;  %v372_v35 = vsel %vm18546_vm0, 0, %v371_v10 }
 0x40f   : > { %7868 = vmatpush1.bf16.msra.mxu0 %v17547_v18  ;;  %7871 = vmatprep.mubr.bf16.mxu0 %v22754_v17  ;;  %373 = vst [vmem:[#allocation3 + $0x58] sm:$0x88] %v372_v35  ;;  %v22769_v18 = vmov 0   ;;  %v397_v17 = vld [vmem:[#allocation3 + $0x70] sm:$0x11] }
 0x410   : > { %7869 = vmatprep.subr.bf16.mxu0 %v17552_v56  ;;  %v20824_v56 = vrot.slane %v22769_v18, 5  ;;  %v8661_v35 = vld [vmem:[#allocation3 + $0x48] sm:$0x11] }
 0x413   : > { %7870 = vmatpush1.bf16.msra.mxu0 %v17550_v41  ;;  %v20827_v41 = vrot.slane %v22769_v18, 4 }
 0x416   : > { %7872 = vmatmul.mubr.bf16.vlgmr.msra.gmra.mrb[0].mxu0 %v22755_v36  ;;  %v17567_v36 = vld [vmem:[%s22506_s2 + $0x1f8] sm:$0xff]  }
 0x417   : > { %7881 = vmatprep.mubr.bf16.mxu0 %v22756_v38  ;;  %v398_v38 = vsel %vm18171_vm6, 0, %v397_v17  ;;  %15165 = vmatprep.subr.bf16.mxu1 %v17567_v36  ;;  %v20869_v17 = vrot.slane %v22769_v18, 7 }
 0x418   : > { %399 = vst [vmem:[#allocation3 + $0x70] sm:$0x11] %v398_v38  ;;  %v8730_v38 = vshll.u32 %v8661_v35, 16 }
 0x41e   : > { %7882 = vmatmul.mubr.bf16.gmra.mrb[4].mxu0 %v22757_v63  ;;  %v17568_v63 = vld [vmem:[%s22506_s2 + $0x1b8] sm:$0xff]  }
 0x41f   : > { %7891 = vmatprep.mubr.bf16.mxu0 %v22758_v29  ;;  %v8727_v29 = vor.u32 %v20827_v41, %v20824_v56  ;;  %15166 = vmatpush3.bf16.msra.mxu1 %v17568_v63 }
 0x423   : > { %v20756_v20 = vpop.f32.mrb[0].mxu1 }
 0x424   : > { %v20758_v37 = vpop.f32.mrb[1].mxu1 }
 0x425   : > { %v3860_v34 = vpop.f32.mrb[2].mxu1 }
 0x426   : > { %7892 = vmatmul.mubr.bf16.gmra.mrb[8].mxu0 %v22759_v48  ;;  %v3862_v14 = vpop.f32.mrb[3].mxu1  ;;  %v374_v48 = vld [vmem:[#allocation3 + $0x80] sm:$0x88]  ;;  %v401_v34 = vld [vmem:[#allocation3 + $0x98] sm:$0x11] }
 0x427   : > { %7901 = vmatprep.mubr.bf16.mxu0 %v22760_v13  ;;  %v375_v13 = vsel %vm18546_vm0, 0, %v374_v48  ;;  %v402_v14 = vsel %vm18171_vm6, 0, %v401_v34 }
 0x428   : > { %376 = vst [vmem:[#allocation3 + $0x80] sm:$0x88] %v375_v13  ;;  %403 = vst [vmem:[#allocation3 + $0x98] sm:$0x11] %v402_v14  ;;  %v8172_v13 = vld [vmem:[#allocation3 + $0x58] sm:$0x88] }
 0x42b   : > { %v20762_v22 = vpop.f32.mrb[4].mxu1 }
 0x42c   : > { %v20764_v26 = vpop.f32.mrb[5].mxu1 }
 0x42d   : > { %v3870_v16 = vpop.f32.mrb[6].mxu1 }
 0x42e   : > { %7902 = vmatmul.mubr.bf16.gmra.mrb[12].mxu0 %v22761_v0  ;;  %v3872_v58 = vpop.f32.mrb[7].mxu1  ;;  %v377_v0 = vld [vmem:[#allocation3 + $0xa8] sm:$0x88]  ;;  %v17569_v16 = vld [vmem:[%s22506_s2 + $0x240] sm:$0xff]  }
 0x42f   : > { %7911 = vmatprep.mubr.bf16.mxu0 %v22762_v9  ;;  %v378_v9 = vsel %vm18546_vm0, 0, %v377_v0  ;;  %v380_v58 = vld [vmem:[#allocation3 + $0xd0] sm:$0x88]  ;;  %15215 = vmatprep.subr.bf16.mxu1 %v17569_v16 }
 0x430   : > { %379 = vst [vmem:[#allocation3 + $0xa8] sm:$0x88] %v378_v9 }
 0x433   : > { %v20768_v7 = vpop.f32.mrb[8].mxu1 }
 0x434   : > { %v20770_v15 = vpop.f32.mrb[9].mxu1 }
 0x435   : > { %v3880_v53 = vpop.f32.mrb[10].mxu1 }
 0x436   : > { %7912 = vmatmul.mubr.bf16.gmra.mrb[16].mxu0 %v22763_v25  ;;  %v3882_v55 = vpop.f32.mrb[11].mxu1  ;;  %v381_v25 = vsel %vm18546_vm0, 0, %v380_v58  ;;  %v409_v53 = vld [vmem:[#allocation3 + $0xe8] sm:$0x11] }
 0x437   : > { %7921 = vmatprep.mubr.bf16.mxu0 %v22764_v39  ;;  %382 = vst [vmem:[#allocation3 + $0xd0] sm:$0x88] %v381_v25  ;;  %v405_v39 = vld [vmem:[#allocation3 + $0xc0] sm:$0x11]  ;;  %v8664_v25 = vld [vmem:[#allocation3 + $0x70] sm:$0x11] }
 0x438   : > { %v406_v55 = vsel %vm18171_vm6, 0, %v405_v39 }
 0x439   : > { %407 = vst [vmem:[#allocation3 + $0xc0] sm:$0x11] %v406_v55  ;;  %v8241_v55 = vshrl.u32 %v8172_v13, 16 }
 0x43b   : > { %v20774_v3 = vpop.f32.mrb[12].mxu1 }
 0x43c   : > { %v20776_v6 = vpop.f32.mrb[13].mxu1 }
 0x43d   : > { %v3890_v4 = vpop.f32.mrb[14].mxu1 }
 0x43e   : > { %7922 = vmatmul.mubr.bf16.gmra.mrb[20].mxu0 %v22765_v45  ;;  %v3892_v28 = vpop.f32.mrb[15].mxu1  ;;  %v410_v45 = vsel %vm18171_vm6, 0, %v409_v53 }
 0x43f   : > { %7931 = vmatprep.mubr.bf16.mxu0 %v22766_v5  ;;  %411 = vst [vmem:[#allocation3 + $0xe8] sm:$0x11] %v410_v45  ;;  %v383_v5 = vld [vmem:[#allocation3 + $0xf8] sm:$0x88]  ;;  %v413_v28 = vld [vmem:[#allocation3 + $0x110] sm:$0x11] }
 0x440   : > { %v384_v4 = vsel %vm18546_vm0, 0, %v383_v5  ;;  %v20880_v45 = vrot.slane %v8727_v29, 4  ;;  %v8732_v5 = vrot.slane %v8730_v38, 5  ;;  %v17570_v29 = vld [vmem:[%s22506_s2 + $0x200] sm:$0xff]  }
 0x441   : > { %385 = vst [vmem:[#allocation3 + $0xf8] sm:$0x88] %v384_v4 }
 0x443   : > { %v20782_v30 = vpop.f32.mrb[16].mxu1 }
 0x444   : > { %v20784_v51 = vpop.f32.mrb[17].mxu1 }
 0x445   : > { %v3900_v27 = vpop.f32.mrb[18].mxu1 }
 0x446   : > { %7932 = vmatmul.mubr.bf16.gmra.mrb[24].mxu0 %v22767_v23  ;;  %v3902_v57 = vpop.f32.mrb[19].mxu1  ;;  %v414_v23 = vsel %vm18171_vm6, 0, %v413_v28  ;;  %v386_v27 = vld [vmem:[#allocation3 + $0x120] sm:$0x88] }
 0x447   : > { %7941 = vmatprep.mubr.bf16.mxu0 %v13488_v43  ;;  %415 = vst [vmem:[#allocation3 + $0x110] sm:$0x11] %v414_v23  ;;  %v387_v57 = vsel %vm18546_vm0, 0, %v386_v27  ;;  %v8754_v27 = vshll.u32 %v8664_v25, 16 }
 0x448   : > { %388 = vst [vmem:[#allocation3 + $0x120] sm:$0x88] %v387_v57 }
 0x44b   : > { %v20789_v40 = vpop.f32.mrb[20].mxu1 }
 0x44c   : > { %v20791_v59 = vpop.f32.mrb[21].mxu1 }
 0x44d   : > { %v3910_v61 = vpop.f32.mrb[22].mxu1 }
 0x44e   : > { %7942 = vmatmul.mubr.bf16.gmra.mrb[28].mxu0 %v13487_v47  ;;  %v3912_v52 = vpop.f32.mrb[23].mxu1  ;;  %v369_v47 = vsel %vm18546_vm0, 0, %v368_v33  ;;  %v417_v61 = vld [vmem:[#allocation3 + $0x138] sm:$0x11] }
 0x44f   : > { %370 = vst [vmem:[#allocation3 + $0x30] sm:$0x88] %v369_v47  ;;  %v418_v52 = vsel %vm18171_vm6, 0, %v417_v61 }
 0x450   : > { %419 = vst [vmem:[#allocation3 + $0x138] sm:$0x11] %v418_v52 }
 0x453   : > { %v20793_v32 = vpop.f32.mrb[24].mxu1 }
 0x454   : > { %v20795_v1 = vpop.f32.mrb[25].mxu1 }
 0x455   : > { %v3920_v43 = vpop.f32.mrb[26].mxu1 }
 0x456   : > { %v3922_v54 = vpop.f32.mrb[27].mxu1  ;;  %v389_v43 = vld [vmem:[#allocation3 + $0x148] sm:$0x88]  ;;  %v8169_v12 = vld [vmem:[#allocation3 + $0x30] sm:$0x88] }
 0x457   : > { %v390_v54 = vsel %vm18546_vm0, 0, %v389_v43  ;;  %v8219_v2 = vshrl.u32 %v8169_v12, 16 }
 0x458   : > { %391 = vst [vmem:[#allocation3 + $0x148] sm:$0x88] %v390_v54  ;;  %v8733_v54 = vsel %vm18508_vm9, %v20880_v45, %v8732_v5 }
 0x459   : > { %v14466_v14 = vrot.slane %v8219_v2, 11  ;;  %v8175_v2 = vld [vmem:[#allocation3 + $0x80] sm:$0x88] }
 0x45b   : > { %v20797_v8 = vpop.f32.mrb[28].mxu1 }
 0x45c   : > { %v20799_v11 = vpop.f32.mrb[29].mxu1 }
 0x45d   : > { %v3930_v60 = vpop.f32.mrb[30].mxu1 }
 0x45e   : > { %v3932_v19 = vpop.f32.mrb[31].mxu1  ;;  %v421_v60 = vld [vmem:[#allocation3 + $0x160] sm:$0x11] }
 0x45f   : > { %v422_v19 = vsel %vm18171_vm6, 0, %v421_v60 }
 0x460   : > { %423 = vst [vmem:[#allocation3 + $0x160] sm:$0x11] %v422_v19  ;;  %v14467_v19 = vrot.slane %v8241_v55, 11 }
 0x4e9   : > { %v7873_v33 = vpop.f32.mrb[0].mxu0 }
 0x4ea   : > { %v16063_v47 = vadd.f32 %v7873_v33, %v20756_v20  ;;  %v7875_v21 = vpop.f32.mrb[1].mxu0 }
 0x4eb   : > { %v16064_v24 = vadd.f32 %v7875_v21, %v20758_v37  ;;  %v7877_v42 = vpop.f32.mrb[2].mxu0  ;;  %v17571_v21 = vld [vmem:[%s22506_s2 + $0x248] sm:$0xff]  }
 0x4ec   : > { %v7984_v44 = vmax.f32 %v16063_v47, 0.0  ;;  %v7879_v10 = vpop.f32.mrb[3].mxu0 }
 0x4ed   : > { %v7985_v46 = vmax.f32 %v16064_v24, 0.0 }
 0x4ef   : > { %v20871_v36 = vpack.c.bf16 %v7985_v46, %v7984_v44  ;;  %v8756_v44 = vrot.slane %v8754_v27, 5 }
 0x4f1   : > { %v7883_v63 = vpop.f32.mrb[4].mxu0  ;;  %v8224_v48 = vshrl.u32 %v20871_v36, 16  ;;  %v8227_v20 = vshll.u32 %v20871_v36, 16 }
 0x4f2   : > { %v16065_v37 = vadd.f32 %v7883_v63, %v20762_v22  ;;  %v7885_v34 = vpop.f32.mrb[5].mxu0 }
 0x4f3   : > { %v16066_v0 = vadd.f32 %v7885_v34, %v20764_v26  ;;  %v7887_v9 = vpop.f32.mrb[6].mxu0  ;;  %v8226_v16 = vrot.slane %v8224_v48, 7  ;;  %v8713_v58 = vrot.slane %v8224_v48, 4  ;;  %v8716_v18 = vrot.slane %v8227_v20, 5 }
 0x4f4   : > { %v7988_v39 = vmax.f32 %v16065_v37, 0.0  ;;  %v7889_v53 = vpop.f32.mrb[7].mxu0  ;;  %v8667_v9 = vld [vmem:[#allocation3 + $0x98] sm:$0x11] }
 0x4f5   : > { %v7989_v4 = vmax.f32 %v16066_v0, 0.0  ;;  %v8229_v22 = vor.u32 %v8227_v20, %v8226_v16  ;;  %v8231_v28 = vrot.slane %v8226_v16, 4  ;;  %v8717_v23 = vor.u32 %v8716_v18, %v8713_v58  ;;  %v17572_v20 = vld [vmem:[%s22506_s2 + $0x208] sm:$0xff]   ;;  %v17573_v0 = vld [vmem:[%s22506_s2 + $0x250] sm:$0xff]  }
 0x4f6   : > { %v8263_v16 = vshrl.u32 %v8175_v2, 16  ;;  %v8757_v53 = vsel %vm18508_vm9, %v20880_v45, %v8756_v44  ;;  %v17576_v44 = vld [vmem:[%s22506_s2 + $0x218] sm:$0xff]  }
 0x4f7   : > { %v20882_v26 = vpack.c.bf16 %v7989_v4, %v7988_v39  ;;  %v8230_v57 = vsel %vm18594_vm3, %v14466_v14, %v8229_v22  ;;  %v8239_v61 = vsel %vm18594_vm3, %v8231_v28, %v20869_v17  ;;  %v8718_v52 = vrot.slane %v8717_v23, 4  ;;  %v17574_v4 = vld [vmem:[%s22506_s2 + $0x210] sm:$0xff]  }
 0x4f8   : > { %v20889_v43 = vcombine.low %v8230_v57, %v8239_v61  ;;  %v20891_v41 = vcombine.high %v8230_v57, %v8239_v61  ;;  %v8778_v28 = vshll.u32 %v8667_v9, 16  ;;  %v17575_v61 = vld [vmem:[%s22506_s2 + $0x258] sm:$0xff]   ;;  %v17578_v9 = vld [vmem:[%s22506_s2 + $0x220] sm:$0xff]  }
 0x4f9   : > { %v7893_v60 = vpop.f32.mrb[8].mxu0  ;;  %v8246_v33 = vshrl.u32 %v20882_v26, 16  ;;  %v8249_v47 = vshll.u32 %v20882_v26, 16  ;;  %v8723_v12 = vsel %vm18508_vm9, %v8718_v52, %v20824_v56 }
 0x4fa   : > { %v16067_v24 = vadd.f32 %v7893_v60, %v20768_v7  ;;  %v7895_v42 = vpop.f32.mrb[9].mxu0  ;;  %9593 = vmatprep.mubr.bf16.mxu1 %v20891_v41  ;;  %v20911_v38 = vcombine.low %v8723_v12, %v8733_v54  ;;  %v20913_v63 = vcombine.high %v8723_v12, %v8733_v54  ;;  %v14468_v54 = vrot.slane %v8263_v16, 11 }
 0x4fb   : > { %v16068_v10 = vadd.f32 %v7895_v42, %v20770_v15  ;;  %v7897_v46 = vpop.f32.mrb[10].mxu0  ;;  %9594 = vmatmul.mubr.bf16.vlgmr.msra.gmra.mrb[32].mxu1 %v20889_v43  ;;  %v8248_v35 = vrot.slane %v8246_v33, 7  ;;  %v8737_v13 = vrot.slane %v8246_v33, 4  ;;  %v8740_v37 = vrot.slane %v8249_v47, 5 }
 0x4fc   : > { %v7992_v7 = vmax.f32 %v16067_v24, 0.0  ;;  %v7899_v48 = vpop.f32.mrb[11].mxu0  ;;  %15216 = vmatpush3.bf16.msra.mxu1 %v17570_v29 }
 0x4fd   : > { %v7993_v34 = vmax.f32 %v16068_v10, 0.0  ;;  %v8251_v15 = vor.u32 %v8249_v47, %v8248_v35  ;;  %v8253_v14 = vrot.slane %v8248_v35, 4  ;;  %15217 = vmatprep.subr.bf16.mxu1 %v17571_v21  ;;  %v8741_v58 = vor.u32 %v8740_v37, %v8737_v13  ;;  %v8178_v21 = vld [vmem:[#allocation3 + $0xa8] sm:$0x88]  ;;  %v17577_v48 = vld [vmem:[%s22506_s2 + $0x260] sm:$0xff]  }
 0x4fe   : > { %v8780_v35 = vrot.slane %v8778_v28, 5 }
 0x4ff   : > { %v20921_v18 = vpack.c.bf16 %v7993_v34, %v7992_v7  ;;  %v8252_v25 = vsel %vm18594_vm3, %v14467_v19, %v8251_v15  ;;  %v8261_v39 = vsel %vm18594_vm3, %v8253_v14, %v20869_v17  ;;  %v8742_v22 = vrot.slane %v8741_v58, 4 }
 0x500   : > { %v20931_v55 = vcombine.high %v8252_v25, %v8261_v39  ;;  %v20933_v5 = vcombine.low %v8252_v25, %v8261_v39  ;;  %15218 = vmatpush3.bf16.msra.mxu1 %v17572_v20  ;;  %v8285_v20 = vshrl.u32 %v8178_v21, 16  ;;  %v8781_v58 = vsel %vm18508_vm9, %v20880_v45, %v8780_v35 }
 0x501   : > { %v7903_v23 = vpop.f32.mrb[12].mxu0  ;;  %v8268_v27 = vshrl.u32 %v20921_v18, 16  ;;  %v8271_v57 = vshll.u32 %v20921_v18, 16  ;;  %15219 = vmatprep.subr.bf16.mxu1 %v17573_v0  ;;  %v8747_v60 = vsel %vm18508_vm9, %v8742_v22, %v20824_v56 }
 0x502   : > { %v16069_v52 = vadd.f32 %v7903_v23, %v20774_v3  ;;  %v7905_v29 = vpop.f32.mrb[13].mxu0  ;;  %9601 = vmatprep.mubr.bf16.mxu1 %v20931_v55  ;;  %v20950_v24 = vcombine.high %v8747_v60, %v8757_v53  ;;  %v20952_v42 = vcombine.low %v8747_v60, %v8757_v53  ;;  %v17579_v53 = vld [vmem:[%s22506_s2 + $0x268] sm:$0xff]   ;;  %v14469_v28 = vrot.slane %v8285_v20, 11 }
 0x503   : > { %v16070_v19 = vadd.f32 %v7905_v29, %v20776_v6  ;;  %v7907_v33 = vpop.f32.mrb[14].mxu0  ;;  %9602 = vmatmul.mubr.bf16.gmra.mrb[36].mxu1 %v20933_v5  ;;  %v8270_v47 = vrot.slane %v8268_v27, 7  ;;  %v8761_v10 = vrot.slane %v8268_v27, 4  ;;  %v8764_v46 = vrot.slane %v8271_v57, 5  ;;  %v8181_v27 = vld [vmem:[#allocation3 + $0xd0] sm:$0x88] }
 0x504   : > { %v7996_v3 = vmax.f32 %v16069_v52, 0.0  ;;  %v7909_v12 = vpop.f32.mrb[15].mxu0  ;;  %15220 = vmatpush3.bf16.msra.mxu1 %v17574_v4  ;;  %v17580_v33 = vld [vmem:[%s22506_s2 + $0x228] sm:$0xff]  }
 0x505   : > { %v7997_v6 = vmax.f32 %v16070_v19, 0.0  ;;  %v8273_v2 = vor.u32 %v8271_v57, %v8270_v47  ;;  %v8275_v7 = vrot.slane %v8270_v47, 4  ;;  %15221 = vmatprep.subr.bf16.mxu1 %v17575_v61  ;;  %v8765_v13 = vor.u32 %v8764_v46, %v8761_v10 }
 0x506   : > { %v8307_v12 = vshrl.u32 %v8181_v27, 16 }
 0x507   : > { %v20960_v37 = vpack.c.bf16 %v7997_v6, %v7996_v3  ;;  %v8274_v34 = vsel %vm18594_vm3, %v14468_v54, %v8273_v2  ;;  %v8283_v15 = vsel %vm18594_vm3, %v8275_v7, %v20869_v17  ;;  %v8766_v16 = vrot.slane %v8765_v13, 4  ;;  %v17582_v7 = vld [vmem:[%s22506_s2 + $0x230] sm:$0xff]  }
 0x508   : > { %v20967_v14 = vcombine.high %v8274_v34, %v8283_v15  ;;  %v20969_v0 = vcombine.low %v8274_v34, %v8283_v15  ;;  %15222 = vmatpush3.bf16.msra.mxu1 %v17576_v44  ;;  %v8670_v44 = vld [vmem:[#allocation3 + $0xc0] sm:$0x11]  ;;  %v14470_v34 = vrot.slane %v8307_v12, 11 }
 0x509   : > { %8156 = vst [vmem:[#allocation3 + $0xb0] sm:$0xff] %v20960_v37  ;;  %v7913_v25 = vpop.f32.mrb[16].mxu0  ;;  %v8290_v39 = vshrl.u32 %v20960_v37, 16  ;;  %15223 = vmatprep.subr.bf16.mxu1 %v17577_v48  ;;  %v8293_v23 = vshll.u32 %v20960_v37, 16  ;;  %v8771_v57 = vsel %vm18508_vm9, %v8766_v16, %v20824_v56  ;;  %v8802_v20 = vshll.u32 %v8670_v44, 16  ;;  %v17583_v16 = vld [vmem:[%s22506_s2 + $0x278] sm:$0xff]  }
 0x50a   : > { %v16071_v4 = vadd.f32 %v7913_v25, %v20782_v30  ;;  %v7915_v22 = vpop.f32.mrb[17].mxu0  ;;  %9609 = vmatprep.mubr.bf16.mxu1 %v20967_v14  ;;  %v20990_v54 = vcombine.high %v8771_v57, %v8781_v58  ;;  %v20992_v30 = vcombine.low %v8771_v57, %v8781_v58 }
 0x50b   : > { %v16072_v61 = vadd.f32 %v7915_v22, %v20784_v51  ;;  %v7917_v52 = vpop.f32.mrb[18].mxu0  ;;  %9610 = vmatmul.mubr.bf16.gmra.mrb[40].mxu1 %v20969_v0  ;;  %v8292_v29 = vrot.slane %v8290_v39, 7  ;;  %v17581_v51 = vld [vmem:[%s22506_s2 + $0x270] sm:$0xff]  }
 0x50c   : > { %v8000_v60 = vmax.f32 %v16071_v4, 0.0  ;;  %v7919_v19 = vpop.f32.mrb[19].mxu0  ;;  %15224 = vmatpush3.bf16.msra.mxu1 %v17578_v9 }
 0x50d   : > { %v8001_v47 = vmax.f32 %v16072_v61, 0.0  ;;  %v8295_v21 = vor.u32 %v8293_v23, %v8292_v29  ;;  %v8297_v3 = vrot.slane %v8292_v29, 4  ;;  %15225 = vmatprep.subr.bf16.mxu1 %v17579_v53  ;;  %v8184_v23 = vld [vmem:[#allocation3 + $0xf8] sm:$0x88]  ;;  %v8804_v19 = vrot.slane %v8802_v20, 5 }
 0x50e   : > { %v8329_v12 = vshrl.u32 %v8184_v23, 16 }
 0x50f   : > { %v21000_v10 = vpack.c.bf16 %v8001_v47, %v8000_v60  ;;  %v8296_v46 = vsel %vm18594_vm3, %v14469_v28, %v8295_v21  ;;  %v8305_v35 = vsel %vm18594_vm3, %v8297_v3, %v20869_v17  ;;  %v17585_v21 = vld [vmem:[%s22506_s2 + $0x2c0] sm:$0xff]  }
 0x510   : > { %v21007_v6 = vcombine.high %v8296_v46, %v8305_v35  ;;  %v21009_v2 = vcombine.low %v8296_v46, %v8305_v35  ;;  %15226 = vmatpush3.bf16.msra.mxu1 %v17580_v33  ;;  %v8668_v48 = vld [vmem:[#allocation3 + $0xb0] sm:$0xff] }
 0x511   : > { %v7923_v13 = vpop.f32.mrb[20].mxu0  ;;  %v8312_v15 = vshrl.u32 %v21000_v10, 16  ;;  %v8315_v9 = vshll.u32 %v21000_v10, 16  ;;  %15227 = vmatprep.subr.bf16.mxu1 %v17581_v51  ;;  %v8783_v39 = vshrl.u32 %v8668_v48, 16  ;;  %v8786_v53 = vshll.u32 %v8668_v48, 16 }
 0x512   : > { %v16073_v58 = vadd.f32 %v7923_v13, %v20789_v40  ;;  %v7925_v25 = vpop.f32.mrb[21].mxu0  ;;  %9617 = vmatprep.mubr.bf16.mxu1 %v21007_v6  ;;  %v17584_v40 = vld [vmem:[%s22506_s2 + $0x238] sm:$0xff]   ;;  %v8805_v13 = vsel %vm18508_vm9, %v20880_v45, %v8804_v19 }
 0x513   : > { %v16074_v4 = vadd.f32 %v7925_v25, %v20791_v59  ;;  %v7927_v22 = vpop.f32.mrb[22].mxu0  ;;  %9618 = vmatmul.mubr.bf16.gmra.mrb[44].mxu1 %v21009_v2  ;;  %v8314_v28 = vrot.slane %v8312_v15, 7  ;;  %v21023_v27 = vrot.slane %v8312_v15, 4  ;;  %v21025_v57 = vrot.slane %v8315_v9, 5 }
 0x514   : > { %v8004_v61 = vmax.f32 %v16073_v58, 0.0  ;;  %v7929_v52 = vpop.f32.mrb[23].mxu0  ;;  %15228 = vmatpush3.bf16.msra.mxu1 %v17582_v7  ;;  %v8785_v29 = vrot.slane %v8783_v39, 4  ;;  %v8788_v60 = vrot.slane %v8786_v53, 5  ;;  %v14471_v25 = vrot.slane %v8329_v12, 11 }
 0x515   : > { %v8005_v59 = vmax.f32 %v16074_v4, 0.0  ;;  %v8317_v33 = vor.u32 %v8315_v9, %v8314_v28  ;;  %v8319_v47 = vrot.slane %v8314_v28, 4  ;;  %15229 = vmatprep.subr.bf16.mxu1 %v17583_v16  ;;  %v8813_v3 = vor.u32 %v21025_v57, %v21023_v27  ;;  %v8187_v28 = vld [vmem:[#allocation3 + $0x120] sm:$0x88] }
 0x516   : > { %v8789_v51 = vor.u32 %v8788_v60, %v8785_v29 }
 0x517   : > { %v21035_v44 = vpack.c.bf16 %v8005_v59, %v8004_v61  ;;  %v8318_v46 = vsel %vm18594_vm3, %v14470_v34, %v8317_v33  ;;  %v8327_v35 = vsel %vm18594_vm3, %v8319_v47, %v20869_v17  ;;  %v8351_v33 = vshrl.u32 %v8187_v28, 16  ;;  %v8190_v28 = vld [vmem:[#allocation3 + $0x148] sm:$0x88] }
 0x518   : > { %v21042_v7 = vcombine.high %v8318_v46, %v8327_v35  ;;  %v21044_v48 = vcombine.low %v8318_v46, %v8327_v35  ;;  %15230 = vmatpush3.bf16.msra.mxu1 %v17584_v40  ;;  %v8790_v20 = vrot.slane %v8789_v51, 4 }
 0x519   : > { %v7933_v15 = vpop.f32.mrb[24].mxu0  ;;  %v8334_v9 = vshrl.u32 %v21035_v44, 16  ;;  %v8337_v16 = vshll.u32 %v21035_v44, 16  ;;  %15279 = vmatprep.subr.bf16.mxu1 %v17585_v21 }
 0x51a   : > { %v16075_v34 = vadd.f32 %v7933_v15, %v20793_v32  ;;  %v7935_v58 = vpop.f32.mrb[25].mxu0  ;;  %9625 = vmatprep.mubr.bf16.mxu1 %v21042_v7  ;;  %v8795_v39 = vsel %vm18508_vm9, %v8790_v20, %v20824_v56 }
 0x51b   : > { %v16076_v53 = vadd.f32 %v7935_v58, %v20795_v1  ;;  %v7937_v4 = vpop.f32.mrb[26].mxu0  ;;  %9626 = vmatmul.mubr.bf16.gmra.mrb[48].mxu1 %v21044_v48  ;;  %v8336_v22 = vrot.slane %v8334_v9, 7  ;;  %v21058_v23 = vcombine.high %v8795_v39, %v8805_v13  ;;  %v21060_v61 = vcombine.low %v8795_v39, %v8805_v13 }
 0x51c   : > { %v8008_v32 = vmax.f32 %v16075_v34, 0.0  ;;  %v7939_v52 = vpop.f32.mrb[27].mxu0  ;;  %v21062_v40 = vrot.slane %v8334_v9, 4  ;;  %v21064_v59 = vrot.slane %v8337_v16, 5 }
 0x51d   : > { %v8009_v29 = vmax.f32 %v16076_v53, 0.0  ;;  %v8339_v60 = vor.u32 %v8337_v16, %v8336_v22  ;;  %v8341_v19 = vrot.slane %v8336_v22, 4  ;;  %v14472_v16 = vrot.slane %v8351_v33, 11 }
 0x51e   : > { %v8837_v12 = vor.u32 %v21064_v59, %v21062_v40  ;;  %v8373_v33 = vshrl.u32 %v8190_v28, 16 }
 0x51f   : > { %v21066_v1 = vpack.c.bf16 %v8009_v29, %v8008_v32  ;;  %v8340_v47 = vsel %vm18594_vm3, %v14471_v25, %v8339_v60  ;;  %v8349_v21 = vsel %vm18594_vm3, %v8341_v19, %v20869_v17 }
 0x520   : > { %v21075_v51 = vcombine.high %v8340_v47, %v8349_v21  ;;  %v21077_v46 = vcombine.low %v8340_v47, %v8349_v21 }
 0x521   : > { %v7943_v35 = vpop.f32.mrb[28].mxu0  ;;  %v8356_v20 = vshrl.u32 %v21066_v1, 16  ;;  %v8359_v13 = vshll.u32 %v21066_v1, 16 }
 0x522   : > { %v16077_v15 = vadd.f32 %v7943_v35, %v20797_v8  ;;  %v7945_v9 = vpop.f32.mrb[29].mxu0  ;;  %9633 = vmatprep.mubr.bf16.mxu1 %v21075_v51 }
 0x523   : > { %v16078_v34 = vadd.f32 %v7945_v9, %v20799_v11  ;;  %v7947_v58 = vpop.f32.mrb[30].mxu0  ;;  %9634 = vmatmul.mubr.bf16.gmra.mrb[52].mxu1 %v21077_v46  ;;  %v8358_v25 = vrot.slane %v8356_v20, 7  ;;  %v21085_v39 = vrot.slane %v8356_v20, 4  ;;  %v21087_v53 = vrot.slane %v8359_v13, 5 }
 0x524   : > { %v8012_v4 = vmax.f32 %v16077_v15, 0.0  ;;  %v7949_v22 = vpop.f32.mrb[31].mxu0 }
 0x525   : > { %v8013_v32 = vmax.f32 %v16078_v34, 0.0  ;;  %v8361_v52 = vor.u32 %v8359_v13, %v8358_v25  ;;  %v8363_v8 = vrot.slane %v8358_v25, 4  ;;  %v14473_v13 = vrot.slane %v8373_v33, 11  ;;  %v17588_v33 = vld [vmem:[%s22506_s2 + $0x288] sm:$0xff]  }
 0x527   : > { %v21091_v60 = vpack.c.bf16 %v8013_v32, %v8012_v4  ;;  %v8362_v11 = vsel %vm18594_vm3, %v14472_v16, %v8361_v52  ;;  %v8371_v19 = vsel %vm18594_vm3, %v8363_v8, %v20869_v17  ;;  %v21124_v52 = vcombine.high %v20871_v36, %v17859_v49  ;;  %v17586_v8 = vld [vmem:[%s22506_s2 + $0x280] sm:$0xff]  }
 0x528   : > { %v21098_v47 = vcombine.high %v8362_v11, %v8371_v19  ;;  %v21100_v21 = vcombine.low %v8362_v11, %v8371_v19  ;;  %v17587_v11 = vld [vmem:[%s22506_s2 + $0x2c8] sm:$0xff]   ;;  %v21140_v19 = vcombine.high %v20882_v26, %v17859_v49 }
 0x529   : > { %v8378_v35 = vshrl.u32 %v21091_v60, 16  ;;  %v8381_v20 = vshll.u32 %v21091_v60, 16 }
 0x52a   : > { %9641 = vmatprep.mubr.bf16.mxu1 %v21098_v47 }
 0x52b   : > { %9642 = vmatmul.mubr.bf16.gmra.mrb[56].mxu1 %v21100_v21  ;;  %v8380_v15 = vrot.slane %v8378_v35, 7  ;;  %v21106_v9 = vrot.slane %v8378_v35, 4  ;;  %v21108_v16 = vrot.slane %v8381_v20, 5  ;;  %v17590_v35 = vld [vmem:[%s22506_s2 + $0x290] sm:$0xff]  }
 0x52d   : > { %v8383_v34 = vor.u32 %v8381_v20, %v8380_v15  ;;  %v8385_v58 = vrot.slane %v8380_v15, 4  ;;  %v21155_v20 = vcombine.low %v20882_v26, %v17859_v49  ;;  %v21162_v15 = vcombine.high %v20921_v18, %v17859_v49  ;;  %v17593_v26 = vld [vmem:[%s22506_s2 + $0x2e0] sm:$0xff]  }
 0x52f   : > { %v8384_v4 = vsel %vm18594_vm3, %v14473_v13, %v8383_v34  ;;  %v8393_v22 = vsel %vm18594_vm3, %v8385_v58, %v20869_v17  ;;  %v21133_v17 = vcombine.low %v20871_v36, %v17859_v49  ;;  %v17589_v36 = vld [vmem:[%s22506_s2 + $0x2d0] sm:$0xff]   ;;  %22771 = vst [vmem:[#allocation33_spill] sm:$0xff] %v21155_v20  ;;  %v17591_v13 = vld [vmem:[%s22506_s2 + $0x2d8] sm:$0xff]   ;;  %22772 = vst [vmem:[#allocation48_spill] sm:$0xff] %v21162_v15 }
 0x530   : > { %v21117_v28 = vcombine.high %v8384_v4, %v8393_v22  ;;  %v21119_v32 = vcombine.low %v8384_v4, %v8393_v22  ;;  %v17592_v34 = vld [vmem:[%s22506_s2 + $0x298] sm:$0xff]   ;;  %v17594_v58 = vld [vmem:[%s22506_s2 + $0x2a0] sm:$0xff]   ;;  %v21177_v4 = vcombine.low %v20921_v18, %v17859_v49  ;;  %v17595_v22 = vld [vmem:[%s22506_s2 + $0x2e8] sm:$0xff]  }
 0x531   : > { %v17597_v18 = vld [vmem:[%s22506_s2 + $0x2f0] sm:$0xff]  }
 0x532   : > { %22770 = vst [vmem:[#allocation32_spill] sm:$0xff] %v21119_v32  ;;  %9649 = vmatprep.mubr.bf16.mxu1 %v21117_v28  ;;  %22773 = vst [vmem:[#allocation49_spill] sm:$0xff] %v21177_v4 }
 0x533   : > { %9650 = vmatmul.mubr.bf16.gmra.mrb[60].mxu1 %v21119_v32 }
 0x534   : > { %9690 = vmatprep.mubr.bf16.mxu1 %v21124_v52 }
 0x53b   : > { %9691 = vmatmul.mubr.bf16.vlgmr.msra.gmra.mrb[64].mxu1 %v21133_v17 }
 0x53c   : > { %9698 = vmatprep.mubr.bf16.mxu1 %v21140_v19  ;;  %15280 = vmatpush3.bf16.msra.mxu1 %v17586_v8  ;;  %v21184_v8 = vcombine.high %v20960_v37, %v17859_v49 }
 0x53d   : > { %15281 = vmatprep.subr.bf16.mxu1 %v17587_v11  ;;  %v17596_v11 = vld [vmem:[%s22506_s2 + $0x2a8] sm:$0xff]  }
 0x53e   : > { %22774 = vst [vmem:[#allocation50_spill] sm:$0xff] %v21184_v8 }
 0x540   : > { %15282 = vmatpush3.bf16.msra.mxu1 %v17588_v33  ;;  %v17598_v33 = vld [vmem:[%s22506_s2 + $0x2b0] sm:$0xff]  }
 0x541   : > { %15283 = vmatprep.subr.bf16.mxu1 %v17589_v36  ;;  %v21199_v36 = vcombine.low %v20960_v37, %v17859_v49  ;;  %v17601_v37 = vld [vmem:[%s22506_s2 + $0x40] sm:$0xff]  }
 0x543   : > { %9699 = vmatmul.mubr.bf16.gmra.mrb[68].mxu1 %v21155_v20 }
 0x544   : > { %9706 = vmatprep.mubr.bf16.mxu1 %v21162_v15  ;;  %15284 = vmatpush3.bf16.msra.mxu1 %v17590_v35  ;;  %v17599_v35 = vld [vmem:[%s22506_s2 + $0x2f8] sm:$0xff]  }
 0x545   : > { %15285 = vmatprep.subr.bf16.mxu1 %v17591_v13  ;;  %v21206_v13 = vcombine.high %v21000_v10, %v17859_v49 }
 0x548   : > { %15286 = vmatpush3.bf16.msra.mxu1 %v17592_v34  ;;  %v17600_v34 = vld [vmem:[%s22506_s2 + $0x2b8] sm:$0xff]  }
 0x549   : > { %15287 = vmatprep.subr.bf16.mxu1 %v17593_v26  ;;  %v21218_v26 = vcombine.low %v21000_v10, %v17859_v49  ;;  %v21238_v10 = vcombine.low %v21066_v1, %v17859_v49 }
 0x54b   : > { %9707 = vmatmul.mubr.bf16.gmra.mrb[72].mxu1 %v21177_v4 }
 0x54c   : > { %9714 = vmatprep.mubr.bf16.mxu1 %v21184_v8  ;;  %15288 = vmatpush3.bf16.msra.mxu1 %v17594_v58  ;;  %v21222_v58 = vcombine.high %v21035_v44, %v17859_v49 }
 0x54d   : > { %15289 = vmatprep.subr.bf16.mxu1 %v17595_v22  ;;  %v21228_v22 = vcombine.low %v21035_v44, %v17859_v49  ;;  %v21248_v44 = vcombine.low %v21091_v60, %v17859_v49 }
 0x54f   : > { %22776 = vst [vmem:[#allocation52_spill] sm:$0xff] %v21248_v44 }
 0x550   : > { %15290 = vmatpush3.bf16.msra.mxu1 %v17596_v11  ;;  %v21232_v11 = vcombine.high %v21066_v1, %v17859_v49  ;;  %v17602_v1 = vld [vmem:[%s22506_s2] sm:$0xff]  }
 0x551   : > { %15291 = vmatprep.subr.bf16.mxu1 %v17597_v18  ;;  %v21242_v18 = vcombine.high %v21091_v60, %v17859_v49  ;;  %v17604_v49 = vld [vmem:[%s22506_s2 + $0x8] sm:$0xff]   ;;  %v17605_v60 = vld [vmem:[%s22506_s2 + $0x50] sm:$0xff]  }
 0x553   : > { %9715 = vmatmul.mubr.bf16.gmra.mrb[76].mxu1 %v21199_v36  ;;  %22775 = vst [vmem:[#allocation51_spill] sm:$0xff] %v21242_v18 }
 0x554   : > { %9722 = vmatprep.mubr.bf16.mxu1 %v21206_v13  ;;  %15292 = vmatpush3.bf16.msra.mxu1 %v17598_v33  ;;  %v17603_v33 = vld [vmem:[%s22506_s2 + $0x48] sm:$0xff]  }
 0x555   : > { %15293 = vmatprep.subr.bf16.mxu1 %v17599_v35  ;;  %v17606_v35 = vld [vmem:[%s22506_s2 + $0x10] sm:$0xff]  }
 0x558   : > { %15294 = vmatpush3.bf16.msra.mxu1 %v17600_v34  ;;  %v17607_v34 = vld [vmem:[%s22506_s2 + $0x58] sm:$0xff]  }
 0x559   : > { %15343 = vmatprep.subr.bf16.mxu1 %v17601_v37  ;;  %v8673_v37 = vld [vmem:[#allocation3 + $0xe8] sm:$0x11] }
 0x55b   : > { %9723 = vmatmul.mubr.bf16.gmra.mrb[80].mxu1 %v21218_v26 }
 0x55c   : > { %9730 = vmatprep.mubr.bf16.mxu1 %v21222_v58 }
 0x563   : > { %9731 = vmatmul.mubr.bf16.gmra.mrb[84].mxu1 %v21228_v22 }
 0x564   : > { %9738 = vmatprep.mubr.bf16.mxu1 %v21232_v11 }
 0x56b   : > { %9739 = vmatmul.mubr.bf16.gmra.mrb[88].mxu1 %v21238_v10 }
 0x56c   : > { %9746 = vmatprep.mubr.bf16.mxu1 %v21242_v18 }
 0x573   : > { %9747 = vmatmul.mubr.bf16.gmra.mrb[92].mxu1 %v21248_v44 }
 0x574   : > { %9787 = vmatprep.mubr.bf16.mxu1 %v20913_v63 }
 0x57b   : > { %9788 = vmatmul.mubr.bf16.vlgmr.msra.gmra.mrb[96].mxu1 %v20911_v38 }
 0x57c   : > { %9795 = vmatprep.mubr.bf16.mxu1 %v20950_v24  ;;  %15344 = vmatpush3.bf16.msra.mxu1 %v17602_v1  ;;  %v17608_v1 = vld [vmem:[%s22506_s2 + $0x18] sm:$0xff]  }
 0x57d   : > { %15345 = vmatprep.subr.bf16.mxu1 %v17603_v33  ;;  %v17609_v33 = vld [vmem:[%s22506_s2 + $0x60] sm:$0xff]  }
 0x580   : > { %15346 = vmatpush3.bf16.msra.mxu1 %v17604_v49  ;;  %v8826_v49 = vshll.u32 %v8673_v37, 16  ;;  %v8676_v37 = vld [vmem:[#allocation3 + $0x110] sm:$0x11] }
 0x581   : > { %15347 = vmatprep.subr.bf16.mxu1 %v17605_v60  ;;  %v17610_v60 = vld [vmem:[%s22506_s2 + $0x20] sm:$0xff]   ;;  %v8850_v57 = vshll.u32 %v8676_v37, 16  ;;  %v17616_v37 = vld [vmem:[%s22506_s2 + $0x38] sm:$0xff]  }
 0x582   : > { %v8828_v25 = vrot.slane %v8826_v49, 5  ;;  %v17615_v49 = vld [vmem:[%s22506_s2 + $0x78] sm:$0xff]  }
 0x583   : > { %9796 = vmatmul.mubr.bf16.gmra.mrb[100].mxu1 %v20952_v42 }
 0x584   : > { %9803 = vmatprep.mubr.bf16.mxu1 %v20990_v54  ;;  %15348 = vmatpush3.bf16.msra.mxu1 %v17606_v35  ;;  %v17611_v35 = vld [vmem:[%s22506_s2 + $0x68] sm:$0xff]   ;;  %v8829_v27 = vsel %vm18508_vm9, %v20880_v45, %v8828_v25  ;;  %v8852_v25 = vrot.slane %v8850_v57, 5 }
 0x585   : > { %15349 = vmatprep.subr.bf16.mxu1 %v17607_v34  ;;  %v8814_v34 = vrot.slane %v8813_v3, 4  ;;  %v17614_v3 = vld [vmem:[%s22506_s2 + $0x30] sm:$0xff]  }
 0x586   : > { %v8853_v40 = vsel %vm18508_vm9, %v20880_v45, %v8852_v25 }
 0x587   : > { %v8819_v29 = vsel %vm18508_vm9, %v8814_v34, %v20824_v56  ;;  %v8679_v34 = vld [vmem:[#allocation3 + $0x138] sm:$0x11] }
 0x588   : > { %15350 = vmatpush3.bf16.msra.mxu1 %v17608_v1  ;;  %v17612_v1 = vld [vmem:[%s22506_s2 + $0x28] sm:$0xff]   ;;  %v8874_v59 = vshll.u32 %v8679_v34, 16 }
 0x589   : > { %15351 = vmatprep.subr.bf16.mxu1 %v17609_v33  ;;  %v17613_v33 = vld [vmem:[%s22506_s2 + $0x70] sm:$0xff]  }
 0x58a   : > { %v8876_v44 = vrot.slane %v8874_v59, 5  ;;  %v22778_v59 = vor.u32 %v21108_v16, %v21106_v9 }
 0x58b   : > { %9804 = vmatmul.mubr.bf16.gmra.mrb[104].mxu1 %v20992_v30 }
 0x58c   : > { %9811 = vmatprep.mubr.bf16.mxu1 %v21058_v23  ;;  %15352 = vmatpush3.bf16.msra.mxu1 %v17610_v60  ;;  %v21309_v60 = vcombine.high %v8819_v29, %v8829_v27 }
 0x58d   : > { %15353 = vmatprep.subr.bf16.mxu1 %v17611_v35  ;;  %v8838_v35 = vrot.slane %v8837_v12, 4  ;;  %v21328_v12 = vcombine.low %v8819_v29, %v8829_v27  ;;  %v8877_v29 = vsel %vm18508_vm9, %v20880_v45, %v8876_v44 }
 0x590   : > { %15354 = vmatpush3.bf16.msra.mxu1 %v17612_v1  ;;  %v17617_v1 = vld [vmem:[%s22506_s2 + $0xc0] sm:$0xff]  }
 0x591   : > { %15355 = vmatprep.subr.bf16.mxu1 %v17613_v33  ;;  %v8843_v33 = vsel %vm18508_vm9, %v8838_v35, %v20824_v56  ;;  %v8682_v35 = vld [vmem:[#allocation3 + $0x160] sm:$0x11] }
 0x592   : > { %v21330_v57 = vcombine.high %v8843_v33, %v8853_v40  ;;  %v8898_v27 = vshll.u32 %v8682_v35, 16  ;;  %v21343_v34 = vcombine.low %v8843_v33, %v8853_v40 }
 0x593   : > { %9812 = vmatmul.mubr.bf16.gmra.mrb[108].mxu1 %v21060_v61 }
 0x594   : > { %9819 = vmatprep.mubr.bf16.mxu1 %v21309_v60  ;;  %15356 = vmatpush3.bf16.msra.mxu1 %v17614_v3  ;;  %v22777_v3 = vor.u32 %v21087_v53, %v21085_v39 }
 0x595   : > { %15357 = vmatprep.subr.bf16.mxu1 %v17615_v49 }
 0x596   : > { %v8862_v49 = vrot.slane %v22777_v3, 4  ;;  %v8886_v3 = vrot.slane %v22778_v59, 4 }
 0x598   : > { %15358 = vmatpush3.bf16.msra.mxu1 %v17616_v37  ;;  %v8867_v25 = vsel %vm18508_vm9, %v8862_v49, %v20824_v56  ;;  %v21345_v37 = vld [vmem:[#allocation2 + $0x80] sm:$0xff]  ;;  %v8900_v49 = vrot.slane %v8898_v27, 5  ;;  %v8891_v35 = vsel %vm18508_vm9, %v8886_v3, %v20824_v56 }
 0x599   : > { %15407 = vmatprep.subr.bf16.mxu1 %v17617_v1  ;;  %v22611_v39 = vshrl.u32 %v21345_v37, 16  ;;  %v21348_v53 = vcombine.high %v8867_v25, %v8877_v29  ;;  %v8166_v1 = vld [vmem:[#allocation3 + $0x8] sm:$0x88]  ;;  %v22610_v40 = vshll.u32 %v21345_v37, 16  ;;  %v21364_v32 = vcombine.low %v8867_v25, %v8877_v29  ;;  %v356_v25 = vld [vmem:[#allocation3 + $0x20] sm:$0x11] }
 0x59a   : > { %v8197_v44 = vshrl.u32 %v8166_v1, 16  ;;  %v8901_v18 = vsel %vm18508_vm9, %v20880_v45, %v8900_v49  ;;  %v357_v29 = vsel %vm18171_vm6, 0, %v356_v25  ;;  %v17626_v25 = vld [vmem:[%s22506_s2 + $0xa0] sm:$0xff]  }
 0x59b   : > { %9820 = vmatmul.mubr.bf16.gmra.mrb[112].mxu1 %v21328_v12  ;;  %v8204_v33 = vrot.slane %v22611_v39, 7  ;;  %v21370_v1 = vcombine.high %v8891_v35, %v8901_v18  ;;  %358 = vst [vmem:[#allocation3 + $0x20] sm:$0x11] %v357_v29  ;;  %v21385_v3 = vcombine.low %v8891_v35, %v8901_v18  ;;  %v17620_v18 = vld [vmem:[%s22506_s2 + $0x88] sm:$0xff]   ;;  %v17621_v35 = vld [vmem:[%s22506_s2 + $0xd0] sm:$0xff]  }
 0x59c   : > { %9827 = vmatprep.mubr.bf16.mxu1 %v21330_v57  ;;  %v14465_v9 = vrot.slane %v8197_v44, 11  ;;  %v17618_v44 = vld [vmem:[%s22506_s2 + $0x80] sm:$0xff]   ;;  %v17628_v29 = vld [vmem:[%s22506_s2 + $0xa8] sm:$0xff]  }
 0x59d   : > { %v21368_v16 = vor.u32 %v22610_v40, %v8204_v33  ;;  %v8209_v27 = vrot.slane %v8204_v33, 4  ;;  %22779 = vst [vmem:[#allocation53_spill] sm:$0xff] %v21370_v1  ;;  %22780 = vst [vmem:[#allocation54_spill] sm:$0xff] %v21385_v3  ;;  %v17619_v33 = vld [vmem:[%s22506_s2 + $0xc8] sm:$0xff]  }
 0x59f   : > { %v8208_v56 = vsel %vm18594_vm3, %v14465_v9, %v21368_v16  ;;  %v21380_v45 = vsel %vm18594_vm3, %v8209_v27, %v21368_v16  ;;  %v17622_v9 = vld [vmem:[%s22506_s2 + $0x90] sm:$0xff]   ;;  %v17624_v27 = vld [vmem:[%s22506_s2 + $0x98] sm:$0xff]  }
 0x5a0   : > { %v14476_v59 = vcombine.high %v8208_v56, %v21380_v45  ;;  %v14475_v49 = vcombine.low %v8208_v56, %v21380_v45  ;;  %v17625_v56 = vld [vmem:[%s22506_s2 + $0xe0] sm:$0xff]  }
 0x5a3   : > { %9828 = vmatmul.mubr.bf16.gmra.mrb[116].mxu1 %v21343_v34 }
 0x5a4   : > { %9835 = vmatprep.mubr.bf16.mxu1 %v21348_v53 }
 0x5ab   : > { %9836 = vmatmul.mubr.bf16.gmra.mrb[120].mxu1 %v21364_v32 }
 0x5ac   : > { %9843 = vmatprep.mubr.bf16.mxu1 %v21370_v1  ;;  %v17646_v1 = vld [vmem:[%s22506_s2 + $0x130] sm:$0xff]  }
 0x5b3   : > { %9844 = vmatmul.mubr.bf16.gmra.mrb[124].mxu1 %v21385_v3 }
 0x5b4   : > { %10172 = vmatprep.mubr.bf16.mxu1 %v14476_v59  ;;  %v17629_v59 = vld [vmem:[%s22506_s2 + $0xf0] sm:$0xff]  }
 0x5bb   : > { %10173 = vmatmul.mubr.bf16.vlgmr.msra.gmra.mrb[128].mxu1 %v14475_v49 }
 0x5bc   : > { %10180 = vmatprep.mubr.bf16.mxu1 %v20891_v41  ;;  %15408 = vmatpush3.bf16.msra.mxu1 %v17618_v44  ;;  %v17623_v41 = vld [vmem:[%s22506_s2 + $0xd8] sm:$0xff]  }
 0x5bd   : > { %15409 = vmatprep.subr.bf16.mxu1 %v17619_v33 }
 0x5c0   : > { %15410 = vmatpush3.bf16.msra.mxu1 %v17620_v18 }
 0x5c1   : > { %15411 = vmatprep.subr.bf16.mxu1 %v17621_v35  ;;  %v17630_v35 = vld [vmem:[%s22506_s2 + $0xb0] sm:$0xff]  }
 0x5c3   : > { %10181 = vmatmul.mubr.bf16.gmra.mrb[132].mxu1 %v20889_v43  ;;  %v17627_v43 = vld [vmem:[%s22506_s2 + $0xe8] sm:$0xff]  }
 0x5c4   : > { %10188 = vmatprep.mubr.bf16.mxu1 %v20931_v55  ;;  %15412 = vmatpush3.bf16.msra.mxu1 %v17622_v9 }
 0x5c5   : > { %15413 = vmatprep.subr.bf16.mxu1 %v17623_v41  ;;  %v17631_v41 = vld [vmem:[%s22506_s2 + $0xf8] sm:$0xff]  }
 0x5c8   : > { %15414 = vmatpush3.bf16.msra.mxu1 %v17624_v27  ;;  %v17632_v27 = vld [vmem:[%s22506_s2 + $0xb8] sm:$0xff]  }
 0x5c9   : > { %15415 = vmatprep.subr.bf16.mxu1 %v17625_v56  ;;  %v17633_v56 = vld [vmem:[%s22506_s2 + $0x140] sm:$0xff]  }
 0x5cb   : > { %10189 = vmatmul.mubr.bf16.gmra.mrb[136].mxu1 %v20933_v5 }
 0x5cc   : > { %10196 = vmatprep.mubr.bf16.mxu1 %v20967_v14  ;;  %15416 = vmatpush3.bf16.msra.mxu1 %v17626_v25 }
 0x5cd   : > { %15417 = vmatprep.subr.bf16.mxu1 %v17627_v43 }
 0x5ce   : > { %v15167_v49 = vpop.f32.mrb[32].mxu1 }
 0x5cf   : > { %v15168_v44 = vpop.f32.mrb[33].mxu1 }
 0x5d0   : > { %v21430_v33 = vadd.f32 %v15168_v44, %v15167_v49  ;;  %v15170_v18 = vpop.f32.mrb[34].mxu1  ;;  %15418 = vmatpush3.bf16.msra.mxu1 %v17628_v29 }
 0x5d1   : > { %v15171_v9 = vpop.f32.mrb[35].mxu1  ;;  %15419 = vmatprep.subr.bf16.mxu1 %v17629_v59 }
 0x5d3   : > { %10197 = vmatmul.mubr.bf16.gmra.mrb[140].mxu1 %v20969_v0 }
 0x5d4   : > { %10204 = vmatprep.mubr.bf16.mxu1 %v21007_v6  ;;  %15420 = vmatpush3.bf16.msra.mxu1 %v17630_v35 }
 0x5d5   : > { %15421 = vmatprep.subr.bf16.mxu1 %v17631_v41 }
 0x5d6   : > { %v15173_v25 = vpop.f32.mrb[36].mxu1 }
 0x5d7   : > { %v15174_v43 = vpop.f32.mrb[37].mxu1 }
 0x5d8   : > { %v21446_v29 = vadd.f32 %v15174_v43, %v15173_v25  ;;  %v15176_v59 = vpop.f32.mrb[38].mxu1  ;;  %15422 = vmatpush3.bf16.msra.mxu1 %v17632_v27 }
 0x5d9   : > { %v15177_v49 = vpop.f32.mrb[39].mxu1  ;;  %15471 = vmatprep.subr.bf16.mxu1 %v17633_v56 }
 0x5db   : > { %10205 = vmatmul.mubr.bf16.gmra.mrb[144].mxu1 %v21009_v2 }
 0x5dc   : > { %10212 = vmatprep.mubr.bf16.mxu1 %v21042_v7 }
 0x5de   : > { %v15179_v44 = vpop.f32.mrb[40].mxu1 }
 0x5df   : > { %v15180_v18 = vpop.f32.mrb[41].mxu1 }
 0x5e0   : > { %v21450_v35 = vadd.f32 %v15180_v18, %v15179_v44  ;;  %v15182_v9 = vpop.f32.mrb[42].mxu1 }
 0x5e1   : > { %v15183_v41 = vpop.f32.mrb[43].mxu1  ;;  %v21462_v9 = vcombine.high %v21345_v37, %v21345_v37 }
 0x5e3   : > { %10213 = vmatmul.mubr.bf16.gmra.mrb[148].mxu1 %v21044_v48  ;;  %22781 = vst [vmem:[#allocation55_spill] sm:$0xff] %v21462_v9 }
 0x5e4   : > { %10220 = vmatprep.mubr.bf16.mxu1 %v21075_v51 }
 0x5e6   : > { %v15185_v25 = vpop.f32.mrb[44].mxu1 }
 0x5e7   : > { %v15186_v43 = vpop.f32.mrb[45].mxu1 }
 0x5e8   : > { %v21454_v59 = vadd.f32 %v15186_v43, %v15185_v25  ;;  %v15188_v27 = vpop.f32.mrb[46].mxu1 }
 0x5e9   : > { %v15189_v56 = vpop.f32.mrb[47].mxu1  ;;  %v21468_v27 = vcombine.low %v21345_v37, %v21345_v37 }
 0x5eb   : > { %10221 = vmatmul.mubr.bf16.gmra.mrb[152].mxu1 %v21077_v46  ;;  %22782 = vst [vmem:[#allocation56_spill] sm:$0xff] %v21468_v27 }
 0x5ec   : > { %10228 = vmatprep.mubr.bf16.mxu1 %v21098_v47 }
 0x5ee   : > { %v15191_v49 = vpop.f32.mrb[48].mxu1 }
 0x5ef   : > { %v15192_v40 = vpop.f32.mrb[49].mxu1 }
 0x5f0   : > { %v21458_v44 = vadd.f32 %v15192_v40, %v15191_v49  ;;  %v15194_v18 = vpop.f32.mrb[50].mxu1  ;;  %v17634_v49 = vld [vmem:[%s22506_s2 + $0x100] sm:$0xff]  }
 0x5f1   : > { %v15195_v41 = vpop.f32.mrb[51].mxu1 }
 0x5f2   : > { %v17635_v41 = vld [vmem:[%s22506_s2 + $0x148] sm:$0xff]  }
 0x5f3   : > { %10229 = vmatmul.mubr.bf16.gmra.mrb[156].mxu1 %v21100_v21 }
 0x5f4   : > { %10269 = vmatprep.mubr.bf16.mxu1 %v21462_v9 }
 0x5f6   : > { %v15197_v25 = vpop.f32.mrb[52].mxu1 }
 0x5f7   : > { %v15198_v43 = vpop.f32.mrb[53].mxu1 }
 0x5f8   : > { %v21470_v56 = vadd.f32 %v15198_v43, %v15197_v25  ;;  %v15200_v40 = vpop.f32.mrb[54].mxu1  ;;  %v17636_v25 = vld [vmem:[%s22506_s2 + $0x108] sm:$0xff]   ;;  %v17637_v43 = vld [vmem:[%s22506_s2 + $0x150] sm:$0xff]  }
 0x5f9   : > { %v15201_v18 = vpop.f32.mrb[55].mxu1 }
 0x5fb   : > { %10270 = vmatmul.mubr.bf16.vlgmr.msra.gmra.mrb[160].mxu1 %v21468_v27 }
 0x5fc   : > { %10277 = vmatprep.mubr.bf16.mxu1 %v21124_v52  ;;  %15472 = vmatpush3.bf16.msra.mxu1 %v17634_v49  ;;  %v17638_v52 = vld [vmem:[%s22506_s2 + $0x110] sm:$0xff]  }
 0x5fd   : > { %15473 = vmatprep.subr.bf16.mxu1 %v17635_v41  ;;  %v17639_v41 = vld [vmem:[%s22506_s2 + $0x158] sm:$0xff]  }
 0x5fe   : > { %v15203_v40 = vpop.f32.mrb[56].mxu1 }
 0x5ff   : > { %v15204_v18 = vpop.f32.mrb[57].mxu1 }
 0x600   : > { %v21486_v39 = vadd.f32 %v15204_v18, %v15203_v40  ;;  %v15206_v3 = vpop.f32.mrb[58].mxu1  ;;  %15474 = vmatpush3.bf16.msra.mxu1 %v17636_v25  ;;  %v17641_v25 = vld [vmem:[%s22506_s2 + $0x160] sm:$0xff]  }
 0x601   : > { %v15207_v49 = vpop.f32.mrb[59].mxu1  ;;  %15475 = vmatprep.subr.bf16.mxu1 %v17637_v43  ;;  %v17640_v3 = vld [vmem:[%s22506_s2 + $0x118] sm:$0xff]  }
 0x603   : > { %10278 = vmatmul.mubr.bf16.gmra.mrb[164].mxu1 %v21133_v17  ;;  %v17642_v17 = vld [vmem:[%s22506_s2 + $0x120] sm:$0xff]  }
 0x604   : > { %10285 = vmatprep.mubr.bf16.mxu1 %v21140_v19  ;;  %15476 = vmatpush3.bf16.msra.mxu1 %v17638_v52 }
 0x605   : > { %15477 = vmatprep.subr.bf16.mxu1 %v17639_v41  ;;  %v17643_v41 = vld [vmem:[%s22506_s2 + $0x168] sm:$0xff]  }
 0x606   : > { %v15209_v40 = vpop.f32.mrb[60].mxu1 }
 0x607   : > { %v15210_v43 = vpop.f32.mrb[61].mxu1 }
 0x608   : > { %v21502_v18 = vadd.f32 %v15210_v43, %v15209_v40  ;;  %v15212_v49 = vpop.f32.mrb[62].mxu1  ;;  %15478 = vmatpush3.bf16.msra.mxu1 %v17640_v3  ;;  %v17644_v40 = vld [vmem:[%s22506_s2 + $0x128] sm:$0xff]   ;;  %v17645_v3 = vld [vmem:[%s22506_s2 + $0x170] sm:$0xff]  }
 0x609   : > { %v15213_v52 = vpop.f32.mrb[63].mxu1  ;;  %15479 = vmatprep.subr.bf16.mxu1 %v17641_v25 }
 0x60b   : > { %10286 = vmatmul.mubr.bf16.gmra.mrb[168].mxu1 %v21155_v20 }
 0x60c   : > { %10293 = vmatprep.mubr.bf16.mxu1 %v21162_v15  ;;  %15480 = vmatpush3.bf16.msra.mxu1 %v17642_v17  ;;  %v17647_v17 = vld [vmem:[%s22506_s2 + $0x178] sm:$0xff]   ;;  %v22783_v15 = vshrl.u32 %v21345_v37, 16 }
 0x60d   : > { %15481 = vmatprep.subr.bf16.mxu1 %v17643_v41 }
 0x60e   : > { %v15231_v43 = vpop.f32.mrb[64].mxu1  ;;  %v8689_v20 = vrot.slane %v22783_v15, 4 }
 0x60f   : > { %v15232_v25 = vpop.f32.mrb[65].mxu1 }
 0x610   : > { %v15233_v49 = vadd.f32 %v15232_v25, %v15231_v43  ;;  %v15234_v52 = vpop.f32.mrb[66].mxu1  ;;  %15482 = vmatpush3.bf16.msra.mxu1 %v17644_v40  ;;  %v17648_v40 = vld [vmem:[%s22506_s2 + $0x138] sm:$0xff]  }
 0x611   : > { %v15235_v27 = vpop.f32.mrb[67].mxu1  ;;  %15483 = vmatprep.subr.bf16.mxu1 %v17645_v3 }
 0x612   : > { %v21525_v41 = vadd.f32 %v15233_v49, %v21430_v33  ;;  %v17649_v27 = vld [vmem:[%s22506_s2 + $0x340] sm:$0xff]  }
 0x613   : > { %10294 = vmatmul.mubr.bf16.gmra.mrb[172].mxu1 %v21177_v4 }
 0x614   : > { %10301 = vmatprep.mubr.bf16.mxu1 %v21184_v8  ;;  %15484 = vmatpush3.bf16.msra.mxu1 %v17646_v1 }
 0x615   : > { %15485 = vmatprep.subr.bf16.mxu1 %v17647_v17 }
 0x616   : > { %v15237_v3 = vpop.f32.mrb[68].mxu1 }
 0x617   : > { %v15238_v43 = vpop.f32.mrb[69].mxu1 }
 0x618   : > { %v15239_v25 = vadd.f32 %v15238_v43, %v15237_v3  ;;  %v15240_v52 = vpop.f32.mrb[70].mxu1  ;;  %15486 = vmatpush3.bf16.msra.mxu1 %v17648_v40  ;;  %v22784_v3 = vshll.u32 %v21345_v37, 16 }
 0x619   : > { %v15241_v33 = vpop.f32.mrb[71].mxu1  ;;  %15535 = vmatprep.subr.bf16.mxu1 %v17649_v27 }
 0x61a   : > { %v21536_v49 = vadd.f32 %v15239_v25, %v21446_v29  ;;  %v8692_v40 = vrot.slane %v22784_v3, 5  ;;  %v8658_v29 = vld [vmem:[#allocation3 + $0x20] sm:$0x11] }
 0x61b   : > { %10302 = vmatmul.mubr.bf16.gmra.mrb[176].mxu1 %v21199_v36  ;;  %v8706_v25 = vshll.u32 %v8658_v29, 16 }
 0x61c   : > { %10309 = vmatprep.mubr.bf16.mxu1 %v21206_v13  ;;  %v8693_v43 = vor.u32 %v8692_v40, %v8689_v20 }
 0x61d   : > { %v8708_v15 = vrot.slane %v8706_v25, 5 }
 0x61e   : > { %v15243_v1 = vpop.f32.mrb[72].mxu1 }
 0x61f   : > { %v15244_v17 = vpop.f32.mrb[73].mxu1 }
 0x620   : > { %v15245_v9 = vadd.f32 %v15244_v17, %v15243_v1  ;;  %v15246_v8 = vpop.f32.mrb[74].mxu1  ;;  %v21549_v17 = vrot.slane %v8693_v43, 4 }
 0x621   : > { %v15247_v4 = vpop.f32.mrb[75].mxu1 }
 0x622   : > { %v21545_v27 = vadd.f32 %v15245_v9, %v21450_v35  ;;  %v21559_v20 = vsel %vm18508_vm9, %v21549_v17, %v8692_v40  ;;  %v8709_v35 = vsel %vm18508_vm9, %v21549_v17, %v8708_v15  ;;  %v17650_v15 = vld [vmem:[%s22506_s2 + $0x300] sm:$0xff]  }
 0x623   : > { %10310 = vmatmul.mubr.bf16.gmra.mrb[180].mxu1 %v21218_v26 }
 0x624   : > { %10317 = vmatprep.mubr.bf16.mxu1 %v21222_v58 }
 0x626   : > { %v15249_v52 = vpop.f32.mrb[76].mxu1 }
 0x627   : > { %v15250_v33 = vpop.f32.mrb[77].mxu1 }
 0x628   : > { %v15251_v8 = vadd.f32 %v15250_v33, %v15249_v52  ;;  %v15252_v4 = vpop.f32.mrb[78].mxu1 }
 0x629   : > { %v15253_v1 = vpop.f32.mrb[79].mxu1 }
 0x62a   : > { %v21552_v37 = vadd.f32 %v15251_v8, %v21454_v59  ;;  %v14516_v59 = vcombine.high %v21559_v20, %v8709_v35  ;;  %v14515_v8 = vcombine.low %v21559_v20, %v8709_v35  ;;  %v17652_v35 = vld [vmem:[%s22506_s2 + $0x308] sm:$0xff]  }
 0x62b   : > { %10318 = vmatmul.mubr.bf16.gmra.mrb[184].mxu1 %v21228_v22 }
 0x62c   : > { %10325 = vmatprep.mubr.bf16.mxu1 %v21232_v11 }
 0x62e   : > { %v15255_v9 = vpop.f32.mrb[80].mxu1 }
 0x62f   : > { %v15256_v3 = vpop.f32.mrb[81].mxu1 }
 0x630   : > { %v15257_v29 = vadd.f32 %v15256_v3, %v15255_v9  ;;  %v15258_v43 = vpop.f32.mrb[82].mxu1  ;;  %v17651_v3 = vld [vmem:[%s22506_s2 + $0x348] sm:$0xff]  }
 0x631   : > { %v15259_v25 = vpop.f32.mrb[83].mxu1 }
 0x632   : > { %v21566_v52 = vadd.f32 %v15257_v29, %v21458_v44  ;;  %v17653_v29 = vld [vmem:[%s22506_s2 + $0x350] sm:$0xff]  }
 0x633   : > { %10326 = vmatmul.mubr.bf16.gmra.mrb[188].mxu1 %v21238_v10 }
 0x634   : > { %10366 = vmatprep.mubr.bf16.mxu1 %v14516_v59 }
 0x636   : > { %v15261_v33 = vpop.f32.mrb[84].mxu1 }
 0x637   : > { %v15262_v40 = vpop.f32.mrb[85].mxu1 }
 0x638   : > { %v15263_v4 = vadd.f32 %v15262_v40, %v15261_v33  ;;  %v15264_v1 = vpop.f32.mrb[86].mxu1  ;;  %v17655_v40 = vld [vmem:[%s22506_s2 + $0x358] sm:$0xff]  }
 0x639   : > { %v15265_v9 = vpop.f32.mrb[87].mxu1  ;;  %v17657_v1 = vld [vmem:[%s22506_s2 + $0x360] sm:$0xff]  }
 0x63a   : > { %v21577_v44 = vadd.f32 %v15263_v4, %v21470_v56  ;;  %v17654_v56 = vld [vmem:[%s22506_s2 + $0x310] sm:$0xff]   ;;  %v17656_v4 = vld [vmem:[%s22506_s2 + $0x318] sm:$0xff]  }
 0x63b   : > { %10367 = vmatmul.mubr.bf16.vlgmr.msra.gmra.mrb[192].mxu1 %v14515_v8 }
 0x63c   : > { %10374 = vmatprep.mubr.bf16.mxu1 %v20913_v63  ;;  %15536 = vmatpush3.bf16.msra.mxu1 %v17650_v15 }
 0x63d   : > { %15537 = vmatprep.subr.bf16.mxu1 %v17651_v3 }
 0x63e   : > { %v15267_v43 = vpop.f32.mrb[88].mxu1 }
 0x63f   : > { %v15268_v59 = vpop.f32.mrb[89].mxu1 }
 0x640   : > { %v15269_v25 = vadd.f32 %v15268_v59, %v15267_v43  ;;  %v15270_v33 = vpop.f32.mrb[90].mxu1  ;;  %15538 = vmatpush3.bf16.msra.mxu1 %v17652_v35  ;;  %v17660_v59 = vld [vmem:[%s22506_s2 + $0x328] sm:$0xff]  }
 0x641   : > { %v15271_v63 = vpop.f32.mrb[91].mxu1  ;;  %15539 = vmatprep.subr.bf16.mxu1 %v17653_v29  ;;  %v17659_v29 = vld [vmem:[%s22506_s2 + $0x368] sm:$0xff]  }
 0x642   : > { %v21593_v8 = vadd.f32 %v15269_v25, %v21486_v39  ;;  %v17661_v25 = vld [vmem:[%s22506_s2 + $0x370] sm:$0xff]  }
 0x643   : > { %10375 = vmatmul.mubr.bf16.gmra.mrb[196].mxu1 %v20911_v38  ;;  %v17658_v38 = vld [vmem:[%s22506_s2 + $0x320] sm:$0xff]  }
 0x644   : > { %10382 = vmatprep.mubr.bf16.mxu1 %v20950_v24  ;;  %15540 = vmatpush3.bf16.msra.mxu1 %v17654_v56 }
 0x645   : > { %15541 = vmatprep.subr.bf16.mxu1 %v17655_v40 }
 0x646   : > { %v15273_v15 = vpop.f32.mrb[92].mxu1 }
 0x647   : > { %v15274_v9 = vpop.f32.mrb[93].mxu1 }
 0x648   : > { %v15275_v3 = vadd.f32 %v15274_v9, %v15273_v15  ;;  %v15276_v35 = vpop.f32.mrb[94].mxu1  ;;  %15542 = vmatpush3.bf16.msra.mxu1 %v17656_v4  ;;  %v17664_v9 = vld [vmem:[%s22506_s2 + $0x338] sm:$0xff]  }
 0x649   : > { %v15277_v39 = vpop.f32.mrb[95].mxu1  ;;  %15543 = vmatprep.subr.bf16.mxu1 %v17657_v1  ;;  %v17663_v1 = vld [vmem:[%s22506_s2 + $0x378] sm:$0xff]  }
 0x64a   : > { %v21610_v43 = vadd.f32 %v15275_v3, %v21502_v18  ;;  %v17662_v18 = vld [vmem:[%s22506_s2 + $0x330] sm:$0xff]   ;;  %v17665_v3 = vld [vmem:[%s22506_s2 + $0x3c0] sm:$0xff]  }
 0x64b   : > { %10383 = vmatmul.mubr.bf16.gmra.mrb[200].mxu1 %v20952_v42 }
 0x64c   : > { %10390 = vmatprep.mubr.bf16.mxu1 %v20990_v54  ;;  %15544 = vmatpush3.bf16.msra.mxu1 %v17658_v38 }
 0x64d   : > { %15545 = vmatprep.subr.bf16.mxu1 %v17659_v29 }
 0x64e   : > { %v15295_v33 = vpop.f32.mrb[96].mxu1 }
 0x64f   : > { %v15296_v56 = vpop.f32.mrb[97].mxu1 }
 0x650   : > { %v15297_v63 = vadd.f32 %v15296_v56, %v15295_v33  ;;  %v15298_v40 = vpop.f32.mrb[98].mxu1  ;;  %15546 = vmatpush3.bf16.msra.mxu1 %v17660_v59 }
 0x651   : > { %v15299_v4 = vpop.f32.mrb[99].mxu1  ;;  %15547 = vmatprep.subr.bf16.mxu1 %v17661_v25 }
 0x652   : > { %v21627_v15 = vadd.f32 %v15297_v63, %v21525_v41 }
 0x653   : > { %10391 = vmatmul.mubr.bf16.gmra.mrb[204].mxu1 %v20992_v30 }
 0x654   : > { %10398 = vmatprep.mubr.bf16.mxu1 %v21058_v23  ;;  %15548 = vmatpush3.bf16.msra.mxu1 %v17662_v18 }
 0x655   : > { %15549 = vmatprep.subr.bf16.mxu1 %v17663_v1 }
 0x656   : > { %v15301_v35 = vpop.f32.mrb[100].mxu1 }
 0x657   : > { %v15302_v38 = vpop.f32.mrb[101].mxu1 }
 0x658   : > { %v15303_v39 = vadd.f32 %v15302_v38, %v15301_v35  ;;  %v15304_v29 = vpop.f32.mrb[102].mxu1  ;;  %15550 = vmatpush3.bf16.msra.mxu1 %v17664_v9 }
 0x659   : > { %v15305_v41 = vpop.f32.mrb[103].mxu1  ;;  %15599 = vmatprep.subr.bf16.mxu1 %v17665_v3 }
 0x65a   : > { %v21638_v59 = vadd.f32 %v15303_v39, %v21536_v49 }
 0x65b   : > { %10399 = vmatmul.mubr.bf16.gmra.mrb[208].mxu1 %v21060_v61 }
 0x65c   : > { %10406 = vmatprep.mubr.bf16.mxu1 %v21309_v60 }
 0x65e   : > { %v15307_v25 = vpop.f32.mrb[104].mxu1 }
 0x65f   : > { %v15308_v33 = vpop.f32.mrb[105].mxu1 }
 0x660   : > { %v15309_v56 = vadd.f32 %v15308_v33, %v15307_v25  ;;  %v15310_v63 = vpop.f32.mrb[106].mxu1 }
 0x661   : > { %v15311_v40 = vpop.f32.mrb[107].mxu1 }
 0x662   : > { %v21643_v18 = vadd.f32 %v15309_v56, %v21545_v27  ;;  %v17666_v40 = vld [vmem:[%s22506_s2 + $0x380] sm:$0xff]  }
 0x663   : > { %10407 = vmatmul.mubr.bf16.gmra.mrb[212].mxu1 %v21328_v12 }
 0x664   : > { %10414 = vmatprep.mubr.bf16.mxu1 %v21330_v57 }
 0x666   : > { %v15313_v4 = vpop.f32.mrb[108].mxu1 }
 0x667   : > { %v15314_v1 = vpop.f32.mrb[109].mxu1 }
 0x668   : > { %v15315_v49 = vadd.f32 %v15314_v1, %v15313_v4  ;;  %v15316_v9 = vpop.f32.mrb[110].mxu1  ;;  %v17667_v1 = vld [vmem:[%s22506_s2 + $0x3c8] sm:$0xff]  }
 0x669   : > { %v15317_v3 = vpop.f32.mrb[111].mxu1 }
 0x66a   : > { %v21648_v35 = vadd.f32 %v15315_v49, %v21552_v37  ;;  %v17669_v49 = vld [vmem:[%s22506_s2 + $0x3d0] sm:$0xff]  }
 0x66b   : > { %10415 = vmatmul.mubr.bf16.gmra.mrb[216].mxu1 %v21343_v34 }
 0x66c   : > { %10422 = vmatprep.mubr.bf16.mxu1 %v21348_v53 }
 0x66e   : > { %v15319_v38 = vpop.f32.mrb[112].mxu1 }
 0x66f   : > { %v15320_v39 = vpop.f32.mrb[113].mxu1 }
 0x670   : > { %v15321_v27 = vadd.f32 %v15320_v39, %v15319_v38  ;;  %v15322_v29 = vpop.f32.mrb[114].mxu1 }
 0x671   : > { %v15323_v41 = vpop.f32.mrb[115].mxu1  ;;  %v17672_v29 = vld [vmem:[%s22506_s2 + $0x398] sm:$0xff]  }
 0x672   : > { %v21653_v25 = vadd.f32 %v15321_v27, %v21566_v52  ;;  %v17673_v41 = vld [vmem:[%s22506_s2 + $0x3e0] sm:$0xff]  }
 0x673   : > { %10423 = vmatmul.mubr.bf16.gmra.mrb[220].mxu1 %v21364_v32 }
 0x674   : > { %10896 = vmatprep.mubr.bf16.mxu1 %v20931_v55  ;;  %v17668_v55 = vld [vmem:[%s22506_s2 + $0x388] sm:$0xff]  }
 0x676   : > { %v15325_v33 = vpop.f32.mrb[116].mxu1 }
 0x677   : > { %v15326_v56 = vpop.f32.mrb[117].mxu1 }
 0x678   : > { %v15327_v37 = vadd.f32 %v15326_v56, %v15325_v33  ;;  %v15328_v63 = vpop.f32.mrb[118].mxu1 }
 0x679   : > { %v15329_v4 = vpop.f32.mrb[119].mxu1 }
 0x67a   : > { %v21664_v52 = vadd.f32 %v15327_v37, %v21577_v44  ;;  %v17671_v44 = vld [vmem:[%s22506_s2 + $0x3d8] sm:$0xff]   ;;  %v17676_v4 = vld [vmem:[%s22506_s2 + $0x3a8] sm:$0xff]  }
 0x67b   : > { %10897 = vmatmul.mubr.bf16.vlgmr.msra.gmra.mrb[224].mxu1 %v20933_v5  ;;  %v17670_v5 = vld [vmem:[%s22506_s2 + $0x390] sm:$0xff]  }
 0x67c   : > { %10904 = vmatprep.mubr.bf16.mxu1 %v20967_v14  ;;  %15600 = vmatpush3.bf16.msra.mxu1 %v17666_v40 }
 0x67d   : > { %15601 = vmatprep.subr.bf16.mxu1 %v17667_v1  ;;  %v17677_v1 = vld [vmem:[%s22506_s2 + $0x3f0] sm:$0xff]  }
 0x67e   : > { %v15331_v9 = vpop.f32.mrb[120].mxu1 }
 0x67f   : > { %v15332_v3 = vpop.f32.mrb[121].mxu1 }
 0x680   : > { %v15333_v38 = vadd.f32 %v15332_v3, %v15331_v9  ;;  %v15334_v39 = vpop.f32.mrb[122].mxu1  ;;  %15602 = vmatpush3.bf16.msra.mxu1 %v17668_v55 }
 0x681   : > { %v15335_v14 = vpop.f32.mrb[123].mxu1  ;;  %15603 = vmatprep.subr.bf16.mxu1 %v17669_v49  ;;  %v17680_v39 = vld [vmem:[%s22506_s2 + $0x3b8] sm:$0xff]  }
 0x682   : > { %v21681_v27 = vadd.f32 %v15333_v38, %v21593_v8  ;;  %v17675_v8 = vld [vmem:[%s22506_s2 + $0x3e8] sm:$0xff]  }
 0x683   : > { %10905 = vmatmul.mubr.bf16.gmra.mrb[228].mxu1 %v20969_v0  ;;  %v17674_v0 = vld [vmem:[%s22506_s2 + $0x3a0] sm:$0xff]  }
 0x684   : > { %10912 = vmatprep.mubr.bf16.mxu1 %v21007_v6  ;;  %15604 = vmatpush3.bf16.msra.mxu1 %v17670_v5  ;;  %v17681_v5 = vld [vmem:[%s22506_s2 + $0x440] sm:$0xff]  }
 0x685   : > { %15605 = vmatprep.subr.bf16.mxu1 %v17671_v44 }
 0x686   : > { %v15337_v33 = vpop.f32.mrb[124].mxu1 }
 0x687   : > { %v15338_v56 = vpop.f32.mrb[125].mxu1 }
 0x688   : > { %v15339_v37 = vadd.f32 %v15338_v56, %v15337_v33  ;;  %v15340_v63 = vpop.f32.mrb[126].mxu1  ;;  %15606 = vmatpush3.bf16.msra.mxu1 %v17672_v29 }
 0x689   : > { %v15341_v6 = vpop.f32.mrb[127].mxu1  ;;  %15607 = vmatprep.subr.bf16.mxu1 %v17673_v41 }
 0x68a   : > { %v21698_v40 = vadd.f32 %v15339_v37, %v21610_v43  ;;  %v17679_v43 = vld [vmem:[%s22506_s2 + $0x3f8] sm:$0xff]  }
 0x68b   : > { %10913 = vmatmul.mubr.bf16.gmra.mrb[232].mxu1 %v21009_v2  ;;  %v17678_v2 = vld [vmem:[%s22506_s2 + $0x3b0] sm:$0xff]  }
 0x68c   : > { %10920 = vmatprep.mubr.bf16.mxu1 %v21042_v7  ;;  %15608 = vmatpush3.bf16.msra.mxu1 %v17674_v0 }
 0x68d   : > { %15609 = vmatprep.subr.bf16.mxu1 %v17675_v8 }
 0x68e   : > { %v15359_v55 = vpop.f32.mrb[128].mxu1 }
 0x68f   : > { %v15360_v49 = vpop.f32.mrb[129].mxu1 }
 0x690   : > { %v15361_v9 = vadd.f32 %v15360_v49, %v15359_v55  ;;  %v15362_v3 = vpop.f32.mrb[130].mxu1  ;;  %15610 = vmatpush3.bf16.msra.mxu1 %v17676_v4 }
 0x691   : > { %v15363_v7 = vpop.f32.mrb[131].mxu1  ;;  %15611 = vmatprep.subr.bf16.mxu1 %v17677_v1 }
 0x692   : > { %v21715_v38 = vadd.f32 %v15361_v9, %v21627_v15 }
 0x693   : > { %10921 = vmatmul.mubr.bf16.gmra.mrb[236].mxu1 %v21044_v48 }
 0x694   : > { %10928 = vmatprep.mubr.bf16.mxu1 %v21075_v51  ;;  %15612 = vmatpush3.bf16.msra.mxu1 %v17678_v2  ;;  %v8193_v51 = vld [vmem:[#allocation3 + $0x170] sm:$0x88] }
 0x695   : > { %15613 = vmatprep.subr.bf16.mxu1 %v17679_v43  ;;  %v8395_v33 = vshrl.u32 %v8193_v51, 16 }
 0x696   : > { %v15365_v14 = vpop.f32.mrb[132].mxu1 }
 0x697   : > { %v15366_v44 = vpop.f32.mrb[133].mxu1  ;;  %v14474_v8 = vrot.slane %v8395_v33, 11  ;;  %v22787_v33 = vld [vmem:[#allocation48_spill] sm:$0xff] }
 0x698   : > { %v15367_v29 = vadd.f32 %v15366_v44, %v15365_v14  ;;  %v15368_v41 = vpop.f32.mrb[134].mxu1  ;;  %15614 = vmatpush3.bf16.msra.mxu1 %v17680_v39 }
 0x699   : > { %v15369_v15 = vpop.f32.mrb[135].mxu1  ;;  %15663 = vmatprep.subr.bf16.mxu1 %v17681_v5  ;;  %v17682_v41 = vld [vmem:[%s22506_s2 + $0x400] sm:$0xff]  }
 0x69a   : > { %v21726_v48 = vadd.f32 %v15367_v29, %v21638_v59  ;;  %v364_v59 = vld [vmem:[#allocation3 + $0x188] sm:$0x11] }
 0x69b   : > { %10929 = vmatmul.mubr.bf16.gmra.mrb[240].mxu1 %v21077_v46  ;;  %v8406_v46 = vsel %vm18594_vm3, %v14474_v8, %v21368_v16  ;;  %v365_v1 = vsel %vm18171_vm6, 0, %v364_v59 }
 0x69c   : > { %10936 = vmatprep.mubr.bf16.mxu1 %v21098_v47  ;;  %366 = vst [vmem:[#allocation3 + $0x188] sm:$0x11] %v365_v1  ;;  %v14493_v7 = vcombine.low %v8406_v46, %v21380_v45  ;;  %v22789_v1 = vld [vmem:[#allocation50_spill] sm:$0xff] }
 0x69e   : > { %v15371_v56 = vpop.f32.mrb[136].mxu1 }
 0x69f   : > { %v15372_v37 = vpop.f32.mrb[137].mxu1 }
 0x6a0   : > { %v15373_v63 = vadd.f32 %v15372_v37, %v15371_v56  ;;  %v15374_v0 = vpop.f32.mrb[138].mxu1  ;;  %v17685_v56 = vld [vmem:[%s22506_s2 + $0x450] sm:$0xff]  }
 0x6a1   : > { %v15375_v6 = vpop.f32.mrb[139].mxu1 }
 0x6a2   : > { %v21731_v4 = vadd.f32 %v15373_v63, %v21643_v18  ;;  %v14494_v18 = vcombine.high %v8406_v46, %v21380_v45  ;;  %v17683_v45 = vld [vmem:[%s22506_s2 + $0x448] sm:$0xff]   ;;  %v17687_v46 = vld [vmem:[%s22506_s2 + $0x458] sm:$0xff]  }
 0x6a3   : > { %10937 = vmatmul.mubr.bf16.gmra.mrb[244].mxu1 %v21100_v21 }
 0x6a4   : > { %10944 = vmatprep.mubr.bf16.mxu1 %v21117_v28  ;;  %v22785_v28 = vld [vmem:[#allocation32_spill] sm:$0xff] }
 0x6a6   : > { %v15377_v47 = vpop.f32.mrb[140].mxu1 }
 0x6a7   : > { %v15378_v55 = vpop.f32.mrb[141].mxu1 }
 0x6a8   : > { %v15379_v49 = vadd.f32 %v15378_v55, %v15377_v47  ;;  %v15380_v9 = vpop.f32.mrb[142].mxu1  ;;  %v22788_v47 = vld [vmem:[#allocation49_spill] sm:$0xff] }
 0x6a9   : > { %v15381_v3 = vpop.f32.mrb[143].mxu1  ;;  %v17688_v55 = vld [vmem:[%s22506_s2 + $0x418] sm:$0xff]  }
 0x6aa   : > { %v21742_v21 = vadd.f32 %v15379_v49, %v21648_v35  ;;  %v17689_v49 = vld [vmem:[%s22506_s2 + $0x460] sm:$0xff]  }
 0x6ab   : > { %10945 = vmatmul.mubr.bf16.gmra.mrb[248].mxu1 %v22785_v28 }
 0x6ac   : > { %10952 = vmatprep.mubr.bf16.mxu1 %v14494_v18 }
 0x6ae   : > { %v15383_v2 = vpop.f32.mrb[144].mxu1 }
 0x6af   : > { %v15384_v16 = vpop.f32.mrb[145].mxu1 }
 0x6b0   : > { %v15385_v43 = vadd.f32 %v15384_v16, %v15383_v2  ;;  %v15386_v62 = vpop.f32.mrb[146].mxu1  ;;  %v17691_v16 = vld [vmem:[%s22506_s2 + $0x468] sm:$0xff]  }
 0x6b1   : > { %v15387_v39 = vpop.f32.mrb[147].mxu1  ;;  %v17693_v62 = vld [vmem:[%s22506_s2 + $0x470] sm:$0xff]  }
 0x6b2   : > { %v21747_v5 = vadd.f32 %v15385_v43, %v21653_v25  ;;  %v22786_v25 = vld [vmem:[#allocation33_spill] sm:$0xff]  ;;  %v17692_v43 = vld [vmem:[%s22506_s2 + $0x428] sm:$0xff]  }
 0x6b3   : > { %10953 = vmatmul.mubr.bf16.gmra.mrb[252].mxu1 %v14493_v7 }
 0x6b4   : > { %10993 = vmatprep.mubr.bf16.mxu1 %v21140_v19  ;;  %v17684_v19 = vld [vmem:[%s22506_s2 + $0x408] sm:$0xff]  }
 0x6b6   : > { %v15389_v14 = vpop.f32.mrb[148].mxu1 }
 0x6b7   : > { %v15390_v44 = vpop.f32.mrb[149].mxu1 }
 0x6b8   : > { %v15391_v35 = vadd.f32 %v15390_v44, %v15389_v14  ;;  %v15392_v29 = vpop.f32.mrb[150].mxu1 }
 0x6b9   : > { %v15393_v15 = vpop.f32.mrb[151].mxu1 }
 0x6ba   : > { %v21757_v51 = vadd.f32 %v15391_v35, %v21664_v52  ;;  %v17686_v52 = vld [vmem:[%s22506_s2 + $0x410] sm:$0xff]  }
 0x6bb   : > { %10994 = vmatmul.mubr.bf16.vlgmr.msra.gmra.mrb[0].mxu1 %v22786_v25 }
 0x6bc   : > { %11001 = vmatprep.mubr.bf16.mxu1 %v22787_v33  ;;  %15664 = vmatpush3.bf16.msra.mxu1 %v17682_v41  ;;  %v17696_v41 = vld [vmem:[%s22506_s2 + $0x438] sm:$0xff]  }
 0x6bd   : > { %15665 = vmatprep.subr.bf16.mxu1 %v17683_v45 }
 0x6be   : > { %v15395_v37 = vpop.f32.mrb[152].mxu1 }
 0x6bf   : > { %v15396_v63 = vpop.f32.mrb[153].mxu1 }
 0x6c0   : > { %v15397_v0 = vadd.f32 %v15396_v63, %v15395_v37  ;;  %v15398_v6 = vpop.f32.mrb[154].mxu1  ;;  %15666 = vmatpush3.bf16.msra.mxu1 %v17684_v19 }
 0x6c1   : > { %v15399_v8 = vpop.f32.mrb[155].mxu1  ;;  %15667 = vmatprep.subr.bf16.mxu1 %v17685_v56  ;;  %v22790_v6 = vld [vmem:[#allocation51_spill] sm:$0xff] }
 0x6c2   : > { %v21774_v59 = vadd.f32 %v15397_v0, %v21681_v27  ;;  %v17690_v27 = vld [vmem:[%s22506_s2 + $0x420] sm:$0xff]  }
 0x6c3   : > { %11002 = vmatmul.mubr.bf16.gmra.mrb[4].mxu1 %v22788_v47 }
 0x6c4   : > { %11009 = vmatprep.mubr.bf16.mxu1 %v22789_v1  ;;  %15668 = vmatpush3.bf16.msra.mxu1 %v17686_v52  ;;  %v22792_v1 = vld [vmem:[#allocation55_spill] sm:$0xff] }
 0x6c5   : > { %15669 = vmatprep.subr.bf16.mxu1 %v17687_v46 }
 0x6c6   : > { %v15401_v9 = vpop.f32.mrb[156].mxu1 }
 0x6c7   : > { %v15402_v18 = vpop.f32.mrb[157].mxu1 }
 0x6c8   : > { %v15403_v3 = vadd.f32 %v15402_v18, %v15401_v9  ;;  %v15404_v28 = vpop.f32.mrb[158].mxu1  ;;  %15670 = vmatpush3.bf16.msra.mxu1 %v17688_v55 }
 0x6c9   : > { %v15405_v2 = vpop.f32.mrb[159].mxu1  ;;  %15671 = vmatprep.subr.bf16.mxu1 %v17689_v49 }
 0x6ca   : > { %v21791_v7 = vadd.f32 %v15403_v3, %v21698_v40  ;;  %v17695_v40 = vld [vmem:[%s22506_s2 + $0x478] sm:$0xff]  }
 0x6cb   : > { %11010 = vmatmul.mubr.bf16.gmra.mrb[8].mxu1 %v21199_v36  ;;  %v17694_v36 = vld [vmem:[%s22506_s2 + $0x430] sm:$0xff]  }
 0x6cc   : > { %11017 = vmatprep.mubr.bf16.mxu1 %v21206_v13  ;;  %15672 = vmatpush3.bf16.msra.mxu1 %v17690_v27  ;;  %v22793_v3 = vld [vmem:[#allocation56_spill] sm:$0xff] }
 0x6cd   : > { %15673 = vmatprep.subr.bf16.mxu1 %v17691_v16 }
 0x6ce   : > { %v15423_v39 = vpop.f32.mrb[160].mxu1 }
 0x6cf   : > { %v15424_v14 = vpop.f32.mrb[161].mxu1 }
 0x6d0   : > { %v15425_v44 = vadd.f32 %v15424_v14, %v15423_v39  ;;  %v15426_v35 = vpop.f32.mrb[162].mxu1  ;;  %15674 = vmatpush3.bf16.msra.mxu1 %v17692_v43 }
 0x6d1   : > { %v15427_v13 = vpop.f32.mrb[163].mxu1  ;;  %15675 = vmatprep.subr.bf16.mxu1 %v17693_v62 }
 0x6d2   : > { %v21808_v29 = vadd.f32 %v15425_v44, %v21715_v38 }
 0x6d3   : > { %11018 = vmatmul.mubr.bf16.gmra.mrb[12].mxu1 %v21218_v26 }
 0x6d4   : > { %11025 = vmatprep.mubr.bf16.mxu1 %v21222_v58  ;;  %15676 = vmatpush3.bf16.msra.mxu1 %v17694_v36 }
 0x6d5   : > { %15677 = vmatprep.subr.bf16.mxu1 %v17695_v40 }
 0x6d6   : > { %v15429_v15 = vpop.f32.mrb[164].mxu1 }
 0x6d7   : > { %v15430_v45 = vpop.f32.mrb[165].mxu1 }
 0x6d8   : > { %v15431_v25 = vadd.f32 %v15430_v45, %v15429_v15  ;;  %v15432_v33 = vpop.f32.mrb[166].mxu1  ;;  %15678 = vmatpush3.bf16.msra.mxu1 %v17696_v41 }
 0x6d9   : > { %v15433_v19 = vpop.f32.mrb[167].mxu1 }
 0x6da   : > { %v21816_v56 = vadd.f32 %v15431_v25, %v21726_v48 }
 0x6db   : > { %11026 = vmatmul.mubr.bf16.gmra.mrb[16].mxu1 %v21228_v22 }
 0x6dc   : > { %11033 = vmatprep.mubr.bf16.mxu1 %v21232_v11  ;;  %v22791_v11 = vld [vmem:[#allocation52_spill] sm:$0xff] }
 0x6de   : > { %v15435_v26 = vpop.f32.mrb[168].mxu1 }
 0x6df   : > { %v15436_v58 = vpop.f32.mrb[169].mxu1 }
 0x6e0   : > { %v15437_v38 = vadd.f32 %v15436_v58, %v15435_v26  ;;  %v15438_v37 = vpop.f32.mrb[170].mxu1 }
 0x6e1   : > { %v15439_v63 = vpop.f32.mrb[171].mxu1 }
 0x6e2   : > { %v21821_v0 = vadd.f32 %v15437_v38, %v21731_v4 }
 0x6e3   : > { %11034 = vmatmul.mubr.bf16.gmra.mrb[20].mxu1 %v21238_v10 }
 0x6e4   : > { %11041 = vmatprep.mubr.bf16.mxu1 %v22790_v6  ;;  %v22794_v6 = vld [vmem:[#allocation53_spill] sm:$0xff] }
 0x6e6   : > { %v15441_v52 = vpop.f32.mrb[172].mxu1 }
 0x6e7   : > { %v15442_v8 = vpop.f32.mrb[173].mxu1 }
 0x6e8   : > { %v15443_v48 = vadd.f32 %v15442_v8, %v15441_v52  ;;  %v15444_v46 = vpop.f32.mrb[174].mxu1 }
 0x6e9   : > { %v15445_v47 = vpop.f32.mrb[175].mxu1 }
 0x6ea   : > { %v21826_v22 = vadd.f32 %v15443_v48, %v21742_v21 }
 0x6eb   : > { %11042 = vmatmul.mubr.bf16.gmra.mrb[24].mxu1 %v22791_v11  ;;  %v22795_v11 = vld [vmem:[#allocation54_spill] sm:$0xff] }
 0x6ec   : > { %11049 = vmatprep.mubr.bf16.mxu1 %v22792_v1 }
 0x6ee   : > { %v15447_v55 = vpop.f32.mrb[176].mxu1 }
 0x6ef   : > { %v15448_v49 = vpop.f32.mrb[177].mxu1 }
 0x6f0   : > { %v15449_v4 = vadd.f32 %v15448_v49, %v15447_v55  ;;  %v15450_v9 = vpop.f32.mrb[178].mxu1 }
 0x6f1   : > { %v15451_v18 = vpop.f32.mrb[179].mxu1 }
 0x6f2   : > { %v21831_v10 = vadd.f32 %v15449_v4, %v21747_v5  ;;  %v17699_v18 = vld [vmem:[%s22507_s3 + $0x108] sm:$0xff]  }
 0x6f3   : > { %11050 = vmatmul.mubr.bf16.gmra.mrb[28].mxu1 %v22793_v3  ;;  %v17700_v3 = vld [vmem:[%s22507_s3 + $0xc8] sm:$0xff]  }
 0x6f4   : > { %11090 = vmatprep.mubr.bf16.mxu1 %v20950_v24 }
 0x6f6   : > { %v15453_v28 = vpop.f32.mrb[180].mxu1 }
 0x6f7   : > { %v15454_v27 = vpop.f32.mrb[181].mxu1 }
 0x6f8   : > { %v15455_v21 = vadd.f32 %v15454_v27, %v15453_v28  ;;  %v15456_v2 = vpop.f32.mrb[182].mxu1 }
 0x6f9   : > { %v15457_v16 = vpop.f32.mrb[183].mxu1 }
 0x6fa   : > { %v21836_v43 = vadd.f32 %v15455_v21, %v21757_v51 }
 0x6fb   : > { %11091 = vmatmul.mubr.bf16.vlgmr.msra.gmra.mrb[32].mxu1 %v20952_v42 }
 0x6fc   : > { %11098 = vmatprep.mubr.bf16.mxu1 %v20990_v54 }
 0x6fe   : > { %v15459_v62 = vpop.f32.mrb[184].mxu1 }
 0x6ff   : > { %v15460_v39 = vpop.f32.mrb[185].mxu1 }
 0x700   : > { %v15461_v5 = vadd.f32 %v15460_v39, %v15459_v62  ;;  %v15462_v14 = vpop.f32.mrb[186].mxu1  ;;  %v17702_v62 = vld [vmem:[%s22507_s3 + $0xd0] sm:$0xff]  }
 0x701   : > { %v15463_v44 = vpop.f32.mrb[187].mxu1 }
 0x702   : > { %v21841_v35 = vadd.f32 %v15461_v5, %v21774_v59 }
 0x703   : > { %11099 = vmatmul.mubr.bf16.gmra.mrb[36].mxu1 %v20992_v30 }
 0x704   : > { %11106 = vmatprep.mubr.bf16.mxu1 %v21058_v23 }
 0x706   : > { %v15465_v24 = vpop.f32.mrb[188].mxu1 }
 0x707   : > { %v15466_v36 = vpop.f32.mrb[189].mxu1 }
 0x708   : > { %v15467_v51 = vadd.f32 %v15466_v36, %v15465_v24  ;;  %v15468_v13 = vpop.f32.mrb[190].mxu1 }
 0x709   : > { %v15469_v40 = vpop.f32.mrb[191].mxu1 }
 0x70a   : > { %v21846_v42 = vadd.f32 %v15467_v51, %v21791_v7  ;;  %v17704_v51 = vld [vmem:[%s22507_s3 + $0xd8] sm:$0xff]  }
 0x70b   : > { %11107 = vmatmul.mubr.bf16.gmra.mrb[40].mxu1 %v21060_v61 }
 0x70c   : > { %11114 = vmatprep.mubr.bf16.mxu1 %v21309_v60  ;;  %v8685_v60 = vld [vmem:[#allocation3 + $0x188] sm:$0x11] }
 0x70d   : > { %v8922_v26 = vshll.u32 %v8685_v60, 16 }
 0x70e   : > { %v15487_v54 = vpop.f32.mrb[192].mxu1 }
 0x70f   : > { %v15488_v41 = vpop.f32.mrb[193].mxu1 }
 0x710   : > { %v15489_v59 = vadd.f32 %v15488_v41, %v15487_v54  ;;  %v15490_v15 = vpop.f32.mrb[194].mxu1 }
 0x711   : > { %v15491_v45 = vpop.f32.mrb[195].mxu1 }
 0x712   : > { %v21851_v30 = vadd.f32 %v15489_v59, %v21808_v29  ;;  %v17706_v45 = vld [vmem:[%s22507_s3 + $0xe0] sm:$0xff]  }
 0x713   : > { %11115 = vmatmul.mubr.bf16.gmra.mrb[44].mxu1 %v21328_v12 }
 0x714   : > { %11122 = vmatprep.mubr.bf16.mxu1 %v21330_v57  ;;  %v8924_v57 = vrot.slane %v8922_v26, 5 }
 0x716   : > { %v15493_v23 = vpop.f32.mrb[196].mxu1 }
 0x717   : > { %v15494_v25 = vpop.f32.mrb[197].mxu1 }
 0x718   : > { %v15495_v7 = vadd.f32 %v15494_v25, %v15493_v23  ;;  %v15496_v33 = vpop.f32.mrb[198].mxu1 }
 0x719   : > { %v15497_v19 = vpop.f32.mrb[199].mxu1 }
 0x71a   : > { %v21856_v61 = vadd.f32 %v15495_v7, %v21816_v56 }
 0x71b   : > { %11123 = vmatmul.mubr.bf16.gmra.mrb[48].mxu1 %v21343_v34  ;;  %v8925_v34 = vsel %vm18508_vm9, %v21549_v17, %v8924_v57 }
 0x71c   : > { %11130 = vmatprep.mubr.bf16.mxu1 %v21348_v53  ;;  %v14534_v48 = vcombine.high %v21559_v20, %v8925_v34  ;;  %v14533_v55 = vcombine.low %v21559_v20, %v8925_v34 }
 0x71e   : > { %v15499_v29 = vpop.f32.mrb[200].mxu1 }
 0x71f   : > { %v15500_v58 = vpop.f32.mrb[201].mxu1 }
 0x720   : > { %v15501_v38 = vadd.f32 %v15500_v58, %v15499_v29  ;;  %v15502_v12 = vpop.f32.mrb[202].mxu1 }
 0x721   : > { %v15503_v37 = vpop.f32.mrb[203].mxu1  ;;  %v440_v12 = vld [vmem:[#allocation4 + $0x18] sm:$0x8] }
 0x722   : > { %v21861_v63 = vadd.f32 %v15501_v38, %v21821_v0  ;;  %v17698_v0 = vld [vmem:[%s22507_s3 + $0xc0] sm:$0xff]  }
 0x723   : > { %11131 = vmatmul.mubr.bf16.gmra.mrb[52].mxu1 %v21364_v32  ;;  %v17697_v32 = vld [vmem:[%s22507_s3 + $0x100] sm:$0xff]  }
 0x724   : > { %11138 = vmatprep.mubr.bf16.mxu1 %v22794_v6  ;;  %15727 = vmatprep.subr.bf16.mxu1 %v17697_v32  ;;  %v441_v6 = vsel %vm18537_vm13, 0, %v440_v12  ;;  %v17708_v32 = vld [vmem:[%s22507_s3 + $0xe8] sm:$0xff]  }
 0x725   : > { %15728 = vmatpush3.bf16.msra.mxu1 %v17698_v0  ;;  %442 = vst [vmem:[#allocation4 + $0x18] sm:$0x8] %v441_v6  ;;  %v17709_v0 = vld [vmem:[%s22507_s3 + $0x130] sm:$0xff]   ;;  %v455_v6 = vld [vmem:[#allocation4 + $0x7c] sm:$0x8] }
 0x726   : > { %v15505_v56 = vpop.f32.mrb[204].mxu1  ;;  %15729 = vmatprep.subr.bf16.mxu1 %v17699_v18 }
 0x727   : > { %v15506_v53 = vpop.f32.mrb[205].mxu1 }
 0x728   : > { %v15507_v52 = vadd.f32 %v15506_v53, %v15505_v56  ;;  %v15508_v8 = vpop.f32.mrb[206].mxu1  ;;  %v465_v53 = vld [vmem:[#allocation4 + $0x24] sm:$0x1] }
 0x729   : > { %v15509_v46 = vpop.f32.mrb[207].mxu1  ;;  %15730 = vmatpush3.bf16.msra.mxu1 %v17700_v3  ;;  %v17707_v8 = vld [vmem:[%s22507_s3 + $0x128] sm:$0xff]   ;;  %v17711_v3 = vld [vmem:[%s22507_s3 + $0x138] sm:$0xff]  }
 0x72a   : > { %v21870_v47 = vadd.f32 %v15507_v52, %v21826_v22  ;;  %v466_v46 = vsel %vm18154_vm4, 0, %v465_v53  ;;  %v456_v53 = vsel %vm18537_vm13, 0, %v455_v6 }
 0x72b   : > { %11139 = vmatmul.mubr.bf16.gmra.mrb[56].mxu1 %v22795_v11  ;;  %467 = vst [vmem:[#allocation4 + $0x24] sm:$0x1] %v466_v46  ;;  %457 = vst [vmem:[#allocation4 + $0x7c] sm:$0x8] %v456_v53 }
 0x72c   : > { %11146 = vmatprep.mubr.bf16.mxu1 %v14534_v48  ;;  %v17755_v48 = vld [vmem:[%s22507_s3 + $0x180] sm:$0xff]  }
 0x72e   : > { %v15511_v17 = vpop.f32.mrb[208].mxu1 }
 0x72f   : > { %v15512_v1 = vpop.f32.mrb[209].mxu1 }
 0x730   : > { %v15513_v49 = vadd.f32 %v15512_v1, %v15511_v17  ;;  %v15514_v22 = vpop.f32.mrb[210].mxu1  ;;  %v17710_v17 = vld [vmem:[%s22507_s3 + $0xf0] sm:$0xff]   ;;  %v443_v1 = vld [vmem:[#allocation4 + $0x2c] sm:$0x8] }
 0x731   : > { %v15515_v4 = vpop.f32.mrb[211].mxu1 }
 0x732   : > { %v21881_v9 = vadd.f32 %v15513_v49, %v21831_v10  ;;  %v17701_v10 = vld [vmem:[%s22507_s3 + $0x110] sm:$0xff]   ;;  %v444_v49 = vsel %vm18537_vm13, 0, %v443_v1 }
 0x733   : > { %11147 = vmatmul.mubr.bf16.gmra.mrb[60].mxu1 %v14533_v55  ;;  %15731 = vmatprep.subr.bf16.mxu1 %v17701_v10  ;;  %445 = vst [vmem:[#allocation4 + $0x2c] sm:$0x8] %v444_v49 }
 0x734   : > { %15732 = vmatpush3.bf16.msra.mxu1 %v17702_v62 }
 0x736   : > { %v15517_v28 = vpop.f32.mrb[212].mxu1 }
 0x737   : > { %v15518_v27 = vpop.f32.mrb[213].mxu1 }
 0x738   : > { %v15519_v20 = vadd.f32 %v15518_v27, %v15517_v28  ;;  %v15520_v21 = vpop.f32.mrb[214].mxu1  ;;  %v17712_v28 = vld [vmem:[%s22507_s3 + $0xf8] sm:$0xff]   ;;  %v469_v27 = vld [vmem:[#allocation4 + $0x38] sm:$0x1] }
 0x739   : > { %v15521_v2 = vpop.f32.mrb[215].mxu1 }
 0x73a   : > { %v21890_v16 = vadd.f32 %v15519_v20, %v21836_v43  ;;  %v17703_v43 = vld [vmem:[%s22507_s3 + $0x118] sm:$0xff]   ;;  %v470_v20 = vsel %vm18154_vm4, 0, %v469_v27  ;;  %v446_v2 = vld [vmem:[#allocation4 + $0x40] sm:$0x8] }
 0x73b   : > { %15733 = vmatprep.subr.bf16.mxu1 %v17703_v43  ;;  %471 = vst [vmem:[#allocation4 + $0x38] sm:$0x1] %v470_v20  ;;  %v447_v62 = vsel %vm18537_vm13, 0, %v446_v2 }
 0x73c   : > { %15734 = vmatpush3.bf16.msra.mxu1 %v17704_v51  ;;  %448 = vst [vmem:[#allocation4 + $0x40] sm:$0x8] %v447_v62 }
 0x73e   : > { %v15523_v39 = vpop.f32.mrb[216].mxu1 }
 0x73f   : > { %v15524_v5 = vpop.f32.mrb[217].mxu1 }
 0x740   : > { %v15525_v14 = vadd.f32 %v15524_v5, %v15523_v39  ;;  %v15526_v44 = vpop.f32.mrb[218].mxu1 }
 0x741   : > { %v15527_v24 = vpop.f32.mrb[219].mxu1  ;;  %v21957_v44 = vld [vmem:[%s22507_s3 + $0x140] sm:$0xff]  }
 0x742   : > { %v21899_v36 = vadd.f32 %v15525_v14, %v21841_v35  ;;  %v17705_v35 = vld [vmem:[%s22507_s3 + $0x120] sm:$0xff]   ;;  %v473_v24 = vld [vmem:[#allocation4 + $0x4c] sm:$0x1] }
 0x743   : > { %15735 = vmatprep.subr.bf16.mxu1 %v17705_v35  ;;  %v474_v43 = vsel %vm18154_vm4, 0, %v473_v24 }
 0x744   : > { %15736 = vmatpush3.bf16.msra.mxu1 %v17706_v45  ;;  %475 = vst [vmem:[#allocation4 + $0x4c] sm:$0x1] %v474_v43  ;;  %v477_v45 = vld [vmem:[#allocation4 + $0x60] sm:$0x1]  ;;  %v493_v43 = vld [vmem:[#allocation4 + $0xb0] sm:$0x1] }
 0x745   : > { %15737 = vmatprep.subr.bf16.mxu1 %v17707_v8 }
 0x746   : > { %v15529_v13 = vpop.f32.mrb[220].mxu1 }
 0x747   : > { %v15530_v40 = vpop.f32.mrb[221].mxu1 }
 0x748   : > { %v15531_v54 = vadd.f32 %v15530_v40, %v15529_v13  ;;  %v15532_v41 = vpop.f32.mrb[222].mxu1  ;;  %15738 = vmatpush3.bf16.msra.mxu1 %v17708_v32  ;;  %v449_v13 = vld [vmem:[#allocation4 + $0x54] sm:$0x8]  ;;  %v485_v32 = vld [vmem:[#allocation4 + $0x88] sm:$0x1] }
 0x749   : > { %v15533_v59 = vpop.f32.mrb[223].mxu1  ;;  %15739 = vmatprep.subr.bf16.mxu1 %v17709_v0  ;;  %v486_v0 = vsel %vm18154_vm4, 0, %v485_v32 }
 0x74a   : > { %v21908_v15 = vadd.f32 %v15531_v54, %v21846_v42  ;;  %v450_v54 = vsel %vm18537_vm13, 0, %v449_v13  ;;  %487 = vst [vmem:[#allocation4 + $0x88] sm:$0x1] %v486_v0 }
 0x74b   : > { %451 = vst [vmem:[#allocation4 + $0x54] sm:$0x8] %v450_v54 }
 0x74c   : > { %15740 = vmatpush3.bf16.msra.mxu1 %v17710_v17  ;;  %v458_v17 = vld [vmem:[#allocation4 + $0x90] sm:$0x8] }
 0x74d   : > { %15741 = vmatprep.subr.bf16.mxu1 %v17711_v3 }
 0x74e   : > { %v15551_v23 = vpop.f32.mrb[224].mxu1 }
 0x74f   : > { %v15552_v25 = vpop.f32.mrb[225].mxu1 }
 0x750   : > { %v21916_v7 = vadd.f32 %v15552_v25, %v15551_v23  ;;  %v15554_v33 = vpop.f32.mrb[226].mxu1  ;;  %15742 = vmatpush3.bf16.msra.mxu1 %v17712_v28  ;;  %v478_v23 = vsel %vm18154_vm4, 0, %v477_v45  ;;  %v489_v28 = vld [vmem:[#allocation4 + $0x9c] sm:$0x1] }
 0x751   : > { %v15555_v19 = vpop.f32.mrb[227].mxu1  ;;  %15967 = vmatprep.subr.bf16.mxu1 %v21957_v44  ;;  %479 = vst [vmem:[#allocation4 + $0x60] sm:$0x1] %v478_v23  ;;  %v452_v33 = vld [vmem:[#allocation4 + $0x68] sm:$0x8]  ;;  %v490_v27 = vsel %vm18154_vm4, 0, %v489_v28 }
 0x752   : > { %491 = vst [vmem:[#allocation4 + $0x9c] sm:$0x1] %v490_v27 }
 0x756   : > { %v15557_v60 = vpop.f32.mrb[228].mxu1 }
 0x757   : > { %v15558_v26 = vpop.f32.mrb[229].mxu1 }
 0x758   : > { %v21918_v42 = vadd.f32 %v15558_v26, %v15557_v60  ;;  %v15560_v29 = vpop.f32.mrb[230].mxu1  ;;  %v453_v60 = vsel %vm18537_vm13, 0, %v452_v33 }
 0x759   : > { %v15561_v58 = vpop.f32.mrb[231].mxu1  ;;  %454 = vst [vmem:[#allocation4 + $0x68] sm:$0x8] %v453_v60 }
 0x75e   : > { %v15563_v38 = vpop.f32.mrb[232].mxu1 }
 0x75f   : > { %v15564_v37 = vpop.f32.mrb[233].mxu1 }
 0x760   : > { %v21922_v34 = vadd.f32 %v15564_v37, %v15563_v38  ;;  %v15566_v56 = vpop.f32.mrb[234].mxu1  ;;  %v481_v38 = vld [vmem:[#allocation4 + $0x74] sm:$0x1] }
 0x761   : > { %v15567_v52 = vpop.f32.mrb[235].mxu1  ;;  %v482_v12 = vsel %vm18154_vm4, 0, %v481_v38 }
 0x762   : > { %483 = vst [vmem:[#allocation4 + $0x74] sm:$0x1] %v482_v12 }
 0x766   : > { %v15569_v11 = vpop.f32.mrb[236].mxu1 }
 0x767   : > { %v15570_v55 = vpop.f32.mrb[237].mxu1 }
 0x768   : > { %v21940_v22 = vadd.f32 %v15570_v55, %v15569_v11  ;;  %v15572_v4 = vpop.f32.mrb[238].mxu1  ;;  %v459_v55 = vsel %vm18537_vm13, 0, %v458_v17 }
 0x769   : > { %v15573_v18 = vpop.f32.mrb[239].mxu1  ;;  %460 = vst [vmem:[#allocation4 + $0x90] sm:$0x8] %v459_v55 }
 0x76e   : > { %v15575_v21 = vpop.f32.mrb[240].mxu1 }
 0x76f   : > { %v15576_v10 = vpop.f32.mrb[241].mxu1 }
 0x770   : > { %v21952_v39 = vadd.f32 %v15576_v10, %v15575_v21  ;;  %v15578_v5 = vpop.f32.mrb[242].mxu1  ;;  %v461_v21 = vld [vmem:[#allocation4 + $0xa4] sm:$0x8] }
 0x771   : > { %v15579_v14 = vpop.f32.mrb[243].mxu1  ;;  %v462_v10 = vsel %vm18537_vm13, 0, %v461_v21 }
 0x772   : > { %463 = vst [vmem:[#allocation4 + $0xa4] sm:$0x8] %v462_v10 }
 0x776   : > { %v15581_v51 = vpop.f32.mrb[244].mxu1 }
 0x777   : > { %v15582_v40 = vpop.f32.mrb[245].mxu1 }
 0x778   : > { %v21964_v41 = vadd.f32 %v15582_v40, %v15581_v51  ;;  %v15584_v59 = vpop.f32.mrb[246].mxu1 }
 0x779   : > { %v15585_v35 = vpop.f32.mrb[247].mxu1 }
 0x77e   : > { %v15587_v25 = vpop.f32.mrb[248].mxu1 }
 0x77f   : > { %v15588_v19 = vpop.f32.mrb[249].mxu1 }
 0x780   : > { %v21970_v26 = vadd.f32 %v15588_v19, %v15587_v25  ;;  %v15590_v29 = vpop.f32.mrb[250].mxu1 }
 0x781   : > { %v15591_v58 = vpop.f32.mrb[251].mxu1 }
 0x786   : > { %v15593_v37 = vpop.f32.mrb[252].mxu1 }
 0x787   : > { %v15594_v56 = vpop.f32.mrb[253].mxu1 }
 0x788   : > { %v21976_v52 = vadd.f32 %v15594_v56, %v15593_v37  ;;  %v15596_v8 = vpop.f32.mrb[254].mxu1 }
 0x789   : > { %v15597_v46 = vpop.f32.mrb[255].mxu1 }
 0x78e   : > { %v15615_v11 = vpop.f32.mrb[0].mxu1 }
 0x78f   : > { %v15616_v1 = vpop.f32.mrb[1].mxu1 }
 0x790   : > { %v15617_v49 = vadd.f32 %v15616_v1, %v15615_v11  ;;  %v15618_v4 = vpop.f32.mrb[2].mxu1 }
 0x791   : > { %v15619_v18 = vpop.f32.mrb[3].mxu1 }
 0x792   : > { %v10996_v3 = vadd.f32 %v15617_v49, %v21916_v7  ;;  %v494_v7 = vsel %vm18154_vm4, 0, %v493_v43 }
 0x793   : > { %495 = vst [vmem:[#allocation4 + $0xb0] sm:$0x1] %v494_v7 }
 0x796   : > { %v15621_v20 = vpop.f32.mrb[4].mxu1 }
 0x797   : > { %v15622_v2 = vpop.f32.mrb[5].mxu1 }
 0x798   : > { %v15623_v62 = vadd.f32 %v15622_v2, %v15621_v20  ;;  %v15624_v5 = vpop.f32.mrb[6].mxu1 }
 0x799   : > { %v15625_v14 = vpop.f32.mrb[7].mxu1 }
 0x79a   : > { %v11004_v24 = vadd.f32 %v15623_v62, %v21918_v42 }
 0x79e   : > { %v15627_v51 = vpop.f32.mrb[8].mxu1 }
 0x79f   : > { %v15628_v13 = vpop.f32.mrb[9].mxu1 }
 0x7a0   : > { %v15629_v40 = vadd.f32 %v15628_v13, %v15627_v51  ;;  %v15630_v54 = vpop.f32.mrb[10].mxu1  ;;  %v11288_v13 = vld [vmem:[#allocation4 + $0x20] sm:$0xf] }
 0x7a1   : > { %v15631_v59 = vpop.f32.mrb[11].mxu1  ;;  %v11286_v54 = vld [vmem:[#allocation4 + $0x18] sm:$0x8] }
 0x7a2   : > { %v21991_v35 = vadd.f32 %v15629_v40, %v21922_v34  ;;  %v11350_v59 = vshrl.u32 %v11288_v13, 16 }
 0x7a6   : > { %v15633_v57 = vpop.f32.mrb[12].mxu1 }
 0x7a7   : > { %v15634_v45 = vpop.f32.mrb[13].mxu1 }
 0x7a8   : > { %v15635_v23 = vadd.f32 %v15634_v45, %v15633_v57  ;;  %v15636_v25 = vpop.f32.mrb[14].mxu1 }
 0x7a9   : > { %v15637_v33 = vpop.f32.mrb[15].mxu1  ;;  %v17860_v25 = vmov 0.0  }
 0x7aa   : > { %v21994_v42 = vadd.f32 %v15635_v23, %v21940_v22 }
 0x7ae   : > { %v15639_v19 = vpop.f32.mrb[16].mxu1 }
 0x7af   : > { %v15640_v60 = vpop.f32.mrb[17].mxu1 }
 0x7b0   : > { %v15641_v29 = vadd.f32 %v15640_v60, %v15639_v19  ;;  %v15642_v58 = vpop.f32.mrb[18].mxu1  ;;  %v11352_v60 = vrot.slane %v11350_v59, 7 }
 0x7b1   : > { %v15643_v38 = vpop.f32.mrb[19].mxu1 }
 0x7b2   : > { %v21997_v12 = vadd.f32 %v15641_v29, %v21952_v39  ;;  %v11353_v29 = vshll.u32 %v11288_v13, 16  ;;  %v17718_v13 = vld [vmem:[%s22507_s3 + $0x150] sm:$0xff]  }
 0x7b6   : > { %v15645_v37 = vpop.f32.mrb[20].mxu1 }
 0x7b7   : > { %v15646_v6 = vpop.f32.mrb[21].mxu1 }
 0x7b8   : > { %v15647_v34 = vadd.f32 %v15646_v6, %v15645_v37  ;;  %v15648_v56 = vpop.f32.mrb[22].mxu1 }
 0x7b9   : > { %v15649_v53 = vpop.f32.mrb[23].mxu1 }
 0x7ba   : > { %v22000_v8 = vadd.f32 %v15647_v34, %v21964_v41 }
 0x7be   : > { %v15651_v46 = vpop.f32.mrb[24].mxu1 }
 0x7bf   : > { %v15652_v32 = vpop.f32.mrb[25].mxu1 }
 0x7c0   : > { %v15653_v22 = vadd.f32 %v15652_v32, %v15651_v46  ;;  %v15654_v0 = vpop.f32.mrb[26].mxu1  ;;  %v11355_v46 = vor.u32 %v11353_v29, %v11352_v60 }
 0x7c1   : > { %v15655_v11 = vpop.f32.mrb[27].mxu1 }
 0x7c2   : > { %v22003_v17 = vadd.f32 %v15653_v22, %v21970_v26 }
 0x7c6   : > { %v15657_v1 = vpop.f32.mrb[28].mxu1 }
 0x7c7   : > { %v15658_v55 = vpop.f32.mrb[29].mxu1 }
 0x7c8   : > { %v15659_v39 = vadd.f32 %v15658_v55, %v15657_v1  ;;  %v15660_v49 = vpop.f32.mrb[30].mxu1  ;;  %v11289_v55 = vld [vmem:[#allocation4 + $0x2c] sm:$0x8] }
 0x7c9   : > { %v15661_v4 = vpop.f32.mrb[31].mxu1 }
 0x7ca   : > { %v22006_v18 = vadd.f32 %v15659_v39, %v21976_v52 }
 0x7ce   : > { %v15679_v28 = vpop.f32.mrb[32].mxu1 }
 0x7cf   : > { %v15680_v27 = vpop.f32.mrb[33].mxu1 }
 0x7d0   : > { %v15681_v41 = vadd.f32 %v15680_v27, %v15679_v28  ;;  %v15682_v20 = vpop.f32.mrb[34].mxu1 }
 0x7d1   : > { %v15683_v21 = vpop.f32.mrb[35].mxu1  ;;  %v17716_v20 = vld [vmem:[%s22507_s3 + $0x148] sm:$0xff]  }
 0x7d2   : > { %v11093_v2 = vadd.f32 %v15681_v41, %v10996_v3  ;;  %v11336_v3 = vshrl.u32 %v11286_v54, 16  ;;  %v11294_v21 = vld [vmem:[#allocation4 + $0x48] sm:$0xf] }
 0x7d4   : > { %v11155_v10 = vadd.f32 %v11093_v2, %v21851_v30  ;;  %v14888_v6 = vrot.slane %v11336_v3, 11  ;;  %v11358_v2 = vshrl.u32 %v11289_v55, 16  ;;  %v17722_v55 = vld [vmem:[%s22507_s3 + $0x160] sm:$0xff]  }
 0x7d6   : > { %v11171_v62 = vmax.f32 %v11155_v10, 0.0  ;;  %v15685_v5 = vpop.f32.mrb[36].mxu1 }
 0x7d7   : > { %v15686_v26 = vpop.f32.mrb[37].mxu1 }
 0x7d8   : > { %v15115_v14 = vpack.c.bf16 %v11171_v62, %v11171_v62  ;;  %v15687_v43 = vadd.f32 %v15686_v26, %v15685_v5  ;;  %v15688_v7 = vpop.f32.mrb[38].mxu1  ;;  %v11394_v26 = vshrl.u32 %v11294_v21, 16 }
 0x7d9   : > { %v15689_v51 = vpop.f32.mrb[39].mxu1 }
 0x7da   : > { %11267 = vst [vmem:[#allocation4 + $0x1c] sm:$0xf] %v15115_v14  ;;  %v11101_v40 = vadd.f32 %v15687_v43, %v11004_v24  ;;  %v11292_v51 = vld [vmem:[#allocation4 + $0x40] sm:$0x8] }
 0x7dc   : > { %v11157_v52 = vadd.f32 %v11101_v40, %v21856_v61  ;;  %v14889_v40 = vrot.slane %v11358_v2, 11 }
 0x7de   : > { %v11173_v57 = vmax.f32 %v11157_v52, 0.0  ;;  %v15691_v45 = vpop.f32.mrb[40].mxu1 }
 0x7df   : > { %v15692_v23 = vpop.f32.mrb[41].mxu1 }
 0x7e0   : > { %v15133_v30 = vpack.c.bf16 %v17860_v25, %v11173_v57  ;;  %v15693_v33 = vadd.f32 %v15692_v23, %v15691_v45  ;;  %v15694_v19 = vpop.f32.mrb[42].mxu1 }
 0x7e1   : > { %v11287_v58 = vld [vmem:[#allocation4 + $0x1c] sm:$0xf]  ;;  %v15695_v38 = vpop.f32.mrb[43].mxu1 }
 0x7e2   : > { %v22011_v37 = vld [vmem:[#allocation4 + $0x1c] sm:$0xff]   ;;  %v11341_v24 = vshrl.u32 %v11287_v58, 16  ;;  %15147 = vst [vmem:[#allocation4 + $0x30] sm:$0xff] %v15133_v30   ;;  %v11109_v61 = vadd.f32 %v15693_v33, %v21991_v35  ;;  %v11344_v56 = vshll.u32 %v11287_v58, 16  ;;  %v11396_v30 = vrot.slane %v11394_v26, 7 }
 0x7e3   : > { %12293 = vmatprep.mubr.bf16.mxu1 %v22011_v37  ;;  %v11397_v33 = vshll.u32 %v11294_v21, 16 }
 0x7e4   : > { %v11343_v34 = vrot.slane %v11341_v24, 7  ;;  %v11159_v53 = vadd.f32 %v11109_v61, %v21861_v63  ;;  %v17720_v24 = vld [vmem:[%s22507_s3 + $0x158] sm:$0xff]  }
 0x7e6   : > { %v11346_v32 = vor.u32 %v11344_v56, %v11343_v34  ;;  %v11348_v22 = vrot.slane %v11343_v34, 4  ;;  %v11175_v0 = vmax.f32 %v11159_v53, 0.0  ;;  %v15697_v11 = vpop.f32.mrb[44].mxu1 }
 0x7e7   : > { %v15698_v1 = vpop.f32.mrb[45].mxu1 }
 0x7e8   : > { %v15119_v39 = vpack.c.bf16 %v11175_v0, %v11175_v0  ;;  %v15699_v49 = vadd.f32 %v15698_v1, %v15697_v11  ;;  %v15700_v4 = vpop.f32.mrb[46].mxu1  ;;  %v11347_v35 = vsel %vm18594_vm3, %v14888_v6, %v11346_v32  ;;  %v11356_v28 = vsel %vm18594_vm3, %v11348_v22, %v11355_v46 }
 0x7e9   : > { %v15701_v27 = vpop.f32.mrb[47].mxu1  ;;  %v22020_v41 = vcombine.low %v11347_v35, %v11356_v28  ;;  %v22022_v63 = vld [vmem:[#allocation4 + $0x30] sm:$0xff]   ;;  %v11677_v35 = vld [vmem:[#allocation4 + $0x20] sm:$0xf] }
 0x7ea   : > { %11271 = vst [vmem:[#allocation4 + $0x44] sm:$0xf] %v15119_v39  ;;  %v11117_v10 = vadd.f32 %v15699_v49, %v21994_v42  ;;  %v11290_v62 = vld [vmem:[#allocation4 + $0x30] sm:$0xf]  ;;  %v11291_v5 = vld [vmem:[#allocation4 + $0x34] sm:$0xf] }
 0x7eb   : > { %12294 = vmatmul.mubr.bf16.vlgmr.msra.gmra.mrb[64].mxu1 %v22020_v41  ;;  %v11363_v43 = vshrl.u32 %v11290_v62, 16  ;;  %v11372_v7 = vshrl.u32 %v11291_v5, 16  ;;  %v11366_v52 = vshll.u32 %v11290_v62, 16  ;;  %v11375_v23 = vshll.u32 %v11291_v5, 16  ;;  %v11295_v4 = vld [vmem:[#allocation4 + $0x54] sm:$0x8] }
 0x7ec   : > { %12301 = vmatprep.mubr.bf16.mxu1 %v22022_v63  ;;  %15968 = vmatpush3.bf16.msra.mxu1 %v21957_v44  ;;  %v11161_v14 = vadd.f32 %v11117_v10, %v21870_v47  ;;  %v11380_v47 = vshrl.u32 %v11292_v51, 16  ;;  %v11300_v10 = vld [vmem:[#allocation4 + $0x70] sm:$0xf] }
 0x7ed   : > { %15969 = vmatprep.subr.bf16.mxu1 %v17716_v20  ;;  %v11365_v57 = vrot.slane %v11363_v43, 7  ;;  %v11374_v45 = vrot.slane %v11372_v7, 7  ;;  %v17724_v43 = vld [vmem:[%s22507_s3 + $0x168] sm:$0xff]   ;;  %v11737_v7 = vshll.u32 %v11677_v35, 16 }
 0x7ee   : > { %v15703_v42 = vpop.f32.mrb[48].mxu1  ;;  %v11177_v54 = vmax.f32 %v11161_v14, 0.0  ;;  %v14890_v0 = vrot.slane %v11380_v47, 11  ;;  %v11402_v14 = vshrl.u32 %v11295_v4, 16  ;;  %v11741_v47 = vshrl.u32 %v11677_v35, 16 }
 0x7ef   : > { %v15704_v59 = vpop.f32.mrb[49].mxu1  ;;  %v11368_v29 = vor.u32 %v11366_v52, %v11365_v57  ;;  %v11370_v58 = vrot.slane %v11365_v57, 4  ;;  %v11377_v38 = vor.u32 %v11375_v23, %v11374_v45  ;;  %v11298_v23 = vld [vmem:[#allocation4 + $0x68] sm:$0x8]  ;;  %v11678_v4 = vld [vmem:[#allocation4 + $0x24] sm:$0x1] }
 0x7f0   : > { %v15705_v44 = vadd.f32 %v15704_v59, %v15703_v42  ;;  %v15706_v3 = vpop.f32.mrb[50].mxu1  ;;  %15970 = vmatpush3.bf16.msra.mxu1 %v17716_v20  ;;  %v15137_v19 = vpack.c.bf16 %v17860_v25, %v11177_v54  ;;  %v11438_v54 = vshrl.u32 %v11300_v10, 16  ;;  %v11743_v35 = vrot.slane %v11741_v47, 4 }
 0x7f1   : > { %v15707_v60 = vpop.f32.mrb[51].mxu1  ;;  %15971 = vmatprep.subr.bf16.mxu1 %v17718_v13  ;;  %v11293_v6 = vld [vmem:[#allocation4 + $0x44] sm:$0xf]  ;;  %v11369_v34 = vsel %vm18594_vm3, %v14889_v40, %v11368_v29  ;;  %v11378_v56 = vsel %vm18594_vm3, %v11370_v58, %v11377_v38  ;;  %v11424_v38 = vshrl.u32 %v11298_v23, 16 }
 0x7f2   : > { %v11125_v61 = vadd.f32 %v15705_v44, %v21997_v12  ;;  %15148 = vst [vmem:[#allocation4 + $0x58] sm:$0xff] %v15137_v19   ;;  %v22044_v53 = vld [vmem:[#allocation4 + $0x44] sm:$0xff]   ;;  %v11385_v46 = vshrl.u32 %v11293_v6, 16  ;;  %v22047_v22 = vcombine.low %v11369_v34, %v11378_v56  ;;  %v11388_v1 = vshll.u32 %v11293_v6, 16 }
 0x7f3   : > { %v11399_v12 = vor.u32 %v11397_v33, %v11396_v30  ;;  %v14891_v44 = vrot.slane %v11402_v14, 11  ;;  %v17726_v3 = vld [vmem:[%s22507_s3 + $0x170] sm:$0xff]   ;;  %v11747_v14 = vshll.u32 %v11678_v4, 16 }
 0x7f4   : > { %v11163_v32 = vadd.f32 %v11125_v61, %v21881_v9  ;;  %15972 = vmatpush3.bf16.msra.mxu1 %v17718_v13  ;;  %v11387_v11 = vrot.slane %v11385_v46, 7  ;;  %v11441_v61 = vshll.u32 %v11300_v10, 16 }
 0x7f5   : > { %15973 = vmatprep.subr.bf16.mxu1 %v17720_v24  ;;  %12302 = vmatmul.mubr.bf16.gmra.mrb[68].mxu1 %v22047_v22 }
 0x7f6   : > { %v11179_v39 = vmax.f32 %v11163_v32, 0.0  ;;  %v15709_v49 = vpop.f32.mrb[52].mxu1  ;;  %12309 = vmatprep.mubr.bf16.mxu1 %v22044_v53  ;;  %v11390_v28 = vor.u32 %v11388_v1, %v11387_v11  ;;  %v11392_v27 = vrot.slane %v11387_v11, 4 }
 0x7f7   : > { %v15710_v9 = vpop.f32.mrb[53].mxu1 }
 0x7f8   : > { %v15123_v20 = vpack.c.bf16 %v11179_v39, %v11179_v39  ;;  %v15711_v21 = vadd.f32 %v15710_v9, %v15709_v49  ;;  %v15712_v2 = vpop.f32.mrb[54].mxu1  ;;  %15974 = vmatpush3.bf16.msra.mxu1 %v17720_v24  ;;  %v11391_v5 = vsel %vm18594_vm3, %v14890_v0, %v11390_v28  ;;  %v11400_v26 = vsel %vm18594_vm3, %v11392_v27, %v11399_v12  ;;  %v17728_v12 = vld [vmem:[%s22507_s3 + $0x178] sm:$0xff]   ;;  %v428_v9 = vld [vmem:[#allocation4 + $0x10] sm:$0x1] }
 0x7f9   : > { %v15713_v62 = vpop.f32.mrb[55].mxu1  ;;  %15975 = vmatprep.subr.bf16.mxu1 %v17722_v55  ;;  %v22062_v13 = vcombine.low %v11391_v5, %v11400_v26  ;;  %v22064_v42 = vld [vmem:[#allocation4 + $0x58] sm:$0xff]   ;;  %v11440_v24 = vrot.slane %v11438_v54, 7  ;;  %v11683_v26 = vld [vmem:[#allocation4 + $0x48] sm:$0xf] }
 0x7fa   : > { %11275 = vst [vmem:[#allocation4 + $0x6c] sm:$0xf] %v15123_v20  ;;  %v11133_v51 = vadd.f32 %v15711_v21, %v22000_v8  ;;  %v11296_v40 = vld [vmem:[#allocation4 + $0x58] sm:$0xf]  ;;  %v11297_v52 = vld [vmem:[#allocation4 + $0x5c] sm:$0xf] }
 0x7fb   : > { %v11407_v57 = vshrl.u32 %v11296_v40, 16  ;;  %v11416_v45 = vshrl.u32 %v11297_v52, 16  ;;  %v22070_v8 = vrot.slane %v11737_v7, 5  ;;  %v11410_v60 = vshll.u32 %v11296_v40, 16  ;;  %v11301_v5 = vld [vmem:[#allocation4 + $0x7c] sm:$0x8] }
 0x7fc   : > { %v11165_v59 = vadd.f32 %v11133_v51, %v21890_v16  ;;  %15976 = vmatpush3.bf16.msra.mxu1 %v17722_v55  ;;  %v11419_v58 = vshll.u32 %v11297_v52, 16  ;;  %v14892_v20 = vrot.slane %v11424_v38, 11  ;;  %v11443_v21 = vor.u32 %v11441_v61, %v11440_v24 }
 0x7fd   : > { %15977 = vmatprep.subr.bf16.mxu1 %v17724_v43  ;;  %12310 = vmatmul.mubr.bf16.gmra.mrb[72].mxu1 %v22062_v13  ;;  %v11409_v19 = vrot.slane %v11407_v57, 7  ;;  %v11418_v16 = vrot.slane %v11416_v45, 7  ;;  %v429_v7 = vsel %vm18154_vm4, 0, %v428_v9  ;;  %v11744_v54 = vor.u32 %v11743_v35, %v22070_v8  ;;  %v11681_v45 = vld [vmem:[#allocation4 + $0x38] sm:$0x1] }
 0x7fe   : > { %v11181_v30 = vmax.f32 %v11165_v59, 0.0  ;;  %v15715_v33 = vpop.f32.mrb[56].mxu1  ;;  %12317 = vmatprep.mubr.bf16.mxu1 %v22064_v42  ;;  %430 = vst [vmem:[#allocation4 + $0x10] sm:$0x1] %v429_v7  ;;  %v11446_v57 = vshrl.u32 %v11301_v5, 16  ;;  %v11785_v23 = vshll.u32 %v11683_v26, 16 }
 0x7ff   : > { %v15716_v29 = vpop.f32.mrb[57].mxu1  ;;  %v11412_v46 = vor.u32 %v11410_v60, %v11409_v19  ;;  %v11414_v32 = vrot.slane %v11409_v19, 4  ;;  %v11421_v11 = vor.u32 %v11419_v58, %v11418_v16  ;;  %v22100_v60 = vld [vmem:[#allocation4 + $0x98] sm:$0xf] }
 0x800   : > { %v15141_v6 = vpack.c.bf16 %v17860_v25, %v11181_v30  ;;  %v15717_v34 = vadd.f32 %v15716_v29, %v15715_v33  ;;  %v15718_v56 = vpop.f32.mrb[58].mxu1  ;;  %15978 = vmatpush3.bf16.msra.mxu1 %v17724_v43  ;;  %v17729_v43 = vld [vmem:[%s22507_s3 + $0x40] sm:$0xff]   ;;  %v22102_v29 = vrot.slane %v11747_v14, 5 }
 0x801   : > { %v15719_v0 = vpop.f32.mrb[59].mxu1  ;;  %v11299_v1 = vld [vmem:[#allocation4 + $0x6c] sm:$0xf]  ;;  %15979 = vmatprep.subr.bf16.mxu1 %v17726_v3  ;;  %v11413_v39 = vsel %vm18594_vm3, %v14891_v44, %v11412_v46  ;;  %v11422_v28 = vsel %vm18594_vm3, %v11414_v32, %v11421_v11  ;;  %v11789_v44 = vshrl.u32 %v11683_v26, 16  ;;  %v22111_v11 = vrot.slane %v11785_v23, 5 }
 0x802   : > { %15149 = vst [vmem:[#allocation4 + $0x80] sm:$0xff] %v15141_v6   ;;  %v11141_v55 = vadd.f32 %v15717_v34, %v22003_v17  ;;  %v11429_v49 = vshrl.u32 %v11299_v1, 16  ;;  %v22083_v27 = vld [vmem:[#allocation4 + $0x6c] sm:$0xff]   ;;  %v22086_v10 = vcombine.low %v11413_v39, %v11422_v28  ;;  %v11432_v17 = vshll.u32 %v11299_v1, 16  ;;  %v11676_v0 = vld [vmem:[#allocation4 + $0x1c] sm:$0xf] }
 0x803   : > { %v22107_v6 = vrot.slane %v11744_v54, 4  ;;  %v11771_v34 = vshll.u32 %v11681_v45, 16  ;;  %v11791_v39 = vrot.slane %v11789_v44, 4  ;;  %v11679_v14 = vld [vmem:[#allocation4 + $0x30] sm:$0xf] }
 0x804   : > { %v11167_v2 = vadd.f32 %v11141_v55, %v21899_v36  ;;  %v11431_v62 = vrot.slane %v11429_v49, 7  ;;  %15980 = vmatpush3.bf16.msra.mxu1 %v17726_v3  ;;  %v11304_v55 = vld [vmem:[#allocation4 + $0x90] sm:$0x8] }
 0x805   : > { %15981 = vmatprep.subr.bf16.mxu1 %v17728_v12  ;;  %12318 = vmatmul.mubr.bf16.gmra.mrb[76].mxu1 %v22086_v10  ;;  %v11468_v26 = vshrl.u32 %v11304_v55, 16  ;;  %v11792_v45 = vor.u32 %v11791_v39, %v22111_v11 }
 0x806   : > { %v11183_v51 = vmax.f32 %v11167_v2, 0.0  ;;  %v15721_v36 = vpop.f32.mrb[60].mxu1  ;;  %v11434_v40 = vor.u32 %v11432_v17, %v11431_v62  ;;  %v11436_v52 = vrot.slane %v11431_v62, 4  ;;  %12325 = vmatprep.mubr.bf16.mxu1 %v22083_v27  ;;  %v11731_v2 = vshll.u32 %v11676_v0, 16 }
 0x807   : > { %v15722_v59 = vpop.f32.mrb[61].mxu1  ;;  %v22116_v62 = vrot.slane %v11771_v34, 5 }
 0x808   : > { %v15127_v3 = vpack.c.bf16 %v11183_v51, %v11183_v51  ;;  %v15723_v47 = vadd.f32 %v15722_v59, %v15721_v36  ;;  %v15724_v30 = vpop.f32.mrb[62].mxu1  ;;  %v11435_v33 = vsel %vm18594_vm3, %v14892_v20, %v11434_v40  ;;  %v11444_v19 = vsel %vm18594_vm3, %v11436_v52, %v11443_v21  ;;  %15982 = vmatpush3.bf16.msra.mxu1 %v17728_v12  ;;  %v11307_v20 = vld [vmem:[#allocation4 + $0xa4] sm:$0x8]  ;;  %v22121_v40 = vld [vmem:[#allocation4 + $0x4c] sm:$0x1] }
 0x809   : > { %v15725_v16 = vpop.f32.mrb[63].mxu1  ;;  %15807 = vmatprep.subr.bf16.mxu1 %v17729_v43  ;;  %v22105_v38 = vcombine.low %v11435_v33, %v11444_v19  ;;  %v11302_v24 = vld [vmem:[#allocation4 + $0x80] sm:$0xf]  ;;  %v11303_v61 = vld [vmem:[#allocation4 + $0x84] sm:$0xf]  ;;  %v14893_v12 = vrot.slane %v11446_v57, 11 }
 0x80a   : > { %11279 = vst [vmem:[#allocation4 + $0x94] sm:$0xf] %v15127_v3  ;;  %v11149_v58 = vadd.f32 %v15723_v47, %v22006_v18  ;;  %v22109_v56 = vld [vmem:[#allocation4 + $0x80] sm:$0xff]   ;;  %v11451_v46 = vshrl.u32 %v11302_v24, 16  ;;  %v11460_v32 = vshrl.u32 %v11303_v61, 16  ;;  %v11482_v18 = vshrl.u32 %v22100_v60, 16 }
 0x80b   : > { %v11454_v4 = vshll.u32 %v11302_v24, 16  ;;  %v11463_v9 = vshll.u32 %v11303_v61, 16  ;;  %v11728_v21 = vshrl.u32 %v11676_v0, 16  ;;  %v11680_v43 = vld [vmem:[#allocation4 + $0x34] sm:$0xf]  ;;  %v11485_v36 = vshll.u32 %v22100_v60, 16 }
 0x80c   : > { %v11169_v1 = vadd.f32 %v11149_v58, %v21908_v15  ;;  %v11453_v49 = vrot.slane %v11451_v46, 7  ;;  %v11462_v35 = vrot.slane %v11460_v32, 7  ;;  %v11484_v51 = vrot.slane %v11482_v18, 7  ;;  %v11689_v47 = vld [vmem:[#allocation4 + $0x70] sm:$0xf] }
 0x80d   : > { %12326 = vmatmul.mubr.bf16.gmra.mrb[80].mxu1 %v22105_v38  ;;  %v11490_v57 = vshrl.u32 %v11307_v20, 16  ;;  %v11733_v3 = vrot.slane %v11731_v2, 5  ;;  %v11752_v30 = vshrl.u32 %v11679_v14, 16  ;;  %v11755_v33 = vshll.u32 %v11679_v14, 16  ;;  %v11682_v46 = vld [vmem:[#allocation4 + $0x44] sm:$0xf] }
 0x80e   : > { %v11185_v28 = vmax.f32 %v11169_v1, 0.0  ;;  %12333 = vmatprep.mubr.bf16.mxu1 %v22109_v56  ;;  %v11456_v15 = vor.u32 %v11454_v4, %v11453_v49  ;;  %v11458_v17 = vrot.slane %v11453_v49, 4  ;;  %v11465_v5 = vor.u32 %v11463_v9, %v11462_v35 }
 0x80f   : > { %v11761_v19 = vshll.u32 %v11680_v43, 16  ;;  %v11765_v60 = vshrl.u32 %v11680_v43, 16  ;;  %v14894_v58 = vrot.slane %v11468_v26, 11  ;;  %v11487_v34 = vor.u32 %v11485_v36, %v11484_v51 }
 0x810   : > { %v15145_v7 = vpack.c.bf16 %v17860_v25, %v11185_v28  ;;  %v11457_v52 = vsel %vm18594_vm3, %v14893_v12, %v11456_v15  ;;  %v11466_v54 = vsel %vm18594_vm3, %v11458_v17, %v11465_v5  ;;  %v11730_v25 = vrot.slane %v11728_v21, 4  ;;  %v11685_v17 = vld [vmem:[#allocation4 + $0x58] sm:$0xf] }
 0x811   : > { %v11305_v59 = vld [vmem:[#allocation4 + $0x94] sm:$0xf]  ;;  %v22128_v23 = vcombine.low %v11457_v52, %v11466_v54  ;;  %v22132_v32 = vrot.slane %v11792_v45, 4  ;;  %v11795_v0 = vshll.u32 %v22121_v40, 16  ;;  %v11833_v1 = vshll.u32 %v11689_v47, 16 }
 0x812   : > { %15150 = vst [vmem:[#allocation4 + $0xa8] sm:$0xff] %v15145_v7   ;;  %v11473_v44 = vshrl.u32 %v11305_v59, 16  ;;  %v22130_v16 = vld [vmem:[#allocation4 + $0x94] sm:$0xff]   ;;  %v11476_v61 = vshll.u32 %v11305_v59, 16  ;;  %v11837_v12 = vshrl.u32 %v11689_v47, 16  ;;  %v14895_v39 = vrot.slane %v11490_v57, 11 }
 0x813   : > { %v11734_v49 = vor.u32 %v11733_v3, %v11730_v25  ;;  %v11754_v4 = vrot.slane %v11752_v30, 4  ;;  %v11757_v35 = vrot.slane %v11755_v33, 5  ;;  %v22136_v9 = vrot.slane %v11761_v19, 5  ;;  %v11686_v7 = vld [vmem:[#allocation4 + $0x5c] sm:$0xf] }
 0x814   : > { %v11475_v24 = vrot.slane %v11473_v44, 7  ;;  %v11767_v28 = vrot.slane %v11765_v60, 4  ;;  %v11776_v2 = vshrl.u32 %v11682_v46, 16  ;;  %v11779_v15 = vshll.u32 %v11682_v46, 16  ;;  %v11688_v59 = vld [vmem:[#allocation4 + $0x6c] sm:$0xf] }
 0x815   : > { %12334 = vmatmul.mubr.bf16.gmra.mrb[84].mxu1 %v22128_v23  ;;  %v11750_v43 = vsel %vm18508_vm9, %v22107_v6, %v22102_v29  ;;  %v11758_v51 = vor.u32 %v11757_v35, %v11754_v4  ;;  %v11735_v57 = vrot.slane %v11734_v49, 4  ;;  %v11800_v25 = vshrl.u32 %v11685_v17, 16 }
 0x816   : > { %v11478_v55 = vor.u32 %v11476_v61, %v11475_v24  ;;  %v11480_v18 = vrot.slane %v11475_v24, 4  ;;  %12341 = vmatprep.mubr.bf16.mxu1 %v22130_v16  ;;  %v11768_v36 = vor.u32 %v11767_v28, %v22136_v9  ;;  %v11778_v45 = vrot.slane %v11776_v2, 4 }
 0x817   : > { %v11781_v44 = vrot.slane %v11779_v15, 5  ;;  %v11803_v29 = vshll.u32 %v11685_v17, 16  ;;  %v11809_v6 = vshll.u32 %v11686_v7, 16  ;;  %v11813_v19 = vshrl.u32 %v11686_v7, 16  ;;  %v11687_v15 = vld [vmem:[#allocation4 + $0x60] sm:$0x1] }
 0x818   : > { %v11479_v20 = vsel %vm18594_vm3, %v14894_v58, %v11478_v55  ;;  %v11488_v21 = vsel %vm18594_vm3, %v11480_v18, %v11487_v34  ;;  %v11824_v60 = vshrl.u32 %v11688_v59, 16  ;;  %v11827_v34 = vshll.u32 %v11688_v59, 16 }
 0x819   : > { %v22143_v5 = vcombine.low %v11479_v20, %v11488_v21  ;;  %v11308_v26 = vld [vmem:[#allocation4 + $0xa8] sm:$0xf]  ;;  %v11309_v14 = vld [vmem:[#allocation4 + $0xac] sm:$0xf]  ;;  %v11759_v46 = vrot.slane %v11758_v51, 4  ;;  %v11797_v55 = vrot.slane %v11795_v0, 5  ;;  %v11740_v20 = vsel %vm18508_vm9, %v11735_v57, %v22070_v8 }
 0x81a   : > { %v22150_v40 = vld [vmem:[#allocation4 + $0xa8] sm:$0xff]   ;;  %v11495_v52 = vshrl.u32 %v11308_v26, 16  ;;  %v11504_v54 = vshrl.u32 %v11309_v14, 16  ;;  %v11498_v47 = vshll.u32 %v11308_v26, 16  ;;  %v11507_v33 = vshll.u32 %v11309_v14, 16 }
 0x81b   : > { %v22154_v18 = vrot.slane %v11833_v1, 5  ;;  %v11839_v49 = vrot.slane %v11837_v12, 4  ;;  %v11769_v4 = vrot.slane %v11768_v36, 4  ;;  %v11782_v2 = vor.u32 %v11781_v44, %v11778_v45  ;;  %v11690_v26 = vld [vmem:[#allocation4 + $0x74] sm:$0x1] }
 0x81c   : > { %v11497_v3 = vrot.slane %v11495_v52, 7  ;;  %v11506_v30 = vrot.slane %v11504_v54, 7  ;;  %v11802_v17 = vrot.slane %v11800_v25, 4  ;;  %v11805_v0 = vrot.slane %v11803_v29, 5  ;;  %v11691_v52 = vld [vmem:[#allocation4 + $0x80] sm:$0xf] }
 0x81d   : > { %12342 = vmatmul.mubr.bf16.gmra.mrb[88].mxu1 %v22143_v5  ;;  %v22165_v1 = vrot.slane %v11809_v6, 5  ;;  %v11815_v12 = vrot.slane %v11813_v19, 4  ;;  %v11826_v14 = vrot.slane %v11824_v60, 4  ;;  %v11829_v7 = vrot.slane %v11827_v34, 5  ;;  %v11692_v54 = vld [vmem:[#allocation4 + $0x84] sm:$0xf] }
 0x81e   : > { %12349 = vmatprep.mubr.bf16.mxu1 %v22150_v40  ;;  %v11500_v58 = vor.u32 %v11498_v47, %v11497_v3  ;;  %v11502_v24 = vrot.slane %v11497_v3, 4  ;;  %v11509_v61 = vor.u32 %v11507_v33, %v11506_v30  ;;  %v11819_v51 = vshll.u32 %v11687_v15, 16  ;;  %v11695_v44 = vld [vmem:[#allocation4 + $0x98] sm:$0xf]  ;;  %v11694_v30 = vld [vmem:[#allocation4 + $0x94] sm:$0xf] }
 0x81f   : > { %v11840_v36 = vor.u32 %v11839_v49, %v22154_v18  ;;  %v11764_v8 = vsel %vm18508_vm9, %v11759_v46, %v22136_v9  ;;  %v11783_v59 = vrot.slane %v11782_v2, 4  ;;  %v11798_v57 = vsel %vm18508_vm9, %v22132_v32, %v11797_v55  ;;  %v17730_v55 = vld [vmem:[%s22507_s3] sm:$0xff]  }
 0x820   : > { %v11501_v35 = vsel %vm18594_vm3, %v14895_v39, %v11500_v58  ;;  %v11510_v28 = vsel %vm18594_vm3, %v11502_v24, %v11509_v61  ;;  %v22167_v39 = vcombine.low %v11740_v20, %v11750_v43  ;;  %v11843_v45 = vshll.u32 %v11690_v26, 16  ;;  %v17731_v20 = vld [vmem:[%s22507_s3 + $0x48] sm:$0xff]  }
 0x821   : > { %v22163_v21 = vcombine.low %v11501_v35, %v11510_v28  ;;  %v11774_v43 = vsel %vm18508_vm9, %v11769_v4, %v22116_v62  ;;  %v11806_v25 = vor.u32 %v11805_v0, %v11802_v17  ;;  %v11816_v3 = vor.u32 %v11815_v12, %v22165_v1  ;;  %v11693_v28 = vld [vmem:[#allocation4 + $0x88] sm:$0x1] }
 0x822   : > { %v11830_v47 = vor.u32 %v11829_v7, %v11826_v14  ;;  %v11848_v33 = vshrl.u32 %v11691_v52, 16  ;;  %v11851_v9 = vshll.u32 %v11691_v52, 16  ;;  %v11857_v29 = vshll.u32 %v11692_v54, 16  ;;  %v17732_v52 = vld [vmem:[%s22507_s3 + $0x8] sm:$0xff]  }
 0x823   : > { %v11861_v6 = vshrl.u32 %v11692_v54, 16  ;;  %v11821_v19 = vrot.slane %v11819_v51, 5  ;;  %v11841_v60 = vrot.slane %v11840_v36, 4  ;;  %v11881_v32 = vshll.u32 %v11695_v44, 16  ;;  %v11697_v51 = vld [vmem:[#allocation4 + $0xa8] sm:$0xf] }
 0x824   : > { %v11885_v58 = vshrl.u32 %v11695_v44, 16  ;;  %v11788_v24 = vsel %vm18508_vm9, %v11783_v59, %v22111_v11  ;;  %v11845_v61 = vrot.slane %v11843_v45, 5  ;;  %v11872_v34 = vshrl.u32 %v11694_v30, 16  ;;  %v11698_v36 = vld [vmem:[#allocation4 + $0xac] sm:$0xf]  ;;  %v17733_v44 = vld [vmem:[%s22507_s3 + $0x50] sm:$0xff]  }
 0x825   : > { %12350 = vmatmul.mubr.bf16.gmra.mrb[92].mxu1 %v22163_v21  ;;  %v11875_v62 = vshll.u32 %v11694_v30, 16  ;;  %v22185_v46 = vcombine.low %v11764_v8, %v11774_v43  ;;  %v11807_v49 = vrot.slane %v11806_v25, 4  ;;  %v11817_v4 = vrot.slane %v11816_v3, 4 }
 0x826   : > { %15983 = vmatprep.mubr.bf16.mxu1 %v22167_v39  ;;  %v11831_v35 = vrot.slane %v11830_v47, 4  ;;  %v11850_v2 = vrot.slane %v11848_v33, 4  ;;  %v11853_v15 = vrot.slane %v11851_v9, 5  ;;  %v22193_v11 = vrot.slane %v11857_v29, 5 }
 0x827   : > { %v11863_v17 = vrot.slane %v11861_v6, 4  ;;  %v22195_v0 = vcombine.low %v11788_v24, %v11798_v57  ;;  %v22197_v12 = vrot.slane %v11881_v32, 5  ;;  %v11887_v26 = vrot.slane %v11885_v58, 4  ;;  %v11696_v57 = vld [vmem:[#allocation4 + $0x9c] sm:$0x1]  ;;  %v17735_v58 = vld [vmem:[%s22507_s3 + $0x58] sm:$0xff]  }
 0x828   : > { %v11874_v14 = vrot.slane %v11872_v34, 4  ;;  %v11877_v7 = vrot.slane %v11875_v62, 5  ;;  %v11812_v54 = vsel %vm18508_vm9, %v11807_v49, %v22165_v1  ;;  %v11846_v8 = vsel %vm18508_vm9, %v11841_v60, %v11845_v61  ;;  %v11699_v34 = vld [vmem:[#allocation4 + $0xb0] sm:$0x1] }
 0x829   : > { %v11867_v59 = vshll.u32 %v11693_v28, 16  ;;  %v11822_v45 = vsel %vm18508_vm9, %v11817_v4, %v11821_v19  ;;  %v11836_v43 = vsel %vm18508_vm9, %v11831_v35, %v22154_v18  ;;  %v11854_v25 = vor.u32 %v11853_v15, %v11850_v2  ;;  %v17734_v19 = vld [vmem:[%s22507_s3 + $0x10] sm:$0xff]   ;;  %v17736_v2 = vld [vmem:[%s22507_s3 + $0x18] sm:$0xff]   ;;  %v17737_v15 = vld [vmem:[%s22507_s3 + $0x60] sm:$0xff]  }
 0x82a   : > { %v11864_v1 = vor.u32 %v11863_v17, %v22193_v11  ;;  %v11896_v3 = vshrl.u32 %v11697_v51, 16  ;;  %v11899_v47 = vshll.u32 %v11697_v51, 16  ;;  %v11905_v30 = vshll.u32 %v11698_v36, 16 }
 0x82b   : > { %v11909_v33 = vshrl.u32 %v11698_v36, 16  ;;  %v11878_v9 = vor.u32 %v11877_v7, %v11874_v14  ;;  %v11888_v29 = vor.u32 %v11887_v26, %v22197_v12  ;;  %v11891_v6 = vshll.u32 %v11696_v57, 16  ;;  %v11284_v26 = vld [vmem:[#allocation4 + $0x8] sm:$0xf]  ;;  %v11285_v14 = vld [vmem:[#allocation4 + $0xc] sm:$0xf] }
 0x82c   : > { %v11869_v60 = vrot.slane %v11867_v59, 5  ;;  %v22222_v32 = vcombine.low %v11812_v54, %v11822_v45  ;;  %v22224_v18 = vcombine.low %v11836_v43, %v11846_v8  ;;  %v11855_v24 = vrot.slane %v11854_v25, 4  ;;  %v17738_v59 = vld [vmem:[%s22507_s3 + $0x20] sm:$0xff]   ;;  %v11283_v57 = vld [vmem:[#allocation4 + $0x4] sm:$0x8]  ;;  %v17739_v43 = vld [vmem:[%s22507_s3 + $0x68] sm:$0xff]  }
 0x82d   : > { %15984 = vmatmul.mubr.bf16.vlgmr.msra.gmra.mrb[96].mxu1 %v22185_v46  ;;  %v11865_v61 = vrot.slane %v11864_v1, 4  ;;  %v11898_v62 = vrot.slane %v11896_v3, 4  ;;  %v11907_v49 = vrot.slane %v11905_v30, 5  ;;  %v11911_v4 = vrot.slane %v11909_v33, 4  ;;  %v17740_v30 = vld [vmem:[%s22507_s3 + $0x28] sm:$0xff]  }
 0x82e   : > { %15987 = vmatprep.mubr.bf16.mxu1 %v22195_v0  ;;  %15808 = vmatpush3.bf16.msra.mxu1 %v17730_v55  ;;  %v11901_v55 = vrot.slane %v11899_v47, 5  ;;  %v11879_v35 = vrot.slane %v11878_v9, 4  ;;  %v11889_v28 = vrot.slane %v11888_v29, 4  ;;  %v11915_v17 = vshll.u32 %v11699_v34, 16 }
 0x82f   : > { %15809 = vmatprep.subr.bf16.mxu1 %v17731_v20  ;;  %v11893_v20 = vrot.slane %v11891_v6, 5  ;;  %v11860_v7 = vsel %vm18508_vm9, %v11855_v24, %v22193_v11  ;;  %v11870_v51 = vsel %vm18508_vm9, %v11865_v61, %v11869_v60  ;;  %v11319_v45 = vshrl.u32 %v11284_v26, 16  ;;  %v17742_v24 = vld [vmem:[%s22507_s3 + $0x30] sm:$0xff]   ;;  %v17745_v61 = vld [vmem:[#allocation4 + $0x8] sm:$0xff]  }
 0x830   : > { %v11902_v36 = vor.u32 %v11901_v55, %v11898_v62  ;;  %v11884_v54 = vsel %vm18508_vm9, %v11879_v35, %v22197_v12  ;;  %v11328_v11 = vshrl.u32 %v11285_v14, 16  ;;  %v11917_v3 = vrot.slane %v11915_v17, 5 }
 0x831   : > { %v11894_v8 = vsel %vm18508_vm9, %v11889_v28, %v11893_v20  ;;  %v11314_v47 = vshrl.u32 %v11283_v57, 16  ;;  %v11321_v33 = vrot.slane %v11319_v45, 7  ;;  %v11322_v9 = vshll.u32 %v11284_v26, 16  ;;  %v17744_v28 = vld [vmem:[%s22507_s3 + $0x38] sm:$0xff]   ;;  %v17747_v26 = vld [vmem:[%s22507_s3 + $0x88] sm:$0xff]  }
 0x832   : > { %15810 = vmatpush3.bf16.msra.mxu1 %v17732_v52  ;;  %v11912_v52 = vor.u32 %v11911_v4, %v11907_v49  ;;  %v22255_v25 = vcombine.low %v11884_v54, %v11894_v8  ;;  %v11903_v12 = vrot.slane %v11902_v36, 4  ;;  %v11330_v29 = vrot.slane %v11328_v11, 7  ;;  %v17754_v36 = vld [vmem:[%s22507_s3 + $0x1c0] sm:$0xff]   ;;  %v11674_v54 = vld [vmem:[#allocation4 + $0xc] sm:$0xf] }
 0x833   : > { %15811 = vmatprep.subr.bf16.mxu1 %v17733_v44  ;;  %v22250_v44 = vcombine.low %v11860_v7, %v11870_v51  ;;  %v11331_v6 = vshll.u32 %v11285_v14, 16  ;;  %v14887_v34 = vrot.slane %v11314_v47, 11  ;;  %v11324_v62 = vor.u32 %v11322_v9, %v11321_v33  ;;  %v17748_v14 = vld [vmem:[%s22507_s3 + $0x90] sm:$0xff]   ;;  %v17749_v7 = vld [vmem:[%s22507_s3 + $0x98] sm:$0xff]   ;;  %v17751_v51 = vld [vmem:[%s22507_s3 + $0xa8] sm:$0xff]  }
 0x834   : > { %v11913_v1 = vrot.slane %v11912_v52, 4  ;;  %v11908_v60 = vsel %vm18508_vm9, %v11903_v12, %v11907_v49  ;;  %v11326_v55 = vrot.slane %v11321_v33, 4  ;;  %v17743_v49 = vld [vmem:[%s22507_s3 + $0x78] sm:$0xff]   ;;  %v11713_v57 = vshll.u32 %v11674_v54, 16  ;;  %v436_v9 = vld [vmem:[#allocation4 + $0xc4] sm:$0x1] }
 0x835   : > { %15988 = vmatmul.mubr.bf16.gmra.mrb[100].mxu1 %v22222_v32  ;;  %v11333_v4 = vor.u32 %v11331_v6, %v11330_v29  ;;  %v11325_v20 = vsel %vm18594_vm3, %v14887_v34, %v11324_v62  ;;  %v11673_v52 = vld [vmem:[#allocation4 + $0x8] sm:$0xf]  ;;  %v11717_v45 = vshrl.u32 %v11674_v54, 16  ;;  %v437_v29 = vsel %vm18154_vm4, 0, %v436_v9  ;;  %v17756_v34 = vld [vmem:[%s22507_s3 + $0x1c8] sm:$0xff]  }
 0x836   : > { %15991 = vmatprep.mubr.bf16.mxu1 %v22224_v18  ;;  %15812 = vmatpush3.bf16.msra.mxu1 %v17734_v19  ;;  %v17741_v19 = vld [vmem:[%s22507_s3 + $0x70] sm:$0xff]   ;;  %v11704_v8 = vshrl.u32 %v11673_v52, 16  ;;  %v11715_v12 = vrot.slane %v11713_v57, 5  ;;  %438 = vst [vmem:[#allocation4 + $0xc4] sm:$0x1] %v437_v29  ;;  %v17757_v62 = vld [vmem:[%s22507_s3 + $0x188] sm:$0xff]  }
 0x837   : > { %15813 = vmatprep.subr.bf16.mxu1 %v17735_v58  ;;  %v11918_v58 = vsel %vm18508_vm9, %v11913_v1, %v11917_v3  ;;  %v11719_v1 = vrot.slane %v11717_v45, 4  ;;  %v11675_v3 = vld [vmem:[#allocation4 + $0x10] sm:$0x1] }
 0x838   : > { %v22272_v35 = vcombine.low %v11908_v60, %v11918_v58  ;;  %v11706_v11 = vrot.slane %v11704_v8, 4  ;;  %v11723_v33 = vshll.u32 %v11675_v3, 16  ;;  %v17776_v8 = vld [vmem:[%s22507_s3 + $0x230] sm:$0xff]  }
 0x83a   : > { %15814 = vmatpush3.bf16.msra.mxu1 %v17736_v2  ;;  %v11334_v2 = vsel %vm18594_vm3, %v11326_v55, %v11333_v4  ;;  %v11725_v60 = vrot.slane %v11723_v33, 5  ;;  %v17758_v55 = vld [vmem:[%s22507_s3 + $0x1d0] sm:$0xff]  }
 0x83b   : > { %15815 = vmatprep.subr.bf16.mxu1 %v17737_v15  ;;  %v17746_v15 = vld [vmem:[%s22507_s3 + $0x80] sm:$0xff]   ;;  %v14897_v17 = vcombine.low %v11325_v20, %v11334_v2  ;;  %v17759_v4 = vld [vmem:[%s22507_s3 + $0x190] sm:$0xff]   ;;  %v17764_v2 = vld [vmem:[%s22507_s3 + $0x1e8] sm:$0xff]  }
 0x83c   : > { %v17763_v20 = vld [vmem:[%s22507_s3 + $0x1a0] sm:$0xff]  }
 0x83d   : > { %15992 = vmatmul.mubr.bf16.gmra.mrb[104].mxu1 %v22250_v44 }
 0x83e   : > { %15995 = vmatprep.mubr.bf16.mxu1 %v22255_v25  ;;  %15816 = vmatpush3.bf16.msra.mxu1 %v17738_v59  ;;  %v11707_v59 = vshll.u32 %v11673_v52, 16 }
 0x83f   : > { %15817 = vmatprep.subr.bf16.mxu1 %v17739_v43 }
 0x840   : > { %v11709_v43 = vrot.slane %v11707_v59, 5 }
 0x842   : > { %15818 = vmatpush3.bf16.msra.mxu1 %v17740_v30  ;;  %v11710_v47 = vor.u32 %v11709_v43, %v11706_v11  ;;  %v11720_v30 = vor.u32 %v11719_v1, %v11715_v12  ;;  %v11312_v1 = vld [vmem:[#allocation4 + $0xc0] sm:$0xf] }
 0x843   : > { %15819 = vmatprep.subr.bf16.mxu1 %v17741_v19  ;;  %v11526_v9 = vshrl.u32 %v11312_v1, 16 }
 0x844   : > { %v11711_v6 = vrot.slane %v11710_v47, 4  ;;  %v11721_v19 = vrot.slane %v11720_v30, 4  ;;  %v11310_v30 = vld [vmem:[#allocation4 + $0xb8] sm:$0x8] }
 0x845   : > { %15996 = vmatmul.mubr.bf16.gmra.mrb[108].mxu1 %v22272_v35 }
 0x846   : > { %15820 = vmatpush3.bf16.msra.mxu1 %v17742_v24  ;;  %12631 = vmatprep.mubr.bf16.mxu1 %v17745_v61  ;;  %v11716_v58 = vsel %vm18508_vm9, %v11711_v6, %v11715_v12  ;;  %v11726_v24 = vsel %vm18508_vm9, %v11721_v19, %v11725_v60  ;;  %v11311_v12 = vld [vmem:[#allocation4 + $0xbc] sm:$0xf]  ;;  %v11512_v6 = vshrl.u32 %v11310_v30, 16  ;;  %v11528_v60 = vrot.slane %v11526_v9, 7 }
 0x847   : > { %15821 = vmatprep.subr.bf16.mxu1 %v17743_v49  ;;  %v14917_v61 = vcombine.low %v11716_v58, %v11726_v24  ;;  %v17761_v49 = vld [vmem:[%s22507_s3 + $0x198] sm:$0xff]   ;;  %v11517_v33 = vshrl.u32 %v11311_v12, 16 }
 0x849   : > { %v11519_v19 = vrot.slane %v11517_v33, 7 }
 0x84a   : > { %15822 = vmatpush3.bf16.msra.mxu1 %v17744_v28  ;;  %v17762_v28 = vld [vmem:[%s22507_s3 + $0x1e0] sm:$0xff]  }
 0x84b   : > { %15999 = vmatprep.subr.bf16.mxu1 %v17746_v15 }
 0x84d   : > { %12632 = vmatmul.mubr.bf16.vlgmr.msra.gmra.mrb[112].mxu1 %v14897_v17  ;;  %v17766_v17 = vld [vmem:[%s22507_s3 + $0x1f0] sm:$0xff]  }
 0x84e   : > { %12639 = vmatprep.mubr.bf16.mxu1 %v22011_v37  ;;  %16000 = vmatpush3.bf16.msra.mxu1 %v17746_v15  ;;  %v17750_v37 = vld [vmem:[%s22507_s3 + $0xa0] sm:$0xff]   ;;  %v17765_v15 = vld [vmem:[%s22507_s3 + $0x1a8] sm:$0xff]  }
 0x84f   : > { %16001 = vmatprep.subr.bf16.mxu1 %v17747_v26 }
 0x852   : > { %16002 = vmatpush3.bf16.msra.mxu1 %v17747_v26  ;;  %v17767_v26 = vld [vmem:[%s22507_s3 + $0x1b0] sm:$0xff]  }
 0x853   : > { %16003 = vmatprep.subr.bf16.mxu1 %v17748_v14 }
 0x855   : > { %12640 = vmatmul.mubr.bf16.gmra.mrb[116].mxu1 %v22020_v41  ;;  %v17752_v41 = vld [vmem:[%s22507_s3 + $0xb0] sm:$0xff]  }
 0x856   : > { %12647 = vmatprep.mubr.bf16.mxu1 %v22022_v63  ;;  %16004 = vmatpush3.bf16.msra.mxu1 %v17748_v14  ;;  %v17753_v63 = vld [vmem:[%s22507_s3 + $0xb8] sm:$0xff]  }
 0x857   : > { %16005 = vmatprep.subr.bf16.mxu1 %v17749_v7  ;;  %v17768_v14 = vld [vmem:[%s22507_s3 + $0x1f8] sm:$0xff]  }
 0x85a   : > { %16006 = vmatpush3.bf16.msra.mxu1 %v17749_v7  ;;  %v17793_v7 = vld [vmem:[#allocation4 + $0x30] sm:$0xff]  }
 0x85b   : > { %16007 = vmatprep.subr.bf16.mxu1 %v17750_v37 }
 0x85d   : > { %12648 = vmatmul.mubr.bf16.gmra.mrb[120].mxu1 %v22047_v22 }
 0x85e   : > { %12655 = vmatprep.mubr.bf16.mxu1 %v22044_v53  ;;  %16008 = vmatpush3.bf16.msra.mxu1 %v17750_v37  ;;  %v17769_v37 = vld [vmem:[%s22507_s3 + $0x1b8] sm:$0xff]  }
 0x85f   : > { %16009 = vmatprep.subr.bf16.mxu1 %v17751_v51 }
 0x862   : > { %16010 = vmatpush3.bf16.msra.mxu1 %v17751_v51  ;;  %v17770_v51 = vld [vmem:[%s22507_s3 + $0x200] sm:$0xff]  }
 0x863   : > { %16011 = vmatprep.subr.bf16.mxu1 %v17752_v41 }
 0x865   : > { %12656 = vmatmul.mubr.bf16.gmra.mrb[124].mxu1 %v22062_v13 }
 0x866   : > { %12663 = vmatprep.mubr.bf16.mxu1 %v22064_v42  ;;  %16012 = vmatpush3.bf16.msra.mxu1 %v17752_v41  ;;  %v17771_v41 = vld [vmem:[%s22507_s3 + $0x208] sm:$0xff]  }
 0x867   : > { %16013 = vmatprep.subr.bf16.mxu1 %v17753_v63 }
 0x86a   : > { %16014 = vmatpush3.bf16.msra.mxu1 %v17753_v63  ;;  %v17772_v63 = vld [vmem:[%s22507_s3 + $0x210] sm:$0xff]  }
 0x86b   : > { %15887 = vmatprep.subr.bf16.mxu1 %v17754_v36  ;;  %v17773_v36 = vld [vmem:[%s22507_s3 + $0x218] sm:$0xff]  }
 0x86d   : > { %12664 = vmatmul.mubr.bf16.gmra.mrb[128].mxu1 %v22086_v10 }
 0x86e   : > { %12671 = vmatprep.mubr.bf16.mxu1 %v22083_v27 }
 0x875   : > { %12672 = vmatmul.mubr.bf16.gmra.mrb[132].mxu1 %v22105_v38 }
 0x876   : > { %12679 = vmatprep.mubr.bf16.mxu1 %v22109_v56 }
 0x87d   : > { %12680 = vmatmul.mubr.bf16.gmra.mrb[136].mxu1 %v22128_v23 }
 0x87e   : > { %12687 = vmatprep.mubr.bf16.mxu1 %v22130_v16 }
 0x885   : > { %12688 = vmatmul.mubr.bf16.gmra.mrb[140].mxu1 %v22143_v5 }
 0x886   : > { %16015 = vmatprep.mubr.bf16.mxu1 %v14917_v61  ;;  %v14896_v61 = vrot.slane %v11512_v6, 11 }
 0x88d   : > { %16016 = vmatmul.mubr.bf16.vlgmr.msra.gmra.mrb[96].mxu1 %v22167_v39  ;;  %v17760_v39 = vld [vmem:[%s22507_s3 + $0x1d8] sm:$0xff]  }
 0x88e   : > { %16019 = vmatprep.mubr.bf16.mxu1 %v22185_v46  ;;  %15888 = vmatpush3.bf16.msra.mxu1 %v17755_v48 }
 0x88f   : > { %15889 = vmatprep.subr.bf16.mxu1 %v17756_v34 }
 0x892   : > { %15890 = vmatpush3.bf16.msra.mxu1 %v17757_v62  ;;  %v17777_v62 = vld [vmem:[#allocation4 + $0xbc] sm:$0xff]  }
 0x893   : > { %15891 = vmatprep.subr.bf16.mxu1 %v17758_v55 }
 0x895   : > { %16020 = vmatmul.mubr.bf16.gmra.mrb[100].mxu1 %v22195_v0 }
 0x896   : > { %16023 = vmatprep.mubr.bf16.mxu1 %v22222_v32  ;;  %15892 = vmatpush3.bf16.msra.mxu1 %v17759_v4  ;;  %v11524_v4 = vrot.slane %v11519_v19, 4 }
 0x897   : > { %15893 = vmatprep.subr.bf16.mxu1 %v17760_v39 }
 0x89a   : > { %15894 = vmatpush3.bf16.msra.mxu1 %v17761_v49 }
 0x89b   : > { %15895 = vmatprep.subr.bf16.mxu1 %v17762_v28 }
 0x89d   : > { %16024 = vmatmul.mubr.bf16.gmra.mrb[104].mxu1 %v22224_v18 }
 0x89e   : > { %16027 = vmatprep.mubr.bf16.mxu1 %v22250_v44  ;;  %15896 = vmatpush3.bf16.msra.mxu1 %v17763_v20 }
 0x89f   : > { %15897 = vmatprep.subr.bf16.mxu1 %v17764_v2 }
 0x8a2   : > { %15898 = vmatpush3.bf16.msra.mxu1 %v17765_v15 }
 0x8a3   : > { %15899 = vmatprep.subr.bf16.mxu1 %v17766_v17 }
 0x8a5   : > { %16028 = vmatmul.mubr.bf16.gmra.mrb[108].mxu1 %v22255_v25 }
 0x8a6   : > { %15900 = vmatpush3.bf16.msra.mxu1 %v17767_v26  ;;  %13042 = vmatprep.mubr.bf16.mxu1 %v17793_v7 }
 0x8a7   : > { %15901 = vmatprep.subr.bf16.mxu1 %v17768_v14 }
 0x8aa   : > { %15902 = vmatpush3.bf16.msra.mxu1 %v17769_v37 }
 0x8ab   : > { %16031 = vmatprep.subr.bf16.mxu1 %v17770_v51 }
 0x8ad   : > { %13043 = vmatmul.mubr.bf16.vlgmr.msra.gmra.mrb[144].mxu1 %v22047_v22  ;;  %v17775_v22 = vld [vmem:[%s22507_s3 + $0x228] sm:$0xff]  }
 0x8ae   : > { %13050 = vmatprep.mubr.bf16.mxu1 %v22044_v53  ;;  %16032 = vmatpush3.bf16.msra.mxu1 %v17770_v51  ;;  %v17774_v53 = vld [vmem:[%s22507_s3 + $0x220] sm:$0xff]   ;;  %v11700_v51 = vld [vmem:[#allocation4 + $0xbc] sm:$0xf] }
 0x8af   : > { %16033 = vmatprep.subr.bf16.mxu1 %v17771_v41  ;;  %v11920_v50 = vshrl.u32 %v11700_v51, 16 }
 0x8b2   : > { %16034 = vmatpush3.bf16.msra.mxu1 %v17771_v41 }
 0x8b3   : > { %16035 = vmatprep.subr.bf16.mxu1 %v17772_v63 }
 0x8b5   : > { %13051 = vmatmul.mubr.bf16.gmra.mrb[148].mxu1 %v22062_v13 }
 0x8b6   : > { %13058 = vmatprep.mubr.bf16.mxu1 %v22064_v42  ;;  %16036 = vmatpush3.bf16.msra.mxu1 %v17772_v63  ;;  %v11701_v63 = vld [vmem:[#allocation4 + $0xc0] sm:$0xf] }
 0x8b7   : > { %16037 = vmatprep.subr.bf16.mxu1 %v17773_v36 }
 0x8ba   : > { %16038 = vmatpush3.bf16.msra.mxu1 %v17773_v36  ;;  %v11923_v36 = vshll.u32 %v11700_v51, 16 }
 0x8bb   : > { %16039 = vmatprep.subr.bf16.mxu1 %v17774_v53 }
 0x8bd   : > { %13059 = vmatmul.mubr.bf16.gmra.mrb[152].mxu1 %v22086_v10  ;;  %v17778_v10 = vld [vmem:[%s22507_s3 + $0x238] sm:$0xff]  }
 0x8be   : > { %v15743_v52 = vpop.f32.mrb[64].mxu1  ;;  %13066 = vmatprep.mubr.bf16.mxu1 %v22083_v27  ;;  %16040 = vmatpush3.bf16.msra.mxu1 %v17774_v53  ;;  %v11929_v53 = vshll.u32 %v11701_v63, 16 }
 0x8bf   : > { %v15744_v13 = vpop.f32.mrb[65].mxu1  ;;  %16041 = vmatprep.subr.bf16.mxu1 %v17775_v22 }
 0x8c0   : > { %v22408_v42 = vadd.f32 %v15744_v13, %v15743_v52  ;;  %v15746_v54 = vpop.f32.mrb[66].mxu1 }
 0x8c1   : > { %v15747_v59 = vpop.f32.mrb[67].mxu1  ;;  %v11922_v54 = vrot.slane %v11920_v50, 4 }
 0x8c2   : > { %16042 = vmatpush3.bf16.msra.mxu1 %v17775_v22  ;;  %v11933_v22 = vshrl.u32 %v11701_v63, 16  ;;  %v11925_v59 = vrot.slane %v11923_v36, 5 }
 0x8c3   : > { %16043 = vmatprep.subr.bf16.mxu1 %v17776_v8 }
 0x8c5   : > { %13067 = vmatmul.mubr.bf16.gmra.mrb[156].mxu1 %v22105_v38 }
 0x8c6   : > { %13074 = vmatprep.mubr.bf16.mxu1 %v22109_v56  ;;  %16044 = vmatpush3.bf16.msra.mxu1 %v17776_v8 }
 0x8c7   : > { %16045 = vmatprep.subr.bf16.mxu1 %v17778_v10 }
 0x8c8   : > { %v15749_v27 = vpop.f32.mrb[68].mxu1 }
 0x8c9   : > { %v15750_v57 = vpop.f32.mrb[69].mxu1 }
 0x8ca   : > { %v22418_v45 = vadd.f32 %v15750_v57, %v15749_v27  ;;  %v15752_v11 = vpop.f32.mrb[70].mxu1  ;;  %16046 = vmatpush3.bf16.msra.mxu1 %v17778_v10  ;;  %v11931_v10 = vrot.slane %v11929_v53, 5  ;;  %v11935_v27 = vrot.slane %v11933_v22, 4 }
 0x8cb   : > { %v15753_v43 = vpop.f32.mrb[71].mxu1  ;;  %v11702_v11 = vld [vmem:[#allocation4 + $0xc4] sm:$0x1] }
 0x8cc   : > { %v11939_v43 = vshll.u32 %v11702_v11, 16 }
 0x8cd   : > { %13075 = vmatmul.mubr.bf16.gmra.mrb[160].mxu1 %v22128_v23  ;;  %v11520_v23 = vshll.u32 %v11311_v12, 16 }
 0x8ce   : > { %13082 = vmatprep.mubr.bf16.mxu1 %v22130_v16  ;;  %v11529_v16 = vshll.u32 %v11312_v1, 16  ;;  %v11941_v33 = vrot.slane %v11939_v43, 5 }
 0x8cf   : > { %v11522_v55 = vor.u32 %v11520_v23, %v11519_v19 }
 0x8d0   : > { %v15755_v3 = vpop.f32.mrb[72].mxu1  ;;  %v11531_v39 = vor.u32 %v11529_v16, %v11528_v60 }
 0x8d1   : > { %v15756_v47 = vpop.f32.mrb[73].mxu1 }
 0x8d2   : > { %v22422_v38 = vadd.f32 %v15756_v47, %v15755_v3  ;;  %v15758_v56 = vpop.f32.mrb[74].mxu1 }
 0x8d3   : > { %v15759_v29 = vpop.f32.mrb[75].mxu1 }
 0x8d5   : > { %13083 = vmatmul.mubr.bf16.gmra.mrb[164].mxu1 %v22143_v5  ;;  %v11523_v5 = vsel %vm18594_vm3, %v14896_v61, %v11522_v55 }
 0x8d6   : > { %13090 = vmatprep.mubr.bf16.mxu1 %v22150_v40  ;;  %v11532_v40 = vsel %vm18594_vm3, %v11524_v4, %v11531_v39 }
 0x8d7   : > { %v14906_v2 = vcombine.low %v11523_v5, %v11532_v40 }
 0x8d8   : > { %v15761_v58 = vpop.f32.mrb[76].mxu1 }
 0x8d9   : > { %v15762_v24 = vpop.f32.mrb[77].mxu1 }
 0x8da   : > { %v22426_v48 = vadd.f32 %v15762_v24, %v15761_v58  ;;  %v15764_v34 = vpop.f32.mrb[78].mxu1 }
 0x8db   : > { %v15765_v49 = vpop.f32.mrb[79].mxu1 }
 0x8dd   : > { %13091 = vmatmul.mubr.bf16.gmra.mrb[168].mxu1 %v22163_v21 }
 0x8de   : > { %13098 = vmatprep.mubr.bf16.mxu1 %v17777_v62 }
 0x8e0   : > { %v15767_v28 = vpop.f32.mrb[80].mxu1 }
 0x8e1   : > { %v15768_v20 = vpop.f32.mrb[81].mxu1 }
 0x8e2   : > { %v22433_v15 = vadd.f32 %v15768_v20, %v15767_v28  ;;  %v15770_v17 = vpop.f32.mrb[82].mxu1 }
 0x8e3   : > { %v15771_v26 = vpop.f32.mrb[83].mxu1 }
 0x8e5   : > { %13099 = vmatmul.mubr.bf16.gmra.mrb[172].mxu1 %v14906_v2 }
 0x8e6   : > { %16047 = vmatprep.mubr.bf16.mxu1 %v22185_v46 }
 0x8e8   : > { %v15773_v14 = vpop.f32.mrb[84].mxu1 }
 0x8e9   : > { %v15774_v7 = vpop.f32.mrb[85].mxu1 }
 0x8ea   : > { %v22436_v21 = vadd.f32 %v15774_v7, %v15773_v14  ;;  %v15776_v37 = vpop.f32.mrb[86].mxu1 }
 0x8eb   : > { %v15777_v41 = vpop.f32.mrb[87].mxu1 }
 0x8ed   : > { %16048 = vmatmul.mubr.bf16.vlgmr.msra.gmra.mrb[96].mxu1 %v22195_v0  ;;  %v11926_v0 = vor.u32 %v11925_v59, %v11922_v54 }
 0x8ee   : > { %16051 = vmatprep.mubr.bf16.mxu1 %v22222_v32  ;;  %v11936_v32 = vor.u32 %v11935_v27, %v11931_v10 }
 0x8ef   : > { %v11927_v56 = vrot.slane %v11926_v0, 4 }
 0x8f0   : > { %v15779_v52 = vpop.f32.mrb[88].mxu1  ;;  %v11937_v30 = vrot.slane %v11936_v32, 4 }
 0x8f1   : > { %v15780_v13 = vpop.f32.mrb[89].mxu1 }
 0x8f2   : > { %v22440_v46 = vadd.f32 %v15780_v13, %v15779_v52  ;;  %v15782_v8 = vpop.f32.mrb[90].mxu1 }
 0x8f3   : > { %v15783_v57 = vpop.f32.mrb[91].mxu1 }
 0x8f5   : > { %16052 = vmatmul.mubr.bf16.gmra.mrb[100].mxu1 %v22224_v18  ;;  %v11932_v18 = vsel %vm18508_vm9, %v11927_v56, %v11931_v10 }
 0x8f6   : > { %16055 = vmatprep.mubr.bf16.mxu1 %v22250_v44  ;;  %v11942_v44 = vsel %vm18508_vm9, %v11937_v30, %v11941_v33 }
 0x8f7   : > { %v14926_v29 = vcombine.low %v11932_v18, %v11942_v44 }
 0x8f8   : > { %v15785_v12 = vpop.f32.mrb[92].mxu1 }
 0x8f9   : > { %v15786_v1 = vpop.f32.mrb[93].mxu1 }
 0x8fa   : > { %v15787_v3 = vadd.f32 %v15786_v1, %v15785_v12  ;;  %v15788_v47 = vpop.f32.mrb[94].mxu1 }
 0x8fb   : > { %v15789_v9 = vpop.f32.mrb[95].mxu1 }
 0x8fd   : > { %16056 = vmatmul.mubr.bf16.gmra.mrb[104].mxu1 %v22255_v25 }
 0x8fe   : > { %16059 = vmatprep.mubr.bf16.mxu1 %v22272_v35 }
 0x905   : > { %16060 = vmatmul.mubr.bf16.gmra.mrb[108].mxu1 %v14926_v29 }
 0x920   : > { %v15823_v6 = vpop.f32.mrb[112].mxu1 }
 0x921   : > { %v15824_v19 = vpop.f32.mrb[113].mxu1 }
 0x922   : > { %v15825_v23 = vadd.f32 %v15824_v19, %v15823_v6  ;;  %v15826_v60 = vpop.f32.mrb[114].mxu1 }
 0x923   : > { %v15827_v16 = vpop.f32.mrb[115].mxu1 }
 0x924   : > { %v16082_v58 = vadd.f32 %v15825_v23, %v22408_v42 }
 0x928   : > { %v15829_v24 = vpop.f32.mrb[116].mxu1 }
 0x929   : > { %v15830_v61 = vpop.f32.mrb[117].mxu1 }
 0x92a   : > { %v15831_v25 = vadd.f32 %v15830_v61, %v15829_v24  ;;  %v15832_v34 = vpop.f32.mrb[118].mxu1 }
 0x92b   : > { %v15833_v35 = vpop.f32.mrb[119].mxu1 }
 0x92c   : > { %v16079_v62 = vadd.f32 %v15831_v25, %v22418_v45 }
 0x930   : > { %v15835_v55 = vpop.f32.mrb[120].mxu1 }
 0x931   : > { %v15836_v4 = vpop.f32.mrb[121].mxu1 }
 0x932   : > { %v15837_v31 = vadd.f32 %v15836_v4, %v15835_v55  ;;  %v15838_v39 = vpop.f32.mrb[122].mxu1 }
 0x933   : > { %v15839_v49 = vpop.f32.mrb[123].mxu1 }
 0x934   : > { %v16088_v5 = vadd.f32 %v15837_v31, %v22422_v38 }
 0x938   : > { %v15841_v40 = vpop.f32.mrb[124].mxu1 }
 0x939   : > { %v15842_v28 = vpop.f32.mrb[125].mxu1 }
 0x93a   : > { %v15843_v20 = vadd.f32 %v15842_v28, %v15841_v40  ;;  %v15844_v2 = vpop.f32.mrb[126].mxu1 }
 0x93b   : > { %v15845_v17 = vpop.f32.mrb[127].mxu1 }
 0x93c   : > { %v16085_v42 = vadd.f32 %v15843_v20, %v22426_v48 }
 0x940   : > { %v15847_v26 = vpop.f32.mrb[128].mxu1 }
 0x941   : > { %v15848_v14 = vpop.f32.mrb[129].mxu1 }
 0x942   : > { %v15849_v7 = vadd.f32 %v15848_v14, %v15847_v26  ;;  %v15850_v37 = vpop.f32.mrb[130].mxu1 }
 0x943   : > { %v15851_v51 = vpop.f32.mrb[131].mxu1 }
 0x944   : > { %v16094_v45 = vadd.f32 %v15849_v7, %v22433_v15 }
 0x948   : > { %v15853_v41 = vpop.f32.mrb[132].mxu1 }
 0x949   : > { %v15854_v63 = vpop.f32.mrb[133].mxu1 }
 0x94a   : > { %v15855_v50 = vadd.f32 %v15854_v63, %v15853_v41  ;;  %v15856_v36 = vpop.f32.mrb[134].mxu1 }
 0x94b   : > { %v15857_v53 = vpop.f32.mrb[135].mxu1 }
 0x94c   : > { %v16091_v38 = vadd.f32 %v15855_v50, %v22436_v21 }
 0x950   : > { %v15859_v22 = vpop.f32.mrb[136].mxu1 }
 0x951   : > { %v15860_v52 = vpop.f32.mrb[137].mxu1 }
 0x952   : > { %v15861_v13 = vadd.f32 %v15860_v52, %v15859_v22  ;;  %v15862_v54 = vpop.f32.mrb[138].mxu1 }
 0x953   : > { %v15863_v8 = vpop.f32.mrb[139].mxu1 }
 0x954   : > { %v16100_v48 = vadd.f32 %v15861_v13, %v22440_v46 }
 0x958   : > { %v15865_v59 = vpop.f32.mrb[140].mxu1 }
 0x959   : > { %v15866_v10 = vpop.f32.mrb[141].mxu1 }
 0x95a   : > { %v15867_v27 = vadd.f32 %v15866_v10, %v15865_v59  ;;  %v15868_v57 = vpop.f32.mrb[142].mxu1 }
 0x95b   : > { %v15869_v11 = vpop.f32.mrb[143].mxu1 }
 0x95c   : > { %v16097_v15 = vadd.f32 %v15867_v27, %v15787_v3 }
 0x980   : > { %v15903_v0 = vpop.f32.mrb[144].mxu1 }
 0x981   : > { %v15904_v32 = vpop.f32.mrb[145].mxu1 }
 0x982   : > { %v15905_v43 = vadd.f32 %v15904_v32, %v15903_v0  ;;  %v15906_v12 = vpop.f32.mrb[146].mxu1 }
 0x983   : > { %v15907_v1 = vpop.f32.mrb[147].mxu1 }
 0x984   : > { %v16083_v47 = vadd.f32 %v16082_v58, %v15905_v43 }
 0x988   : > { %v15909_v21 = vpop.f32.mrb[148].mxu1 }
 0x989   : > { %v15910_v56 = vpop.f32.mrb[149].mxu1 }
 0x98a   : > { %v15911_v30 = vadd.f32 %v15910_v56, %v15909_v21  ;;  %v15912_v33 = vpop.f32.mrb[150].mxu1 }
 0x98b   : > { %v15913_v9 = vpop.f32.mrb[151].mxu1 }
 0x98c   : > { %v16080_v18 = vadd.f32 %v16079_v62, %v15911_v30 }
 0x990   : > { %v15915_v44 = vpop.f32.mrb[152].mxu1 }
 0x991   : > { %v15916_v46 = vpop.f32.mrb[153].mxu1 }
 0x992   : > { %v15917_v29 = vadd.f32 %v15916_v46, %v15915_v44  ;;  %v15918_v6 = vpop.f32.mrb[154].mxu1 }
 0x993   : > { %v15919_v19 = vpop.f32.mrb[155].mxu1 }
 0x994   : > { %v16089_v23 = vadd.f32 %v16088_v5, %v15917_v29 }
 0x998   : > { %v15921_v60 = vpop.f32.mrb[156].mxu1 }
 0x999   : > { %v15922_v3 = vpop.f32.mrb[157].mxu1 }
 0x99a   : > { %v15923_v16 = vadd.f32 %v15922_v3, %v15921_v60  ;;  %v15924_v24 = vpop.f32.mrb[158].mxu1 }
 0x99b   : > { %v15925_v61 = vpop.f32.mrb[159].mxu1 }
 0x99c   : > { %v16086_v25 = vadd.f32 %v16085_v42, %v15923_v16 }
 0x9a0   : > { %v15927_v34 = vpop.f32.mrb[160].mxu1 }
 0x9a1   : > { %v15928_v58 = vpop.f32.mrb[161].mxu1 }
 0x9a2   : > { %v15929_v35 = vadd.f32 %v15928_v58, %v15927_v34  ;;  %v15930_v55 = vpop.f32.mrb[162].mxu1 }
 0x9a3   : > { %v15931_v4 = vpop.f32.mrb[163].mxu1 }
 0x9a4   : > { %v16095_v31 = vadd.f32 %v16094_v45, %v15929_v35 }
 0x9a8   : > { %v15933_v39 = vpop.f32.mrb[164].mxu1 }
 0x9a9   : > { %v15934_v62 = vpop.f32.mrb[165].mxu1 }
 0x9aa   : > { %v15935_v49 = vadd.f32 %v15934_v62, %v15933_v39  ;;  %v15936_v40 = vpop.f32.mrb[166].mxu1 }
 0x9ab   : > { %v15937_v28 = vpop.f32.mrb[167].mxu1 }
 0x9ac   : > { %v16092_v20 = vadd.f32 %v16091_v38, %v15935_v49 }
 0x9b0   : > { %v15939_v2 = vpop.f32.mrb[168].mxu1 }
 0x9b1   : > { %v15940_v5 = vpop.f32.mrb[169].mxu1 }
 0x9b2   : > { %v15941_v17 = vadd.f32 %v15940_v5, %v15939_v2  ;;  %v15942_v26 = vpop.f32.mrb[170].mxu1 }
 0x9b3   : > { %v15943_v14 = vpop.f32.mrb[171].mxu1 }
 0x9b4   : > { %v16101_v7 = vadd.f32 %v16100_v48, %v15941_v17 }
 0x9b8   : > { %v15945_v37 = vpop.f32.mrb[172].mxu1 }
 0x9b9   : > { %v15946_v42 = vpop.f32.mrb[173].mxu1 }
 0x9ba   : > { %v15947_v51 = vadd.f32 %v15946_v42, %v15945_v37  ;;  %v15948_v41 = vpop.f32.mrb[174].mxu1 }
 0x9bb   : > { %v15949_v63 = vpop.f32.mrb[175].mxu1 }
 0x9bc   : > { %v16098_v50 = vadd.f32 %v16097_v15, %v15947_v51 }
 0x9c0   : > { %v16049_v36 = vpop.f32.mrb[96].mxu1 }
 0x9c1   : > { %v16081_v45 = vadd.f32 %v16080_v18, %v16049_v36  ;;  %v13141_v53 = vpop.f32.mrb[97].mxu1 }
 0x9c2   : > { %v16084_v22 = vadd.f32 %v16083_v47, %v13141_v53  ;;  %v16050_v52 = vpop.f32.mrb[98].mxu1 }
 0x9c3   : > { %v13222_v13 = vmax.f32 %v16081_v45, 0.0  ;;  %v13144_v54 = vpop.f32.mrb[99].mxu1 }
 0x9c4   : > { %v13220_v38 = vmax.f32 %v16084_v22, 0.0 }
 0x9c6   : > { %v13253_v8 = vadd.f32 %v13222_v13, %v13220_v38 }
 0x9c8   : > { %v16053_v59 = vpop.f32.mrb[100].mxu1 }
 0x9c9   : > { %v16087_v10 = vadd.f32 %v16086_v25, %v16053_v59  ;;  %v13157_v27 = vpop.f32.mrb[101].mxu1 }
 0x9ca   : > { %v16090_v57 = vadd.f32 %v16089_v23, %v13157_v27  ;;  %v16054_v48 = vpop.f32.mrb[102].mxu1 }
 0x9cb   : > { %v13160_v11 = vpop.f32.mrb[103].mxu1  ;;  %v13226_v32 = vmax.f32 %v16087_v10, 0.0 }
 0x9cc   : > { %v13224_v0 = vmax.f32 %v16090_v57, 0.0 }
 0x9ce   : > { %v13255_v43 = vadd.f32 %v13253_v8, %v13224_v0 }
 0x9d0   : > { %v16057_v12 = vpop.f32.mrb[104].mxu1  ;;  %v13257_v15 = vadd.f32 %v13255_v43, %v13226_v32 }
 0x9d1   : > { %v16093_v1 = vadd.f32 %v16092_v20, %v16057_v12  ;;  %v13173_v21 = vpop.f32.mrb[105].mxu1 }
 0x9d2   : > { %v16096_v56 = vadd.f32 %v16095_v31, %v13173_v21  ;;  %v16058_v47 = vpop.f32.mrb[106].mxu1 }
 0x9d3   : > { %v13176_v30 = vpop.f32.mrb[107].mxu1  ;;  %v13230_v9 = vmax.f32 %v16093_v1, 0.0 }
 0x9d4   : > { %v13228_v33 = vmax.f32 %v16096_v56, 0.0 }
 0x9d6   : > { %v13259_v18 = vadd.f32 %v13257_v15, %v13228_v33 }
 0x9d8   : > { %v16061_v44 = vpop.f32.mrb[108].mxu1  ;;  %v13261_v46 = vadd.f32 %v13259_v18, %v13230_v9 }
 0x9d9   : > { %v16099_v29 = vadd.f32 %v16098_v50, %v16061_v44  ;;  %v13189_v6 = vpop.f32.mrb[109].mxu1 }
 0x9da   : > { %v16102_v19 = vadd.f32 %v16101_v7, %v13189_v6  ;;  %v16062_v23 = vpop.f32.mrb[110].mxu1 }
 0x9db   : > { %v13192_v60 = vpop.f32.mrb[111].mxu1  ;;  %v13234_v16 = vmax.f32 %v16099_v29, 0.0 }
 0x9dc   : > { %v13232_v3 = vmax.f32 %v16102_v19, 0.0 }
 0x9de   : > { %v13263_v24 = vadd.f32 %v13261_v46, %v13232_v3 }
 0x9e0   : > { %v13265_v61 = vadd.f32 %v13263_v24, %v13234_v16 }
 0x9e2   : > { %v13267_v25 = vrot.slane %v13265_v61, 4 }
 0x9e4   : > { %v13268_v34 = vadd.f32 %v13267_v25, %v13265_v61 }
 0x9e6   : > { %v13269_v58 = vrot.slane %v13268_v34, 2 }
 0x9e8   : > { %v13270_v35 = vadd.f32 %v13269_v58, %v13268_v34 }
 0x9ea   : > { %v13271_v55 = vrot.slane %v13270_v35, 1 }
 0x9ec   : > { %v13272_v4 = vadd.f32 %v13271_v55, %v13270_v35 }
 0x9ee   : > { %v13273_v31 = vmul.f32 0.015625, %v13272_v4 }
 0x9f0   : > { %13274 = vst [vmem:[%s189_s14] sm:$0x1] %v13273_v31 }
 0x9f1   : > { %17807 = shalt.err (!%p17804_p3)
}
 0x9f2   : > { %s17808_s5 = scalar_lea.hbm %s22462_s23, 16  ;;  %s17812_s8 = scalar_lea.hbm %s22508_s4, 32 }
 0x9f3   : > { %p17809_p4 = scmp.ne.s32.totalorder %s22462_s23, %s17808_s5  ;;  %p17813_p9 = scmp.lt.u32.totalorder %s22462_s23, %s22508_s4 }
 0x9f4   : > { %p17814_p10 = scmp.lt.u32.totalorder %s17812_s8, %s17808_s5  ;;  %p17816_p12 = scmp.lt.u32.totalorder %s17808_s5, %s22462_s23 }
 0x9f5   : > { %p17810_p7 = pnand %p17809_p4, %p17925_p5 }
 0x9f6   : > { %p17815_p11 = por %p17814_p10, %p17813_p9 }
 0x9f7   : > { %p17811_p8 = pneg %p17810_p7 }
 0x9f8   : > { %p17817_p13 = por %p17816_p12, %p17815_p11 }
 0x9fa   : > { %p17818_p0 = pnand %p17817_p13, %p17811_p8 }
 0x9fc   : > { %17821 = shalt.err (!%p17818_p0)
}
 0x9fd   : > { %16647 = dma.vmem_to_hbm [thread:$0]  (%p17925_p5), %s22464_s10, 16, %s22462_s23, %s13276_s27  }
 0x9fe PF: > { %p16653_p1 = scmp.ge.s32.totalorder %s17856_s18, 2  ;;  %s13300_s12 = sand.u32 1, %s17844_s15  }
 0x9ff   : > { %s13301_s13 = scalar_lea.sflag [#allocation7], %s13300_s12 }
 0xa00   : > { %p16650_p2 = pnand %p16653_p1, %p17929_p6 }
 0xa02   : > { %17839 = dma.done.wait (!%p16650_p2), %s13301_s13, 16  }
 0xa03   : > { %17841 = vsyncadd (!%p16650_p2), %s13301_s13, 4294967280  ;;  %p14_p3 = scmp.ge.s32.totalorder %s17912_s21, 4   ;;  %s22798_s15 = smov %s17848_s16 }
 0xa04   : > { %s22799_s16 = smov %s17852_s17  ;;  %s22800_s17 = smov %s17923_s24 }
 0xa05   : > { %s22801_s18 = smov %s17912_s21  ;;  %16 = sbr.rel (!%p14_p3) target bundleno = 3 (0x3), region = 83 }
 0xa0c   :  { %13305 = vsyncpa [#allocation7], 1 }
 0xa0d   :  { %13307 = vsyncpa [#allocation7 + $0x1], 1 }

</bundles_post_ra>
